<compile_context>
chip_gen: v5e
topology: v5e:2x2
jax: 0.10.0
libtpu: 0.0.40
codegen_flags: <defaults>
</compile_context>

<pallas_src>
import jax
import jax.numpy as jnp
from jax import lax
from jax.experimental import pallas as pl
from jax.experimental.pallas import tpu as pltpu

DROPOUT = 0.5          # eval-mode dropout == identity (see TODO above)
RELU = 0.2             # LeakyReLU negative slope
BN_EPS = 1e-5


# --------------------------------------------------------------------------------------
# Static per-layer geometry
# --------------------------------------------------------------------------------------
def _layer_geometry(in_ch, length, layer_defs):
    dims = []
    C, L = in_ch, length
    for (ci, co, k) in layer_defs:
        assert ci == C, (ci, C)
        pad = (k - 1) // 2
        l_out = (L + 2 * pad - k) // 2 + 1
        dims.append(dict(
            Ci=C, Li=L, K=k, pad=pad, Co=co, L_out=l_out,
            # padded-input buffer must cover index j+k for j < 2*L_out, k < K
            Lbuf=max(L + 2 * pad, 2 * l_out + k - 1),
        ))
        C, L = co, l_out
    return dims


# --------------------------------------------------------------------------------------
# Fully fused forward kernel: one sample per grid step, everything VMEM-resident
# --------------------------------------------------------------------------------------
def _make_fused_kernel(dims):
    n_layers = len(dims)

    def kernel(x_ref, *refs):
        w_refs = [refs[2 * i] for i in range(n_layers)]        # (K, Co, Ci) folded weights
        b_refs = [refs[2 * i + 1] for i in range(n_layers)]    # (Co, 1)     folded bias
        wh_ref = refs[2 * n_layers]                            # (Co_last, L_last) head weight
        bh_ref = refs[2 * n_layers + 1]                        # (1, 1)            head bias
        o_ref = refs[2 * n_layers + 2]                         # (1, 1, 1) output block
        act_refs = refs[2 * n_layers + 3:]                     # per-layer padded activations

        # Stage this sample into its zero-padded VMEM buffer.
        d0 = dims[0]
        a0 = act_refs[0]
        a0[...] = jnp.zeros_like(a0)
        a0[:, pl.ds(d0["pad"], d0["Li"])] = x_ref[0]

        y = None
        for i, d in enumerate(dims):
            Ci, K, Co, L_out = d["Ci"], d["K"], d["Co"], d["L_out"]
            two_l = 2 * L_out
            a_ref = act_refs[i]

            # ---- stride-1 conv over the needed range, tap-wise on the VPU ----------
            # Ci*K <= 24 broadcast-MACs onto a lane-major (Co, 2*L_out) accumulator;
            # every tap is a stride-1 slice of the padded VMEM activation buffer.
            y_full = jnp.zeros((Co, two_l), dtype=jnp.float32)
            for k in range(K):
                xk = a_ref[:, pl.ds(k, two_l)]                 # (Ci, 2*L_out)
                wk = w_refs[i][k]                              # (Co, Ci)
                for ci in range(Ci):
                    y_full = y_full + wk[:, ci:ci + 1] * xk[ci:ci + 1, :]

            # ---- stride-2 decimation: MXU matmul against a 0/1 selection matrix ----
            # hi/lo bf16 split keeps the selection exact (~2^-18 relative error) on the
            # MXU's native bf16 path, independent of f32-matmul precision defaults.
            rows = lax.broadcasted_iota(jnp.int32, (two_l, L_out), 0)
            cols = lax.broadcasted_iota(jnp.int32, (two_l, L_out), 1)
            dsel = (rows == 2 * cols).astype(jnp.bfloat16)     # (2*L_out, L_out)
            hi = y_full.astype(jnp.bfloat16)
            lo = (y_full - hi.astype(jnp.float32)).astype(jnp.bfloat16)
            y = (jnp.dot(hi, dsel, preferred_element_type=jnp.float32)
                 + jnp.dot(lo, dsel, preferred_element_type=jnp.float32))  # (Co, L_out)

            # ---- folded BatchNorm bias + LeakyReLU(0.2) -----------------------------
            y = y + b_refs[i][...]
            y = jnp.maximum(y, RELU * y)                       # vmul+vmax, no select

            # Stage for the next layer, already zero-padded (never leaves VMEM).
            if i + 1 < n_layers:
                nxt = act_refs[i + 1]
                nxt[...] = jnp.zeros_like(nxt)
                nxt[:, pl.ds(dims[i + 1]["pad"], L_out)] = y

        # ---- Dropout(eval)=identity, Flatten -> Linear(F,1) -> Sigmoid --------------
        z = jnp.sum(y * wh_ref[...], axis=1, keepdims=True)    # (Co_last, 1)
        z = jnp.sum(z, axis=0, keepdims=True) + bh_ref[...]    # (1, 1)
        # Single (1,1) element: exact reciprocal; approx=True could not matter here.
        o_ref[0] = 1.0 / (1.0 + jnp.exp(-z))

    return kernel


# --------------------------------------------------------------------------------------
# Wrapper: BN folding + one fused pallas_call for the whole network
# --------------------------------------------------------------------------------------
def discriminator_forward(x, params):
    """x: (N, C_in, L) -> (N, 1)."""
    x = x.astype(jnp.float32)
    N, C_in, L = x.shape
    layer_defs = [(p["weight"].shape[1], p["weight"].shape[0], int(p["size"]))
                  for p in params["down"]]
    dims = _layer_geometry(C_in, L, layer_defs)

    # Fold eval-mode BatchNorm into each conv's weight/bias; store weights tap-major
    # (K, Co, Ci) so the kernel's per-tap access is a leading-axis index (no relayout).
    w_list, b_list = [], []
    for p, d in zip(params["down"], dims):
        scale = p["gamma"] * lax.rsqrt(p["var"] + BN_EPS)                    # (Co,)
        w_f = jnp.transpose(p["weight"] * scale[:, None, None], (2, 0, 1))   # (K, Co, Ci)
        b_f = ((p["bias"] - p["mean"]) * scale + p["beta"]).reshape(-1, 1)   # (Co, 1)
        w_list.append(w_f.astype(jnp.float32))
        b_list.append(b_f.astype(jnp.float32))

    co_last, l_last = dims[-1]["Co"], dims[-1]["L_out"]
    # nn.Flatten orders features channel-major -> reshape the (1, F) linear weight.
    w_head = params["w_lin"].reshape(co_last, l_last).astype(jnp.float32)
    b_head = params["b_lin"].reshape(1, 1).astype(jnp.float32)

    in_specs = [pl.BlockSpec((1, C_in, L), lambda n: (n, 0, 0))]
    operands = [x]
    for w_f, b_f in zip(w_list, b_list):
        in_specs.append(pl.BlockSpec(w_f.shape, lambda n: (0, 0, 0)))   # VMEM-resident
        in_specs.append(pl.BlockSpec(b_f.shape, lambda n: (0, 0)))
        operands += [w_f, b_f]
    in_specs += [pl.BlockSpec(w_head.shape, lambda n: (0, 0)),
                 pl.BlockSpec(b_head.shape, lambda n: (0, 0))]
    operands += [w_head, b_head]

    scratch_shapes = [pltpu.VMEM((d["Ci"], d["Lbuf"]), jnp.float32) for d in dims]

    flops = 0
    for d in dims:
        two_l = 2 * d["L_out"]
        flops += 2 * d["Ci"] * d["K"] * d["Co"] * two_l       # tap-wise conv MACs
        flops += 2 * 2 * d["Co"] * two_l * d["L_out"]         # hi/lo decimation matmuls
    flops = N * (flops + 2 * co_last * l_last)
    bytes_accessed = (x.size + sum(w.size + b.size for w, b in zip(w_list, b_list))
                      + w_head.size + b_head.size + N) * 4

    out = pl.pallas_call(
        _make_fused_kernel(dims),
        out_shape=jax.ShapeDtypeStruct((N, 1, 1), jnp.float32),
        grid=(N,),
        in_specs=in_specs,
        out_specs=pl.BlockSpec((1, 1, 1), lambda n: (n, 0, 0)),
        scratch_shapes=scratch_shapes,
        compiler_params=pltpu.CompilerParams(dimension_semantics=("parallel",)),
        cost_estimate=pl.CostEstimate(flops=flops, transcendentals=N,
                                      bytes_accessed=bytes_accessed),
    )(*operands)
    return out.reshape(N, 1)


# --------------------------------------------------------------------------------------
# Layer-schedule helpers (standard doubling-channel / shrinking odd-kernel schedule)
# and deterministic parameter construction
# --------------------------------------------------------------------------------------
def get_sizes_for_layers(B):
    n_channels = [4 * (2 ** i) for i in range(B)]                 # 4, 8, 16, ...
    size_filters = [max(3, 2 * (B - i) + 1) for i in range(B)]    # e.g. 7, 5, 3
    return n_channels, size_filters


def args_down(n_channels, size_filters, cond=False):
    in_ch = 2 if cond else 1
    out = []
    for c, s in zip(n_channels, size_filters):
        out.append((in_ch, c, s))
        in_ch = c
    return out


def init_params(key, depth, input_size):
    in_ch, length = input_size
    n_channels, size_filters = get_sizes_for_layers(depth)
    down = []
    for (ci, co, k) in args_down(n_channels, size_filters):
        key, kw, kb, kg, kbt, km, kv = jax.random.split(key, 7)
        bound = 1.0 / ((ci * k) ** 0.5)
        down.append(dict(
            size=k,
            weight=jax.random.uniform(kw, (co, ci, k), minval=-bound, maxval=bound,
                                      dtype=jnp.float32),
            bias=jax.random.uniform(kb, (co,), minval=-bound, maxval=bound,
                                    dtype=jnp.float32),
            gamma=jax.random.uniform(kg, (co,), minval=0.5, maxval=1.5, dtype=jnp.float32),
            beta=jax.random.uniform(kbt, (co,), minval=-0.1, maxval=0.1, dtype=jnp.float32),
            mean=0.1 * jax.random.normal(km, (co,), dtype=jnp.float32),
            var=jax.random.uniform(kv, (co,), minval=0.5, maxval=1.5, dtype=jnp.float32),
        ))
        pad = (k - 1) // 2
        length = (length + 2 * pad - k) // 2 + 1
    flat = n_channels[-1] * length
    key, kw, kb = jax.random.split(key, 3)
    bound = 1.0 / (flat ** 0.5)
    w_lin = jax.random.uniform(kw, (1, flat), minval=-bound, maxval=bound, dtype=jnp.float32)
    b_lin = jax.random.uniform(kb, (1,), minval=-bound, maxval=bound, dtype=jnp.float32)
    return dict(down=down, w_lin=w_lin, b_lin=b_lin)


# --------------------------------------------------------------------------------------
# Pure-JAX reference for validation (eval-mode semantics of the PyTorch module)
# --------------------------------------------------------------------------------------
def _reference(x, params):
    y = x
    for layer in params["down"]:
        pad = (layer["size"] - 1) // 2
        y = lax.conv_general_dilated(
            y, layer["weight"], window_strides=(2,), padding=[(pad, pad)],
            dimension_numbers=("NCH", "OIH", "NCH"),
            precision=lax.Precision.HIGHEST)
        y = y + layer["bias"][None, :, None]
        y = (y - layer["mean"][None, :, None]) * (
            layer["gamma"][None, :, None] * lax.rsqrt(layer["var"][None, :, None] + BN_EPS)
        ) + layer["beta"][None, :, None]
        y = jnp.where(y >= 0, y, RELU * y)
    y = y.reshape(y.shape[0], -1)
    z = jnp.dot(y, params["w_lin"].T, precision=lax.Precision.HIGHEST) + params["b_lin"]
    return jax.nn.sigmoid(z)


if __name__ == "__main__":
    DEPTH = 3
    N, IN_CH, L = 2, 1, 1024          # small 1-channel signal, 3 stride-2 blocks

    key = jax.random.PRNGKey(0)
    key, kx = jax.random.split(key)
    x = jax.random.normal(kx, (N, IN_CH, L), dtype=jnp.float32)
    params = init_params(key, DEPTH, (IN_CH, L))

    fwd = jax.jit(lambda inp: discriminator_forward(inp, params))
    y = jax.block_until_ready(fwd(x))

    y_ref = _reference(x, params)
    assert y.shape == (N, 1), y.shape
    assert bool(jnp.all(jnp.isfinite(y)))
    assert jnp.allclose(y, y_ref, atol=2e-4, rtol=2e-4), (y, y_ref)

    print("KERNEL_OK")
</pallas_src>

<mosaic_0001>
module attributes {stable_mosaic.version = 11 : i64} {
  func.func @kernel(%arg0: i32, %arg1: memref<1x1x1024xf32, #tpu.memory_space<vmem>>, %arg2: memref<7x4x1xf32, #tpu.memory_space<vmem>>, %arg3: memref<4x1xf32, #tpu.memory_space<vmem>>, %arg4: memref<5x8x4xf32, #tpu.memory_space<vmem>>, %arg5: memref<8x1xf32, #tpu.memory_space<vmem>>, %arg6: memref<3x16x8xf32, #tpu.memory_space<vmem>>, %arg7: memref<16x1xf32, #tpu.memory_space<vmem>>, %arg8: memref<16x128xf32, #tpu.memory_space<vmem>>, %arg9: memref<1x1xf32, #tpu.memory_space<vmem>>, %arg10: memref<1x1x1xf32, #tpu.memory_space<vmem>>, %arg11: memref<1x1030xf32, #tpu.memory_space<vmem>>, %arg12: memref<4x516xf32, #tpu.memory_space<vmem>>, %arg13: memref<8x258xf32, #tpu.memory_space<vmem>>) attributes {dimension_semantics = [#tpu.dimension_semantics<parallel>], iteration_bounds = array<i64: 2>, scalar_prefetch = 0 : i64, scratch_operands = 3 : i64, tpu.core_type = #tpu.core_type<tc>, window_params = [{transform_indices = @transform_0, window_bounds = array<i64: 1, 1, 1024>}, {pipeline_mode = #tpu.pipeline_mode<synchronous>, transform_indices = @transform_1, window_bounds = array<i64: 7, 4, 1>}, {pipeline_mode = #tpu.pipeline_mode<synchronous>, transform_indices = @transform_2, window_bounds = array<i64: 4, 1>}, {pipeline_mode = #tpu.pipeline_mode<synchronous>, transform_indices = @transform_3, window_bounds = array<i64: 5, 8, 4>}, {pipeline_mode = #tpu.pipeline_mode<synchronous>, transform_indices = @transform_4, window_bounds = array<i64: 8, 1>}, {pipeline_mode = #tpu.pipeline_mode<synchronous>, transform_indices = @transform_5, window_bounds = array<i64: 3, 16, 8>}, {pipeline_mode = #tpu.pipeline_mode<synchronous>, transform_indices = @transform_6, window_bounds = array<i64: 16, 1>}, {pipeline_mode = #tpu.pipeline_mode<synchronous>, transform_indices = @transform_7, window_bounds = array<i64: 16, 128>}, {pipeline_mode = #tpu.pipeline_mode<synchronous>, transform_indices = @transform_8, window_bounds = array<i64: 1, 1>}, {transform_indices = @transform_9, window_bounds = array<i64: 1, 1, 1>}]} {
    %cst = arith.constant 0.000000e+00 : f32
    %0 = vector.broadcast %cst : f32 to vector<1x1030xf32>
    %c0 = arith.constant 0 : index
    %c0_0 = arith.constant 0 : index
    %1 = vector.load %arg11[%c0, %c0_0] : memref<1x1030xf32, #tpu.memory_space<vmem>>, vector<1x1030xf32>
    tpu.vector_store %arg11[%c0, %c0_0], %0 {strides = array<i32>} : memref<1x1030xf32, #tpu.memory_space<vmem>>, vector<1x1030xf32>,
    %c0_1 = arith.constant 0 : index
    %c0_2 = arith.constant 0 : index
    %c0_3 = arith.constant 0 : index
    %2 = vector.load %arg1[%c0_1, %c0_2, %c0_3] : memref<1x1x1024xf32, #tpu.memory_space<vmem>>, vector<1x1x1024xf32>
    %3 = vector.shape_cast %2 : vector<1x1x1024xf32> to vector<1x1024xf32>
    %c0_4 = arith.constant 0 : index
    %c3 = arith.constant 3 : index
    %4 = vector.load %arg11[%c0_4, %c3] : memref<1x1030xf32, #tpu.memory_space<vmem>>, vector<1x1024xf32>
    tpu.vector_store %arg11[%c0_4, %c3], %3 {strides = array<i32>} : memref<1x1030xf32, #tpu.memory_space<vmem>>, vector<1x1024xf32>,
    %cst_5 = arith.constant 0.000000e+00 : f32
    %5 = vector.broadcast %cst_5 : f32 to vector<4x1024xf32>
    %c0_6 = arith.constant 0 : index
    %c0_7 = arith.constant 0 : index
    %6 = vector.load %arg11[%c0_6, %c0_7] : memref<1x1030xf32, #tpu.memory_space<vmem>>, vector<1x1024xf32>
    %c0_8 = arith.constant 0 : index
    %c0_9 = arith.constant 0 : index
    %c0_10 = arith.constant 0 : index
    %7 = vector.load %arg2[%c0_8, %c0_9, %c0_10] : memref<7x4x1xf32, #tpu.memory_space<vmem>>, vector<1x4x1xf32>
    %8 = vector.shape_cast %7 : vector<1x4x1xf32> to vector<4x1xf32>
    %9 = vector.broadcast %8 : vector<4x1xf32> to vector<4x1024xf32>
    %10 = vector.broadcast %6 : vector<1x1024xf32> to vector<4x1024xf32>
    %11 = arith.mulf %9, %10 : vector<4x1024xf32>
    %12 = arith.addf %5, %11 : vector<4x1024xf32>
    %c0_11 = arith.constant 0 : index
    %c1 = arith.constant 1 : index
    %13 = vector.load %arg11[%c0_11, %c1] : memref<1x1030xf32, #tpu.memory_space<vmem>>, vector<1x1024xf32>
    %c1_12 = arith.constant 1 : index
    %c0_13 = arith.constant 0 : index
    %c0_14 = arith.constant 0 : index
    %14 = vector.load %arg2[%c1_12, %c0_13, %c0_14] : memref<7x4x1xf32, #tpu.memory_space<vmem>>, vector<1x4x1xf32>
    %15 = vector.shape_cast %14 : vector<1x4x1xf32> to vector<4x1xf32>
    %16 = vector.broadcast %15 : vector<4x1xf32> to vector<4x1024xf32>
    %17 = vector.broadcast %13 : vector<1x1024xf32> to vector<4x1024xf32>
    %18 = arith.mulf %16, %17 : vector<4x1024xf32>
    %19 = arith.addf %12, %18 : vector<4x1024xf32>
    %c0_15 = arith.constant 0 : index
    %c2 = arith.constant 2 : index
    %20 = vector.load %arg11[%c0_15, %c2] : memref<1x1030xf32, #tpu.memory_space<vmem>>, vector<1x1024xf32>
    %c2_16 = arith.constant 2 : index
    %c0_17 = arith.constant 0 : index
    %c0_18 = arith.constant 0 : index
    %21 = vector.load %arg2[%c2_16, %c0_17, %c0_18] : memref<7x4x1xf32, #tpu.memory_space<vmem>>, vector<1x4x1xf32>
    %22 = vector.shape_cast %21 : vector<1x4x1xf32> to vector<4x1xf32>
    %23 = vector.broadcast %22 : vector<4x1xf32> to vector<4x1024xf32>
    %24 = vector.broadcast %20 : vector<1x1024xf32> to vector<4x1024xf32>
    %25 = arith.mulf %23, %24 : vector<4x1024xf32>
    %26 = arith.addf %19, %25 : vector<4x1024xf32>
    %c0_19 = arith.constant 0 : index
    %c3_20 = arith.constant 3 : index
    %27 = vector.load %arg11[%c0_19, %c3_20] : memref<1x1030xf32, #tpu.memory_space<vmem>>, vector<1x1024xf32>
    %c3_21 = arith.constant 3 : index
    %c0_22 = arith.constant 0 : index
    %c0_23 = arith.constant 0 : index
    %28 = vector.load %arg2[%c3_21, %c0_22, %c0_23] : memref<7x4x1xf32, #tpu.memory_space<vmem>>, vector<1x4x1xf32>
    %29 = vector.shape_cast %28 : vector<1x4x1xf32> to vector<4x1xf32>
    %30 = vector.broadcast %29 : vector<4x1xf32> to vector<4x1024xf32>
    %31 = vector.broadcast %27 : vector<1x1024xf32> to vector<4x1024xf32>
    %32 = arith.mulf %30, %31 : vector<4x1024xf32>
    %33 = arith.addf %26, %32 : vector<4x1024xf32>
    %c0_24 = arith.constant 0 : index
    %c4 = arith.constant 4 : index
    %34 = vector.load %arg11[%c0_24, %c4] : memref<1x1030xf32, #tpu.memory_space<vmem>>, vector<1x1024xf32>
    %c4_25 = arith.constant 4 : index
    %c0_26 = arith.constant 0 : index
    %c0_27 = arith.constant 0 : index
    %35 = vector.load %arg2[%c4_25, %c0_26, %c0_27] : memref<7x4x1xf32, #tpu.memory_space<vmem>>, vector<1x4x1xf32>
    %36 = vector.shape_cast %35 : vector<1x4x1xf32> to vector<4x1xf32>
    %37 = vector.broadcast %36 : vector<4x1xf32> to vector<4x1024xf32>
    %38 = vector.broadcast %34 : vector<1x1024xf32> to vector<4x1024xf32>
    %39 = arith.mulf %37, %38 : vector<4x1024xf32>
    %40 = arith.addf %33, %39 : vector<4x1024xf32>
    %c0_28 = arith.constant 0 : index
    %c5 = arith.constant 5 : index
    %41 = vector.load %arg11[%c0_28, %c5] : memref<1x1030xf32, #tpu.memory_space<vmem>>, vector<1x1024xf32>
    %c5_29 = arith.constant 5 : index
    %c0_30 = arith.constant 0 : index
    %c0_31 = arith.constant 0 : index
    %42 = vector.load %arg2[%c5_29, %c0_30, %c0_31] : memref<7x4x1xf32, #tpu.memory_space<vmem>>, vector<1x4x1xf32>
    %43 = vector.shape_cast %42 : vector<1x4x1xf32> to vector<4x1xf32>
    %44 = vector.broadcast %43 : vector<4x1xf32> to vector<4x1024xf32>
    %45 = vector.broadcast %41 : vector<1x1024xf32> to vector<4x1024xf32>
    %46 = arith.mulf %44, %45 : vector<4x1024xf32>
    %47 = arith.addf %40, %46 : vector<4x1024xf32>
    %c0_32 = arith.constant 0 : index
    %c6 = arith.constant 6 : index
    %48 = vector.load %arg11[%c0_32, %c6] : memref<1x1030xf32, #tpu.memory_space<vmem>>, vector<1x1024xf32>
    %c6_33 = arith.constant 6 : index
    %c0_34 = arith.constant 0 : index
    %c0_35 = arith.constant 0 : index
    %49 = vector.load %arg2[%c6_33, %c0_34, %c0_35] : memref<7x4x1xf32, #tpu.memory_space<vmem>>, vector<1x4x1xf32>
    %50 = vector.shape_cast %49 : vector<1x4x1xf32> to vector<4x1xf32>
    %51 = vector.broadcast %50 : vector<4x1xf32> to vector<4x1024xf32>
    %52 = vector.broadcast %48 : vector<1x1024xf32> to vector<4x1024xf32>
    %53 = arith.mulf %51, %52 : vector<4x1024xf32>
    %54 = arith.addf %47, %53 : vector<4x1024xf32>
    %55 = tpu.iota {dimensions = array<i32: 0>} : vector<1024x512xi32>
    %56 = tpu.iota {dimensions = array<i32: 1>} : vector<1024x512xi32>
    %c2_i32 = arith.constant 2 : i32
    %57 = vector.broadcast %c2_i32 : i32 to vector<1024x512xi32>
    %58 = arith.muli %57, %56 : vector<1024x512xi32>
    %59 = arith.cmpi eq, %55, %58 : vector<1024x512xi32>
    %60 = arith.extui %59 : vector<1024x512xi1> to vector<1024x512xi32>
    %61 = arith.sitofp %60 : vector<1024x512xi32> to vector<1024x512xf32>
    %62 = arith.truncf %61 : vector<1024x512xf32> to vector<1024x512xbf16>
    %63 = arith.truncf %54 : vector<4x1024xf32> to vector<4x1024xbf16>
    %64 = arith.extf %63 : vector<4x1024xbf16> to vector<4x1024xf32>
    %65 = arith.subf %54, %64 : vector<4x1024xf32>
    %66 = arith.truncf %65 : vector<4x1024xf32> to vector<4x1024xbf16>
    %cst_36 = arith.constant dense<0.000000e+00> : vector<4x512xf32>
    %67 = tpu.matmul %63, %62, %cst_36 {dimension_numbers = #tpu.dot_dimension_numbers<[1], [0], [0], [1], [0, 0, 1, 1], [], []>} : vector<4x1024xbf16>, vector<1024x512xbf16>, vector<4x512xf32> -> vector<4x512xf32>
    %cst_37 = arith.constant dense<0.000000e+00> : vector<4x512xf32>
    %68 = tpu.matmul %66, %62, %cst_37 {dimension_numbers = #tpu.dot_dimension_numbers<[1], [0], [0], [1], [0, 0, 1, 1], [], []>} : vector<4x1024xbf16>, vector<1024x512xbf16>, vector<4x512xf32> -> vector<4x512xf32>
    %69 = arith.addf %67, %68 : vector<4x512xf32>
    %c0_38 = arith.constant 0 : index
    %c0_39 = arith.constant 0 : index
    %70 = vector.load %arg3[%c0_38, %c0_39] : memref<4x1xf32, #tpu.memory_space<vmem>>, vector<4x1xf32>
    %71 = vector.broadcast %70 : vector<4x1xf32> to vector<4x512xf32>
    %72 = arith.addf %69, %71 : vector<4x512xf32>
    %cst_40 = arith.constant 2.000000e-01 : f32
    %73 = vector.broadcast %cst_40 : f32 to vector<4x512xf32>
    %74 = arith.mulf %73, %72 : vector<4x512xf32>
    %75 = arith.maximumf %72, %74 : vector<4x512xf32>
    %cst_41 = arith.constant 0.000000e+00 : f32
    %76 = vector.broadcast %cst_41 : f32 to vector<4x516xf32>
    %c0_42 = arith.constant 0 : index
    %c0_43 = arith.constant 0 : index
    %77 = vector.load %arg12[%c0_42, %c0_43] : memref<4x516xf32, #tpu.memory_space<vmem>>, vector<4x516xf32>
    tpu.vector_store %arg12[%c0_42, %c0_43], %76 {strides = array<i32>} : memref<4x516xf32, #tpu.memory_space<vmem>>, vector<4x516xf32>,
    %c0_44 = arith.constant 0 : index
    %c2_45 = arith.constant 2 : index
    %78 = vector.load %arg12[%c0_44, %c2_45] : memref<4x516xf32, #tpu.memory_space<vmem>>, vector<4x512xf32>
    tpu.vector_store %arg12[%c0_44, %c2_45], %75 {strides = array<i32>} : memref<4x516xf32, #tpu.memory_space<vmem>>, vector<4x512xf32>,
    %cst_46 = arith.constant 0.000000e+00 : f32
    %79 = vector.broadcast %cst_46 : f32 to vector<8x512xf32>
    %c0_47 = arith.constant 0 : index
    %c0_48 = arith.constant 0 : index
    %80 = vector.load %arg12[%c0_47, %c0_48] : memref<4x516xf32, #tpu.memory_space<vmem>>, vector<4x512xf32>
    %c0_49 = arith.constant 0 : index
    %c0_50 = arith.constant 0 : index
    %c0_51 = arith.constant 0 : index
    %81 = vector.load %arg4[%c0_49, %c0_50, %c0_51] : memref<5x8x4xf32, #tpu.memory_space<vmem>>, vector<1x8x4xf32>
    %82 = vector.shape_cast %81 : vector<1x8x4xf32> to vector<8x4xf32>
    %83 = vector.extract_strided_slice %82 {offsets = [0, 0], sizes = [8, 1], strides = [1, 1]} : vector<8x4xf32> to vector<8x1xf32>
    %84 = vector.extract_strided_slice %80 {offsets = [0, 0], sizes = [1, 512], strides = [1, 1]} : vector<4x512xf32> to vector<1x512xf32>
    %85 = vector.broadcast %83 : vector<8x1xf32> to vector<8x512xf32>
    %86 = vector.broadcast %84 : vector<1x512xf32> to vector<8x512xf32>
    %87 = arith.mulf %85, %86 : vector<8x512xf32>
    %88 = arith.addf %79, %87 : vector<8x512xf32>
    %89 = vector.extract_strided_slice %82 {offsets = [0, 1], sizes = [8, 1], strides = [1, 1]} : vector<8x4xf32> to vector<8x1xf32>
    %90 = vector.extract_strided_slice %80 {offsets = [1, 0], sizes = [1, 512], strides = [1, 1]} : vector<4x512xf32> to vector<1x512xf32>
    %91 = vector.broadcast %89 : vector<8x1xf32> to vector<8x512xf32>
    %92 = vector.broadcast %90 : vector<1x512xf32> to vector<8x512xf32>
    %93 = arith.mulf %91, %92 : vector<8x512xf32>
    %94 = arith.addf %88, %93 : vector<8x512xf32>
    %95 = vector.extract_strided_slice %82 {offsets = [0, 2], sizes = [8, 1], strides = [1, 1]} : vector<8x4xf32> to vector<8x1xf32>
    %96 = vector.extract_strided_slice %80 {offsets = [2, 0], sizes = [1, 512], strides = [1, 1]} : vector<4x512xf32> to vector<1x512xf32>
    %97 = vector.broadcast %95 : vector<8x1xf32> to vector<8x512xf32>
    %98 = vector.broadcast %96 : vector<1x512xf32> to vector<8x512xf32>
    %99 = arith.mulf %97, %98 : vector<8x512xf32>
    %100 = arith.addf %94, %99 : vector<8x512xf32>
    %101 = vector.extract_strided_slice %82 {offsets = [0, 3], sizes = [8, 1], strides = [1, 1]} : vector<8x4xf32> to vector<8x1xf32>
    %102 = vector.extract_strided_slice %80 {offsets = [3, 0], sizes = [1, 512], strides = [1, 1]} : vector<4x512xf32> to vector<1x512xf32>
    %103 = vector.broadcast %101 : vector<8x1xf32> to vector<8x512xf32>
    %104 = vector.broadcast %102 : vector<1x512xf32> to vector<8x512xf32>
    %105 = arith.mulf %103, %104 : vector<8x512xf32>
    %106 = arith.addf %100, %105 : vector<8x512xf32>
    %c0_52 = arith.constant 0 : index
    %c1_53 = arith.constant 1 : index
    %107 = vector.load %arg12[%c0_52, %c1_53] : memref<4x516xf32, #tpu.memory_space<vmem>>, vector<4x512xf32>
    %c1_54 = arith.constant 1 : index
    %c0_55 = arith.constant 0 : index
    %c0_56 = arith.constant 0 : index
    %108 = vector.load %arg4[%c1_54, %c0_55, %c0_56] : memref<5x8x4xf32, #tpu.memory_space<vmem>>, vector<1x8x4xf32>
    %109 = vector.shape_cast %108 : vector<1x8x4xf32> to vector<8x4xf32>
    %110 = vector.extract_strided_slice %109 {offsets = [0, 0], sizes = [8, 1], strides = [1, 1]} : vector<8x4xf32> to vector<8x1xf32>
    %111 = vector.extract_strided_slice %107 {offsets = [0, 0], sizes = [1, 512], strides = [1, 1]} : vector<4x512xf32> to vector<1x512xf32>
    %112 = vector.broadcast %110 : vector<8x1xf32> to vector<8x512xf32>
    %113 = vector.broadcast %111 : vector<1x512xf32> to vector<8x512xf32>
    %114 = arith.mulf %112, %113 : vector<8x512xf32>
    %115 = arith.addf %106, %114 : vector<8x512xf32>
    %116 = vector.extract_strided_slice %109 {offsets = [0, 1], sizes = [8, 1], strides = [1, 1]} : vector<8x4xf32> to vector<8x1xf32>
    %117 = vector.extract_strided_slice %107 {offsets = [1, 0], sizes = [1, 512], strides = [1, 1]} : vector<4x512xf32> to vector<1x512xf32>
    %118 = vector.broadcast %116 : vector<8x1xf32> to vector<8x512xf32>
    %119 = vector.broadcast %117 : vector<1x512xf32> to vector<8x512xf32>
    %120 = arith.mulf %118, %119 : vector<8x512xf32>
    %121 = arith.addf %115, %120 : vector<8x512xf32>
    %122 = vector.extract_strided_slice %109 {offsets = [0, 2], sizes = [8, 1], strides = [1, 1]} : vector<8x4xf32> to vector<8x1xf32>
    %123 = vector.extract_strided_slice %107 {offsets = [2, 0], sizes = [1, 512], strides = [1, 1]} : vector<4x512xf32> to vector<1x512xf32>
    %124 = vector.broadcast %122 : vector<8x1xf32> to vector<8x512xf32>
    %125 = vector.broadcast %123 : vector<1x512xf32> to vector<8x512xf32>
    %126 = arith.mulf %124, %125 : vector<8x512xf32>
    %127 = arith.addf %121, %126 : vector<8x512xf32>
    %128 = vector.extract_strided_slice %109 {offsets = [0, 3], sizes = [8, 1], strides = [1, 1]} : vector<8x4xf32> to vector<8x1xf32>
    %129 = vector.extract_strided_slice %107 {offsets = [3, 0], sizes = [1, 512], strides = [1, 1]} : vector<4x512xf32> to vector<1x512xf32>
    %130 = vector.broadcast %128 : vector<8x1xf32> to vector<8x512xf32>
    %131 = vector.broadcast %129 : vector<1x512xf32> to vector<8x512xf32>
    %132 = arith.mulf %130, %131 : vector<8x512xf32>
    %133 = arith.addf %127, %132 : vector<8x512xf32>
    %c0_57 = arith.constant 0 : index
    %c2_58 = arith.constant 2 : index
    %134 = vector.load %arg12[%c0_57, %c2_58] : memref<4x516xf32, #tpu.memory_space<vmem>>, vector<4x512xf32>
    %c2_59 = arith.constant 2 : index
    %c0_60 = arith.constant 0 : index
    %c0_61 = arith.constant 0 : index
    %135 = vector.load %arg4[%c2_59, %c0_60, %c0_61] : memref<5x8x4xf32, #tpu.memory_space<vmem>>, vector<1x8x4xf32>
    %136 = vector.shape_cast %135 : vector<1x8x4xf32> to vector<8x4xf32>
    %137 = vector.extract_strided_slice %136 {offsets = [0, 0], sizes = [8, 1], strides = [1, 1]} : vector<8x4xf32> to vector<8x1xf32>
    %138 = vector.extract_strided_slice %134 {offsets = [0, 0], sizes = [1, 512], strides = [1, 1]} : vector<4x512xf32> to vector<1x512xf32>
    %139 = vector.broadcast %137 : vector<8x1xf32> to vector<8x512xf32>
    %140 = vector.broadcast %138 : vector<1x512xf32> to vector<8x512xf32>
    %141 = arith.mulf %139, %140 : vector<8x512xf32>
    %142 = arith.addf %133, %141 : vector<8x512xf32>
    %143 = vector.extract_strided_slice %136 {offsets = [0, 1], sizes = [8, 1], strides = [1, 1]} : vector<8x4xf32> to vector<8x1xf32>
    %144 = vector.extract_strided_slice %134 {offsets = [1, 0], sizes = [1, 512], strides = [1, 1]} : vector<4x512xf32> to vector<1x512xf32>
    %145 = vector.broadcast %143 : vector<8x1xf32> to vector<8x512xf32>
    %146 = vector.broadcast %144 : vector<1x512xf32> to vector<8x512xf32>
    %147 = arith.mulf %145, %146 : vector<8x512xf32>
    %148 = arith.addf %142, %147 : vector<8x512xf32>
    %149 = vector.extract_strided_slice %136 {offsets = [0, 2], sizes = [8, 1], strides = [1, 1]} : vector<8x4xf32> to vector<8x1xf32>
    %150 = vector.extract_strided_slice %134 {offsets = [2, 0], sizes = [1, 512], strides = [1, 1]} : vector<4x512xf32> to vector<1x512xf32>
    %151 = vector.broadcast %149 : vector<8x1xf32> to vector<8x512xf32>
    %152 = vector.broadcast %150 : vector<1x512xf32> to vector<8x512xf32>
    %153 = arith.mulf %151, %152 : vector<8x512xf32>
    %154 = arith.addf %148, %153 : vector<8x512xf32>
    %155 = vector.extract_strided_slice %136 {offsets = [0, 3], sizes = [8, 1], strides = [1, 1]} : vector<8x4xf32> to vector<8x1xf32>
    %156 = vector.extract_strided_slice %134 {offsets = [3, 0], sizes = [1, 512], strides = [1, 1]} : vector<4x512xf32> to vector<1x512xf32>
    %157 = vector.broadcast %155 : vector<8x1xf32> to vector<8x512xf32>
    %158 = vector.broadcast %156 : vector<1x512xf32> to vector<8x512xf32>
    %159 = arith.mulf %157, %158 : vector<8x512xf32>
    %160 = arith.addf %154, %159 : vector<8x512xf32>
    %c0_62 = arith.constant 0 : index
    %c3_63 = arith.constant 3 : index
    %161 = vector.load %arg12[%c0_62, %c3_63] : memref<4x516xf32, #tpu.memory_space<vmem>>, vector<4x512xf32>
    %c3_64 = arith.constant 3 : index
    %c0_65 = arith.constant 0 : index
    %c0_66 = arith.constant 0 : index
    %162 = vector.load %arg4[%c3_64, %c0_65, %c0_66] : memref<5x8x4xf32, #tpu.memory_space<vmem>>, vector<1x8x4xf32>
    %163 = vector.shape_cast %162 : vector<1x8x4xf32> to vector<8x4xf32>
    %164 = vector.extract_strided_slice %163 {offsets = [0, 0], sizes = [8, 1], strides = [1, 1]} : vector<8x4xf32> to vector<8x1xf32>
    %165 = vector.extract_strided_slice %161 {offsets = [0, 0], sizes = [1, 512], strides = [1, 1]} : vector<4x512xf32> to vector<1x512xf32>
    %166 = vector.broadcast %164 : vector<8x1xf32> to vector<8x512xf32>
    %167 = vector.broadcast %165 : vector<1x512xf32> to vector<8x512xf32>
    %168 = arith.mulf %166, %167 : vector<8x512xf32>
    %169 = arith.addf %160, %168 : vector<8x512xf32>
    %170 = vector.extract_strided_slice %163 {offsets = [0, 1], sizes = [8, 1], strides = [1, 1]} : vector<8x4xf32> to vector<8x1xf32>
    %171 = vector.extract_strided_slice %161 {offsets = [1, 0], sizes = [1, 512], strides = [1, 1]} : vector<4x512xf32> to vector<1x512xf32>
    %172 = vector.broadcast %170 : vector<8x1xf32> to vector<8x512xf32>
    %173 = vector.broadcast %171 : vector<1x512xf32> to vector<8x512xf32>
    %174 = arith.mulf %172, %173 : vector<8x512xf32>
    %175 = arith.addf %169, %174 : vector<8x512xf32>
    %176 = vector.extract_strided_slice %163 {offsets = [0, 2], sizes = [8, 1], strides = [1, 1]} : vector<8x4xf32> to vector<8x1xf32>
    %177 = vector.extract_strided_slice %161 {offsets = [2, 0], sizes = [1, 512], strides = [1, 1]} : vector<4x512xf32> to vector<1x512xf32>
    %178 = vector.broadcast %176 : vector<8x1xf32> to vector<8x512xf32>
    %179 = vector.broadcast %177 : vector<1x512xf32> to vector<8x512xf32>
    %180 = arith.mulf %178, %179 : vector<8x512xf32>
    %181 = arith.addf %175, %180 : vector<8x512xf32>
    %182 = vector.extract_strided_slice %163 {offsets = [0, 3], sizes = [8, 1], strides = [1, 1]} : vector<8x4xf32> to vector<8x1xf32>
    %183 = vector.extract_strided_slice %161 {offsets = [3, 0], sizes = [1, 512], strides = [1, 1]} : vector<4x512xf32> to vector<1x512xf32>
    %184 = vector.broadcast %182 : vector<8x1xf32> to vector<8x512xf32>
    %185 = vector.broadcast %183 : vector<1x512xf32> to vector<8x512xf32>
    %186 = arith.mulf %184, %185 : vector<8x512xf32>
    %187 = arith.addf %181, %186 : vector<8x512xf32>
    %c0_67 = arith.constant 0 : index
    %c4_68 = arith.constant 4 : index
    %188 = vector.load %arg12[%c0_67, %c4_68] : memref<4x516xf32, #tpu.memory_space<vmem>>, vector<4x512xf32>
    %c4_69 = arith.constant 4 : index
    %c0_70 = arith.constant 0 : index
    %c0_71 = arith.constant 0 : index
    %189 = vector.load %arg4[%c4_69, %c0_70, %c0_71] : memref<5x8x4xf32, #tpu.memory_space<vmem>>, vector<1x8x4xf32>
    %190 = vector.shape_cast %189 : vector<1x8x4xf32> to vector<8x4xf32>
    %191 = vector.extract_strided_slice %190 {offsets = [0, 0], sizes = [8, 1], strides = [1, 1]} : vector<8x4xf32> to vector<8x1xf32>
    %192 = vector.extract_strided_slice %188 {offsets = [0, 0], sizes = [1, 512], strides = [1, 1]} : vector<4x512xf32> to vector<1x512xf32>
    %193 = vector.broadcast %191 : vector<8x1xf32> to vector<8x512xf32>
    %194 = vector.broadcast %192 : vector<1x512xf32> to vector<8x512xf32>
    %195 = arith.mulf %193, %194 : vector<8x512xf32>
    %196 = arith.addf %187, %195 : vector<8x512xf32>
    %197 = vector.extract_strided_slice %190 {offsets = [0, 1], sizes = [8, 1], strides = [1, 1]} : vector<8x4xf32> to vector<8x1xf32>
    %198 = vector.extract_strided_slice %188 {offsets = [1, 0], sizes = [1, 512], strides = [1, 1]} : vector<4x512xf32> to vector<1x512xf32>
    %199 = vector.broadcast %197 : vector<8x1xf32> to vector<8x512xf32>
    %200 = vector.broadcast %198 : vector<1x512xf32> to vector<8x512xf32>
    %201 = arith.mulf %199, %200 : vector<8x512xf32>
    %202 = arith.addf %196, %201 : vector<8x512xf32>
    %203 = vector.extract_strided_slice %190 {offsets = [0, 2], sizes = [8, 1], strides = [1, 1]} : vector<8x4xf32> to vector<8x1xf32>
    %204 = vector.extract_strided_slice %188 {offsets = [2, 0], sizes = [1, 512], strides = [1, 1]} : vector<4x512xf32> to vector<1x512xf32>
    %205 = vector.broadcast %203 : vector<8x1xf32> to vector<8x512xf32>
    %206 = vector.broadcast %204 : vector<1x512xf32> to vector<8x512xf32>
    %207 = arith.mulf %205, %206 : vector<8x512xf32>
    %208 = arith.addf %202, %207 : vector<8x512xf32>
    %209 = vector.extract_strided_slice %190 {offsets = [0, 3], sizes = [8, 1], strides = [1, 1]} : vector<8x4xf32> to vector<8x1xf32>
    %210 = vector.extract_strided_slice %188 {offsets = [3, 0], sizes = [1, 512], strides = [1, 1]} : vector<4x512xf32> to vector<1x512xf32>
    %211 = vector.broadcast %209 : vector<8x1xf32> to vector<8x512xf32>
    %212 = vector.broadcast %210 : vector<1x512xf32> to vector<8x512xf32>
    %213 = arith.mulf %211, %212 : vector<8x512xf32>
    %214 = arith.addf %208, %213 : vector<8x512xf32>
    %215 = tpu.iota {dimensions = array<i32: 0>} : vector<512x256xi32>
    %216 = tpu.iota {dimensions = array<i32: 1>} : vector<512x256xi32>
    %c2_i32_72 = arith.constant 2 : i32
    %217 = vector.broadcast %c2_i32_72 : i32 to vector<512x256xi32>
    %218 = arith.muli %217, %216 : vector<512x256xi32>
    %219 = arith.cmpi eq, %215, %218 : vector<512x256xi32>
    %220 = arith.extui %219 : vector<512x256xi1> to vector<512x256xi32>
    %221 = arith.sitofp %220 : vector<512x256xi32> to vector<512x256xf32>
    %222 = arith.truncf %221 : vector<512x256xf32> to vector<512x256xbf16>
    %223 = arith.truncf %214 : vector<8x512xf32> to vector<8x512xbf16>
    %224 = arith.extf %223 : vector<8x512xbf16> to vector<8x512xf32>
    %225 = arith.subf %214, %224 : vector<8x512xf32>
    %226 = arith.truncf %225 : vector<8x512xf32> to vector<8x512xbf16>
    %cst_73 = arith.constant dense<0.000000e+00> : vector<8x256xf32>
    %227 = tpu.matmul %223, %222, %cst_73 {dimension_numbers = #tpu.dot_dimension_numbers<[1], [0], [0], [1], [0, 0, 1, 1], [], []>} : vector<8x512xbf16>, vector<512x256xbf16>, vector<8x256xf32> -> vector<8x256xf32>
    %cst_74 = arith.constant dense<0.000000e+00> : vector<8x256xf32>
    %228 = tpu.matmul %226, %222, %cst_74 {dimension_numbers = #tpu.dot_dimension_numbers<[1], [0], [0], [1], [0, 0, 1, 1], [], []>} : vector<8x512xbf16>, vector<512x256xbf16>, vector<8x256xf32> -> vector<8x256xf32>
    %229 = arith.addf %227, %228 : vector<8x256xf32>
    %c0_75 = arith.constant 0 : index
    %c0_76 = arith.constant 0 : index
    %230 = vector.load %arg5[%c0_75, %c0_76] : memref<8x1xf32, #tpu.memory_space<vmem>>, vector<8x1xf32>
    %231 = vector.broadcast %230 : vector<8x1xf32> to vector<8x256xf32>
    %232 = arith.addf %229, %231 : vector<8x256xf32>
    %cst_77 = arith.constant 2.000000e-01 : f32
    %233 = vector.broadcast %cst_77 : f32 to vector<8x256xf32>
    %234 = arith.mulf %233, %232 : vector<8x256xf32>
    %235 = arith.maximumf %232, %234 : vector<8x256xf32>
    %cst_78 = arith.constant 0.000000e+00 : f32
    %236 = vector.broadcast %cst_78 : f32 to vector<8x258xf32>
    %c0_79 = arith.constant 0 : index
    %c0_80 = arith.constant 0 : index
    %237 = vector.load %arg13[%c0_79, %c0_80] : memref<8x258xf32, #tpu.memory_space<vmem>>, vector<8x258xf32>
    tpu.vector_store %arg13[%c0_79, %c0_80], %236 {strides = array<i32>} : memref<8x258xf32, #tpu.memory_space<vmem>>, vector<8x258xf32>,
    %c0_81 = arith.constant 0 : index
    %c1_82 = arith.constant 1 : index
    %238 = vector.load %arg13[%c0_81, %c1_82] : memref<8x258xf32, #tpu.memory_space<vmem>>, vector<8x256xf32>
    tpu.vector_store %arg13[%c0_81, %c1_82], %235 {strides = array<i32>} : memref<8x258xf32, #tpu.memory_space<vmem>>, vector<8x256xf32>,
    %cst_83 = arith.constant 0.000000e+00 : f32
    %239 = vector.broadcast %cst_83 : f32 to vector<16x256xf32>
    %c0_84 = arith.constant 0 : index
    %c0_85 = arith.constant 0 : index
    %240 = vector.load %arg13[%c0_84, %c0_85] : memref<8x258xf32, #tpu.memory_space<vmem>>, vector<8x256xf32>
    %c0_86 = arith.constant 0 : index
    %c0_87 = arith.constant 0 : index
    %c0_88 = arith.constant 0 : index
    %241 = vector.load %arg6[%c0_86, %c0_87, %c0_88] : memref<3x16x8xf32, #tpu.memory_space<vmem>>, vector<1x16x8xf32>
    %242 = vector.shape_cast %241 : vector<1x16x8xf32> to vector<16x8xf32>
    %243 = vector.extract_strided_slice %242 {offsets = [0, 0], sizes = [16, 1], strides = [1, 1]} : vector<16x8xf32> to vector<16x1xf32>
    %244 = vector.extract_strided_slice %240 {offsets = [0, 0], sizes = [1, 256], strides = [1, 1]} : vector<8x256xf32> to vector<1x256xf32>
    %245 = vector.broadcast %243 : vector<16x1xf32> to vector<16x256xf32>
    %246 = vector.broadcast %244 : vector<1x256xf32> to vector<16x256xf32>
    %247 = arith.mulf %245, %246 : vector<16x256xf32>
    %248 = arith.addf %239, %247 : vector<16x256xf32>
    %249 = vector.extract_strided_slice %242 {offsets = [0, 1], sizes = [16, 1], strides = [1, 1]} : vector<16x8xf32> to vector<16x1xf32>
    %250 = vector.extract_strided_slice %240 {offsets = [1, 0], sizes = [1, 256], strides = [1, 1]} : vector<8x256xf32> to vector<1x256xf32>
    %251 = vector.broadcast %249 : vector<16x1xf32> to vector<16x256xf32>
    %252 = vector.broadcast %250 : vector<1x256xf32> to vector<16x256xf32>
    %253 = arith.mulf %251, %252 : vector<16x256xf32>
    %254 = arith.addf %248, %253 : vector<16x256xf32>
    %255 = vector.extract_strided_slice %242 {offsets = [0, 2], sizes = [16, 1], strides = [1, 1]} : vector<16x8xf32> to vector<16x1xf32>
    %256 = vector.extract_strided_slice %240 {offsets = [2, 0], sizes = [1, 256], strides = [1, 1]} : vector<8x256xf32> to vector<1x256xf32>
    %257 = vector.broadcast %255 : vector<16x1xf32> to vector<16x256xf32>
    %258 = vector.broadcast %256 : vector<1x256xf32> to vector<16x256xf32>
    %259 = arith.mulf %257, %258 : vector<16x256xf32>
    %260 = arith.addf %254, %259 : vector<16x256xf32>
    %261 = vector.extract_strided_slice %242 {offsets = [0, 3], sizes = [16, 1], strides = [1, 1]} : vector<16x8xf32> to vector<16x1xf32>
    %262 = vector.extract_strided_slice %240 {offsets = [3, 0], sizes = [1, 256], strides = [1, 1]} : vector<8x256xf32> to vector<1x256xf32>
    %263 = vector.broadcast %261 : vector<16x1xf32> to vector<16x256xf32>
    %264 = vector.broadcast %262 : vector<1x256xf32> to vector<16x256xf32>
    %265 = arith.mulf %263, %264 : vector<16x256xf32>
    %266 = arith.addf %260, %265 : vector<16x256xf32>
    %267 = vector.extract_strided_slice %242 {offsets = [0, 4], sizes = [16, 1], strides = [1, 1]} : vector<16x8xf32> to vector<16x1xf32>
    %268 = vector.extract_strided_slice %240 {offsets = [4, 0], sizes = [1, 256], strides = [1, 1]} : vector<8x256xf32> to vector<1x256xf32>
    %269 = vector.broadcast %267 : vector<16x1xf32> to vector<16x256xf32>
    %270 = vector.broadcast %268 : vector<1x256xf32> to vector<16x256xf32>
    %271 = arith.mulf %269, %270 : vector<16x256xf32>
    %272 = arith.addf %266, %271 : vector<16x256xf32>
    %273 = vector.extract_strided_slice %242 {offsets = [0, 5], sizes = [16, 1], strides = [1, 1]} : vector<16x8xf32> to vector<16x1xf32>
    %274 = vector.extract_strided_slice %240 {offsets = [5, 0], sizes = [1, 256], strides = [1, 1]} : vector<8x256xf32> to vector<1x256xf32>
    %275 = vector.broadcast %273 : vector<16x1xf32> to vector<16x256xf32>
    %276 = vector.broadcast %274 : vector<1x256xf32> to vector<16x256xf32>
    %277 = arith.mulf %275, %276 : vector<16x256xf32>
    %278 = arith.addf %272, %277 : vector<16x256xf32>
    %279 = vector.extract_strided_slice %242 {offsets = [0, 6], sizes = [16, 1], strides = [1, 1]} : vector<16x8xf32> to vector<16x1xf32>
    %280 = vector.extract_strided_slice %240 {offsets = [6, 0], sizes = [1, 256], strides = [1, 1]} : vector<8x256xf32> to vector<1x256xf32>
    %281 = vector.broadcast %279 : vector<16x1xf32> to vector<16x256xf32>
    %282 = vector.broadcast %280 : vector<1x256xf32> to vector<16x256xf32>
    %283 = arith.mulf %281, %282 : vector<16x256xf32>
    %284 = arith.addf %278, %283 : vector<16x256xf32>
    %285 = vector.extract_strided_slice %242 {offsets = [0, 7], sizes = [16, 1], strides = [1, 1]} : vector<16x8xf32> to vector<16x1xf32>
    %286 = vector.extract_strided_slice %240 {offsets = [7, 0], sizes = [1, 256], strides = [1, 1]} : vector<8x256xf32> to vector<1x256xf32>
    %287 = vector.broadcast %285 : vector<16x1xf32> to vector<16x256xf32>
    %288 = vector.broadcast %286 : vector<1x256xf32> to vector<16x256xf32>
    %289 = arith.mulf %287, %288 : vector<16x256xf32>
    %290 = arith.addf %284, %289 : vector<16x256xf32>
    %c0_89 = arith.constant 0 : index
    %c1_90 = arith.constant 1 : index
    %291 = vector.load %arg13[%c0_89, %c1_90] : memref<8x258xf32, #tpu.memory_space<vmem>>, vector<8x256xf32>
    %c1_91 = arith.constant 1 : index
    %c0_92 = arith.constant 0 : index
    %c0_93 = arith.constant 0 : index
    %292 = vector.load %arg6[%c1_91, %c0_92, %c0_93] : memref<3x16x8xf32, #tpu.memory_space<vmem>>, vector<1x16x8xf32>
    %293 = vector.shape_cast %292 : vector<1x16x8xf32> to vector<16x8xf32>
    %294 = vector.extract_strided_slice %293 {offsets = [0, 0], sizes = [16, 1], strides = [1, 1]} : vector<16x8xf32> to vector<16x1xf32>
    %295 = vector.extract_strided_slice %291 {offsets = [0, 0], sizes = [1, 256], strides = [1, 1]} : vector<8x256xf32> to vector<1x256xf32>
    %296 = vector.broadcast %294 : vector<16x1xf32> to vector<16x256xf32>
    %297 = vector.broadcast %295 : vector<1x256xf32> to vector<16x256xf32>
    %298 = arith.mulf %296, %297 : vector<16x256xf32>
    %299 = arith.addf %290, %298 : vector<16x256xf32>
    %300 = vector.extract_strided_slice %293 {offsets = [0, 1], sizes = [16, 1], strides = [1, 1]} : vector<16x8xf32> to vector<16x1xf32>
    %301 = vector.extract_strided_slice %291 {offsets = [1, 0], sizes = [1, 256], strides = [1, 1]} : vector<8x256xf32> to vector<1x256xf32>
    %302 = vector.broadcast %300 : vector<16x1xf32> to vector<16x256xf32>
    %303 = vector.broadcast %301 : vector<1x256xf32> to vector<16x256xf32>
    %304 = arith.mulf %302, %303 : vector<16x256xf32>
    %305 = arith.addf %299, %304 : vector<16x256xf32>
    %306 = vector.extract_strided_slice %293 {offsets = [0, 2], sizes = [16, 1], strides = [1, 1]} : vector<16x8xf32> to vector<16x1xf32>
    %307 = vector.extract_strided_slice %291 {offsets = [2, 0], sizes = [1, 256], strides = [1, 1]} : vector<8x256xf32> to vector<1x256xf32>
    %308 = vector.broadcast %306 : vector<16x1xf32> to vector<16x256xf32>
    %309 = vector.broadcast %307 : vector<1x256xf32> to vector<16x256xf32>
    %310 = arith.mulf %308, %309 : vector<16x256xf32>
    %311 = arith.addf %305, %310 : vector<16x256xf32>
    %312 = vector.extract_strided_slice %293 {offsets = [0, 3], sizes = [16, 1], strides = [1, 1]} : vector<16x8xf32> to vector<16x1xf32>
    %313 = vector.extract_strided_slice %291 {offsets = [3, 0], sizes = [1, 256], strides = [1, 1]} : vector<8x256xf32> to vector<1x256xf32>
    %314 = vector.broadcast %312 : vector<16x1xf32> to vector<16x256xf32>
    %315 = vector.broadcast %313 : vector<1x256xf32> to vector<16x256xf32>
    %316 = arith.mulf %314, %315 : vector<16x256xf32>
    %317 = arith.addf %311, %316 : vector<16x256xf32>
    %318 = vector.extract_strided_slice %293 {offsets = [0, 4], sizes = [16, 1], strides = [1, 1]} : vector<16x8xf32> to vector<16x1xf32>
    %319 = vector.extract_strided_slice %291 {offsets = [4, 0], sizes = [1, 256], strides = [1, 1]} : vector<8x256xf32> to vector<1x256xf32>
    %320 = vector.broadcast %318 : vector<16x1xf32> to vector<16x256xf32>
    %321 = vector.broadcast %319 : vector<1x256xf32> to vector<16x256xf32>
    %322 = arith.mulf %320, %321 : vector<16x256xf32>
    %323 = arith.addf %317, %322 : vector<16x256xf32>
    %324 = vector.extract_strided_slice %293 {offsets = [0, 5], sizes = [16, 1], strides = [1, 1]} : vector<16x8xf32> to vector<16x1xf32>
    %325 = vector.extract_strided_slice %291 {offsets = [5, 0], sizes = [1, 256], strides = [1, 1]} : vector<8x256xf32> to vector<1x256xf32>
    %326 = vector.broadcast %324 : vector<16x1xf32> to vector<16x256xf32>
    %327 = vector.broadcast %325 : vector<1x256xf32> to vector<16x256xf32>
    %328 = arith.mulf %326, %327 : vector<16x256xf32>
    %329 = arith.addf %323, %328 : vector<16x256xf32>
    %330 = vector.extract_strided_slice %293 {offsets = [0, 6], sizes = [16, 1], strides = [1, 1]} : vector<16x8xf32> to vector<16x1xf32>
    %331 = vector.extract_strided_slice %291 {offsets = [6, 0], sizes = [1, 256], strides = [1, 1]} : vector<8x256xf32> to vector<1x256xf32>
    %332 = vector.broadcast %330 : vector<16x1xf32> to vector<16x256xf32>
    %333 = vector.broadcast %331 : vector<1x256xf32> to vector<16x256xf32>
    %334 = arith.mulf %332, %333 : vector<16x256xf32>
    %335 = arith.addf %329, %334 : vector<16x256xf32>
    %336 = vector.extract_strided_slice %293 {offsets = [0, 7], sizes = [16, 1], strides = [1, 1]} : vector<16x8xf32> to vector<16x1xf32>
    %337 = vector.extract_strided_slice %291 {offsets = [7, 0], sizes = [1, 256], strides = [1, 1]} : vector<8x256xf32> to vector<1x256xf32>
    %338 = vector.broadcast %336 : vector<16x1xf32> to vector<16x256xf32>
    %339 = vector.broadcast %337 : vector<1x256xf32> to vector<16x256xf32>
    %340 = arith.mulf %338, %339 : vector<16x256xf32>
    %341 = arith.addf %335, %340 : vector<16x256xf32>
    %c0_94 = arith.constant 0 : index
    %c2_95 = arith.constant 2 : index
    %342 = vector.load %arg13[%c0_94, %c2_95] : memref<8x258xf32, #tpu.memory_space<vmem>>, vector<8x256xf32>
    %c2_96 = arith.constant 2 : index
    %c0_97 = arith.constant 0 : index
    %c0_98 = arith.constant 0 : index
    %343 = vector.load %arg6[%c2_96, %c0_97, %c0_98] : memref<3x16x8xf32, #tpu.memory_space<vmem>>, vector<1x16x8xf32>
    %344 = vector.shape_cast %343 : vector<1x16x8xf32> to vector<16x8xf32>
    %345 = vector.extract_strided_slice %344 {offsets = [0, 0], sizes = [16, 1], strides = [1, 1]} : vector<16x8xf32> to vector<16x1xf32>
    %346 = vector.extract_strided_slice %342 {offsets = [0, 0], sizes = [1, 256], strides = [1, 1]} : vector<8x256xf32> to vector<1x256xf32>
    %347 = vector.broadcast %345 : vector<16x1xf32> to vector<16x256xf32>
    %348 = vector.broadcast %346 : vector<1x256xf32> to vector<16x256xf32>
    %349 = arith.mulf %347, %348 : vector<16x256xf32>
    %350 = arith.addf %341, %349 : vector<16x256xf32>
    %351 = vector.extract_strided_slice %344 {offsets = [0, 1], sizes = [16, 1], strides = [1, 1]} : vector<16x8xf32> to vector<16x1xf32>
    %352 = vector.extract_strided_slice %342 {offsets = [1, 0], sizes = [1, 256], strides = [1, 1]} : vector<8x256xf32> to vector<1x256xf32>
    %353 = vector.broadcast %351 : vector<16x1xf32> to vector<16x256xf32>
    %354 = vector.broadcast %352 : vector<1x256xf32> to vector<16x256xf32>
    %355 = arith.mulf %353, %354 : vector<16x256xf32>
    %356 = arith.addf %350, %355 : vector<16x256xf32>
    %357 = vector.extract_strided_slice %344 {offsets = [0, 2], sizes = [16, 1], strides = [1, 1]} : vector<16x8xf32> to vector<16x1xf32>
    %358 = vector.extract_strided_slice %342 {offsets = [2, 0], sizes = [1, 256], strides = [1, 1]} : vector<8x256xf32> to vector<1x256xf32>
    %359 = vector.broadcast %357 : vector<16x1xf32> to vector<16x256xf32>
    %360 = vector.broadcast %358 : vector<1x256xf32> to vector<16x256xf32>
    %361 = arith.mulf %359, %360 : vector<16x256xf32>
    %362 = arith.addf %356, %361 : vector<16x256xf32>
    %363 = vector.extract_strided_slice %344 {offsets = [0, 3], sizes = [16, 1], strides = [1, 1]} : vector<16x8xf32> to vector<16x1xf32>
    %364 = vector.extract_strided_slice %342 {offsets = [3, 0], sizes = [1, 256], strides = [1, 1]} : vector<8x256xf32> to vector<1x256xf32>
    %365 = vector.broadcast %363 : vector<16x1xf32> to vector<16x256xf32>
    %366 = vector.broadcast %364 : vector<1x256xf32> to vector<16x256xf32>
    %367 = arith.mulf %365, %366 : vector<16x256xf32>
    %368 = arith.addf %362, %367 : vector<16x256xf32>
    %369 = vector.extract_strided_slice %344 {offsets = [0, 4], sizes = [16, 1], strides = [1, 1]} : vector<16x8xf32> to vector<16x1xf32>
    %370 = vector.extract_strided_slice %342 {offsets = [4, 0], sizes = [1, 256], strides = [1, 1]} : vector<8x256xf32> to vector<1x256xf32>
    %371 = vector.broadcast %369 : vector<16x1xf32> to vector<16x256xf32>
    %372 = vector.broadcast %370 : vector<1x256xf32> to vector<16x256xf32>
    %373 = arith.mulf %371, %372 : vector<16x256xf32>
    %374 = arith.addf %368, %373 : vector<16x256xf32>
    %375 = vector.extract_strided_slice %344 {offsets = [0, 5], sizes = [16, 1], strides = [1, 1]} : vector<16x8xf32> to vector<16x1xf32>
    %376 = vector.extract_strided_slice %342 {offsets = [5, 0], sizes = [1, 256], strides = [1, 1]} : vector<8x256xf32> to vector<1x256xf32>
    %377 = vector.broadcast %375 : vector<16x1xf32> to vector<16x256xf32>
    %378 = vector.broadcast %376 : vector<1x256xf32> to vector<16x256xf32>
    %379 = arith.mulf %377, %378 : vector<16x256xf32>
    %380 = arith.addf %374, %379 : vector<16x256xf32>
    %381 = vector.extract_strided_slice %344 {offsets = [0, 6], sizes = [16, 1], strides = [1, 1]} : vector<16x8xf32> to vector<16x1xf32>
    %382 = vector.extract_strided_slice %342 {offsets = [6, 0], sizes = [1, 256], strides = [1, 1]} : vector<8x256xf32> to vector<1x256xf32>
    %383 = vector.broadcast %381 : vector<16x1xf32> to vector<16x256xf32>
    %384 = vector.broadcast %382 : vector<1x256xf32> to vector<16x256xf32>
    %385 = arith.mulf %383, %384 : vector<16x256xf32>
    %386 = arith.addf %380, %385 : vector<16x256xf32>
    %387 = vector.extract_strided_slice %344 {offsets = [0, 7], sizes = [16, 1], strides = [1, 1]} : vector<16x8xf32> to vector<16x1xf32>
    %388 = vector.extract_strided_slice %342 {offsets = [7, 0], sizes = [1, 256], strides = [1, 1]} : vector<8x256xf32> to vector<1x256xf32>
    %389 = vector.broadcast %387 : vector<16x1xf32> to vector<16x256xf32>
    %390 = vector.broadcast %388 : vector<1x256xf32> to vector<16x256xf32>
    %391 = arith.mulf %389, %390 : vector<16x256xf32>
    %392 = arith.addf %386, %391 : vector<16x256xf32>
    %393 = tpu.iota {dimensions = array<i32: 0>} : vector<256x128xi32>
    %394 = tpu.iota {dimensions = array<i32: 1>} : vector<256x128xi32>
    %c2_i32_99 = arith.constant 2 : i32
    %395 = vector.broadcast %c2_i32_99 : i32 to vector<256x128xi32>
    %396 = arith.muli %395, %394 : vector<256x128xi32>
    %397 = arith.cmpi eq, %393, %396 : vector<256x128xi32>
    %398 = arith.extui %397 : vector<256x128xi1> to vector<256x128xi32>
    %399 = arith.sitofp %398 : vector<256x128xi32> to vector<256x128xf32>
    %400 = arith.truncf %399 : vector<256x128xf32> to vector<256x128xbf16>
    %401 = arith.truncf %392 : vector<16x256xf32> to vector<16x256xbf16>
    %402 = arith.extf %401 : vector<16x256xbf16> to vector<16x256xf32>
    %403 = arith.subf %392, %402 : vector<16x256xf32>
    %404 = arith.truncf %403 : vector<16x256xf32> to vector<16x256xbf16>
    %cst_100 = arith.constant dense<0.000000e+00> : vector<16x128xf32>
    %405 = tpu.matmul %401, %400, %cst_100 {dimension_numbers = #tpu.dot_dimension_numbers<[1], [0], [0], [1], [0, 0, 1, 1], [], []>} : vector<16x256xbf16>, vector<256x128xbf16>, vector<16x128xf32> -> vector<16x128xf32>
    %cst_101 = arith.constant dense<0.000000e+00> : vector<16x128xf32>
    %406 = tpu.matmul %404, %400, %cst_101 {dimension_numbers = #tpu.dot_dimension_numbers<[1], [0], [0], [1], [0, 0, 1, 1], [], []>} : vector<16x256xbf16>, vector<256x128xbf16>, vector<16x128xf32> -> vector<16x128xf32>
    %407 = arith.addf %405, %406 : vector<16x128xf32>
    %c0_102 = arith.constant 0 : index
    %c0_103 = arith.constant 0 : index
    %408 = vector.load %arg7[%c0_102, %c0_103] : memref<16x1xf32, #tpu.memory_space<vmem>>, vector<16x1xf32>
    %409 = vector.broadcast %408 : vector<16x1xf32> to vector<16x128xf32>
    %410 = arith.addf %407, %409 : vector<16x128xf32>
    %cst_104 = arith.constant 2.000000e-01 : f32
    %411 = vector.broadcast %cst_104 : f32 to vector<16x128xf32>
    %412 = arith.mulf %411, %410 : vector<16x128xf32>
    %413 = arith.maximumf %410, %412 : vector<16x128xf32>
    %c0_105 = arith.constant 0 : index
    %c0_106 = arith.constant 0 : index
    %414 = vector.load %arg8[%c0_105, %c0_106] : memref<16x128xf32, #tpu.memory_space<vmem>>, vector<16x128xf32>
    %415 = arith.mulf %413, %414 : vector<16x128xf32>
    %cst_107 = arith.constant dense<0.000000e+00> : vector<16xf32>
    %416 = vector.multi_reduction <add>, %415, %cst_107 [1] : vector<16x128xf32> to vector<16xf32>
    %417 = vector.shape_cast %416 : vector<16xf32> to vector<16x1xf32>
    %cst_108 = arith.constant dense<0.000000e+00> : vector<1xf32>
    %418 = vector.multi_reduction <add>, %417, %cst_108 [0] : vector<16x1xf32> to vector<1xf32>
    %419 = vector.shape_cast %418 : vector<1xf32> to vector<1x1xf32>
    %c0_109 = arith.constant 0 : index
    %c0_110 = arith.constant 0 : index
    %420 = vector.load %arg9[%c0_109, %c0_110] : memref<1x1xf32, #tpu.memory_space<vmem>>, vector<1x1xf32>
    %421 = arith.addf %419, %420 : vector<1x1xf32>
    %cst_111 = arith.constant 0.000000e+00 : f32
    %422 = vector.broadcast %cst_111 : f32 to vector<1x1xf32>
    %423 = arith.subf %422, %421 : vector<1x1xf32>
    %424 = math.exp %423 : vector<1x1xf32>
    %cst_112 = arith.constant 1.000000e+00 : f32
    %425 = vector.broadcast %cst_112 : f32 to vector<1x1xf32>
    %426 = arith.addf %425, %424 : vector<1x1xf32>
    %cst_113 = arith.constant 1.000000e+00 : f32
    %427 = vector.broadcast %cst_113 : f32 to vector<1x1xf32>
    %428 = arith.divf %427, %426 : vector<1x1xf32>
    %c0_114 = arith.constant 0 : index
    %c0_115 = arith.constant 0 : index
    %c0_116 = arith.constant 0 : index
    %429 = vector.load %arg10[%c0_114, %c0_115, %c0_116] : memref<1x1x1xf32, #tpu.memory_space<vmem>>, vector<1x1x1xf32>
    %430 = vector.shape_cast %429 : vector<1x1x1xf32> to vector<1x1xf32>
    %431 = vector.shape_cast %428 : vector<1x1xf32> to vector<1x1x1xf32>
    tpu.vector_store %arg10[%c0_114, %c0_115, %c0_116], %431 {strides = array<i32>} : memref<1x1x1xf32, #tpu.memory_space<vmem>>, vector<1x1x1xf32>,
    return
  }
  func.func @transform_0(%arg0: i32) -> (i32, i32, i32) {
    %c0_i32 = arith.constant 0 : i32
    %c0_i32_0 = arith.constant 0 : i32
    %c0_i32_1 = arith.constant 0 : i32
    return %arg0, %c0_i32, %c0_i32_0 : i32, i32, i32
  }
  func.func @transform_1(%arg0: i32) -> (i32, i32, i32) {
    %c0_i32 = arith.constant 0 : i32
    %c0_i32_0 = arith.constant 0 : i32
    %c0_i32_1 = arith.constant 0 : i32
    %c0_i32_2 = arith.constant 0 : i32
    return %c0_i32, %c0_i32_0, %c0_i32_1 : i32, i32, i32
  }
  func.func @transform_2(%arg0: i32) -> (i32, i32) {
    %c0_i32 = arith.constant 0 : i32
    %c0_i32_0 = arith.constant 0 : i32
    %c0_i32_1 = arith.constant 0 : i32
    return %c0_i32, %c0_i32_0 : i32, i32
  }
  func.func @transform_3(%arg0: i32) -> (i32, i32, i32) {
    %c0_i32 = arith.constant 0 : i32
    %c0_i32_0 = arith.constant 0 : i32
    %c0_i32_1 = arith.constant 0 : i32
    %c0_i32_2 = arith.constant 0 : i32
    return %c0_i32, %c0_i32_0, %c0_i32_1 : i32, i32, i32
  }
  func.func @transform_4(%arg0: i32) -> (i32, i32) {
    %c0_i32 = arith.constant 0 : i32
    %c0_i32_0 = arith.constant 0 : i32
    %c0_i32_1 = arith.constant 0 : i32
    return %c0_i32, %c0_i32_0 : i32, i32
  }
  func.func @transform_5(%arg0: i32) -> (i32, i32, i32) {
    %c0_i32 = arith.constant 0 : i32
    %c0_i32_0 = arith.constant 0 : i32
    %c0_i32_1 = arith.constant 0 : i32
    %c0_i32_2 = arith.constant 0 : i32
    return %c0_i32, %c0_i32_0, %c0_i32_1 : i32, i32, i32
  }
  func.func @transform_6(%arg0: i32) -> (i32, i32) {
    %c0_i32 = arith.constant 0 : i32
    %c0_i32_0 = arith.constant 0 : i32
    %c0_i32_1 = arith.constant 0 : i32
    return %c0_i32, %c0_i32_0 : i32, i32
  }
  func.func @transform_7(%arg0: i32) -> (i32, i32) {
    %c0_i32 = arith.constant 0 : i32
    %c0_i32_0 = arith.constant 0 : i32
    %c0_i32_1 = arith.constant 0 : i32
    return %c0_i32, %c0_i32_0 : i32, i32
  }
  func.func @transform_8(%arg0: i32) -> (i32, i32) {
    %c0_i32 = arith.constant 0 : i32
    %c0_i32_0 = arith.constant 0 : i32
    %c0_i32_1 = arith.constant 0 : i32
    return %c0_i32, %c0_i32_0 : i32, i32
  }
  func.func @transform_9(%arg0: i32) -> (i32, i32, i32) {
    %c0_i32 = arith.constant 0 : i32
    %c0_i32_0 = arith.constant 0 : i32
    %c0_i32_1 = arith.constant 0 : i32
    return %arg0, %c0_i32, %c0_i32_0 : i32, i32, i32
  }
}

</mosaic_0001>

<bundles_post_ra>
// kernel: _lambda_.1
= control target key start
LH: loop header
LB: loop body
LE: loop exit
PB: predicated region body
PF: predicated region fallthrough
CT: control target
= control target key end

     0   :  { %s15254_s0 = inlined_call_operand.hbm [shape: f32[2,1,1024], index: 0, kind: input, shape index: {}]   ;;  %s15255_s1 = inlined_call_operand.hbm [shape: f32[7,4,1], index: 1, kind: input, shape index: {}]   ;;  %s15256_s2 = inlined_call_operand.vmem [shape: f32[4,1], index: 2, kind: input, shape index: {}]   ;;  %s15257_s3 = inlined_call_operand.hbm [shape: f32[5,8,4], index: 3, kind: input, shape index: {}]   ;;  %s15258_s4 = inlined_call_operand.hbm [shape: f32[8,1], index: 4, kind: input, shape index: {}]   ;;  %s15259_s5 = inlined_call_operand.hbm [shape: f32[3,16,8], index: 5, kind: input, shape index: {}]   ;;  %s15260_s6 = inlined_call_operand.hbm [shape: f32[16,1], index: 6, kind: input, shape index: {}]   ;;  %s15261_s7 = inlined_call_operand.hbm [shape: f32[16,128], index: 7, kind: input, shape index: {}]   ;;  %s15262_s8 = inlined_call_operand.<no memory space> [shape: f32[1,1], index: 8, kind: input, shape index: {}]   ;;  %s15263_s9 = inlined_call_operand.vmem [shape: f32[2,1,1], index: 9, kind: output, shape index: {}]  }
   0x1   :  { %16156 = sst [smem:[#allocation290_spill]] %s15255_s1  ;;  %v14_v0 = vstv %s15262_s8 }
   0x2   :  { %15 = vst [vmem:[#allocation5] sm:$0x1] %v14_v0 }
   0x3   :  { %16 = vsyncpa [#allocation7], 0 }
   0x4   :  { %18 = vsyncpa [#allocation7 + $0x1], 0 }
   0x5   :  { %19 = vsyncpa [#allocation9], 0 }
   0x6   :  { %20 = vsyncpa [#allocation12], 0 }
   0x7   :  { %21 = vsyncpa [#allocation15], 0  ;;  %s8386_s11 = smov 0   ;;  %s8388_s12 = smov 0  }
   0x8   :  { %s8390_s13 = smov 0   ;;  %s8392_s14 = smov 0  }
   0x9 LB: > { %s16157_s1 = sld [smem:[#allocation290_spill]]  ;;  %s8410_s17 = sadd.s32 4294967295, %s8302_s14   ;;  %s8302_s14 = sphi %s8392_s14, %s18293_s14   ;;  %s8298_s13 = sphi %s8390_s13, %s18292_s13   ;;  %s8294_s12 = sphi %s8388_s12, %s18291_s12   ;;  %s8290_s11 = sphi %s8386_s11, %s18290_s11  }
   0xa   : > { %p5972_p0 = scmp.ge.s32.totalorder %s8302_s14, 1  ;;  %p48_p1 = scmp.eq.s32.totalorder %s8410_s17, 0 }
   0xb   : > { %p252_p2 = scmp.lt.s32.totalorder %s8302_s14, 3  ;;  %s8304_s19 = smov [#allocation8]  }
   0xc   : > { %s265_s20 = sshll.u32 %s8304_s19, 4  ;;  %s295_s23 = sshll.u32 %s15258_s4, 4  ;;  %s266_s20 = int_to_ptr.vmem [resolvable:$true] %s265_s20  ;;  %s296_s23 = int_to_ptr.hbm [resolvable:$true] %s295_s23 }
   0xd   : > { %p8415_p3 = pnand %p5972_p0, %p252_p2  ;;  %s8305_s25 = smov [#allocation11]  }
   0xe   : > { %s297_s26 = sshll.u32 %s8305_s25, 4  ;;  %s8306_s27 = smov 64   ;;  %s298_s26 = int_to_ptr.vmem [resolvable:$true] %s297_s26 }
   0xf   : > { %s263_s16 = sshll.u32 %s16157_s1, 4  ;;  %p7874_p4 = pneg %p8415_p3  ;;  %s264_s16 = int_to_ptr.hbm [resolvable:$true] %s263_s16 }
  0x10   : > { %s8307_s28 = smov 4   ;;  %s320_s10 = sshll.u32 %s15260_s6, 4  ;;  %s321_s10 = int_to_ptr.hbm [resolvable:$true] %s320_s10 }
  0x11   : > { %p8426_p5 = pnand %p7874_p4, %p48_p1  ;;  %s8308_s8 = smov [#allocation14]  }
  0x12   : > { %s322_s15 = sshll.u32 %s8308_s8, 4  ;;  %s280_s22 = sshll.u32 %s15257_s3, 4  ;;  %s323_s15 = int_to_ptr.vmem [resolvable:$true] %s322_s15  ;;  %s281_s22 = int_to_ptr.hbm [resolvable:$true] %s280_s22 }
  0x13   : > { %7877 = dma.hbm_to_vmem [thread:$0]  (!%p8426_p5), %s264_s16, 448, %s266_s20, [#allocation9], %s8306_s27, %s8306_s27, %s8307_s28  }
  0x14   : > { %7883 = dma.hbm_to_vmem [thread:$0]  (!%p8426_p5), %s296_s23, 128, %s298_s26, [#allocation12]  }
  0x15   : > { %s8309_s25 = smov 128   ;;  %s8310_s1 = smov 8  }
  0x16   : > { %7889 = dma.hbm_to_vmem [thread:$0]  (!%p8426_p5), %s321_s10, 256, %s323_s15, [#allocation15], %s8309_s25, %s8309_s25, %s8310_s1  }
  0x17   : > { %s8311_s16 = smov [#allocation10]   ;;  %s306_s27 = sshll.u32 %s15259_s5, 4  ;;  %s307_s27 = int_to_ptr.hbm [resolvable:$true] %s306_s27 }
  0x18   : > { %s282_s20 = sshll.u32 %s8311_s16, 4  ;;  %s334_s30 = sshll.u32 %s15261_s7, 4  ;;  %s283_s20 = int_to_ptr.vmem [resolvable:$true] %s282_s20  ;;  %s335_s30 = int_to_ptr.hbm [resolvable:$true] %s334_s30 }
  0x19   : > { %7880 = dma.hbm_to_vmem [thread:$0]  (!%p8426_p5), %s281_s22, 640, %s283_s20, [#allocation9], %s8309_s25, %s8309_s25, %s8310_s1  }
  0x1a   : > { %s8312_s10 = smov [#allocation13]   ;;  %s8313_s15 = smov [#allocation16]  }
  0x1b   : > { %s308_s8 = sshll.u32 %s8312_s10, 4  ;;  %s336_s19 = sshll.u32 %s8313_s15, 4  ;;  %s309_s8 = int_to_ptr.vmem [resolvable:$true] %s308_s8  ;;  %s337_s19 = int_to_ptr.vmem [resolvable:$true] %s336_s19 }
  0x1c   : > { %7886 = dma.hbm_to_vmem [thread:$0]  (!%p8426_p5), %s307_s27, 768, %s309_s8, [#allocation12], %s8309_s25, %s8309_s25, %s8310_s1  }
  0x1d   : > { %7892 = dma.hbm_to_vmem [thread:$0]  (!%p8426_p5), %s335_s30, 256, %s337_s19, [#allocation15], %s8309_s25, %s8309_s25, %s8310_s1  }
  0x1e   : > { %s8455_s21 = sadd.s32 1, %s8302_s14   ;;  %s34_s16 = sadd.s32 1, %s8298_s13 }
  0x1f   : > { %s31_s22 = ssub.s32 %s8302_s14, %s8455_s21  ;;  %p41_p7 = scmp.ne.s32.totalorder %s8298_s13, %s8294_s12 }
  0x20   : > { %p32_p6 = scmp.eq.s32.totalorder %s31_s22, 0  ;;  %p42_p8 = scmp.eq.s32.totalorder %s8302_s14, 0 }
  0x21   : > { %p47_p9 = scmp.ne.s32.totalorder %s8294_s12, %s8290_s11  ;;  %p7903_p11 = scmp.lt.s32.totalorder %s8302_s14, 2 }
  0x22   : > { %s8466_s20 = scalar_select %p32_p6, %s8298_s13, %s34_s16  }
  0x23   : > { %p8470_p10 = por %p48_p1, %p47_p9  ;;  %s353_s26 = sand.u32 1, %s8298_s13  }
  0x24   : > { %s5981_s24 = sshll.u32 %s8302_s14, 3  ;;  %p43_p12 = por %p42_p8, %p41_p7 }
  0x25   : > { %s5980_s1 = sshll.u32 %s353_s26, 3  ;;  %s361_s28 = scalar_lea.hbm %s15254_s0, %s5981_s24 }
  0x26   : > { %s363_s29 = sshll.u32 %s361_s28, 4  ;;  %s357_s30 = scalar_lea.vmem [#allocation6], %s5980_s1  ;;  %s364_s29 = int_to_ptr.hbm [resolvable:$true] %s363_s29 }
  0x27   : > { %s365_s10 = sshll.u32 %s357_s30, 4  ;;  %p8480_p13 = pnand %p7903_p11, %p43_p12  ;;  %s366_s10 = int_to_ptr.vmem [resolvable:$true] %s365_s10 }
  0x28   : > { %s354_s8 = scalar_lea.sflag [#allocation7], %s353_s26  ;;  %s8226_s15 = sshra.s32 %s364_s29, 4  ;;  %s8227_s15 = int_to_ptr.hbm [resolvable:$true] %s8226_s15 }
  0x29   : > { %s8228_s14 = scalar_lea.hbm %s8227_s15, 8  ;;  %p8230_p2 = pneg %p8480_p13 }
  0x2a   : > { %p8229_p0 = scmp.ne.s32.totalorder %s8227_s15, %s8228_s14  ;;  %s8233_s16 = scalar_lea.hbm %s15254_s0, 16 }
  0x2b   : > { %p8234_p6 = scmp.lt.s32.totalorder %s8227_s15, %s15254_s0  ;;  %p8235_p7 = scmp.lt.s32.totalorder %s8233_s16, %s8228_s14 }
  0x2c   : > { %p8231_p4 = pnand %p8230_p2, %p8229_p0 }
  0x2d   : > { %p8236_p8 = por %p8235_p7, %p8234_p6 }
  0x2e   : > { %p8232_p5 = pneg %p8231_p4 }
  0x30   : > { %p8237_p9 = pnand %p8236_p8, %p8232_p5 }
  0x32   : > { %8240 = shalt.err (!%p8237_p9)
}
  0x33   : > { %7896 = dma.hbm_to_vmem [thread:$0]  (!%p8480_p13), %s364_s29, 128, %s366_s10, %s354_s8  }
  0x34   : > { %374 = sbr.rel (%p8415_p3) target bundleno = 2507 (0x9cb), region = 56 }
  0x39   : > { %s376_s26 = sand.u32 1, %s8294_s12  }
  0x3a   : > { %s5983_s25 = sshll.u32 %s376_s26, 3  ;;  %s377_s27 = scalar_lea.sflag [#allocation7], %s376_s26 }
  0x3b   : > { %s380_s28 = scalar_lea.vmem [#allocation6], %s5983_s25 }
  0x3c   : > { %8273 = dma.done.wait (%p8470_p10), %s377_s27, 128  }
  0x3d   : > { %8275 = vsyncadd (%p8470_p10), %s377_s27, 4294967168 }
  0x3e   : > { %8277 = dma.done.wait (%p48_p1), [#allocation9], 1088  }
  0x3f   : > { %8279 = vsyncadd (%p48_p1), [#allocation9], 4294966208 }
  0x40   : > { %8281 = dma.done.wait (%p48_p1), [#allocation12], 896  }
  0x41   : > { %8283 = vsyncadd (%p48_p1), [#allocation12], 4294966400 }
  0x42   : > { %8285 = dma.done.wait (%p48_p1), [#allocation15], 512  }
  0x43   : > { %8287 = vsyncadd (%p48_p1), [#allocation15], 4294966784  ;;  %v15264_v1 = vmov 0   ;;  %v453_v2 = vld [vmem:[%s380_s28] sm:$0xff]  ;;  %v512_v3 = vld [vmem:[#allocation8 + $0x4] sm:$0xf]  ;;  %v448_v10 = vlaneseq }
  0x44   : > { %7972 = vset.pattern.permute.xlu1 %v15264_v1  ;;  %7971 = vset.pattern.permute.xlu0 %v15264_v1  ;;  %s8315_s18 = smov 3   ;;  %v600_v4 = vld [vmem:[#allocation8 + $0x8] sm:$0xf]  ;;  %v470_v5 = vld [vmem:[#allocation8] sm:$0xf]  ;;  %v8316_v11 = vmov 0.0  }
  0x45   : > { %7973 = vset.pattern.permute.xlu2 %v15264_v1  ;;  %455 = vrot.lane.b32.xlu0 %v453_v2, %s8315_s18  ;;  %v736_v6 = vld [vmem:[#allocation8 + $0x10] sm:$0xf]  ;;  %v668_v7 = vld [vmem:[#allocation8 + $0xc] sm:$0xf]  ;;  %v872_v8 = vld [vmem:[#allocation8 + $0x18] sm:$0xf] }
  0x46   : > { %515 = vperm.xlu1 %7972, %v512_v3   ;;  %603 = vperm.xlu2 %7973, %v600_v4   ;;  %v804_v9 = vld [vmem:[#allocation8 + $0x14] sm:$0xf]  ;;  %447 = vst [vmem:[#allocation2] sm:$0xff] %v8316_v11  ;;  %vm450_vm0 = vcmp.lt.s32.totalorder %v448_v10, 6  ;;  %vm458_vm1 = vcmask 23552   ;;  %vm466_vm2 = vcmp.lt.s32.totalorder %v448_v10, 3 }
  0x47   : > { %3775 = vst [vmem:[#allocation3] sm:$0xff] %v8316_v11  ;;  %vm462_vm3 = vcmp.ge.s32.totalorder %v448_v10, 3  ;;  %s8317_s23 = smov 125   ;;  %s8318_s29 = smov 126   ;;  %vm15278_vm15 = vcmask 1039360   ;;  %v16192_v1 = vmov 0 }
  0x48   : > { %452 = vst.msk [vmem:[#allocation2 + $0x8] sm:$0x1] %vm450_vm0, %v8316_v11  ;;  %s8319_s30 = smov 127   ;;  %s8320_s10 = smov 124  }
  0x49   : > { %4812 = vst [vmem:[#allocation4] sm:$0xff] %v8316_v11  ;;  %s8321_s11 = smov 123   ;;  %s8322_s8 = smov 122  }
  0x4a   : > { %s8330_s19 = smov 2   ;;  %s8332_s22 = smov 1  }
  0x4b   : > { %p444_p1 = scmp.lt.s32.totalorder %s8410_s17, 1 }
  0x4d   : > { %473 = vperm.xlu0 %7971, %v470_v5   ;;  %s18295_s17 = smov (!%p444_p1, %s8410_s17), 1 }
  0x4e   : > { %739 = vperm.xlu1 %7972, %v736_v6   ;;  %671 = vperm.xlu2 %7973, %v668_v7   ;;  %s446_s1 = scalar_lea.vmem %s15263_s9, %s18295_s17 }
  0x55   : > { %875 = vperm.xlu0 %7971, %v872_v8  }
  0x56   : > { %807 = vperm.xlu2 %7973, %v804_v9  }
  0xa0   : > { %v8518_v13 = vpop.permute.xlu2 %603 }
  0xa8   : > { %v8525_v18 = vpop.permute.xlu2 %671 }
  0xb0   : > { %v8609_v47 = vpop.permute.xlu2 %807 }
  0xb7   : > { %v456_v12 = vpop.permute.xlu0 %455 }
  0xb8   : > { %v457_v14 = vrot.slane %v456_v12, 7  ;;  %v8521_v16 = vpop.permute.xlu1 %515 }
  0xba   : > { %v459_v15 = vsel %vm458_vm1, %v457_v14, %v456_v12  ;;  %468 = vst.msk [vmem:[#allocation2 + $0x8] sm:$0x1] %vm466_vm2, %v457_v14 }
  0xbb   : > { %465 = vst.msk [vmem:[#allocation2] sm:$0xff] %vm462_vm3, %v459_v15 }
  0xbf   : > { %v8619_v51 = vpop.permute.xlu0 %473 }
  0xc0   : > { %v8544_v25 = vpop.permute.xlu1 %739 }
  0xc1   : > { %v8523_v17 = vld [vmem:[#allocation2 + $0x8] ss:$0 sm:$0xff] }
  0xc2   : > { %v682_v19 = vmul.f32 %v8523_v17, %v8525_v18  ;;  %v614_v20 = vmul.f32 %v8523_v17, %v8518_v13  ;;  %v546_v21 = vmul.f32 %v8523_v17, %v8521_v16  ;;  %v8533_v22 = vld [vmem:[#allocation2] sm:$0xff]  ;;  %v750_v28 = vmul.f32 %v8523_v17, %v8544_v25 }
  0xc3   : > { %v8539_v23 = vperm.slane %v8533_v22, 3  ;;  %v8542_v24 = vperm.slane %v8533_v22, 0  ;;  %v8556_v29 = vperm.slane %v8533_v22, 1  ;;  %v8559_v30 = vperm.slane %v8533_v22, 2 }
  0xc4   : > { %708 = vrot.lane.b32.xlu1 %v682_v19, %s8317_s23  ;;  %640 = vrot.lane.b32.xlu0 %v614_v20, %s8318_s29  ;;  %v8571_v34 = vperm.slane %v8533_v22, 4  ;;  %v8643_v59 = vperm.slane %v8533_v22, 6  ;;  %v8655_v63 = vperm.slane %v8533_v22, 5  ;;  %v8667_v4 = vperm.slane %v8533_v22, 7 }
  0xc5   : > { %572 = vrot.lane.b32.xlu2 %v546_v21, %s8319_s30  ;;  %v541_v26 = vmul.f32 %v8539_v23, %v8521_v16  ;;  %v538_v27 = vmul.f32 %v8542_v24, %v8521_v16  ;;  %v609_v31 = vmul.f32 %v8518_v13, %v8539_v23  ;;  %v539_v32 = vmul.f32 %v8556_v29, %v8521_v16 }
  0xc6   : > { %v540_v33 = vmul.f32 %v8559_v30, %v8521_v16  ;;  %v607_v35 = vmul.f32 %v8518_v13, %v8556_v29  ;;  %v542_v36 = vmul.f32 %v8571_v34, %v8521_v16  ;;  %v608_v37 = vmul.f32 %v8518_v13, %v8559_v30 }
  0xc7   : > { %v678_v38 = vmul.f32 %v8525_v18, %v8571_v34  ;;  %v610_v39 = vmul.f32 %v8518_v13, %v8571_v34  ;;  %v606_v40 = vmul.f32 %v8518_v13, %v8542_v24  ;;  %v744_v41 = vmul.f32 %v8544_v25, %v8559_v30  ;;  %v8631_v55 = vpop.permute.xlu0 %875 }
  0xc8   : > { %v676_v42 = vmul.f32 %v8525_v18, %v8559_v30  ;;  %v677_v43 = vmul.f32 %v8525_v18, %v8539_v23  ;;  %v742_v44 = vmul.f32 %v8544_v25, %v8542_v24  ;;  %v674_v45 = vmul.f32 %v8525_v18, %v8542_v24 }
  0xc9   : > { %v675_v46 = vmul.f32 %v8525_v18, %v8556_v29  ;;  %v813_v48 = vmul.f32 %v8609_v47, %v8539_v23  ;;  %v745_v49 = vmul.f32 %v8544_v25, %v8539_v23  ;;  %v746_v50 = vmul.f32 %v8544_v25, %v8571_v34 }
  0xca   : > { %v811_v52 = vmul.f32 %v8609_v47, %v8556_v29  ;;  %v743_v53 = vmul.f32 %v8544_v25, %v8556_v29  ;;  %v812_v54 = vmul.f32 %v8609_v47, %v8559_v30  ;;  %v882_v56 = vmul.f32 %v8631_v55, %v8571_v34 }
  0xcb   : > { %v814_v57 = vmul.f32 %v8609_v47, %v8571_v34  ;;  %v810_v58 = vmul.f32 %v8609_v47, %v8542_v24  ;;  %v544_v60 = vmul.f32 %v8643_v59, %v8521_v16  ;;  %v880_v61 = vmul.f32 %v8631_v55, %v8559_v30 }
  0xcc   : > { %562 = vrot.lane.b32.xlu0 %v541_v26, %s8319_s30  ;;  %556 = vrot.lane.b32.xlu1 %v538_v27, %s8319_s30  ;;  %v881_v62 = vmul.f32 %v8631_v55, %v8539_v23  ;;  %v543_v0 = vmul.f32 %v8655_v63, %v8521_v16  ;;  %v878_v2 = vmul.f32 %v8631_v55, %v8542_v24 }
  0xcd   : > { %776 = vrot.lane.b32.xlu2 %v750_v28, %s8320_s10  ;;  %v879_v3 = vmul.f32 %v8631_v55, %v8556_v29  ;;  %v681_v6 = vmul.f32 %v8525_v18, %v8667_v4  ;;  %v545_v7 = vmul.f32 %v8667_v4, %v8521_v16  ;;  %v613_v8 = vmul.f32 %v8518_v13, %v8667_v4 }
  0xce   : > { %v748_v11 = vmul.f32 %v8544_v25, %v8643_v59  ;;  %v612_v12 = vmul.f32 %v8518_v13, %v8643_v59  ;;  %v680_v14 = vmul.f32 %v8525_v18, %v8643_v59  ;;  %v747_v16 = vmul.f32 %v8544_v25, %v8655_v63 }
  0xcf   : > { %v611_v19 = vmul.f32 %v8518_v13, %v8655_v63  ;;  %v679_v20 = vmul.f32 %v8525_v18, %v8655_v63  ;;  %v818_v27 = vmul.f32 %v8523_v17, %v8609_v47  ;;  %v749_v13 = vmul.f32 %v8544_v25, %v8667_v4 }
  0xd0   : > { %v817_v18 = vmul.f32 %v8609_v47, %v8667_v4  ;;  %v816_v25 = vmul.f32 %v8609_v47, %v8643_v59 }
  0xd4   : > { %630 = vrot.lane.b32.xlu0 %v609_v31, %s8318_s29  ;;  %558 = vrot.lane.b32.xlu1 %v539_v32, %s8319_s30 }
  0xd5   : > { %560 = vrot.lane.b32.xlu2 %v540_v33, %s8319_s30  ;;  %v885_v33 = vmul.f32 %v8631_v55, %v8667_v4 }
  0xdc   : > { %626 = vrot.lane.b32.xlu0 %v607_v35, %s8318_s29  ;;  %564 = vrot.lane.b32.xlu1 %v542_v36, %s8319_s30  ;;  %v884_v35 = vmul.f32 %v8631_v55, %v8643_v59 }
  0xdd   : > { %628 = vrot.lane.b32.xlu2 %v608_v37, %s8318_s29 }
  0xe4   : > { %700 = vrot.lane.b32.xlu0 %v678_v38, %s8317_s23  ;;  %632 = vrot.lane.b32.xlu1 %v610_v39, %s8318_s29  ;;  %v3757_v39 = vld [vmem:[%s15256_s2] sm:$0xf] }
  0xe5   : > { %624 = vrot.lane.b32.xlu2 %v606_v40, %s8318_s29  ;;  %v8742_v40 = vand.u32 127, %v448_v10 }
  0xe7   : > { %16162 = vst [vmem:[#allocation21_spill] sm:$0xff] %v8742_v40 }
  0xec   : > { %764 = vrot.lane.b32.xlu0 %v744_v41, %s8320_s10  ;;  %696 = vrot.lane.b32.xlu1 %v676_v42, %s8317_s23  ;;  %v815_v41 = vmul.f32 %v8609_v47, %v8655_v63  ;;  %v883_v42 = vmul.f32 %v8631_v55, %v8655_v63  ;;  %v886_v47 = vmul.f32 %v8523_v17, %v8631_v55 }
  0xed   : > { %698 = vrot.lane.b32.xlu2 %v677_v43, %s8317_s23  ;;  %v8749_v43 = vshrl.u32 %v448_v10, 7 }
  0xef   : > { %16163 = vst [vmem:[#allocation22_spill] sm:$0xff] %v8749_v43  ;;  %v8765_v10 = vadd.s32 368, %v8749_v43  ;;  %v8782_v17 = vadd.s32 120, %v8749_v43  ;;  %v8785_v55 = vadd.s32 240, %v8749_v43 }
  0xf4   : > { %760 = vrot.lane.b32.xlu0 %v742_v44, %s8320_s10  ;;  %692 = vrot.lane.b32.xlu1 %v674_v45, %s8317_s23  ;;  %v8754_v44 = vmul.u32 2, %v8742_v40 }
  0xf5   : > { %694 = vrot.lane.b32.xlu2 %v675_v46, %s8317_s23 }
  0xf6   : > { %vm1261_vm4 = vcmp.eq.s32.totalorder %v8765_v10, %v8754_v44  ;;  %vm1137_vm10 = vcmp.eq.s32.totalorder %v8782_v17, %v8754_v44  ;;  %vm1197_vm11 = vcmp.eq.s32.totalorder %v8785_v55, %v8754_v44 }
  0xfc   : > { %834 = vrot.lane.b32.xlu0 %v813_v48, %s8321_s11  ;;  %766 = vrot.lane.b32.xlu1 %v745_v49, %s8320_s10  ;;  %v3810_v49 = vld [vmem:[#allocation10] sm:$0xff] }
  0xfd   : > { %768 = vrot.lane.b32.xlu2 %v746_v50, %s8320_s10  ;;  %v8768_v50 = vadd.s32 376, %v8749_v43 }
  0xff   : > { %vm1265_vm5 = vcmp.eq.s32.totalorder %v8768_v50, %v8754_v44 }
 0x100   : > { %vm8797_vm8 = vmpackc.low %vm1265_vm5, %vm1261_vm4 }
 0x104   : > { %830 = vrot.lane.b32.xlu0 %v811_v52, %s8321_s11  ;;  %762 = vrot.lane.b32.xlu1 %v743_v53, %s8320_s10  ;;  %v8771_v52 = vadd.s32 496, %v8749_v43  ;;  %v8774_v53 = vadd.s32 504, %v8749_v43 }
 0x105   : > { %832 = vrot.lane.b32.xlu2 %v812_v54, %s8321_s11  ;;  %v8779_v54 = vadd.s32 112, %v8749_v43 }
 0x106   : > { %vm1325_vm6 = vcmp.eq.s32.totalorder %v8771_v52, %v8754_v44  ;;  %vm1329_vm7 = vcmp.eq.s32.totalorder %v8774_v53, %v8754_v44 }
 0x107   : > { %vm1133_vm9 = vcmp.eq.s32.totalorder %v8779_v54, %v8754_v44  ;;  %vm8810_vm12 = vmpackc.low %vm1329_vm7, %vm1325_vm6 }
 0x108   : > { %vm8823_vm14 = vmpackc.low %vm1137_vm10, %vm1133_vm9 }
 0x10c   : > { %904 = vrot.lane.b32.xlu0 %v882_v56, %s8322_s8  ;;  %836 = vrot.lane.b32.xlu1 %v814_v57, %s8321_s11  ;;  %v8794_v56 = vadd.s32 248, %v8749_v43  ;;  %v16164_v57 = vmov 0 }
 0x10d   : > { %828 = vrot.lane.b32.xlu2 %v810_v58, %s8321_s11  ;;  %v16165_v57 = vsel %vm8797_vm8, 4294967295, %v16164_v57  ;;  %v15270_v58 = vmov 1.0|1.0  }
 0x10e   : > { %16166 = vst [vmem:[#allocation23_spill] sm:$0xff] %v16165_v57  ;;  %6535 = vmatpush.bf16.msk.msra.mxu2 %vm8797_vm8, %v15270_v58  ;;  %vm1201_vm13 = vcmp.eq.s32.totalorder %v8794_v56, %v8754_v44  ;;  %6551 = vmatpush.bf16.msk.msra.mxu3 %vm8810_vm12, %v15270_v58  ;;  %v16196_v57 = vmov 0 }
 0x10f   : > { %6503 = vmatpush.bf16.msk.msra.mxu0 %vm8823_vm14, %v15270_v58  ;;  %vm8832_vm0 = vmpackc.low %vm1201_vm13, %vm1197_vm11 }
 0x110   : > { %6519 = vmatpush.bf16.msk.msra.mxu1 %vm8832_vm0, %v15270_v58 }
 0x114   : > { %568 = vrot.lane.b32.xlu0 %v544_v60, %s8319_s30  ;;  %900 = vrot.lane.b32.xlu1 %v880_v61, %s8322_s8  ;;  %v16167_v60 = vmov 0 }
 0x115   : > { %902 = vrot.lane.b32.xlu2 %v881_v62, %s8322_s8  ;;  %v16168_v60 = vsel %vm8810_vm12, 4294967295, %v16167_v60 }
 0x116   : > { %16169 = vst [vmem:[#allocation24_spill] sm:$0xff] %v16168_v60  ;;  %v16195_v60 = vmov 1.0|1.0  }
 0x11c   : > { %566 = vrot.lane.b32.xlu0 %v543_v0, %s8319_s30  ;;  %896 = vrot.lane.b32.xlu1 %v878_v2, %s8322_s8  ;;  %v16170_v0 = vmov 0  ;;  %v495_v2 = vmul.f32 %v8559_v30, %v8619_v51  ;;  %v8847_v30 = vadd.s32 360, %v8749_v43 }
 0x11d   : > { %898 = vrot.lane.b32.xlu2 %v879_v3, %s8322_s8  ;;  %v16171_v0 = vsel %vm8823_vm14, 4294967295, %v16170_v0  ;;  %v16173_v3 = vmov 0 }
 0x11e   : > { %16172 = vst [vmem:[#allocation25_spill] sm:$0xff] %v16171_v0  ;;  %v16174_v3 = vsel %vm8832_vm0, 4294967295, %v16173_v3  ;;  %vm1257_vm2 = vcmp.eq.s32.totalorder %v8847_v30, %v8754_v44  ;;  %v9020_v0 = vadd.s32 72, %v8749_v43 }
 0x11f   : > { %v8669_v5 = vpop.permute.xlu2 %572  ;;  %16175 = vst [vmem:[#allocation26_spill] sm:$0xff] %v16174_v3  ;;  %v9017_v3 = vadd.s32 64, %v8749_v43 }
 0x120   : > { %16216 = vst [vmem:[#allocation47_spill] sm:$0xff] %v9020_v0 }
 0x121   : > { %16215 = vst [vmem:[#allocation46_spill] sm:$0xff] %v9017_v3 }
 0x124   : > { %706 = vrot.lane.b32.xlu0 %v681_v6, %s8317_s23  ;;  %570 = vrot.lane.b32.xlu1 %v545_v7, %s8319_s30  ;;  %v8838_v6 = vmul.f32 %v8542_v24, %v8619_v51  ;;  %v8844_v7 = vadd.s32 352, %v8749_v43  ;;  %v8858_v24 = vadd.s32 96, %v8749_v43 }
 0x125   : > { %638 = vrot.lane.b32.xlu2 %v613_v8, %s8318_s29  ;;  %v8850_v8 = vadd.s32 480, %v8749_v43 }
 0x126   : > { %vm1253_vm1 = vcmp.eq.s32.totalorder %v8844_v7, %v8754_v44  ;;  %vm1125_vm6 = vcmp.eq.s32.totalorder %v8858_v24, %v8754_v44 }
 0x127   : > { %v8680_v9 = vpop.permute.xlu2 %776  ;;  %16176 = vst [vmem:[#allocation27_spill] sm:$0xff] %v8850_v8  ;;  %vm1317_vm3 = vcmp.eq.s32.totalorder %v8850_v8, %v8754_v44  ;;  %vm8875_vm4 = vmpackc.low %vm1257_vm2, %vm1253_vm1 }
 0x128   : > { %6537 = vmatpush.bf16.msk.msra.mxu2 %vm8875_vm4, %v15270_v58 }
 0x12c   : > { %772 = vrot.lane.b32.xlu0 %v748_v11, %s8320_s10  ;;  %636 = vrot.lane.b32.xlu1 %v612_v12, %s8318_s29  ;;  %v8855_v12 = vadd.s32 488, %v8749_v43 }
 0x12d   : > { %704 = vrot.lane.b32.xlu2 %v680_v14, %s8317_s23  ;;  %v8861_v14 = vadd.s32 104, %v8749_v43 }
 0x12e   : > { %16178 = vst [vmem:[#allocation29_spill] sm:$0xff] %v8855_v12  ;;  %vm1321_vm5 = vcmp.eq.s32.totalorder %v8855_v12, %v8754_v44  ;;  %v9086_v12 = vadd.s32 56, %v8749_v43 }
 0x12f   : > { %v8691_v15 = vpop.permute.xlu2 %560  ;;  %vm1129_vm7 = vcmp.eq.s32.totalorder %v8861_v14, %v8754_v44  ;;  %vm8891_vm9 = vmpackc.low %vm1321_vm5, %vm1317_vm3 }
 0x130   : > { %6553 = vmatpush.bf16.msk.msra.mxu3 %vm8891_vm9, %v15270_v58  ;;  %vm8909_vm11 = vmpackc.low %vm1129_vm7, %vm1125_vm6  ;;  %16233 = vst [vmem:[#allocation57_spill] sm:$0xff] %v9086_v12 }
 0x131   : > { %6505 = vmatpush.bf16.msk.msra.mxu0 %vm8909_vm11, %v15270_v58  ;;  %v496_v58 = vmul.f32 %v8539_v23, %v8619_v51  ;;  %v16199_v23 = vmov 0 }
 0x134   : > { %770 = vrot.lane.b32.xlu0 %v747_v16, %s8320_s10  ;;  %634 = vrot.lane.b32.xlu1 %v611_v19, %s8318_s29  ;;  %v8864_v16 = vadd.s32 224, %v8749_v43 }
 0x135   : > { %702 = vrot.lane.b32.xlu2 %v679_v20, %s8317_s23  ;;  %v16179_v20 = vmov 0 }
 0x136   : > { %v8702_v21 = vpop.permute.xlu1 %708  ;;  %v8704_v22 = vpop.permute.xlu0 %640  ;;  %v16180_v20 = vsel %vm8875_vm4, 4294967295, %v16179_v20  ;;  %vm1189_vm10 = vcmp.eq.s32.totalorder %v8864_v16, %v8754_v44  ;;  %vm16227_vm4 = vcmask 1031168  }
 0x137   : > { %v8706_v26 = vpop.permute.xlu2 %628  ;;  %16181 = vst [vmem:[#allocation30_spill] sm:$0xff] %v16180_v20  ;;  %v8946_v20 = vmul.f32 %v8556_v29, %v8619_v51  ;;  %v8973_v29 = vadd.s32 216, %v8749_v43 }
 0x13c   : > { %844 = vrot.lane.b32.xlu0 %v818_v27, %s8321_s11  ;;  %774 = vrot.lane.b32.xlu1 %v749_v13, %s8320_s10  ;;  %v8886_v27 = vadd.s32 232, %v8749_v43  ;;  %v16182_v13 = vmov 0 }
 0x13d   : > { %842 = vrot.lane.b32.xlu2 %v817_v18, %s8321_s11  ;;  %v16183_v13 = vsel %vm8891_vm9, 4294967295, %v16182_v13  ;;  %v8898_v18 = vadd.s32 336, %v8749_v43  ;;  %vm1113_vm9 = vcmp.eq.s32.totalorder %v9020_v0, %v8754_v44  ;;  %v16228_v0 = vmov 0 }
 0x13e   : > { %v8717_v28 = vpop.permute.xlu0 %562  ;;  %v8719_v31 = vpop.permute.xlu1 %556  ;;  %16184 = vst [vmem:[#allocation31_spill] sm:$0xff] %v16183_v13  ;;  %vm1193_vm13 = vcmp.eq.s32.totalorder %v8886_v27, %v8754_v44  ;;  %v8942_v13 = vadd.s32 208, %v8749_v43 }
 0x13f   : > { %v8721_v32 = vpop.permute.xlu2 %624  ;;  %v577_v19 = vsel %vm15278_vm15, %v8691_v15, %v8717_v28  ;;  %16185 = vst [vmem:[#allocation32_spill] sm:$0xff] %v8898_v18  ;;  %vm8931_vm1 = vmpackc.low %vm1193_vm13, %vm1189_vm10  ;;  %vm1245_vm2 = vcmp.eq.s32.totalorder %v8898_v18, %v8754_v44  ;;  %v9067_v18 = vadd.s32 432, %v8749_v43 }
 0x140   : > { %v16193_v1 = vsel %vm8931_vm1, 4294967295, %v16192_v1  ;;  %6521 = vmatpush.bf16.msk.msra.mxu1 %vm8931_vm1, %v16195_v60 }
 0x141   : > { %16194 = vst [vmem:[#allocation37_spill] sm:$0xff] %v16193_v1  ;;  %v16205_v1 = vmov 0 }
 0x142   : > { %16226 = vst [vmem:[#allocation53_spill] sm:$0xff] %v9067_v18 }
 0x144   : > { %910 = vrot.lane.b32.xlu0 %v885_v33, %s8322_s8  ;;  %840 = vrot.lane.b32.xlu1 %v816_v25, %s8321_s11  ;;  %v8901_v33 = vadd.s32 344, %v8749_v43  ;;  %v8904_v25 = vadd.s32 464, %v8749_v43 }
 0x145   : > { %908 = vrot.lane.b32.xlu2 %v884_v35, %s8322_s8  ;;  %v16188_v35 = vmov 0 }
 0x146   : > { %v8732_v36 = vpop.permute.xlu0 %630  ;;  %v8734_v37 = vpop.permute.xlu1 %558  ;;  %16186 = vst [vmem:[#allocation33_spill] sm:$0xff] %v8901_v33  ;;  %v16189_v35 = vsel %vm8909_vm11, 4294967295, %v16188_v35  ;;  %vm1249_vm3 = vcmp.eq.s32.totalorder %v8901_v33, %v8754_v44  ;;  %vm1309_vm5 = vcmp.eq.s32.totalorder %v8904_v25, %v8754_v44  ;;  %v16218_v33 = vmov 0 }
 0x147   : > { %v8736_v38 = vpop.permute.xlu2 %698  ;;  %16187 = vst [vmem:[#allocation34_spill] sm:$0xff] %v8904_v25  ;;  %vm8953_vm6 = vmpackc.low %vm1249_vm3, %vm1245_vm2  ;;  %vm16202_vm3 = vcmask 1039360   ;;  %v9035_v25 = vadd.s32 200, %v8749_v43 }
 0x148   : > { %16190 = vst [vmem:[#allocation35_spill] sm:$0xff] %v16189_v35  ;;  %v16197_v57 = vsel %vm8953_vm6, 4294967295, %v16196_v57  ;;  %v8961_v35 = vadd.f32 %v577_v19, %v495_v2  ;;  %6539 = vmatpush.bf16.msk.msra.mxu2 %vm8953_vm6, %v16195_v60  ;;  %v575_v2 = vsel %vm16202_vm3, %v8719_v31, %v8734_v37  ;;  %vm16203_vm13 = vmmov %vm16202_vm3  ;;  %vm1181_vm6 = vcmp.eq.s32.totalorder %v8942_v13, %v8754_v44 }
 0x149   : > { %16198 = vst [vmem:[#allocation38_spill] sm:$0xff] %v16197_v57  ;;  %v576_v19 = vsel %vm16203_vm13, %v8734_v37, %v8691_v15  ;;  %vm1185_vm13 = vcmp.eq.s32.totalorder %v8973_v29, %v8754_v44  ;;  %v8999_v15 = vadd.s32 320, %v8749_v43  ;;  %v9005_v31 = vadd.s32 448, %v8749_v43 }
 0x14a   : > { %16217 = vst [vmem:[#allocation48_spill] sm:$0xff] %v9035_v25 }
 0x14b   : > { %16208 = vst [vmem:[#allocation41_spill] sm:$0xff] %v8999_v15 }
 0x14c   : > { %3760 = vperm.xlu0 %7971, %v3757_v39   ;;  %838 = vrot.lane.b32.xlu1 %v815_v41, %s8321_s11  ;;  %v8916_v39 = vadd.s32 472, %v8749_v43  ;;  %v8919_v41 = vadd.s32 80, %v8749_v43  ;;  %16210 = vst [vmem:[#allocation43_spill] sm:$0xff] %v9005_v31 }
 0x14d   : > { %906 = vrot.lane.b32.xlu2 %v883_v42, %s8322_s8  ;;  %v8922_v42 = vadd.s32 88, %v8749_v43 }
 0x14e   : > { %v8756_v45 = vpop.permute.xlu0 %626  ;;  %v8758_v46 = vpop.permute.xlu1 %564  ;;  %16191 = vst [vmem:[#allocation36_spill] sm:$0xff] %v8916_v39  ;;  %vm1313_vm7 = vcmp.eq.s32.totalorder %v8916_v39, %v8754_v44  ;;  %vm1117_vm10 = vcmp.eq.s32.totalorder %v8919_v41, %v8754_v44  ;;  %v9023_v39 = vadd.s32 192, %v8749_v43 }
 0x14f   : > { %v8760_v48 = vpop.permute.xlu2 %694  ;;  %vm8966_vm15 = vmpackc.low %vm1313_vm7, %vm1309_vm5  ;;  %vm1121_vm2 = vcmp.eq.s32.totalorder %v8922_v42, %v8754_v44 }
 0x150   : > { %v16200_v23 = vsel %vm8966_vm15, 4294967295, %v16199_v23  ;;  %vm16204_vm5 = vmmov %vm16202_vm3  ;;  %6555 = vmatpush.bf16.msk.msra.mxu3 %vm8966_vm15, %v16195_v60  ;;  %vm1109_vm15 = vcmp.eq.s32.totalorder %v9017_v3, %v8754_v44  ;;  %v9083_v3 = vadd.s32 48, %v8749_v43 }
 0x151   : > { %16201 = vst [vmem:[#allocation39_spill] sm:$0xff] %v16200_v23  ;;  %v578_v57 = vsel %vm16204_vm5, %v8717_v28, %v8758_v46  ;;  %vm8987_vm7 = vmpackc.low %vm1121_vm2, %vm1117_vm10  ;;  %v9002_v28 = vadd.s32 328, %v8749_v43  ;;  %v16211_v23 = vmov 0  ;;  %vm1301_vm5 = vcmp.eq.s32.totalorder %v9005_v31, %v8754_v44 }
 0x152   : > { %v16206_v1 = vsel %vm8987_vm7, 4294967295, %v16205_v1  ;;  %6507 = vmatpush.bf16.msk.msra.mxu0 %vm8987_vm7, %v16195_v60  ;;  %vm9009_vm10 = vmpackc.low %vm1185_vm13, %vm1181_vm6  ;;  %vm1237_vm6 = vcmp.eq.s32.totalorder %v8999_v15, %v8754_v44  ;;  %v9064_v15 = vadd.s32 312, %v8749_v43  ;;  %16232 = vst [vmem:[#allocation56_spill] sm:$0xff] %v9083_v3  ;;  %v594_v8 = vadd.f32 %v578_v57, %v496_v58 }
 0x153   : > { %16207 = vst [vmem:[#allocation40_spill] sm:$0xff] %v16206_v1  ;;  %v16212_v23 = vsel %vm9009_vm10, 4294967295, %v16211_v23  ;;  %v9014_v1 = vadd.s32 456, %v8749_v43  ;;  %6523 = vmatpush.bf16.msk.msra.mxu1 %vm9009_vm10, %v16195_v60  ;;  %vm1241_vm2 = vcmp.eq.s32.totalorder %v9002_v28, %v8754_v44  ;;  %v16238_v57 = vmov 0 }
 0x154   : > { %3813 = vperm.xlu0 %7971, %v3810_v49   ;;  %912 = vrot.lane.b32.xlu1 %v886_v47, %s8322_s8  ;;  %16209 = vst [vmem:[#allocation42_spill] sm:$0xff] %v9002_v28  ;;  %vm9037_vm13 = vmpackc.low %vm1241_vm2, %vm1237_vm6  ;;  %v16221_v28 = vmov 0  ;;  %vm1177_vm2 = vcmp.eq.s32.totalorder %v9035_v25, %v8754_v44  ;;  %v9080_v25 = vadd.s32 440, %v8749_v43  ;;  %v9118_v58 = vadd.s32 176, %v8749_v43 }
 0x155   : > { %16213 = vst [vmem:[#allocation44_spill] sm:$0xff] %v16212_v23  ;;  %v16219_v33 = vsel %vm9037_vm13, 4294967295, %v16218_v33  ;;  %vm1305_vm3 = vcmp.eq.s32.totalorder %v9014_v1, %v8754_v44  ;;  %6541 = vmatpush.bf16.msk.msra.mxu2 %vm9037_vm13, %v16195_v60  ;;  %vm16242_vm10 = vcmask 1031168  }
 0x156   : > { %v8816_v61 = vpop.permute.xlu0 %700  ;;  %v8818_v62 = vpop.permute.xlu1 %632  ;;  %16214 = vst [vmem:[#allocation45_spill] sm:$0xff] %v9014_v1  ;;  %vm9054_vm6 = vmpackc.low %vm1305_vm3, %vm1301_vm5  ;;  %v9061_v1 = vadd.s32 304, %v8749_v43  ;;  %vm1233_vm5 = vcmp.eq.s32.totalorder %v9064_v15, %v8754_v44 }
 0x157   : > { %v8852_v11 = vpop.permute.xlu2 %768  ;;  %16220 = vst [vmem:[#allocation49_spill] sm:$0xff] %v16219_v33  ;;  %v16222_v28 = vsel %vm9054_vm6, 4294967295, %v16221_v28  ;;  %v646_v33 = vsel %vm16227_vm4, %v8732_v36, %v8818_v62  ;;  %6557 = vmatpush.bf16.msk.msra.mxu3 %vm9054_vm6, %v16195_v60  ;;  %vm9075_vm3 = vmpackc.low %vm1113_vm9, %vm1109_vm15  ;;  %vm16234_vm15 = vcmp.eq.s32.totalorder %v9023_v39, %v8754_v44  ;;  %vm1293_vm6 = vcmp.eq.s32.totalorder %v9067_v18, %v8754_v44 }
 0x158   : > { %16177 = vst [vmem:[#allocation28_spill] sm:$0xff] %v8852_v11  ;;  %v16229_v0 = vsel %vm9075_vm3, 4294967295, %v16228_v0  ;;  %6509 = vmatpush.bf16.msk.msra.mxu0 %vm9075_vm3, %v16195_v60  ;;  %vm9094_vm4 = vmpackc.low %vm1177_vm2, %vm16234_vm15  ;;  %vm1229_vm9 = vcmp.eq.s32.totalorder %v9061_v1, %v8754_v44  ;;  %vm1297_vm2 = vcmp.eq.s32.totalorder %v9080_v25, %v8754_v44  ;;  %vm1101_vm15 = vcmp.eq.s32.totalorder %v9083_v3, %v8754_v44 }
 0x159   : > { %16223 = vst [vmem:[#allocation50_spill] sm:$0xff] %v16222_v28  ;;  %v16235_v28 = vmov 0  ;;  %6525 = vmatpush.bf16.msk.msra.mxu1 %vm9094_vm4, %v16195_v60  ;;  %vm9107_vm13 = vmpackc.low %vm1233_vm5, %vm1229_vm9  ;;  %vm1105_vm3 = vcmp.eq.s32.totalorder %v9086_v12, %v8754_v44  ;;  %v662_v18 = vadd.f32 %v646_v33, %v594_v8  ;;  %v16249_v8 = vmov 0 }
 0x15a   : > { %16224 = vst [vmem:[#allocation51_spill] sm:$0xff] %v9061_v1  ;;  %v16236_v28 = vsel %vm9094_vm4, 4294967295, %v16235_v28  ;;  %v16239_v57 = vsel %vm9107_vm13, 4294967295, %v16238_v57  ;;  %vm16243_vm9 = vmmov %vm16242_vm10  ;;  %6543 = vmatpush.bf16.msk.msra.mxu2 %vm9107_vm13, %v16195_v60  ;;  %v591_v1 = vadd.f32 %v575_v2, %v8838_v6 }
 0x15b   : > { %16225 = vst [vmem:[#allocation52_spill] sm:$0xff] %v9064_v15  ;;  %vm9129_vm5 = vmpackc.low %vm1297_vm2, %vm1293_vm6  ;;  %v9134_v15 = vadd.s32 184, %v8749_v43  ;;  %vm1165_vm6 = vcmp.eq.s32.totalorder %v9118_v58, %v8754_v44  ;;  %vm16252_vm2 = vcmask 1022976  }
 0x15c   : > { %16230 = vst [vmem:[#allocation54_spill] sm:$0xff] %v16229_v0  ;;  %v644_v0 = vsel %vm16243_vm9, %v8756_v45, %v8706_v26  ;;  %6559 = vmatpush.bf16.msk.msra.mxu3 %vm9129_vm5, %v16195_v60  ;;  %vm16253_vm13 = vmmov %vm16252_vm2 }
 0x15d   : > { %16231 = vst [vmem:[#allocation55_spill] sm:$0xff] %v9080_v25  ;;  %v16244_v25 = vmov 0 }
 0x15e   : > { %v8924_v47 = vpop.permute.xlu0 %764  ;;  %v8926_v49 = vpop.permute.xlu1 %696  ;;  %16237 = vst [vmem:[#allocation58_spill] sm:$0xff] %v16236_v28  ;;  %v645_v28 = vsel %vm16242_vm10, %v8706_v26, %v8732_v36  ;;  %v16245_v25 = vsel %vm9129_vm5, 4294967295, %v16244_v25  ;;  %v592_v36 = vadd.f32 %v576_v19, %v8946_v20  ;;  %vm16248_vm10 = vmmov %vm16243_vm9  ;;  %v16255_v19 = vmov 0 }
 0x15f   : > { %v9007_v37 = vpop.permute.xlu2 %832  ;;  %16240 = vst [vmem:[#allocation59_spill] sm:$0xff] %v16239_v57  ;;  %v643_v26 = vsel %vm16248_vm10, %v8721_v32, %v8756_v45  ;;  %vm9144_vm9 = vmpackc.low %vm1105_vm3, %vm1101_vm15  ;;  %v712_v6 = vsel %vm16252_vm2, %v8760_v48, %v8926_v49  ;;  %v713_v20 = vsel %vm16253_vm13, %v8926_v49, %v8736_v38  ;;  %vm15361_vm10 = vcmask 1014784  }
 0x160   : > { %16241 = vst [vmem:[#allocation60_spill] sm:$0xff] %v9118_v58  ;;  %v16250_v8 = vsel %vm9144_vm9, 4294967295, %v16249_v8  ;;  %6511 = vmatpush.bf16.msk.msra.mxu0 %vm9144_vm9, %v16195_v60  ;;  %vm1169_vm3 = vcmp.eq.s32.totalorder %v9134_v15, %v8754_v44  ;;  %v661_v32 = vadd.f32 %v645_v28, %v8961_v35  ;;  %v660_v45 = vadd.f32 %v644_v0, %v592_v36  ;;  %vm16254_vm15 = vmmov %vm16252_vm2 }
 0x161   : > { %16246 = vst [vmem:[#allocation61_spill] sm:$0xff] %v16245_v25  ;;  %v714_v33 = vsel %vm16254_vm15, %v8736_v38, %v8816_v61  ;;  %vm15362_vm2 = vcmask 1006592   ;;  %vm9165_vm5 = vmpackc.low %vm1169_vm3, %vm1165_vm6  ;;  %v659_v49 = vadd.f32 %v643_v26, %v591_v1  ;;  %v9186_v36 = vadd.s32 288, %v8749_v43 }
 0x162   : > { %16247 = vst [vmem:[#allocation62_spill] sm:$0xff] %v9134_v15  ;;  %v16256_v19 = vsel %vm9165_vm5, 4294967295, %v16255_v19  ;;  %6527 = vmatpush.bf16.msk.msra.mxu1 %vm9165_vm5, %v16195_v60  ;;  %v9174_v0 = vadd.f32 %v712_v6, %v660_v45  ;;  %v729_v35 = vadd.f32 %v713_v20, %v661_v32  ;;  %v9189_v26 = vadd.s32 296, %v8749_v43 }
 0x163   : > { %16251 = vst [vmem:[#allocation63_spill] sm:$0xff] %v16250_v8  ;;  %v730_v8 = vadd.f32 %v714_v33, %v662_v18  ;;  %v9192_v6 = vadd.s32 416, %v8749_v43  ;;  %v9201_v20 = vadd.s32 40, %v8749_v43  ;;  %vm1221_vm6 = vcmp.eq.s32.totalorder %v9186_v36, %v8754_v44 }
 0x164   : > { %16257 = vst [vmem:[#allocation64_spill] sm:$0xff] %v16256_v19  ;;  %vm1225_vm3 = vcmp.eq.s32.totalorder %v9189_v26, %v8754_v44  ;;  %v16264_v45 = vmov 0  ;;  %v16267_v33 = vmov 0  ;;  %v9238_v19 = vadd.s32 280, %v8749_v43 }
 0x165   : > { %16258 = vst [vmem:[#allocation65_spill] sm:$0xff] %v9186_v36  ;;  %vm9210_vm15 = vmpackc.low %vm1225_vm3, %vm1221_vm6  ;;  %vm1097_vm5 = vcmp.eq.s32.totalorder %v9201_v20, %v8754_v44  ;;  %v9257_v36 = vadd.s32 24, %v8749_v43 }
 0x166   : > { %v9049_v23 = vpop.permute.xlu0 %760  ;;  %v693_v31 = vpop.permute.xlu1 %692  ;;  %16259 = vst [vmem:[#allocation66_spill] sm:$0xff] %v9189_v26  ;;  %v16265_v45 = vsel %vm9210_vm15, 4294967295, %v16264_v45  ;;  %6545 = vmatpush.bf16.msk.msra.mxu2 %vm9210_vm15, %v16195_v60  ;;  %v9254_v26 = vadd.s32 16, %v8749_v43 }
 0x167   : > { %v829_v2 = vpop.permute.xlu2 %828  ;;  %v711_v38 = vsel %vm16253_vm13, %v693_v31, %v8760_v48  ;;  %16260 = vst [vmem:[#allocation67_spill] sm:$0xff] %v9192_v6  ;;  %v9195_v48 = vadd.s32 424, %v8749_v43  ;;  %v9198_v31 = vadd.s32 32, %v8749_v43  ;;  %vm1285_vm13 = vcmp.eq.s32.totalorder %v9192_v6, %v8754_v44 }
 0x168   : > { %16263 = vst [vmem:[#allocation70_spill] sm:$0xff] %v9201_v20  ;;  %v9251_v6 = vadd.s32 408, %v8749_v43 }
 0x169   : > { %16261 = vst [vmem:[#allocation68_spill] sm:$0xff] %v9195_v48 }
 0x16a   : > { %16262 = vst [vmem:[#allocation69_spill] sm:$0xff] %v9198_v31 }
 0x16b   : > { %16266 = vst [vmem:[#allocation71_spill] sm:$0xff] %v16265_v45  ;;  %v16273_v45 = vmov 0 }
 0x16c   : > { %16272 = vst [vmem:[#allocation75_spill] sm:$0xff] %v9238_v19 }
 0x16d   : > { %16277 = vst [vmem:[#allocation78_spill] sm:$0xff] %v9251_v6 }
 0x16e   : > { %v9169_v25 = vpop.permute.xlu0 %834  ;;  %v767_v57 = vpop.permute.xlu1 %766  ;;  %16278 = vst [vmem:[#allocation79_spill] sm:$0xff] %v9254_v26 }
 0x16f   : > { %v781_v28 = vsel %vm15361_vm10, %v8924_v47, %v767_v57  ;;  %v849_v1 = vsel %vm15362_vm2, %v9007_v37, %v9169_v25  ;;  %v782_v18 = vsel %vm15361_vm10, %v767_v57, %v8852_v11  ;;  %v9208_v57 = vadd.s32 160, %v8749_v43  ;;  %16279 = vst [vmem:[#allocation80_spill] sm:$0xff] %v9257_v36  ;;  %v9271_v15 = vpop.permute.xlu2 %902 }
 0x170   : > { %v797_v32 = vadd.f32 %v781_v28, %v729_v35  ;;  %vm1289_vm10 = vcmp.eq.s32.totalorder %v9195_v48, %v8754_v44  ;;  %vm1093_vm2 = vcmp.eq.s32.totalorder %v9198_v31, %v8754_v44  ;;  %v9230_v35 = vadd.s32 168, %v8749_v43 }
 0x171   : > { %vm9225_vm6 = vmpackc.low %vm1289_vm10, %vm1285_vm13  ;;  %v9235_v28 = vadd.s32 272, %v8749_v43  ;;  %v9248_v48 = vadd.s32 400, %v8749_v43  ;;  %vm1217_vm13 = vcmp.eq.s32.totalorder %v9238_v19, %v8754_v44  ;;  %v727_v31 = vadd.f32 %v711_v38, %v659_v49 }
 0x172   : > { %v16268_v33 = vsel %vm9225_vm6, 4294967295, %v16267_v33  ;;  %16270 = vst [vmem:[#allocation73_spill] sm:$0xff] %v9230_v35  ;;  %6561 = vmatpush.bf16.msk.msra.mxu3 %vm9225_vm6, %v16195_v60  ;;  %vm9243_vm10 = vmpackc.low %vm1097_vm5, %vm1093_vm2  ;;  %vm1161_vm5 = vcmp.eq.s32.totalorder %v9230_v35, %v8754_v44  ;;  %v9273_v58 = vadd.f32 %v782_v18, %v730_v8  ;;  %vm16281_vm6 = vcmp.eq.s32.totalorder %v9208_v57, %v8754_v44 }
 0x173   : > { %16269 = vst [vmem:[#allocation72_spill] sm:$0xff] %v16268_v33  ;;  %v16274_v45 = vsel %vm9243_vm10, 4294967295, %v16273_v45  ;;  %6513 = vmatpush.bf16.msk.msra.mxu0 %vm9243_vm10, %v16195_v60  ;;  %vm1213_vm2 = vcmp.eq.s32.totalorder %v9235_v28, %v8754_v44  ;;  %v9269_v33 = vadd.s32 144, %v8749_v43  ;;  %vm9280_vm15 = vmpackc.low %vm1161_vm5, %vm16281_vm6  ;;  %v16282_v35 = vmov 0 }
 0x174   : > { %16271 = vst [vmem:[#allocation74_spill] sm:$0xff] %v9235_v28  ;;  %v16283_v35 = vsel %vm9280_vm15, 4294967295, %v16282_v35  ;;  %vm16285_vm10 = vcmask 1006592   ;;  %6529 = vmatpush.bf16.msk.msra.mxu1 %vm9280_vm15, %v16195_v60  ;;  %vm9294_vm3 = vmpackc.low %vm1217_vm13, %vm1213_vm2  ;;  %v16287_v8 = vmov 0  ;;  %vm1277_vm6 = vcmp.eq.s32.totalorder %v9248_v48, %v8754_v44 }
 0x175   : > { %16275 = vst [vmem:[#allocation76_spill] sm:$0xff] %v16274_v45  ;;  %v9275_v45 = vadd.f32 %v849_v1, %v797_v32  ;;  %vm16286_vm9 = vmmov %vm16285_vm10  ;;  %v16288_v8 = vsel %vm9294_vm3, 4294967295, %v16287_v8  ;;  %vm1281_vm5 = vcmp.eq.s32.totalorder %v9251_v6, %v8754_v44  ;;  %6547 = vmatpush.bf16.msk.msra.mxu2 %vm9294_vm3, %v16195_v60  ;;  %vm1089_vm2 = vcmp.eq.s32.totalorder %v9257_v36, %v8754_v44 }
 0x176   : > { %16276 = vst [vmem:[#allocation77_spill] sm:$0xff] %v9248_v48  ;;  %v831_v11 = vpop.permute.xlu0 %830  ;;  %v763_v20 = vpop.permute.xlu1 %762  ;;  %vm1149_vm13 = vcmp.eq.s32.totalorder %v9269_v33, %v8754_v44  ;;  %vm16294_vm15 = vcmask 1014784   ;;  %v16296_v1 = vmov 0  ;;  %v9330_v18 = vadd.s32 256, %v8749_v43 }
 0x177   : > { %16280 = vst [vmem:[#allocation81_spill] sm:$0xff] %v9269_v33  ;;  %v9285_v19 = vsel %vm16285_vm10, %v829_v2, %v831_v11  ;;  %v9289_v49 = vsel %vm16286_vm9, %v831_v11, %v9007_v37  ;;  %vm9305_vm9 = vmpackc.low %vm1281_vm5, %vm1277_vm6  ;;  %v16290_v11 = vmov 0  ;;  %vm1085_vm10 = vcmp.eq.s32.totalorder %v9254_v26, %v8754_v44 }
 0x178   : > { %16284 = vst [vmem:[#allocation82_spill] sm:$0xff] %v16283_v35  ;;  %v16291_v11 = vsel %vm9305_vm9, 4294967295, %v16290_v11  ;;  %v9314_v37 = vadd.s32 152, %v8749_v43  ;;  %v779_v2 = vsel %vm16294_vm15, %v9049_v23, %v763_v20  ;;  %vm16295_vm6 = vmmov %vm16294_vm15  ;;  %6563 = vmatpush.bf16.msk.msra.mxu3 %vm9305_vm9, %v16195_v60  ;;  %v9333_v32 = vadd.s32 264, %v8749_v43 }
 0x179   : > { %16289 = vst [vmem:[#allocation83_spill] sm:$0xff] %v16288_v8  ;;  %v780_v38 = vsel %vm16295_vm6, %v763_v20, %v8924_v47  ;;  %vm9325_vm5 = vmpackc.low %vm1089_vm2, %vm1085_vm10  ;;  %v9341_v47 = vadd.s32 384, %v8749_v43  ;;  %v9344_v23 = vadd.s32 392, %v8749_v43  ;;  %v9347_v20 = vadd.s32 8, %v8749_v43 }
 0x17a   : > { %16292 = vst [vmem:[#allocation84_spill] sm:$0xff] %v16291_v11  ;;  %v16297_v1 = vsel %vm9325_vm5, 4294967295, %v16296_v1  ;;  %6515 = vmatpush.bf16.msk.msra.mxu0 %vm9325_vm5, %v16195_v60  ;;  %vm1153_vm15 = vcmp.eq.s32.totalorder %v9314_v37, %v8754_v44  ;;  %v16304_v11 = vmov 0  ;;  %vm1205_vm2 = vcmp.eq.s32.totalorder %v9330_v18, %v8754_v44 }
 0x17b   : > { %16293 = vst [vmem:[#allocation85_spill] sm:$0xff] %v9314_v37  ;;  %vm9349_vm10 = vmpackc.low %vm1153_vm15, %vm1149_vm13  ;;  %vm1209_vm6 = vcmp.eq.s32.totalorder %v9333_v32, %v8754_v44  ;;  %v9360_v8 = vadd.s32 128, %v8749_v43  ;;  %vm1269_vm15 = vcmp.eq.s32.totalorder %v9341_v47, %v8754_v44  ;;  %vm1273_vm3 = vcmp.eq.s32.totalorder %v9344_v23, %v8754_v44 }
 0x17c   : > { %16298 = vst [vmem:[#allocation86_spill] sm:$0xff] %v16297_v1  ;;  %v16305_v11 = vsel %vm9349_vm10, 4294967295, %v16304_v11  ;;  %6531 = vmatpush.bf16.msk.msra.mxu1 %vm9349_vm10, %v16195_v60  ;;  %vm9365_vm13 = vmpackc.low %vm1209_vm6, %vm1205_vm2  ;;  %v16308_v1 = vmov 0  ;;  %vm1081_vm9 = vcmp.eq.s32.totalorder %v9347_v20, %v8754_v44  ;;  %v9376_v35 = vadd.s32 136, %v8749_v43 }
 0x17d   : > { %16299 = vst [vmem:[#allocation87_spill] sm:$0xff] %v9330_v18  ;;  %v16309_v1 = vsel %vm9365_vm13, 4294967295, %v16308_v1  ;;  %6549 = vmatpush.bf16.msk.msra.mxu2 %vm9365_vm13, %v16195_v60  ;;  %vm9385_vm2 = vmpackc.low %vm1273_vm3, %vm1269_vm15  ;;  %v16313_v18 = vmov 0  ;;  %vm1141_vm6 = vcmp.eq.s32.totalorder %v9360_v8, %v8754_v44  ;;  %v9398_v6 = vadd.s32 752, %v8749_v43 }
 0x17e   : > { %16300 = vst [vmem:[#allocation88_spill] sm:$0xff] %v9333_v32  ;;  %v9378_v32 = vpop.permute.xlu0 %904  ;;  %v16314_v18 = vsel %vm9385_vm2, 4294967295, %v16313_v18  ;;  %v9400_v48 = vadd.f32 %v779_v2, %v727_v31  ;;  %vm16319_vm3 = vcmask 1006592   ;;  %6565 = vmatpush.bf16.msk.msra.mxu3 %vm9385_vm2, %v16195_v60  ;;  %vm16320_vm15 = vcmp.eq.s32.totalorder %v8749_v43, %v8754_v44 }
 0x17f   : > { %16301 = vst [vmem:[#allocation89_spill] sm:$0xff] %v9341_v47  ;;  %v9395_v47 = vadd.s32 632, %v8749_v43  ;;  %vm9411_vm13 = vmpackc.low %vm1081_vm9, %vm16320_vm15  ;;  %v16321_v28 = vmov 0  ;;  %vm1145_vm10 = vcmp.eq.s32.totalorder %v9376_v35, %v8754_v44  ;;  %v9418_v31 = vadd.s32 760, %v8749_v43 }
 0x180   : > { %16302 = vst [vmem:[#allocation90_spill] sm:$0xff] %v9344_v23  ;;  %v9392_v23 = vadd.s32 624, %v8749_v43  ;;  %v16322_v28 = vsel %vm9411_vm13, 4294967295, %v16321_v28  ;;  %v9421_v2 = vadd.f32 %v780_v38, %v9174_v0  ;;  %6517 = vmatpush.bf16.msk.msra.mxu0 %vm9411_vm13, %v16195_v60  ;;  %vm9429_vm9 = vmpackc.low %vm1145_vm10, %vm1141_vm6  ;;  %v9437_v0 = vpop.permute.xlu2 %898  ;;  %v16329_v38 = vmov 0 }
 0x181   : > { %16303 = vst [vmem:[#allocation91_spill] sm:$0xff] %v9347_v20  ;;  %vm1393_vm2 = vcmp.eq.s32.totalorder %v9395_v47, %v8754_v44  ;;  %6533 = vmatpush.bf16.msk.msra.mxu1 %vm9429_vm9, %v16195_v60  ;;  %vm1453_vm10 = vcmp.eq.s32.totalorder %v9398_v6, %v8754_v44  ;;  %vm1457_vm6 = vcmp.eq.s32.totalorder %v9418_v31, %v8754_v44  ;;  %v9528_v20 = vadd.s32 728, %v8749_v43 }
 0x182   : > { %16306 = vst [vmem:[#allocation92_spill] sm:$0xff] %v16305_v11  ;;  %v9380_v11 = vpop.permute.xlu1 %836  ;;  %vm1389_vm15 = vcmp.eq.s32.totalorder %v9392_v23, %v8754_v44 }
 0x183   : > { %16307 = vst [vmem:[#allocation93_spill] sm:$0xff] %v9360_v8  ;;  %v16351_v8 = vmov 0 }
 0x184   : > { %16310 = vst [vmem:[#allocation94_spill] sm:$0xff] %v16309_v1  ;;  %v850_v1 = vsel %vm16319_vm3, %v9169_v25, %v9380_v11  ;;  %vm16325_vm3 = vcmask 998400  }
 0x185   : > { %16311 = vst [vmem:[#allocation95_spill] sm:$0xff] %v9376_v35  ;;  %v918_v25 = vsel %vm16325_vm3, %v9271_v15, %v9378_v32  ;;  %vm9442_vm3 = vmpackc.low %vm1393_vm2, %vm1389_vm15  ;;  %v9471_v35 = vadd.s32 880, %v8749_v43 }
 0x186   : > { %16312 = vst [vmem:[#allocation96_spill] sm:$0xff] %v9378_v32  ;;  %v16330_v38 = vsel %vm9442_vm3, 4294967295, %v16329_v38  ;;  %6567 = vmatpush.bf16.msk.msrb.mxu0 %vm9442_vm3, %v16195_v60  ;;  %vm9460_vm2 = vmpackc.low %vm1457_vm6, %vm1453_vm10  ;;  %v9531_v32 = vadd.s32 864, %v8749_v43 }
 0x187   : > { %16315 = vst [vmem:[#allocation97_spill] sm:$0xff] %v16314_v18  ;;  %v16326_v18 = vmov 0  ;;  %6583 = vmatpush.bf16.msk.msrb.mxu1 %vm9460_vm2, %v16195_v60 }
 0x188   : > { %16316 = vst [vmem:[#allocation98_spill] sm:$0xff] %v9392_v23  ;;  %v16327_v18 = vsel %vm9429_vm9, 4294967295, %v16326_v18  ;;  %v866_v23 = vadd.f32 %v850_v1, %v9273_v58  ;;  %v9481_v58 = vadd.s32 888, %v8749_v43  ;;  %v9484_v1 = vadd.s32 1008, %v8749_v43 }
 0x189   : > { %16317 = vst [vmem:[#allocation99_spill] sm:$0xff] %v9395_v47  ;;  %v9454_v47 = vadd.s32 616, %v8749_v43  ;;  %vm1517_vm9 = vcmp.eq.s32.totalorder %v9471_v35, %v8754_v44 }
 0x18a   : > { %16318 = vst [vmem:[#allocation100_spill] sm:$0xff] %v9398_v6  ;;  %v9465_v6 = vadd.s32 736, %v8749_v43  ;;  %v934_v37 = vadd.f32 %v918_v25, %v866_v23 }
 0x18b   : > { %16323 = vst [vmem:[#allocation101_spill] sm:$0xff] %v16322_v28  ;;  %v9451_v28 = vadd.s32 608, %v8749_v43  ;;  %vm1385_vm10 = vcmp.eq.s32.totalorder %v9454_v47, %v8754_v44 }
 0x18c   : > { %16324 = vst [vmem:[#allocation102_spill] sm:$0xff] %v9418_v31  ;;  %v9468_v31 = vadd.s32 744, %v8749_v43  ;;  %vm1445_vm3 = vcmp.eq.s32.totalorder %v9465_v6, %v8754_v44 }
 0x18d   : > { %16328 = vst [vmem:[#allocation103_spill] sm:$0xff] %v16327_v18  ;;  %v16334_v18 = vmov 0  ;;  %vm1381_vm15 = vcmp.eq.s32.totalorder %v9451_v28, %v8754_v44 }
 0x18e   : > { %16331 = vst [vmem:[#allocation104_spill] sm:$0xff] %v16330_v38  ;;  %v16335_v18 = vsel %vm9460_vm2, 4294967295, %v16334_v18  ;;  %vm9486_vm6 = vmpackc.low %vm1385_vm10, %vm1381_vm15  ;;  %v16342_v38 = vmov 0  ;;  %vm1449_vm2 = vcmp.eq.s32.totalorder %v9468_v31, %v8754_v44  ;;  %vm1521_vm15 = vcmp.eq.s32.totalorder %v9481_v58, %v8754_v44 }
 0x18f   : > { %16332 = vst [vmem:[#allocation105_spill] sm:$0xff] %v9451_v28  ;;  %v16343_v38 = vsel %vm9486_vm6, 4294967295, %v16342_v38  ;;  %vm9499_vm13 = vmpackc.low %vm1449_vm2, %vm1445_vm3  ;;  %v901_v28 = vpop.permute.xlu1 %900  ;;  %6569 = vmatpush.bf16.msk.msrb.mxu0 %vm9486_vm6, %v16195_v60  ;;  %vm16357_vm10 = vcmask 998400  }
 0x190   : > { %16333 = vst [vmem:[#allocation106_spill] sm:$0xff] %v9454_v47  ;;  %v16346_v47 = vmov 0  ;;  %vm9518_vm3 = vmpackc.low %vm1521_vm15, %vm1517_vm9  ;;  %6585 = vmatpush.bf16.msk.msrb.mxu1 %vm9499_vm13, %v16195_v60  ;;  %vm16358_vm9 = vcmp.eq.s32.totalorder %v9484_v1, %v8754_v44  ;;  %v916_v23 = vsel %vm16357_vm10, %v9437_v0, %v901_v28 }
 0x191   : > { %16336 = vst [vmem:[#allocation107_spill] sm:$0xff] %v16335_v18  ;;  %v9497_v18 = vadd.s32 1016, %v8749_v43  ;;  %v16347_v47 = vsel %vm9499_vm13, 4294967295, %v16346_v47  ;;  %v16352_v8 = vsel %vm9518_vm3, 4294967295, %v16351_v8  ;;  %6599 = vmatpush.bf16.msk.msrb.mxu2 %vm9518_vm3, %v16195_v60  ;;  %vm1441_vm13 = vcmp.eq.s32.totalorder %v9528_v20, %v8754_v44 }
 0x192   : > { %16337 = vst [vmem:[#allocation108_spill] sm:$0xff] %v9465_v6  ;;  %v9508_v6 = vadd.s32 592, %v8749_v43 }
 0x193   : > { %16338 = vst [vmem:[#allocation109_spill] sm:$0xff] %v9468_v31  ;;  %v9511_v31 = vadd.s32 600, %v8749_v43  ;;  %vm1585_vm2 = vcmp.eq.s32.totalorder %v9497_v18, %v8754_v44 }
 0x194   : > { %16339 = vst [vmem:[#allocation110_spill] sm:$0xff] %v9471_v35  ;;  %v9513_v35 = vpop.permute.xlu0 %568  ;;  %vm9544_vm15 = vmpackc.low %vm1585_vm2, %vm16358_vm9  ;;  %vm1373_vm6 = vcmp.eq.s32.totalorder %v9508_v6, %v8754_v44 }
 0x195   : > { %16340 = vst [vmem:[#allocation111_spill] sm:$0xff] %v9481_v58  ;;  %v9525_v58 = vadd.s32 720, %v8749_v43  ;;  %6615 = vmatpush.bf16.msk.msrb.mxu3 %vm9544_vm15, %v16195_v60  ;;  %vm1377_vm2 = vcmp.eq.s32.totalorder %v9511_v31, %v8754_v44 }
 0x196   : > { %16341 = vst [vmem:[#allocation112_spill] sm:$0xff] %v9484_v1  ;;  %vm9563_vm3 = vmpackc.low %vm1377_vm2, %vm1373_vm6 }
 0x197   : > { %16344 = vst [vmem:[#allocation113_spill] sm:$0xff] %v16343_v38  ;;  %v917_v38 = vsel %vm16357_vm10, %v901_v28, %v9271_v15  ;;  %v9551_v15 = vadd.s32 872, %v8749_v43  ;;  %vm1437_vm9 = vcmp.eq.s32.totalorder %v9525_v58, %v8754_v44  ;;  %vm1509_vm10 = vcmp.eq.s32.totalorder %v9531_v32, %v8754_v44  ;;  %6571 = vmatpush.bf16.msk.msrb.mxu0 %vm9563_vm3, %v16195_v60 }
 0x198   : > { %16345 = vst [vmem:[#allocation114_spill] sm:$0xff] %v9497_v18  ;;  %v16359_v18 = vmov 0  ;;  %v933_v25 = vadd.f32 %v917_v38, %v9275_v45  ;;  %v9574_v45 = vadd.s32 992, %v8749_v43  ;;  %vm9581_vm6 = vmpackc.low %vm1441_vm13, %vm1437_vm9  ;;  %v16368_v38 = vmov 0 }
 0x199   : > { %16348 = vst [vmem:[#allocation115_spill] sm:$0xff] %v16347_v47  ;;  %v16360_v18 = vsel %vm9544_vm15, 4294967295, %v16359_v18  ;;  %vm1513_vm5 = vcmp.eq.s32.totalorder %v9551_v15, %v8754_v44  ;;  %v16369_v38 = vsel %vm9581_vm6, 4294967295, %v16368_v38  ;;  %v9589_v47 = vadd.s32 576, %v8749_v43  ;;  %6587 = vmatpush.bf16.msk.msrb.mxu1 %vm9581_vm6, %v16195_v60 }
 0x19a   : > { %16349 = vst [vmem:[#allocation116_spill] sm:$0xff] %v9508_v6  ;;  %v9576_v28 = vpack.c.bf16 %v934_v37, %v933_v25  ;;  %vm9599_vm2 = vmpackc.low %vm1513_vm5, %vm1509_vm10  ;;  %vm1573_vm13 = vcmp.eq.s32.totalorder %v9574_v45, %v8754_v44 }
 0x19b   : > { %16350 = vst [vmem:[#allocation117_spill] sm:$0xff] %v9511_v31  ;;  %v9612_v31 = vadd.s32 848, %v8749_v43  ;;  %6601 = vmatpush.bf16.msk.msrb.mxu2 %vm9599_vm2, %v16195_v60  ;;  %vm1365_vm9 = vcmp.eq.s32.totalorder %v9589_v47, %v8754_v44 }
 0x19c   : > { %16353 = vst [vmem:[#allocation118_spill] sm:$0xff] %v16352_v8  ;;  %v16363_v8 = vmov 0  ;;  %v2875_v6 = vunpack.c.l.bf16 %v9576_v28 }
 0x19d   : > { %16354 = vst [vmem:[#allocation119_spill] sm:$0xff] %v9525_v58  ;;  %v16364_v8 = vsel %vm9563_vm3, 4294967295, %v16363_v8  ;;  %v9609_v58 = vadd.s32 712, %v8749_v43  ;;  %vm16388_vm3 = vcmask 998400  }
 0x19e   : > { %16355 = vst [vmem:[#allocation120_spill] sm:$0xff] %v9528_v20  ;;  %v9606_v20 = vadd.s32 704, %v8749_v43 }
 0x19f   : > { %16356 = vst [vmem:[#allocation121_spill] sm:$0xff] %v9531_v32  ;;  %v9594_v32 = vpop.permute.xlu2 %638  ;;  %vm1433_vm15 = vcmp.eq.s32.totalorder %v9609_v58, %v8754_v44 }
 0x1a0   : > { %16361 = vst [vmem:[#allocation122_spill] sm:$0xff] %v16360_v18  ;;  %v9586_v18 = vadd.s32 1000, %v8749_v43 }
 0x1a1   : > { %16362 = vst [vmem:[#allocation123_spill] sm:$0xff] %v9551_v15  ;;  %v9592_v15 = vadd.s32 584, %v8749_v43 }
 0x1a2   : > { %16365 = vst [vmem:[#allocation124_spill] sm:$0xff] %v16364_v8  ;;  %v16374_v8 = vmov 0  ;;  %vm1577_vm5 = vcmp.eq.s32.totalorder %v9586_v18, %v8754_v44 }
 0x1a3   : > { %16366 = vst [vmem:[#allocation125_spill] sm:$0xff] %v9574_v45  ;;  %v16375_v8 = vsel %vm9599_vm2, 4294967295, %v16374_v8  ;;  %vm9623_vm10 = vmpackc.low %vm1577_vm5, %vm1573_vm13  ;;  %v16380_v45 = vmov 0  ;;  %vm1369_vm6 = vcmp.eq.s32.totalorder %v9592_v15, %v8754_v44  ;;  %vm1501_vm5 = vcmp.eq.s32.totalorder %v9612_v31, %v8754_v44 }
 0x1a4   : > { %16367 = vst [vmem:[#allocation126_spill] sm:$0xff] %v9576_v28  ;;  %v16381_v45 = vsel %vm9623_vm10, 4294967295, %v16380_v45  ;;  %6617 = vmatpush.bf16.msk.msrb.mxu3 %vm9623_vm10, %v16195_v60  ;;  %vm9641_vm13 = vmpackc.low %vm1369_vm6, %vm1365_vm9  ;;  %vm16389_vm6 = vcmp.eq.s32.totalorder %v9606_v20, %v8754_v44 }
 0x1a5   : > { %16370 = vst [vmem:[#allocation127_spill] sm:$0xff] %v16369_v38  ;;  %v2876_v38 = vunpack.c.h.bf16 %v9576_v28  ;;  %v2883_v28 = vsub.f32 %v933_v25, %v2875_v6  ;;  %v864_v6 = vadd.f32 %v9289_v49, %v9421_v2  ;;  %6573 = vmatpush.bf16.msk.msrb.mxu0 %vm9641_vm13, %v16195_v60  ;;  %vm9662_vm9 = vmpackc.low %vm1433_vm15, %vm16389_vm6 }
 0x1a6   : > { %16371 = vst [vmem:[#allocation128_spill] sm:$0xff] %v9586_v18  ;;  %v9636_v18 = vpop.permute.xlu0 %566  ;;  %6589 = vmatpush.bf16.msk.msrb.mxu1 %vm9662_vm9, %v16195_v60 }
 0x1a7   : > { %16372 = vst [vmem:[#allocation129_spill] sm:$0xff] %v9589_v47  ;;  %v897_v47 = vpop.permute.xlu1 %896  ;;  %v2884_v1 = vsub.f32 %v934_v37, %v2876_v38  ;;  %v863_v37 = vadd.f32 %v9285_v19, %v9400_v48  ;;  %v16390_v38 = vmov 0  ;;  %v9668_v49 = vpack.c.bf16 %v2883_v28, %v2883_v28 }
 0x1a8   : > { %16373 = vst [vmem:[#allocation130_spill] sm:$0xff] %v9592_v15  ;;  %v16384_v15 = vmov 0  ;;  %v915_v25 = vsel %vm16388_vm3, %v897_v47, %v9437_v0  ;;  %v16391_v38 = vsel %vm9662_vm9, 4294967295, %v16390_v38  ;;  %v16394_v19 = vmov 0 }
 0x1a9   : > { %16376 = vst [vmem:[#allocation131_spill] sm:$0xff] %v16375_v8  ;;  %v9634_v8 = vadd.s32 856, %v8749_v43  ;;  %v16385_v15 = vsel %vm9641_vm13, 4294967295, %v16384_v15  ;;  %v932_v48 = vadd.f32 %v916_v23, %v864_v6  ;;  %v931_v47 = vadd.f32 %v915_v25, %v863_v37  ;;  %2931 = vmatmul.bf16.vlgmr.msra.gmra.mxu2 %v9668_v49 }
 0x1aa   : > { %16377 = vst [vmem:[#allocation132_spill] sm:$0xff] %v9606_v20  ;;  %v9677_v2 = vpack.c.bf16 %v2884_v1, %v2884_v1  ;;  %v9683_v0 = vadd.s32 984, %v8749_v43  ;;  %v9689_v28 = vadd.s32 560, %v8749_v43  ;;  %v9692_v23 = vadd.s32 568, %v8749_v43 }
 0x1ab   : > { %16378 = vst [vmem:[#allocation133_spill] sm:$0xff] %v9609_v58  ;;  %v9648_v58 = vadd.s32 976, %v8749_v43  ;;  %vm1505_vm10 = vcmp.eq.s32.totalorder %v9634_v8, %v8754_v44  ;;  %v9695_v1 = vadd.s32 688, %v8749_v43  ;;  %v9697_v6 = vpack.c.bf16 %v932_v48, %v931_v47 }
 0x1ac   : > { %16379 = vst [vmem:[#allocation134_spill] sm:$0xff] %v9612_v31  ;;  %vm9673_vm3 = vmpackc.low %vm1505_vm10, %vm1501_vm5  ;;  %2944 = vmatmul.bf16.vlgmr.msra.gmra.mxu3 %v9677_v2  ;;  %vm1569_vm10 = vcmp.eq.s32.totalorder %v9683_v0, %v8754_v44  ;;  %v9703_v37 = vadd.s32 696, %v8749_v43  ;;  %v9706_v25 = vadd.s32 832, %v8749_v43  ;;  %vm1357_vm6 = vcmp.eq.s32.totalorder %v9689_v28, %v8754_v44 }
 0x1ad   : > { %16382 = vst [vmem:[#allocation135_spill] sm:$0xff] %v16381_v45  ;;  %v16395_v19 = vsel %vm9673_vm3, 4294967295, %v16394_v19  ;;  %6603 = vmatpush.bf16.msk.msrb.mxu2 %vm9673_vm3, %v16195_v60  ;;  %vm1565_vm15 = vcmp.eq.s32.totalorder %v9648_v58, %v8754_v44  ;;  %vm1361_vm3 = vcmp.eq.s32.totalorder %v9692_v23, %v8754_v44  ;;  %vm1421_vm9 = vcmp.eq.s32.totalorder %v9695_v1, %v8754_v44 }
 0x1ae   : > { %16383 = vst [vmem:[#allocation136_spill] sm:$0xff] %v9634_v8  ;;  %vm9708_vm5 = vmpackc.low %vm1569_vm10, %vm1565_vm15  ;;  %v2873_v45 = vunpack.c.l.bf16 %v9697_v6  ;;  %vm1425_vm10 = vcmp.eq.s32.totalorder %v9703_v37, %v8754_v44  ;;  %vm1493_vm13 = vcmp.eq.s32.totalorder %v9706_v25, %v8754_v44 }
 0x1af   : > { %16386 = vst [vmem:[#allocation137_spill] sm:$0xff] %v16385_v15  ;;  %v9721_v15 = vpop.permute.xlu2 %704  ;;  %6619 = vmatpush.bf16.msk.msrb.mxu3 %vm9708_vm5, %v16195_v60  ;;  %vm9728_vm15 = vmpackc.low %vm1361_vm3, %vm1357_vm6 }
 0x1b0   : > { %16387 = vst [vmem:[#allocation138_spill] sm:$0xff] %v9648_v58  ;;  %6575 = vmatpush.bf16.msk.msrb.mxu0 %vm9728_vm15, %v16195_v60  ;;  %vm9743_vm2 = vmpackc.low %vm1425_vm10, %vm1421_vm9  ;;  %v16463_v58 = vmov 0 }
 0x1b1   : > { %16392 = vst [vmem:[#allocation139_spill] sm:$0xff] %v16391_v38  ;;  %v9719_v38 = vadd.s32 840, %v8749_v43  ;;  %6591 = vmatpush.bf16.msk.msrb.mxu1 %vm9743_vm2, %v16195_v60 }
 0x1b2   : > { %16393 = vst [vmem:[#allocation140_spill] sm:$0xff] %v9668_v49  ;;  %v16409_v49 = vmov 0 }
 0x1b3   : > { %16396 = vst [vmem:[#allocation141_spill] sm:$0xff] %v16395_v19  ;;  %v16405_v19 = vmov 0  ;;  %v16410_v49 = vsel %vm9728_vm15, 4294967295, %v16409_v49  ;;  %vm1497_vm3 = vcmp.eq.s32.totalorder %v9719_v38, %v8754_v44 }
 0x1b4   : > { %16397 = vst [vmem:[#allocation142_spill] sm:$0xff] %v9677_v2  ;;  %v16406_v19 = vsel %vm9708_vm5, 4294967295, %v16405_v19  ;;  %v2874_v2 = vunpack.c.h.bf16 %v9697_v6  ;;  %vm9761_vm9 = vmpackc.low %vm1497_vm3, %vm1493_vm13 }
 0x1b5   : > { %16398 = vst [vmem:[#allocation143_spill] sm:$0xff] %v9683_v0  ;;  %6605 = vmatpush.bf16.msk.msrb.mxu2 %vm9761_vm9, %v16195_v60 }
 0x1b6   : > { %16399 = vst [vmem:[#allocation144_spill] sm:$0xff] %v9689_v28  ;;  %v2881_v28 = vsub.f32 %v931_v47, %v2873_v45  ;;  %v2882_v0 = vsub.f32 %v932_v48, %v2874_v2  ;;  %v9775_v45 = vadd.s32 552, %v8749_v43  ;;  %v9786_v48 = vadd.s32 672, %v8749_v43 }
 0x1b7   : > { %16400 = vst [vmem:[#allocation145_spill] sm:$0xff] %v9692_v23  ;;  %v9738_v23 = vpop.permute.xlu1 %570  ;;  %v9789_v2 = vadd.s32 680, %v8749_v43 }
 0x1b8   : > { %16401 = vst [vmem:[#allocation146_spill] sm:$0xff] %v9695_v1  ;;  %v9736_v1 = vpop.permute.xlu0 %706  ;;  %v9777_v47 = vpack.c.bf16 %v2882_v0, %v2882_v0  ;;  %v9799_v0 = vadd.s32 816, %v8749_v43 }
 0x1b9   : > { %16402 = vst [vmem:[#allocation147_spill] sm:$0xff] %v9697_v6  ;;  %v9750_v6 = vadd.s32 960, %v8749_v43 }
 0x1ba   : > { %16403 = vst [vmem:[#allocation148_spill] sm:$0xff] %v9703_v37  ;;  %v9756_v37 = vadd.s32 544, %v8749_v43  ;;  %2918 = vmatmul.bf16.vlgmr.msra.gmra.mxu1 %v9777_v47 }
 0x1bb   : > { %16404 = vst [vmem:[#allocation149_spill] sm:$0xff] %v9706_v25  ;;  %v9753_v25 = vadd.s32 968, %v8749_v43  ;;  %vm1557_vm6 = vcmp.eq.s32.totalorder %v9750_v6, %v8754_v44 }
 0x1bc   : > { %16407 = vst [vmem:[#allocation150_spill] sm:$0xff] %v16406_v19  ;;  %v16412_v19 = vmov 0  ;;  %vm1349_vm3 = vcmp.eq.s32.totalorder %v9756_v37, %v8754_v44 }
 0x1bd   : > { %16408 = vst [vmem:[#allocation151_spill] sm:$0xff] %v9719_v38  ;;  %v16413_v19 = vsel %vm9743_vm2, 4294967295, %v16412_v19  ;;  %v9770_v38 = vpack.c.bf16 %v2881_v28, %v2881_v28  ;;  %vm1561_vm10 = vcmp.eq.s32.totalorder %v9753_v25, %v8754_v44  ;;  %v1070_v28 = vadd.s32 128, %v8742_v40 }
 0x1be   : > { %16411 = vst [vmem:[#allocation152_spill] sm:$0xff] %v16410_v49  ;;  %v16418_v49 = vmov 0  ;;  %vm9779_vm13 = vmpackc.low %vm1561_vm10, %vm1557_vm6  ;;  %vm1353_vm6 = vcmp.eq.s32.totalorder %v9775_v45, %v8754_v44  ;;  %v9817_v40 = vadd.s32 952, %v8749_v43 }
 0x1bf   : > { %16414 = vst [vmem:[#allocation153_spill] sm:$0xff] %v16413_v19  ;;  %v16419_v49 = vsel %vm9761_vm9, 4294967295, %v16418_v49  ;;  %v16424_v19 = vmov 0  ;;  %2905 = vmatmul.bf16.vlgmr.msra.gmra.mxu0 %v9770_v38  ;;  %6621 = vmatpush.bf16.msk.msrb.mxu3 %vm9779_vm13, %v16195_v60  ;;  %vm9805_vm10 = vmpackc.low %vm1353_vm6, %vm1349_vm3  ;;  %vm1413_vm9 = vcmp.eq.s32.totalorder %v9786_v48, %v8754_v44  ;;  %vm1485_vm6 = vcmp.eq.s32.totalorder %v9799_v0, %v8754_v44 }
 0x1c0   : > { %16415 = vst [vmem:[#allocation154_spill] sm:$0xff] %v9750_v6  ;;  %v16425_v19 = vsel %vm9779_vm13, 4294967295, %v16424_v19  ;;  %vm1417_vm13 = vcmp.eq.s32.totalorder %v9789_v2, %v8754_v44  ;;  %6577 = vmatpush.bf16.msk.msrb.mxu0 %vm9805_vm10, %v16195_v60  ;;  %v500_v6 = vmul.f32 %v8667_v4, %v8619_v51  ;;  %v16467_v4 = vmov 0 }
 0x1c1   : > { %16416 = vst [vmem:[#allocation155_spill] sm:$0xff] %v9753_v25  ;;  %vm9822_vm3 = vmpackc.low %vm1417_vm13, %vm1413_vm9  ;;  %v9873_v25 = vpop.permute.xlu2 %702 }
 0x1c2   : > { %16417 = vst [vmem:[#allocation156_spill] sm:$0xff] %v9756_v37  ;;  %v16431_v37 = vmov 0  ;;  %6593 = vmatpush.bf16.msk.msrb.mxu1 %vm9822_vm3, %v16195_v60 }
 0x1c3   : > { %16420 = vst [vmem:[#allocation157_spill] sm:$0xff] %v16419_v49  ;;  %v9802_v49 = vadd.s32 824, %v8749_v43  ;;  %v16432_v37 = vsel %vm9805_vm10, 4294967295, %v16431_v37  ;;  %vm1553_vm10 = vcmp.eq.s32.totalorder %v9817_v40, %v8754_v44 }
 0x1c4   : > { %16421 = vst [vmem:[#allocation158_spill] sm:$0xff] %v9770_v38  ;;  %v9836_v38 = vpop.permute.xlu0 %772 }
 0x1c5   : > { %16422 = vst [vmem:[#allocation159_spill] sm:$0xff] %v9775_v45  ;;  %vm1489_vm2 = vcmp.eq.s32.totalorder %v9802_v49, %v8754_v44  ;;  %v16441_v45 = vmov 0 }
 0x1c6   : > { %16423 = vst [vmem:[#allocation160_spill] sm:$0xff] %v9777_v47  ;;  %v16436_v47 = vmov 0  ;;  %vm9843_vm9 = vmpackc.low %vm1489_vm2, %vm1485_vm6 }
 0x1c7   : > { %16426 = vst [vmem:[#allocation161_spill] sm:$0xff] %v16425_v19  ;;  %v9814_v19 = vadd.s32 944, %v8749_v43  ;;  %v16437_v47 = vsel %vm9822_vm3, 4294967295, %v16436_v47  ;;  %v16442_v45 = vsel %vm9843_vm9, 4294967295, %v16441_v45  ;;  %6607 = vmatpush.bf16.msk.msrb.mxu2 %vm9843_vm9, %v16195_v60 }
 0x1c8   : > { %16427 = vst [vmem:[#allocation162_spill] sm:$0xff] %v9786_v48  ;;  %v9834_v48 = vadd.s32 536, %v8749_v43 }
 0x1c9   : > { %16428 = vst [vmem:[#allocation163_spill] sm:$0xff] %v9789_v2  ;;  %v9831_v2 = vadd.s32 528, %v8749_v43  ;;  %vm1549_vm13 = vcmp.eq.s32.totalorder %v9814_v19, %v8754_v44 }
 0x1ca   : > { %16429 = vst [vmem:[#allocation164_spill] sm:$0xff] %v9799_v0  ;;  %v9855_v0 = vadd.s32 664, %v8749_v43  ;;  %vm9860_vm2 = vmpackc.low %vm1553_vm10, %vm1549_vm13  ;;  %vm1345_vm3 = vcmp.eq.s32.totalorder %v9834_v48, %v8754_v44 }
 0x1cb   : > { %16430 = vst [vmem:[#allocation165_spill] sm:$0xff] %v9802_v49  ;;  %v9852_v49 = vadd.s32 656, %v8749_v43  ;;  %vm1341_vm6 = vcmp.eq.s32.totalorder %v9831_v2, %v8754_v44  ;;  %6623 = vmatpush.bf16.msk.msrb.mxu3 %vm9860_vm2, %v16195_v60 }
 0x1cc   : > { %16433 = vst [vmem:[#allocation166_spill] sm:$0xff] %v16432_v37  ;;  %v9838_v37 = vpop.permute.xlu1 %636  ;;  %vm9878_vm10 = vmpackc.low %vm1345_vm3, %vm1341_vm6  ;;  %vm1409_vm9 = vcmp.eq.s32.totalorder %v9855_v0, %v8754_v44 }
 0x1cd   : > { %16434 = vst [vmem:[#allocation167_spill] sm:$0xff] %v9814_v19  ;;  %v9871_v19 = vmul.u32 2, %v1070_v28  ;;  %vm1405_vm13 = vcmp.eq.s32.totalorder %v9852_v49, %v8754_v44  ;;  %6579 = vmatpush.bf16.msk.msrb.mxu0 %vm9878_vm10, %v16195_v60  ;;  %v16454_v28 = vmov 0 }
 0x1ce   : > { %16435 = vst [vmem:[#allocation168_spill] sm:$0xff] %v9817_v40  ;;  %v9869_v40 = vadd.s32 800, %v8749_v43  ;;  %vm9892_vm15 = vmpackc.low %vm1409_vm9, %vm1405_vm13 }
 0x1cf   : > { %16438 = vst [vmem:[#allocation169_spill] sm:$0xff] %v16437_v47  ;;  %v16446_v47 = vmov 0  ;;  %v16455_v28 = vsel %vm9892_vm15, 4294967295, %v16454_v28  ;;  %6595 = vmatpush.bf16.msk.msrb.mxu1 %vm9892_vm15, %v16195_v60  ;;  %vm1202_vm7 = vcmp.eq.s32.totalorder %v8794_v56, %v9871_v19 }
 0x1d0   : > { %16439 = vst [vmem:[#allocation170_spill] sm:$0xff] %v9831_v2  ;;  %v16447_v47 = vsel %vm9860_vm2, 4294967295, %v16446_v47  ;;  %vm1477_vm3 = vcmp.eq.s32.totalorder %v9869_v40, %v8754_v44  ;;  %v9919_v2 = vadd.s32 648, %v8749_v43  ;;  %vm16466_vm2 = vcmask 1039360  }
 0x1d1   : > { %16440 = vst [vmem:[#allocation171_spill] sm:$0xff] %v9834_v48  ;;  %v9887_v48 = vadd.s32 808, %v8749_v43 }
 0x1d2   : > { %16443 = vst [vmem:[#allocation172_spill] sm:$0xff] %v16442_v45  ;;  %v16450_v45 = vmov 0  ;;  %vm1401_vm4 = vcmp.eq.s32.totalorder %v9919_v2, %v8754_v44 }
 0x1d3   : > { %16444 = vst [vmem:[#allocation173_spill] sm:$0xff] %v9852_v49  ;;  %v16451_v45 = vsel %vm9878_vm10, 4294967295, %v16450_v45  ;;  %v9902_v49 = vadd.s32 936, %v8749_v43  ;;  %vm1481_vm9 = vcmp.eq.s32.totalorder %v9887_v48, %v8754_v44 }
 0x1d4   : > { %16445 = vst [vmem:[#allocation174_spill] sm:$0xff] %v9855_v0  ;;  %v9905_v0 = vadd.s32 512, %v8749_v43  ;;  %vm9923_vm6 = vmpackc.low %vm1481_vm9, %vm1477_vm3 }
 0x1d5   : > { %16448 = vst [vmem:[#allocation175_spill] sm:$0xff] %v16447_v47  ;;  %v9899_v47 = vadd.s32 928, %v8749_v43  ;;  %v16464_v58 = vsel %vm9923_vm6, 4294967295, %v16463_v58  ;;  %vm1545_vm15 = vcmp.eq.s32.totalorder %v9902_v49, %v8754_v44  ;;  %6609 = vmatpush.bf16.msk.msrb.mxu2 %vm9923_vm6, %v16195_v60  ;;  %vm1198_vm6 = vcmp.eq.s32.totalorder %v8785_v55, %v9871_v19 }
 0x1d6   : > { %16449 = vst [vmem:[#allocation176_spill] sm:$0xff] %v9869_v40  ;;  %v9916_v40 = vadd.s32 640, %v8749_v43  ;;  %vm1333_vm10 = vcmp.eq.s32.totalorder %v9905_v0, %v8754_v44 }
 0x1d7   : > { %16452 = vst [vmem:[#allocation177_spill] sm:$0xff] %v16451_v45  ;;  %v9913_v45 = vadd.s32 520, %v8749_v43  ;;  %vm1541_vm13 = vcmp.eq.s32.totalorder %v9899_v47, %v8754_v44 }
 0x1d8   : > { %16453 = vst [vmem:[#allocation178_spill] sm:$0xff] %v9887_v48  ;;  %vm9939_vm3 = vmpackc.low %vm1545_vm15, %vm1541_vm13  ;;  %vm1397_vm5 = vcmp.eq.s32.totalorder %v9916_v40, %v8754_v44  ;;  %vm1134_vm15 = vcmp.eq.s32.totalorder %v8779_v54, %v9871_v19  ;;  %vm1138_vm13 = vcmp.eq.s32.totalorder %v8782_v17, %v9871_v19 }
 0x1d9   : > { %16456 = vst [vmem:[#allocation179_spill] sm:$0xff] %v16455_v28  ;;  %v582_v28 = vsel %vm16466_vm2, %v9738_v23, %v8669_v5  ;;  %v16468_v4 = vsel %vm9939_vm3, 4294967295, %v16467_v4  ;;  %vm1337_vm9 = vcmp.eq.s32.totalorder %v9913_v45, %v8754_v44  ;;  %6625 = vmatpush.bf16.msk.msrb.mxu3 %vm9939_vm3, %v16195_v60  ;;  %v16470_v5 = vmov 0 }
 0x1da   : > { %16457 = vst [vmem:[#allocation180_spill] sm:$0xff] %v9899_v47  ;;  %vm9952_vm2 = vmpackc.low %vm1337_vm9, %vm1333_vm10  ;;  %v498_v47 = vmul.f32 %v8655_v63, %v8619_v51 }
 0x1db   : > { %16458 = vst [vmem:[#allocation181_spill] sm:$0xff] %v9902_v49  ;;  %v16471_v5 = vsel %vm9952_vm2, 4294967295, %v16470_v5  ;;  %6581 = vmatpush.bf16.msk.msrb.mxu0 %vm9952_vm2, %v16195_v60  ;;  %vm9971_vm10 = vmpackc.low %vm1401_vm4, %vm1397_vm5  ;;  %v9985_v49 = vadd.s32 920, %v8749_v43  ;;  %vm16476_vm4 = vcmask 1039360  }
 0x1dc   : > { %16459 = vst [vmem:[#allocation182_spill] sm:$0xff] %v9905_v0  ;;  %v9982_v0 = vadd.s32 912, %v8749_v43  ;;  %v579_v48 = vsel %vm16476_vm4, %v8758_v46, %v9636_v18  ;;  %vm16477_vm5 = vmmov %vm16476_vm4  ;;  %6597 = vmatpush.bf16.msk.msrb.mxu1 %vm9971_vm10, %v16195_v60  ;;  %vm16481_vm4 = vcmask 1031168  }
 0x1dd   : > { %16460 = vst [vmem:[#allocation183_spill] sm:$0xff] %v9913_v45  ;;  %v9979_v45 = vadd.s32 792, %v8749_v43  ;;  %v581_v8 = vsel %vm16477_vm5, %v9513_v35, %v9738_v23  ;;  %vm10006_vm9 = vmpackc.low %vm1138_vm13, %vm1134_vm15  ;;  %v650_v63 = vsel %vm16481_vm4, %v9594_v32, %v8704_v22  ;;  %v580_v46 = vsel %vm16477_vm5, %v9636_v18, %v9513_v35 }
 0x1de   : > { %16461 = vst [vmem:[#allocation184_spill] sm:$0xff] %v9916_v40  ;;  %v9976_v40 = vadd.s32 784, %v8749_v43  ;;  %v499_v23 = vmul.f32 %v8643_v59, %v8619_v51  ;;  %vm10027_vm15 = vmpackc.low %vm1202_vm7, %vm1198_vm6  ;;  %v16482_v22 = vmov 0  ;;  %vm1533_vm5 = vcmp.eq.s32.totalorder %v9982_v0, %v8754_v44  ;;  %v10042_v59 = vpop.permute.xlu2 %842 }
 0x1df   : > { %16462 = vst [vmem:[#allocation185_spill] sm:$0xff] %v9919_v2  ;;  %v16473_v2 = vmov 0  ;;  %6631 = vmatpush.bf16.msk.msra.mxu0 %vm10006_vm9, %v16195_v60  ;;  %v16483_v22 = vsel %vm10027_vm15, 4294967295, %v16482_v22  ;;  %vm1473_vm4 = vcmp.eq.s32.totalorder %v9979_v45, %v8754_v44  ;;  %v16485_v18 = vmov 0 }
 0x1e0   : > { %16465 = vst [vmem:[#allocation186_spill] sm:$0xff] %v16464_v58  ;;  %v9964_v58 = vpop.permute.xlu0 %770  ;;  %v16474_v2 = vsel %vm9971_vm10, 4294967295, %v16473_v2  ;;  %6647 = vmatpush.bf16.msk.msra.mxu1 %vm10027_vm15, %v16195_v60  ;;  %vm1469_vm13 = vcmp.eq.s32.totalorder %v9976_v40, %v8754_v44  ;;  %v597_v35 = vadd.f32 %v581_v8, %v499_v23  ;;  %vm1126_vm6 = vcmp.eq.s32.totalorder %v8858_v24, %v9871_v19 }
 0x1e1   : > { %16469 = vst [vmem:[#allocation187_spill] sm:$0xff] %v16468_v4  ;;  %v9966_v4 = vpop.permute.xlu1 %634  ;;  %vm10044_vm7 = vmpackc.low %vm1473_vm4, %vm1469_vm13  ;;  %vm1130_vm15 = vcmp.eq.s32.totalorder %v8861_v14, %v9871_v19  ;;  %vm1190_vm13 = vcmp.eq.s32.totalorder %v8864_v16, %v9871_v19  ;;  %vm1194_vm4 = vcmp.eq.s32.totalorder %v8886_v27, %v9871_v19  ;;  %v10064_v8 = vadd.s32 768, %v8749_v43 }
 0x1e2   : > { %16472 = vst [vmem:[#allocation188_spill] sm:$0xff] %v16471_v5  ;;  %v497_v5 = vmul.f32 %v8571_v34, %v8619_v51  ;;  %v16478_v34 = vmov 0  ;;  %v16486_v18 = vsel %vm10044_vm7, 4294967295, %v16485_v18  ;;  %6611 = vmatpush.bf16.msk.msrb.mxu2 %vm10044_vm7, %v16195_v60  ;;  %vm16491_vm7 = vcmask 1031168  }
 0x1e3   : > { %16475 = vst [vmem:[#allocation189_spill] sm:$0xff] %v16474_v2  ;;  %v16479_v34 = vsel %vm10006_vm9, 4294967295, %v16478_v34  ;;  %v598_v2 = vadd.f32 %v582_v28, %v500_v6  ;;  %vm1537_vm9 = vcmp.eq.s32.totalorder %v9985_v49, %v8754_v44  ;;  %v16488_v6 = vmov 0 }
 0x1e4   : > { %16480 = vst [vmem:[#allocation190_spill] sm:$0xff] %v16479_v34  ;;  %v595_v51 = vadd.f32 %v579_v48, %v497_v5  ;;  %vm10055_vm10 = vmpackc.low %vm1537_vm9, %vm1533_vm5  ;;  %v10067_v48 = vadd.s32 776, %v8749_v43  ;;  %v649_v5 = vsel %vm16491_vm7, %v9838_v37, %v9594_v32  ;;  %v16492_v23 = vmov 0 }
 0x1e5   : > { %16484 = vst [vmem:[#allocation191_spill] sm:$0xff] %v16483_v22  ;;  %v16489_v6 = vsel %vm10055_vm10, 4294967295, %v16488_v6  ;;  %v666_v28 = vadd.f32 %v650_v63, %v598_v2  ;;  %6627 = vmatpush.bf16.msk.msrb.mxu3 %vm10055_vm10, %v16195_v60  ;;  %vm10075_vm9 = vmpackc.low %vm1130_vm15, %vm1126_vm6  ;;  %v10083_v22 = vadd.s32 904, %v8749_v43  ;;  %v16495_v32 = vmov 0 }
 0x1e6   : > { %16487 = vst [vmem:[#allocation192_spill] sm:$0xff] %v16486_v18  ;;  %v16493_v23 = vsel %vm10075_vm9, 4294967295, %v16492_v23  ;;  %v10080_v18 = vadd.s32 896, %v8749_v43  ;;  %6633 = vmatpush.bf16.msk.msra.mxu0 %vm10075_vm9, %v16195_v60  ;;  %vm10088_vm5 = vmpackc.low %vm1194_vm4, %vm1190_vm13  ;;  %vm1461_vm15 = vcmp.eq.s32.totalorder %v10064_v8, %v8754_v44  ;;  %vm1465_vm7 = vcmp.eq.s32.totalorder %v10067_v48, %v8754_v44 }
 0x1e7   : > { %16490 = vst [vmem:[#allocation193_spill] sm:$0xff] %v16489_v6  ;;  %v16496_v32 = vsel %vm10088_vm5, 4294967295, %v16495_v32  ;;  %6649 = vmatpush.bf16.msk.msra.mxu1 %vm10088_vm5, %v16195_v60  ;;  %vm10105_vm13 = vmpackc.low %vm1465_vm7, %vm1461_vm15  ;;  %vm1529_vm6 = vcmp.eq.s32.totalorder %v10083_v22, %v8754_v44  ;;  %v596_v6 = vadd.f32 %v580_v46, %v498_v47  ;;  %vm16501_vm5 = vcmask 1022976  }
 0x1e8   : > { %16494 = vst [vmem:[#allocation194_spill] sm:$0xff] %v16493_v23  ;;  %v10100_v2 = vpop.permute.xlu0 %844  ;;  %v16498_v23 = vmov 0  ;;  %vm1525_vm4 = vcmp.eq.s32.totalorder %v10080_v18, %v8754_v44  ;;  %6613 = vmatpush.bf16.msk.msrb.mxu2 %vm10105_vm13, %v16195_v60  ;;  %v16502_v34 = vmov 0  ;;  %v665_v44 = vadd.f32 %v649_v5, %v597_v35 }
 0x1e9   : > { %16497 = vst [vmem:[#allocation195_spill] sm:$0xff] %v16496_v32  ;;  %v775_v63 = vpop.permute.xlu1 %774  ;;  %v16499_v23 = vsel %vm10105_vm13, 4294967295, %v16498_v23  ;;  %v718_v32 = vsel %vm16501_vm5, %v9736_v1, %v8702_v21  ;;  %vm10123_vm15 = vmpackc.low %vm1529_vm6, %vm1525_vm4  ;;  %vm16505_vm9 = vcmask 1031168   ;;  %vm16506_vm5 = vcmp.eq.s32.totalorder %v8765_v10, %v9871_v19 }
 0x1ea   : > { %16500 = vst [vmem:[#allocation196_spill] sm:$0xff] %v16499_v23  ;;  %v16503_v34 = vsel %vm10123_vm15, 4294967295, %v16502_v34  ;;  %v647_v47 = vsel %vm16505_vm9, %v8818_v62, %v9966_v4  ;;  %6629 = vmatpush.bf16.msk.msrb.mxu3 %vm10123_vm15, %v16195_v60  ;;  %vm16507_vm6 = vcmp.eq.s32.totalorder %v8768_v50, %v9871_v19  ;;  %v16508_v21 = vmov 0  ;;  %vm16517_vm10 = vmmov %vm16505_vm9  ;;  %v16547_v23 = vld [vmem:[#allocation32_spill] sm:$0xff] }
 0x1eb   : > { %16504 = vst [vmem:[#allocation197_spill] sm:$0xff] %v16503_v34  ;;  %vm10143_vm4 = vmpackc.low %vm16507_vm6, %vm16506_vm5  ;;  %vm16511_vm7 = vcmask 1022976   ;;  %v734_v46 = vadd.f32 %v718_v32, %v666_v28  ;;  %vm16512_vm5 = vcmp.eq.s32.totalorder %v8771_v52, %v9871_v19  ;;  %vm16513_vm6 = vcmp.eq.s32.totalorder %v8774_v53, %v9871_v19  ;;  %v16524_v32 = vld [vmem:[#allocation27_spill] sm:$0xff] }
 0x1ec   : > { %v16509_v21 = vsel %vm10143_vm4, 4294967295, %v16508_v21  ;;  %v717_v62 = vsel %vm16511_vm7, %v9721_v15, %v9736_v1  ;;  %6663 = vmatpush.bf16.msk.msra.mxu2 %vm10143_vm4, %v16195_v60  ;;  %vm10163_vm15 = vmpackc.low %vm16513_vm6, %vm16512_vm5  ;;  %v16514_v35 = vmov 0  ;;  %v648_v1 = vsel %vm16517_vm10, %v9966_v4, %v9838_v37  ;;  %v16525_v37 = vld [vmem:[#allocation29_spill] sm:$0xff] }
 0x1ed   : > { %16510 = vst [vmem:[#allocation198_spill] sm:$0xff] %v16509_v21  ;;  %v16515_v35 = vsel %vm10163_vm15, 4294967295, %v16514_v35  ;;  %vm16518_vm4 = vcmask 1014784   ;;  %vm16519_vm5 = vcmp.eq.s32.totalorder %v8919_v41, %v9871_v19  ;;  %vm16520_vm6 = vcmp.eq.s32.totalorder %v8922_v42, %v9871_v19  ;;  %v16532_v21 = vld [vmem:[#allocation46_spill] sm:$0xff] }
 0x1ee   : > { %16516 = vst [vmem:[#allocation199_spill] sm:$0xff] %v16515_v35  ;;  %v786_v28 = vsel %vm16518_vm4, %v775_v63, %v8680_v9  ;;  %6679 = vmatpush.bf16.msk.msra.mxu3 %vm10163_vm15, %v16195_v60  ;;  %vm10185_vm9 = vmpackc.low %vm16520_vm6, %vm16519_vm5  ;;  %v16521_v5 = vmov 0  ;;  %v663_v9 = vadd.f32 %v647_v47, %v595_v51  ;;  %vm16527_vm5 = vcmp.eq.s32.totalorder %v8942_v13, %v9871_v19  ;;  %v16533_v51 = vld [vmem:[#allocation47_spill] sm:$0xff]  ;;  %v10215_v47 = vpop.permute.xlu2 %908 }
 0x1ef   : > { %v16522_v5 = vsel %vm10185_vm9, 4294967295, %v16521_v5  ;;  %vm16526_vm7 = vmmov %vm16518_vm4  ;;  %6635 = vmatpush.bf16.msk.msra.mxu0 %vm10185_vm9, %v16195_v60  ;;  %vm16528_vm6 = vcmp.eq.s32.totalorder %v8973_v29, %v9871_v19  ;;  %v16529_v35 = vmov 0  ;;  %vm16534_vm10 = vcmask 1022976  }
 0x1f0   : > { %16523 = vst [vmem:[#allocation200_spill] sm:$0xff] %v16522_v5  ;;  %v785_v4 = vsel %vm16526_vm7, %v9836_v38, %v775_v63  ;;  %vm10204_vm15 = vmpackc.low %vm16528_vm6, %vm16527_vm5  ;;  %v715_v63 = vsel %vm16534_vm10, %v8816_v61, %v9873_v25  ;;  %v733_v5 = vadd.f32 %v717_v62, %v665_v44  ;;  %vm16535_vm5 = vcmp.eq.s32.totalorder %v8844_v7, %v9871_v19  ;;  %v16540_v61 = vld [vmem:[#allocation48_spill] sm:$0xff] }
 0x1f1   : > { %v16530_v35 = vsel %vm10204_vm15, 4294967295, %v16529_v35  ;;  %6651 = vmatpush.bf16.msk.msra.mxu1 %vm10204_vm15, %v16195_v60  ;;  %vm16536_vm6 = vcmp.eq.s32.totalorder %v8847_v30, %v9871_v19  ;;  %v16537_v34 = vmov 0  ;;  %vm16541_vm9 = vmmov %vm16534_vm10  ;;  %v802_v62 = vadd.f32 %v786_v28, %v734_v46  ;;  %v10254_v28 = vpop.permute.xlu0 %910 }
 0x1f2   : > { %16531 = vst [vmem:[#allocation27_spill] sm:$0xff] %v16530_v35  ;;  %vm10226_vm4 = vmpackc.low %vm16536_vm6, %vm16535_vm5  ;;  %v716_v44 = vsel %vm16541_vm9, %v9873_v25, %v9721_v15  ;;  %vm16542_vm5 = vcmp.eq.s32.totalorder %v16524_v32, %v9871_v19  ;;  %vm16543_vm6 = vcmp.eq.s32.totalorder %v16525_v37, %v9871_v19  ;;  %v16544_v35 = vmov 0  ;;  %v16548_v15 = vld [vmem:[#allocation33_spill] sm:$0xff] }
 0x1f3   : > { %v16538_v34 = vsel %vm10226_vm4, 4294967295, %v16537_v34  ;;  %6665 = vmatpush.bf16.msk.msra.mxu2 %vm10226_vm4, %v16195_v60  ;;  %vm10246_vm15 = vmpackc.low %vm16543_vm6, %vm16542_vm5  ;;  %v664_v25 = vadd.f32 %v648_v1, %v596_v6  ;;  %v801_v46 = vadd.f32 %v785_v4, %v733_v5  ;;  %vm16549_vm5 = vcmp.eq.s32.totalorder %v16532_v21, %v9871_v19  ;;  %v16554_v6 = vld [vmem:[#allocation34_spill] sm:$0xff]  ;;  %v16555_v1 = vld [vmem:[#allocation36_spill] sm:$0xff] }
 0x1f4   : > { %16539 = vst [vmem:[#allocation46_spill] sm:$0xff] %v16538_v34  ;;  %v16545_v35 = vsel %vm10246_vm15, 4294967295, %v16544_v35  ;;  %v841_v34 = vpop.permute.xlu1 %840  ;;  %6681 = vmatpush.bf16.msk.msra.mxu3 %vm10246_vm15, %v16195_v60  ;;  %vm16550_vm6 = vcmp.eq.s32.totalorder %v16533_v51, %v9871_v19  ;;  %v16551_v37 = vmov 0  ;;  %v731_v5 = vadd.f32 %v715_v63, %v663_v9 }
 0x1f5   : > { %16546 = vst [vmem:[#allocation47_spill] sm:$0xff] %v16545_v35  ;;  %vm10265_vm10 = vmpackc.low %vm16550_vm6, %vm16549_vm5  ;;  %vm16556_vm4 = vcmask 1006592   ;;  %vm16557_vm5 = vcmp.eq.s32.totalorder %v9023_v39, %v9871_v19  ;;  %vm16558_vm6 = vcmp.eq.s32.totalorder %v16540_v61, %v9871_v19  ;;  %v16559_v35 = vmov 0  ;;  %v16568_v61 = vld [vmem:[#allocation60_spill] sm:$0xff] }
 0x1f6   : > { %v16552_v37 = vsel %vm10265_vm10, 4294967295, %v16551_v37  ;;  %v853_v4 = vsel %vm16556_vm4, %v841_v34, %v10042_v59  ;;  %6637 = vmatpush.bf16.msk.msra.mxu0 %vm10265_vm10, %v16195_v60  ;;  %vm10284_vm15 = vmpackc.low %vm16558_vm6, %vm16557_vm5  ;;  %vm16563_vm5 = vcmp.eq.s32.totalorder %v16547_v23, %v9871_v19  ;;  %vm16564_vm6 = vcmp.eq.s32.totalorder %v16548_v15, %v9871_v19 }
 0x1f7   : > { %16553 = vst [vmem:[#allocation201_spill] sm:$0xff] %v16552_v37  ;;  %v16560_v35 = vsel %vm10284_vm15, 4294967295, %v16559_v35  ;;  %vm16562_vm9 = vmmov %vm16556_vm4  ;;  %v869_v63 = vadd.f32 %v853_v4, %v801_v46  ;;  %6653 = vmatpush.bf16.msk.msra.mxu1 %vm10284_vm15, %v16195_v60  ;;  %v16565_v37 = vmov 0  ;;  %vm16570_vm7 = vcmask 998400   ;;  %v16576_v4 = vld [vmem:[#allocation41_spill] sm:$0xff] }
 0x1f8   : > { %16561 = vst [vmem:[#allocation202_spill] sm:$0xff] %v16560_v35  ;;  %v854_v9 = vsel %vm16562_vm9, %v10042_v59, %v10100_v2  ;;  %vm10304_vm10 = vmpackc.low %vm16564_vm6, %vm16563_vm5  ;;  %v16569_v59 = vld [vmem:[#allocation62_spill] sm:$0xff]  ;;  %v921_v2 = vsel %vm16570_vm7, %v10215_v47, %v10254_v28  ;;  %vm16571_vm5 = vcmp.eq.s32.totalorder %v16554_v6, %v9871_v19  ;;  %vm16572_vm6 = vcmp.eq.s32.totalorder %v16555_v1, %v9871_v19 }
 0x1f9   : > { %v16566_v37 = vsel %vm10304_vm10, 4294967295, %v16565_v37  ;;  %vm1170_vm9 = vcmp.eq.s32.totalorder %v16569_v59, %v9871_v19  ;;  %6667 = vmatpush.bf16.msk.msra.mxu2 %vm10304_vm10, %v16195_v60  ;;  %vm10324_vm15 = vmpackc.low %vm16572_vm6, %vm16571_vm5  ;;  %v16573_v46 = vmov 0  ;;  %vm1238_vm4 = vcmp.eq.s32.totalorder %v16576_v4, %v9871_v19  ;;  %v16577_v35 = vld [vmem:[#allocation42_spill] sm:$0xff] }
 0x1fa   : > { %16567 = vst [vmem:[#allocation203_spill] sm:$0xff] %v16566_v37  ;;  %v16574_v46 = vsel %vm10324_vm15, 4294967295, %v16573_v46  ;;  %vm1242_vm7 = vcmp.eq.s32.totalorder %v16577_v35, %v9871_v19  ;;  %v10332_v59 = vadd.f32 %v854_v9, %v802_v62  ;;  %v732_v37 = vadd.f32 %v716_v44, %v664_v25  ;;  %6683 = vmatpush.bf16.msk.msra.mxu3 %vm10324_vm15, %v16195_v60  ;;  %v16583_v62 = vld [vmem:[#allocation43_spill] sm:$0xff]  ;;  %v16584_v44 = vld [vmem:[#allocation45_spill] sm:$0xff] }
 0x1fb   : > { %16575 = vst [vmem:[#allocation204_spill] sm:$0xff] %v16574_v46  ;;  %v10334_v15 = vadd.f32 %v921_v2, %v869_v63  ;;  %vm16578_vm5 = vcmp.eq.s32.totalorder %v9083_v3, %v9871_v19  ;;  %vm16579_vm6 = vcmp.eq.s32.totalorder %v9086_v12, %v9871_v19  ;;  %v16580_v4 = vmov 0  ;;  %v16589_v9 = vld [vmem:[#allocation69_spill] sm:$0xff]  ;;  %v16590_v63 = vld [vmem:[#allocation70_spill] sm:$0xff]  ;;  %vm10370_vm12 = vmpackc.low %vm1242_vm7, %vm1238_vm4  ;;  %v907_v12 = vpop.permute.xlu2 %906 }
 0x1fc   : > { %vm10345_vm10 = vmpackc.low %vm16579_vm6, %vm16578_vm5  ;;  %vm1302_vm13 = vcmp.eq.s32.totalorder %v16583_v62, %v9871_v19  ;;  %vm1306_vm2 = vcmp.eq.s32.totalorder %v16584_v44, %v9871_v19  ;;  %vm16585_vm15 = vcmp.eq.s32.totalorder %v16568_v61, %v9871_v19  ;;  %v16586_v25 = vmov 0  ;;  %v16595_v46 = vld [vmem:[#allocation28_spill] sm:$0xff]  ;;  %v16601_v35 = vld [vmem:[#allocation51_spill] sm:$0xff] }
 0x1fd   : > { %v16581_v4 = vsel %vm10345_vm10, 4294967295, %v16580_v4  ;;  %6639 = vmatpush.bf16.msk.msra.mxu0 %vm10345_vm10, %v16195_v60  ;;  %vm10359_vm3 = vmpackc.low %vm1170_vm9, %vm16585_vm15  ;;  %v16591_v2 = vmov 0  ;;  %vm16596_vm5 = vcmask 1014784   ;;  %6669 = vmatpush.bf16.msk.msra.mxu2 %vm10370_vm12, %v16195_v60  ;;  %v16602_v61 = vld [vmem:[#allocation52_spill] sm:$0xff]  ;;  %vm16610_vm7 = vcmask 1006592  }
 0x1fe   : > { %16582 = vst [vmem:[#allocation205_spill] sm:$0xff] %v16581_v4  ;;  %v16587_v25 = vsel %vm10359_vm3, 4294967295, %v16586_v25  ;;  %6655 = vmatpush.bf16.msk.msra.mxu1 %vm10359_vm3, %v16195_v60  ;;  %v16592_v2 = vsel %vm10370_vm12, 4294967295, %v16591_v2  ;;  %v16594_v4 = vld [vmem:[#allocation73_spill] sm:$0xff]  ;;  %v783_v44 = vsel %vm16596_vm5, %v16595_v46, %v9964_v58  ;;  %vm16597_vm6 = vmmov %vm16596_vm5  ;;  %v839_v46 = vpop.permute.xlu1 %838 }
 0x1ff   : > { %16588 = vst [vmem:[#allocation206_spill] sm:$0xff] %v16587_v25  ;;  %v784_v62 = vsel %vm16597_vm6, %v9964_v58, %v9836_v38  ;;  %vm10387_vm4 = vmpackc.low %vm1306_vm2, %vm1302_vm13  ;;  %v16598_v25 = vmov 0  ;;  %v799_v3 = vadd.f32 %v783_v44, %v731_v5  ;;  %vm16603_vm2 = vcmp.eq.s32.totalorder %v16589_v9, %v9871_v19  ;;  %v16608_v38 = vld [vmem:[#allocation53_spill] sm:$0xff]  ;;  %v16609_v5 = vld [vmem:[#allocation55_spill] sm:$0xff] }
 0x200   : > { %16593 = vst [vmem:[#allocation69_spill] sm:$0xff] %v16592_v2  ;;  %v16599_v25 = vsel %vm10387_vm4, 4294967295, %v16598_v25  ;;  %v800_v1 = vadd.f32 %v784_v62, %v732_v37  ;;  %6685 = vmatpush.bf16.msk.msra.mxu3 %vm10387_vm4, %v16195_v60  ;;  %vm16604_vm13 = vcmp.eq.s32.totalorder %v16590_v63, %v9871_v19  ;;  %v16605_v58 = vmov 0  ;;  %vm16611_vm15 = vmmov %vm16610_vm7  ;;  %v16650_v2 = vld [vmem:[#allocation95_spill] sm:$0xff] }
 0x201   : > { %16600 = vst [vmem:[#allocation70_spill] sm:$0xff] %v16599_v25  ;;  %vm10404_vm5 = vmpackc.low %vm16604_vm13, %vm16603_vm2  ;;  %v851_v37 = vsel %vm16610_vm7, %v9380_v11, %v839_v46  ;;  %v852_v62 = vsel %vm16611_vm15, %v839_v46, %v841_v34  ;;  %vm16612_vm2 = vcmp.eq.s32.totalorder %v9208_v57, %v9871_v19  ;;  %vm16613_vm13 = vcmp.eq.s32.totalorder %v16594_v4, %v9871_v19  ;;  %v16638_v25 = vld [vmem:[#allocation67_spill] sm:$0xff] }
 0x202   : > { %v16606_v58 = vsel %vm10404_vm5, 4294967295, %v16605_v58  ;;  %6641 = vmatpush.bf16.msk.msra.mxu0 %vm10404_vm5, %v16195_v60  ;;  %vm10424_vm4 = vmpackc.low %vm16613_vm13, %vm16612_vm2  ;;  %v16614_v44 = vmov 0  ;;  %v867_v11 = vadd.f32 %v851_v37, %v799_v3  ;;  %v868_v34 = vadd.f32 %v852_v62, %v800_v1  ;;  %v16622_v3 = vld [vmem:[#allocation85_spill] sm:$0xff]  ;;  %v16623_v1 = vld [vmem:[#allocation96_spill] sm:$0xff] }
 0x203   : > { %16607 = vst [vmem:[#allocation73_spill] sm:$0xff] %v16606_v58  ;;  %v16615_v44 = vsel %vm10424_vm4, 4294967295, %v16614_v44  ;;  %6657 = vmatpush.bf16.msk.msra.mxu1 %vm10424_vm4, %v16195_v60  ;;  %vm16617_vm7 = vcmp.eq.s32.totalorder %v16601_v35, %v9871_v19  ;;  %vm16618_vm2 = vcmp.eq.s32.totalorder %v16602_v61, %v9871_v19  ;;  %v16619_v46 = vmov 0  ;;  %v16631_v58 = vld [vmem:[#allocation65_spill] sm:$0xff] }
 0x204   : > { %16616 = vst [vmem:[#allocation28_spill] sm:$0xff] %v16615_v44  ;;  %vm10441_vm13 = vmpackc.low %vm16618_vm2, %vm16617_vm7  ;;  %vm1154_vm15 = vcmp.eq.s32.totalorder %v16622_v3, %v9871_v19  ;;  %vm16624_vm6 = vcmask 998400   ;;  %vm16626_vm7 = vcmp.eq.s32.totalorder %v16608_v38, %v9871_v19  ;;  %vm16627_vm2 = vcmp.eq.s32.totalorder %v16609_v5, %v9871_v19 }
 0x205   : > { %v16620_v46 = vsel %vm10441_vm13, 4294967295, %v16619_v46  ;;  %v919_v37 = vsel %vm16624_vm6, %v16623_v1, %v907_v12  ;;  %vm16625_vm4 = vmmov %vm16624_vm6  ;;  %6671 = vmatpush.bf16.msk.msra.mxu2 %vm10441_vm13, %v16195_v60  ;;  %v16628_v44 = vmov 0  ;;  %vm1222_vm6 = vcmp.eq.s32.totalorder %v16631_v58, %v9871_v19  ;;  %v16632_v1 = vld [vmem:[#allocation66_spill] sm:$0xff] }
 0x206   : > { %16621 = vst [vmem:[#allocation51_spill] sm:$0xff] %v16620_v46  ;;  %v920_v62 = vsel %vm16625_vm4, %v907_v12, %v10215_v47  ;;  %vm10462_vm9 = vmpackc.low %vm16627_vm2, %vm16626_vm7  ;;  %vm1226_vm4 = vcmp.eq.s32.totalorder %v16632_v1, %v9871_v19  ;;  %v935_v12 = vadd.f32 %v919_v37, %v867_v11  ;;  %vm16633_vm13 = vcmp.eq.s32.totalorder %v9254_v26, %v9871_v19  ;;  %v16639_v11 = vld [vmem:[#allocation68_spill] sm:$0xff]  ;;  %v16644_v37 = vld [vmem:[#allocation91_spill] sm:$0xff] }
 0x207   : > { %v16629_v44 = vsel %vm10462_vm9, 4294967295, %v16628_v44  ;;  %v936_v47 = vadd.f32 %v920_v62, %v868_v34  ;;  %6687 = vmatpush.bf16.msk.msra.mxu3 %vm10462_vm9, %v16195_v60  ;;  %vm16634_vm7 = vcmp.eq.s32.totalorder %v9257_v36, %v9871_v19  ;;  %v16635_v46 = vmov 0  ;;  %v16659_v1 = vld [vmem:[#allocation100_spill] sm:$0xff]  ;;  %v16660_v58 = vld [vmem:[#allocation102_spill] sm:$0xff] }
 0x208   : > { %16630 = vst [vmem:[#allocation52_spill] sm:$0xff] %v16629_v44  ;;  %vm10479_vm2 = vmpackc.low %vm16634_vm7, %vm16633_vm13  ;;  %vm1286_vm5 = vcmp.eq.s32.totalorder %v16638_v25, %v9871_v19  ;;  %vm1290_vm12 = vcmp.eq.s32.totalorder %v16639_v11, %v9871_v19  ;;  %vm16640_vm9 = vcmp.eq.s32.totalorder %v9269_v33, %v9871_v19  ;;  %v16641_v34 = vmov 0  ;;  %v16649_v44 = vld [vmem:[#allocation93_spill] sm:$0xff]  ;;  %v913_v11 = vpop.permute.xlu1 %912  ;;  %v16674_v33 = vld [vmem:[#allocation78_spill] sm:$0xff] }
 0x209   : > { %v16636_v46 = vsel %vm10479_vm2, 4294967295, %v16635_v46  ;;  %6643 = vmatpush.bf16.msk.msra.mxu0 %vm10479_vm2, %v16195_v60  ;;  %vm10493_vm3 = vmpackc.low %vm1154_vm15, %vm16640_vm9  ;;  %vm1078_vm13 = vcmp.eq.s32.totalorder %v8749_v43, %v9871_v19  ;;  %vm1082_vm7 = vcmp.eq.s32.totalorder %v16644_v37, %v9871_v19  ;;  %v10501_v62 = vpack.c.bf16 %v936_v47, %v935_v12  ;;  %v16655_v43 = vld [vmem:[#allocation99_spill] sm:$0xff] }
 0x20a   : > { %16637 = vst [vmem:[#allocation53_spill] sm:$0xff] %v16636_v46  ;;  %v16642_v34 = vsel %vm10493_vm3, 4294967295, %v16641_v34  ;;  %6659 = vmatpush.bf16.msk.msra.mxu1 %vm10493_vm3, %v16195_v60  ;;  %vm10506_vm2 = vmpackc.low %vm1226_vm4, %vm1222_vm6  ;;  %v16646_v46 = vmov 0  ;;  %vm1146_vm15 = vcmp.eq.s32.totalorder %v16650_v2, %v9871_v19  ;;  %v16651_v37 = vmov 0 }
 0x20b   : > { %16643 = vst [vmem:[#allocation96_spill] sm:$0xff] %v16642_v34  ;;  %v16647_v46 = vsel %vm10506_vm2, 4294967295, %v16646_v46  ;;  %6673 = vmatpush.bf16.msk.msra.mxu2 %vm10506_vm2, %v16195_v60  ;;  %vm10517_vm10 = vmpackc.low %vm1290_vm12, %vm1286_vm5  ;;  %v16654_v34 = vld [vmem:[#allocation98_spill] sm:$0xff]  ;;  %v16656_v2 = vmov 0  ;;  %v2878_v25 = vunpack.c.h.bf16 %v10501_v62  ;;  %vm1454_vm12 = vcmp.eq.s32.totalorder %v16659_v1, %v9871_v19  ;;  %v16667_v1 = vld [vmem:[#allocation75_spill] sm:$0xff] }
 0x20c   : > { %16645 = vst [vmem:[#allocation207_spill] sm:$0xff] %v10501_v62  ;;  %v16652_v37 = vsel %vm10517_vm10, 4294967295, %v16651_v37  ;;  %6689 = vmatpush.bf16.msk.msra.mxu3 %vm10517_vm10, %v16195_v60  ;;  %vm10528_vm9 = vmpackc.low %vm1082_vm7, %vm1078_vm13  ;;  %vm1458_vm5 = vcmp.eq.s32.totalorder %v16660_v58, %v9871_v19  ;;  %vm16661_vm4 = vcmask 998400   ;;  %vm16662_vm13 = vcmp.eq.s32.totalorder %v16649_v44, %v9871_v19  ;;  %v16668_v58 = vld [vmem:[#allocation77_spill] sm:$0xff] }
 0x20d   : > { %16648 = vst [vmem:[#allocation208_spill] sm:$0xff] %v16647_v46  ;;  %v16657_v2 = vsel %vm10528_vm9, 4294967295, %v16656_v2  ;;  %v2877_v46 = vunpack.c.l.bf16 %v10501_v62  ;;  %v922_v3 = vsel %vm16661_vm4, %v10254_v28, %v913_v11  ;;  %6645 = vmatpush.bf16.msk.msra.mxu0 %vm10528_vm9, %v16195_v60  ;;  %vm10546_vm7 = vmpackc.low %vm1146_vm15, %vm16662_vm13  ;;  %v16666_v62 = vld [vmem:[#allocation74_spill] sm:$0xff]  ;;  %vm16669_vm15 = vcmp.eq.s32.totalorder %v16654_v34, %v9871_v19 }
 0x20e   : > { %16653 = vst [vmem:[#allocation209_spill] sm:$0xff] %v16652_v37  ;;  %v16663_v37 = vmov 0  ;;  %v938_v28 = vadd.f32 %v922_v3, %v10332_v59  ;;  %6661 = vmatpush.bf16.msk.msra.mxu1 %vm10546_vm7, %v16195_v60  ;;  %vm16670_vm13 = vcmp.eq.s32.totalorder %v16655_v43, %v9871_v19  ;;  %v16671_v44 = vmov 0  ;;  %vm10572_vm10 = vmpackc.low %vm1458_vm5, %vm1454_vm12  ;;  %v16680_v3 = vld [vmem:[#allocation108_spill] sm:$0xff]  ;;  %v16704_v34 = vld [vmem:[#allocation110_spill] sm:$0xff] }
 0x20f   : > { %16658 = vst [vmem:[#allocation210_spill] sm:$0xff] %v16657_v2  ;;  %v16664_v37 = vsel %vm10546_vm7, 4294967295, %v16663_v37  ;;  %v2885_v11 = vsub.f32 %v935_v12, %v2877_v46  ;;  %v2886_v2 = vsub.f32 %v936_v47, %v2878_v25  ;;  %vm10566_vm6 = vmpackc.low %vm16670_vm13, %vm16669_vm15  ;;  %vm1282_vm4 = vcmp.eq.s32.totalorder %v16674_v33, %v9871_v19  ;;  %v16678_v46 = vld [vmem:[#allocation105_spill] sm:$0xff]  ;;  %v16679_v25 = vld [vmem:[#allocation106_spill] sm:$0xff] }
 0x210   : > { %16665 = vst [vmem:[#allocation211_spill] sm:$0xff] %v16664_v37  ;;  %v16672_v44 = vsel %vm10566_vm6, 4294967295, %v16671_v44  ;;  %v16675_v59 = vmov 0  ;;  %vm1386_vm9 = vcmp.eq.s32.totalorder %v16679_v25, %v9871_v19  ;;  %v10583_v12 = vpack.c.bf16 %v938_v28, %v10334_v15  ;;  %v16687_v25 = vld [vmem:[#allocation109_spill] sm:$0xff] }
 0x211   : > { %16673 = vst [vmem:[#allocation212_spill] sm:$0xff] %v16672_v44  ;;  %v16676_v59 = vsel %vm10572_vm10, 4294967295, %v16675_v59  ;;  %v10585_v47 = vpack.c.bf16 %v2885_v11, %v2885_v11  ;;  %v10587_v37 = vpack.c.bf16 %v2886_v2, %v2886_v2  ;;  %vm16682_vm12 = vcmp.eq.s32.totalorder %v16666_v62, %v9871_v19  ;;  %v16692_v11 = vld [vmem:[#allocation87_spill] sm:$0xff] }
 0x212   : > { %16677 = vst [vmem:[#allocation213_spill] sm:$0xff] %v16676_v59  ;;  %vm16683_vm5 = vcmp.eq.s32.totalorder %v16667_v1, %v9871_v19  ;;  %v16684_v33 = vmov 0  ;;  %vm1450_vm13 = vcmp.eq.s32.totalorder %v16687_v25, %v9871_v19  ;;  %vm16688_vm2 = vcmp.eq.s32.totalorder %v16668_v58, %v9871_v19  ;;  %v16693_v1 = vld [vmem:[#allocation88_spill] sm:$0xff]  ;;  %v16698_v25 = vld [vmem:[#allocation89_spill] sm:$0xff]  ;;  %v16699_v58 = vld [vmem:[#allocation90_spill] sm:$0xff] }
 0x213   : > { %16681 = vst [vmem:[#allocation214_spill] sm:$0xff] %v10583_v12  ;;  %vm10595_vm15 = vmpackc.low %vm16683_vm5, %vm16682_vm12  ;;  %v16689_v2 = vmov 0  ;;  %vm1206_vm12 = vcmp.eq.s32.totalorder %v16692_v11, %v9871_v19  ;;  %v2880_v62 = vunpack.c.h.bf16 %v10583_v12  ;;  %2957 = vmatmul.bf16.vlgmr.msrb.gmra.mxu0 %v10585_v47  ;;  %2970 = vmatmul.bf16.vlgmr.msrb.gmra.mxu1 %v10587_v37  ;;  %v2879_v43 = vunpack.c.l.bf16 %v10583_v12  ;;  %v16705_v12 = vld [vmem:[#allocation111_spill] sm:$0xff] }
 0x214   : > { %v16685_v33 = vsel %vm10595_vm15, 4294967295, %v16684_v33  ;;  %6675 = vmatpush.bf16.msk.msra.mxu2 %vm10595_vm15, %v16195_v60  ;;  %vm10607_vm7 = vmpackc.low %vm1282_vm4, %vm16688_vm2  ;;  %vm16694_vm15 = vcmp.eq.s32.totalorder %v16678_v46, %v9871_v19  ;;  %vm1274_vm4 = vcmp.eq.s32.totalorder %v16699_v58, %v9871_v19  ;;  %6695 = vmatpush.bf16.msk.msrb.mxu0 %vm10566_vm6, %v16195_v60  ;;  %v16701_v46 = vmov 0 }
 0x215   : > { %16686 = vst [vmem:[#allocation215_spill] sm:$0xff] %v16685_v33  ;;  %v16690_v2 = vsel %vm10607_vm7, 4294967295, %v16689_v2  ;;  %vm10621_vm3 = vmpackc.low %vm1386_vm9, %vm16694_vm15  ;;  %v16695_v33 = vmov 0  ;;  %6711 = vmatpush.bf16.msk.msrb.mxu1 %vm10572_vm10, %v16195_v60  ;;  %vm16700_vm9 = vcmp.eq.s32.totalorder %v16680_v3, %v9871_v19  ;;  %vm1518_vm2 = vcmp.eq.s32.totalorder %v16704_v34, %v9871_v19  ;;  %6691 = vmatpush.bf16.msk.msra.mxu3 %vm10607_vm7, %v16195_v60  ;;  %v16710_v34 = vld [vmem:[#allocation112_spill] sm:$0xff] }
 0x216   : > { %16691 = vst [vmem:[#allocation216_spill] sm:$0xff] %v16690_v2  ;;  %v16696_v33 = vsel %vm10621_vm3, 4294967295, %v16695_v33  ;;  %vm10639_vm15 = vmpackc.low %vm1450_vm13, %vm16700_vm9  ;;  %vm1522_vm5 = vcmp.eq.s32.totalorder %v16705_v12, %v9871_v19  ;;  %v2888_v58 = vsub.f32 %v938_v28, %v2880_v62  ;;  %vm16706_vm13 = vcmp.eq.s32.totalorder %v16693_v1, %v9871_v19  ;;  %v16711_v62 = vld [vmem:[#allocation114_spill] sm:$0xff]  ;;  %v16716_v2 = vld [vmem:[#allocation116_spill] sm:$0xff] }
 0x217   : > { %16697 = vst [vmem:[#allocation217_spill] sm:$0xff] %v16696_v33  ;;  %v16702_v46 = vsel %vm10639_vm15, 4294967295, %v16701_v46  ;;  %vm10656_vm9 = vmpackc.low %vm16706_vm13, %vm1206_vm12  ;;  %v16707_v59 = vmov 0  ;;  %v2887_v44 = vsub.f32 %v10334_v15, %v2879_v43  ;;  %vm1582_vm10 = vcmp.eq.s32.totalorder %v16710_v34, %v9871_v19  ;;  %v16717_v43 = vld [vmem:[#allocation117_spill] sm:$0xff]  ;;  %v16721_v34 = vld [vmem:[#allocation119_spill] sm:$0xff] }
 0x218   : > { %16703 = vst [vmem:[#allocation218_spill] sm:$0xff] %v16702_v46  ;;  %v16708_v59 = vsel %vm10656_vm9, 4294967295, %v16707_v59  ;;  %vm1586_vm6 = vcmp.eq.s32.totalorder %v16711_v62, %v9871_v19  ;;  %6677 = vmatpush.bf16.msk.msra.mxu2 %vm10656_vm9, %v16195_v60  ;;  %vm16712_vm7 = vcmp.eq.s32.totalorder %v16698_v25, %v9871_v19  ;;  %v16713_v28 = vmov 0  ;;  %vm10683_vm1 = vmpackc.low %vm1522_vm5, %vm1518_vm2  ;;  %v16722_v12 = vld [vmem:[#allocation120_spill] sm:$0xff]  ;;  %6697 = vmatpush.bf16.msk.msrb.mxu0 %vm10621_vm3, %v16195_v60  ;;  %v16731_v46 = vld [vmem:[#allocation125_spill] sm:$0xff] }
 0x219   : > { %16709 = vst [vmem:[#allocation219_spill] sm:$0xff] %v16708_v59  ;;  %vm10671_vm8 = vmpackc.low %vm1274_vm4, %vm16712_vm7  ;;  %vm1374_vm12 = vcmp.eq.s32.totalorder %v16716_v2, %v9871_v19  ;;  %vm1378_vm13 = vcmp.eq.s32.totalorder %v16717_v43, %v9871_v19  ;;  %v10679_v15 = vpack.c.bf16 %v2888_v58, %v2888_v58  ;;  %v10681_v62 = vpack.c.bf16 %v2887_v44, %v2887_v44  ;;  %v16726_v44 = vld [vmem:[#allocation121_spill] sm:$0xff]  ;;  %v16783_v43 = vld [vmem:[#allocation160_spill] sm:$0xff] }
 0x21a   : > { %v16714_v28 = vsel %vm10671_vm8, 4294967295, %v16713_v28  ;;  %v16718_v59 = vmov 0  ;;  %vm1438_vm7 = vcmp.eq.s32.totalorder %v16721_v34, %v9871_v19  ;;  %vm1442_vm4 = vcmp.eq.s32.totalorder %v16722_v12, %v9871_v19  ;;  %6713 = vmatpush.bf16.msk.msrb.mxu1 %vm10639_vm15, %v16195_v60  ;;  %vm10697_vm9 = vmpackc.low %vm1586_vm6, %vm1582_vm10  ;;  %v16727_v34 = vld [vmem:[#allocation123_spill] sm:$0xff]  ;;  %6693 = vmatpush.bf16.msk.msra.mxu3 %vm10671_vm8, %v16195_v60  ;;  %v16732_v12 = vld [vmem:[#allocation128_spill] sm:$0xff] }
 0x21b   : > { %16715 = vst [vmem:[#allocation220_spill] sm:$0xff] %v16714_v28  ;;  %v16719_v59 = vsel %vm10683_vm1, 4294967295, %v16718_v59  ;;  %v16723_v58 = vmov 0  ;;  %vm1510_vm5 = vcmp.eq.s32.totalorder %v16726_v44, %v9871_v19  ;;  %vm1514_vm2 = vcmp.eq.s32.totalorder %v16727_v34, %v9871_v19  ;;  %2983 = vmatmul.bf16.vlgmr.msrb.gmra.mxu2 %v10681_v62  ;;  %vm10709_vm3 = vmpackc.low %vm1378_vm13, %vm1374_vm12  ;;  %2996 = vmatmul.bf16.vlgmr.msrb.gmra.mxu3 %v10679_v15  ;;  %v16736_v34 = vld [vmem:[#allocation129_spill] sm:$0xff]  ;;  %v16737_v44 = vld [vmem:[#allocation130_spill] sm:$0xff] }
 0x21c   : > { %16720 = vst [vmem:[#allocation221_spill] sm:$0xff] %v16719_v59  ;;  %v16724_v58 = vsel %vm10697_vm9, 4294967295, %v16723_v58  ;;  %v16728_v33 = vmov 0  ;;  %vm1574_vm10 = vcmp.eq.s32.totalorder %v16731_v46, %v9871_v19  ;;  %vm1578_vm6 = vcmp.eq.s32.totalorder %v16732_v12, %v9871_v19  ;;  %6727 = vmatpush.bf16.msk.msrb.mxu2 %vm10683_vm1, %v16195_v60  ;;  %vm10721_vm15 = vmpackc.low %vm1442_vm4, %vm1438_vm7  ;;  %v16741_v59 = vld [vmem:[#allocation133_spill] sm:$0xff]  ;;  %6699 = vmatpush.bf16.msk.msrb.mxu0 %vm10709_vm3, %v16195_v60 }
 0x21d   : > { %16725 = vst [vmem:[#allocation222_spill] sm:$0xff] %v16724_v58  ;;  %v16729_v33 = vsel %vm10709_vm3, 4294967295, %v16728_v33  ;;  %v16733_v28 = vmov 0  ;;  %vm1366_vm12 = vcmp.eq.s32.totalorder %v16736_v34, %v9871_v19  ;;  %vm1370_vm13 = vcmp.eq.s32.totalorder %v16737_v44, %v9871_v19  ;;  %vm10732_vm8 = vmpackc.low %vm1514_vm2, %vm1510_vm5  ;;  %v16781_v34 = vld [vmem:[#allocation163_spill] sm:$0xff] }
 0x21e   : > { %16730 = vst [vmem:[#allocation223_spill] sm:$0xff] %v16729_v33  ;;  %v16734_v28 = vsel %vm10721_vm15, 4294967295, %v16733_v28  ;;  %6743 = vmatpush.bf16.msk.msrb.mxu3 %vm10697_vm9, %v16195_v60  ;;  %v16738_v12 = vmov 0  ;;  %vm1430_vm7 = vcmp.eq.s32.totalorder %v9606_v20, %v9871_v19  ;;  %vm1434_vm4 = vcmp.eq.s32.totalorder %v16741_v59, %v9871_v19  ;;  %6715 = vmatpush.bf16.msk.msrb.mxu1 %vm10721_vm15, %v16195_v60  ;;  %vm10746_vm1 = vmpackc.low %vm1578_vm6, %vm1574_vm10  ;;  %v16745_v20 = vld [vmem:[#allocation136_spill] sm:$0xff]  ;;  %v16749_v33 = vld [vmem:[#allocation138_spill] sm:$0xff] }
 0x21f   : > { %16735 = vst [vmem:[#allocation224_spill] sm:$0xff] %v16734_v28  ;;  %v16739_v12 = vsel %vm10732_vm8, 4294967295, %v16738_v12  ;;  %v16742_v58 = vmov 0  ;;  %vm1502_vm5 = vcmp.eq.s32.totalorder %v9612_v31, %v9871_v19  ;;  %vm1506_vm2 = vcmp.eq.s32.totalorder %v16745_v20, %v9871_v19  ;;  %vm10754_vm9 = vmpackc.low %vm1370_vm13, %vm1366_vm12  ;;  %v16750_v28 = vld [vmem:[#allocation143_spill] sm:$0xff]  ;;  %v16754_v20 = vld [vmem:[#allocation144_spill] sm:$0xff] }
 0x220   : > { %16740 = vst [vmem:[#allocation225_spill] sm:$0xff] %v16739_v12  ;;  %v16743_v58 = vsel %vm10746_vm1, 4294967295, %v16742_v58  ;;  %v16746_v59 = vmov 0  ;;  %vm1566_vm3 = vcmp.eq.s32.totalorder %v16749_v33, %v9871_v19  ;;  %vm1570_vm15 = vcmp.eq.s32.totalorder %v16750_v28, %v9871_v19  ;;  %6729 = vmatpush.bf16.msk.msrb.mxu2 %vm10732_vm8, %v16195_v60  ;;  %vm10765_vm10 = vmpackc.low %vm1434_vm4, %vm1430_vm7  ;;  %v16755_v31 = vld [vmem:[#allocation145_spill] sm:$0xff]  ;;  %v16759_v12 = vld [vmem:[#allocation146_spill] sm:$0xff]  ;;  %6701 = vmatpush.bf16.msk.msrb.mxu0 %vm10754_vm9, %v16195_v60 }
 0x221   : > { %16744 = vst [vmem:[#allocation226_spill] sm:$0xff] %v16743_v58  ;;  %v16747_v59 = vsel %vm10754_vm9, 4294967295, %v16746_v59  ;;  %v16751_v44 = vmov 0  ;;  %vm1358_vm6 = vcmp.eq.s32.totalorder %v16754_v20, %v9871_v19  ;;  %vm1362_vm12 = vcmp.eq.s32.totalorder %v16755_v31, %v9871_v19  ;;  %vm10776_vm13 = vmpackc.low %vm1506_vm2, %vm1502_vm5  ;;  %v16760_v33 = vld [vmem:[#allocation148_spill] sm:$0xff]  ;;  %v16764_v31 = vld [vmem:[#allocation149_spill] sm:$0xff] }
 0x222   : > { %16748 = vst [vmem:[#allocation227_spill] sm:$0xff] %v16747_v59  ;;  %v16752_v44 = vsel %vm10765_vm10, 4294967295, %v16751_v44  ;;  %6745 = vmatpush.bf16.msk.msrb.mxu3 %vm10746_vm1, %v16195_v60  ;;  %v16756_v28 = vmov 0  ;;  %vm1422_vm7 = vcmp.eq.s32.totalorder %v16759_v12, %v9871_v19  ;;  %vm1426_vm4 = vcmp.eq.s32.totalorder %v16760_v33, %v9871_v19  ;;  %6717 = vmatpush.bf16.msk.msrb.mxu1 %vm10765_vm10, %v16195_v60  ;;  %vm10790_vm8 = vmpackc.low %vm1570_vm15, %vm1566_vm3  ;;  %v16765_v12 = vld [vmem:[#allocation151_spill] sm:$0xff]  ;;  %v16769_v59 = vld [vmem:[#allocation154_spill] sm:$0xff] }
 0x223   : > { %16753 = vst [vmem:[#allocation228_spill] sm:$0xff] %v16752_v44  ;;  %v16757_v28 = vsel %vm10776_vm13, 4294967295, %v16756_v28  ;;  %v16761_v58 = vmov 0  ;;  %vm1494_vm5 = vcmp.eq.s32.totalorder %v16764_v31, %v9871_v19  ;;  %vm1498_vm2 = vcmp.eq.s32.totalorder %v16765_v12, %v9871_v19  ;;  %vm10798_vm1 = vmpackc.low %vm1362_vm12, %vm1358_vm6  ;;  %v16770_v44 = vld [vmem:[#allocation155_spill] sm:$0xff]  ;;  %v16774_v12 = vld [vmem:[#allocation156_spill] sm:$0xff]  ;;  %3022 = vmatmul.bf16.vlgmr.msra.gmra.mxu1 %v16783_v43 }
 0x224   : > { %16758 = vst [vmem:[#allocation229_spill] sm:$0xff] %v16757_v28  ;;  %v16762_v58 = vsel %vm10790_vm8, 4294967295, %v16761_v58  ;;  %v16766_v33 = vmov 0  ;;  %vm1558_vm9 = vcmp.eq.s32.totalorder %v16769_v59, %v9871_v19  ;;  %vm1562_vm10 = vcmp.eq.s32.totalorder %v16770_v44, %v9871_v19  ;;  %6731 = vmatpush.bf16.msk.msrb.mxu2 %vm10776_vm13, %v16195_v60  ;;  %vm10809_vm3 = vmpackc.low %vm1426_vm4, %vm1422_vm7  ;;  %v16775_v31 = vld [vmem:[#allocation159_spill] sm:$0xff]  ;;  %v16776_v59 = vld [vmem:[#allocation158_spill] sm:$0xff]  ;;  %6703 = vmatpush.bf16.msk.msrb.mxu0 %vm10798_vm1, %v16195_v60 }
 0x225   : > { %16763 = vst [vmem:[#allocation230_spill] sm:$0xff] %v16762_v58  ;;  %v16767_v33 = vsel %vm10798_vm1, 4294967295, %v16766_v33  ;;  %v16771_v20 = vmov 0  ;;  %vm1350_vm15 = vcmp.eq.s32.totalorder %v16774_v12, %v9871_v19  ;;  %vm1354_vm6 = vcmp.eq.s32.totalorder %v16775_v31, %v9871_v19  ;;  %3009 = vmatmul.bf16.vlgmr.msra.gmra.mxu0 %v16776_v59  ;;  %vm10821_vm12 = vmpackc.low %vm1498_vm2, %vm1494_vm5  ;;  %v16780_v28 = vld [vmem:[#allocation162_spill] sm:$0xff]  ;;  %v16782_v12 = vld [vmem:[#allocation21_spill] sm:$0xff] }
 0x226   : > { %16768 = vst [vmem:[#allocation231_spill] sm:$0xff] %v16767_v33  ;;  %v16772_v20 = vsel %vm10809_vm3, 4294967295, %v16771_v20  ;;  %6747 = vmatpush.bf16.msk.msrb.mxu3 %vm10790_vm8, %v16195_v60  ;;  %v16777_v44 = vmov 0  ;;  %vm1414_vm7 = vcmp.eq.s32.totalorder %v16780_v28, %v9871_v19  ;;  %vm1418_vm4 = vcmp.eq.s32.totalorder %v16781_v34, %v9871_v19  ;;  %vm10834_vm8 = vmpackc.low %vm1562_vm10, %vm1558_vm9  ;;  %v16787_v31 = vld [vmem:[#allocation164_spill] sm:$0xff]  ;;  %v16788_v28 = vld [vmem:[#allocation165_spill] sm:$0xff]  ;;  %6719 = vmatpush.bf16.msk.msrb.mxu1 %vm10809_vm3, %v16195_v60 }
 0x227   : > { %16773 = vst [vmem:[#allocation232_spill] sm:$0xff] %v16772_v20  ;;  %v16778_v44 = vsel %vm10821_vm12, 4294967295, %v16777_v44  ;;  %v1071_v46 = vadd.s32 256, %v16782_v12  ;;  %v16784_v58 = vmov 0  ;;  %vm1486_vm5 = vcmp.eq.s32.totalorder %v16787_v31, %v9871_v19  ;;  %vm10845_vm13 = vmpackc.low %vm1354_vm6, %vm1350_vm15  ;;  %v16792_v33 = vld [vmem:[#allocation167_spill] sm:$0xff]  ;;  %v16793_v34 = vld [vmem:[#allocation168_spill] sm:$0xff] }
 0x228   : > { %16779 = vst [vmem:[#allocation233_spill] sm:$0xff] %v16778_v44  ;;  %v16785_v58 = vsel %vm10834_vm8, 4294967295, %v16784_v58  ;;  %vm1490_vm2 = vcmp.eq.s32.totalorder %v16788_v28, %v9871_v19  ;;  %v16789_v12 = vmov 0  ;;  %vm1550_vm9 = vcmp.eq.s32.totalorder %v16792_v33, %v9871_v19  ;;  %6733 = vmatpush.bf16.msk.msrb.mxu2 %vm10821_vm12, %v16195_v60  ;;  %vm10856_vm1 = vmpackc.low %vm1418_vm4, %vm1414_vm7  ;;  %v16797_v20 = vld [vmem:[#allocation170_spill] sm:$0xff]  ;;  %v16798_v31 = vld [vmem:[#allocation171_spill] sm:$0xff]  ;;  %6705 = vmatpush.bf16.msk.msrb.mxu0 %vm10845_vm13, %v16195_v60 }
 0x229   : > { %16786 = vst [vmem:[#allocation234_spill] sm:$0xff] %v16785_v58  ;;  %v16790_v12 = vsel %vm10845_vm13, 4294967295, %v16789_v12  ;;  %vm1554_vm10 = vcmp.eq.s32.totalorder %v16793_v34, %v9871_v19  ;;  %v16794_v28 = vmov 0  ;;  %vm1342_vm15 = vcmp.eq.s32.totalorder %v16797_v20, %v9871_v19  ;;  %vm10867_vm3 = vmpackc.low %vm1490_vm2, %vm1486_vm5  ;;  %v16802_v44 = vld [vmem:[#allocation173_spill] sm:$0xff]  ;;  %v16803_v33 = vld [vmem:[#allocation174_spill] sm:$0xff] }
 0x22a   : > { %16791 = vst [vmem:[#allocation235_spill] sm:$0xff] %v16790_v12  ;;  %v16795_v28 = vsel %vm10856_vm1, 4294967295, %v16794_v28  ;;  %vm1346_vm6 = vcmp.eq.s32.totalorder %v16798_v31, %v9871_v19  ;;  %6749 = vmatpush.bf16.msk.msrb.mxu3 %vm10834_vm8, %v16195_v60  ;;  %v16799_v34 = vmov 0  ;;  %vm1406_vm7 = vcmp.eq.s32.totalorder %v16802_v44, %v9871_v19  ;;  %vm10880_vm12 = vmpackc.low %vm1554_vm10, %vm1550_vm9  ;;  %v16807_v58 = vld [vmem:[#allocation176_spill] sm:$0xff]  ;;  %v16808_v20 = vld [vmem:[#allocation178_spill] sm:$0xff]  ;;  %6721 = vmatpush.bf16.msk.msrb.mxu1 %vm10856_vm1, %v16195_v60 }
 0x22b   : > { %16796 = vst [vmem:[#allocation236_spill] sm:$0xff] %v16795_v28  ;;  %v16800_v34 = vsel %vm10867_vm3, 4294967295, %v16799_v34  ;;  %vm1410_vm4 = vcmp.eq.s32.totalorder %v16803_v33, %v9871_v19  ;;  %v10875_v2 = vmul.u32 2, %v1071_v46  ;;  %v16804_v31 = vmov 0  ;;  %v16809_v46 = vld [vmem:[#allocation140_spill] sm:$0xff]  ;;  %vm10892_vm8 = vmpackc.low %vm1346_vm6, %vm1342_vm15  ;;  %v16814_v44 = vld [vmem:[#allocation181_spill] sm:$0xff] }
 0x22c   : > { %16801 = vst [vmem:[#allocation237_spill] sm:$0xff] %v16800_v34  ;;  %v16805_v31 = vsel %vm10880_vm12, 4294967295, %v16804_v31  ;;  %vm1478_vm5 = vcmp.eq.s32.totalorder %v16807_v58, %v9871_v19  ;;  %vm1482_vm2 = vcmp.eq.s32.totalorder %v16808_v20, %v9871_v19  ;;  %3035 = vmatmul.bf16.vlgmr.msra.gmra.mxu2 %v16809_v46  ;;  %v16810_v33 = vmov 0  ;;  %v16813_v12 = vld [vmem:[#allocation180_spill] sm:$0xff]  ;;  %v16815_v58 = vld [vmem:[#allocation142_spill] sm:$0xff]  ;;  %vm10904_vm13 = vmpackc.low %vm1410_vm4, %vm1406_vm7  ;;  %6707 = vmatpush.bf16.msk.msrb.mxu0 %vm10892_vm8, %v16195_v60 }
 0x22d   : > { %16806 = vst [vmem:[#allocation238_spill] sm:$0xff] %v16805_v31  ;;  %v16811_v33 = vsel %vm10892_vm8, 4294967295, %v16810_v33  ;;  %vm1542_vm9 = vcmp.eq.s32.totalorder %v16813_v12, %v9871_v19  ;;  %vm1546_vm10 = vcmp.eq.s32.totalorder %v16814_v44, %v9871_v19  ;;  %3048 = vmatmul.bf16.vlgmr.msra.gmra.mxu3 %v16815_v58  ;;  %6735 = vmatpush.bf16.msk.msrb.mxu2 %vm10867_vm3, %v16195_v60  ;;  %v16816_v28 = vmov 0  ;;  %v16819_v20 = vld [vmem:[#allocation182_spill] sm:$0xff]  ;;  %v16820_v46 = vld [vmem:[#allocation183_spill] sm:$0xff]  ;;  %vm10915_vm1 = vmpackc.low %vm1482_vm2, %vm1478_vm5 }
 0x22e   : > { %16812 = vst [vmem:[#allocation239_spill] sm:$0xff] %v16811_v33  ;;  %v16817_v28 = vsel %vm10904_vm13, 4294967295, %v16816_v28  ;;  %vm1334_vm15 = vcmp.eq.s32.totalorder %v16819_v20, %v9871_v19  ;;  %vm1338_vm6 = vcmp.eq.s32.totalorder %v16820_v46, %v9871_v19  ;;  %6751 = vmatpush.bf16.msk.msrb.mxu3 %vm10880_vm12, %v16195_v60  ;;  %v16821_v44 = vmov 0  ;;  %v16824_v34 = vld [vmem:[#allocation184_spill] sm:$0xff]  ;;  %v16825_v12 = vld [vmem:[#allocation185_spill] sm:$0xff]  ;;  %vm10926_vm3 = vmpackc.low %vm1546_vm10, %vm1542_vm9  ;;  %6723 = vmatpush.bf16.msk.msrb.mxu1 %vm10904_vm13, %v16195_v60 }
 0x22f   : > { %16818 = vst [vmem:[#allocation240_spill] sm:$0xff] %v16817_v28  ;;  %v16822_v44 = vsel %vm10915_vm1, 4294967295, %v16821_v44  ;;  %vm1398_vm7 = vcmp.eq.s32.totalorder %v16824_v34, %v9871_v19  ;;  %vm1402_vm4 = vcmp.eq.s32.totalorder %v16825_v12, %v9871_v19  ;;  %v16826_v46 = vmov 0  ;;  %vm10937_vm12 = vmpackc.low %vm1338_vm6, %vm1334_vm15 }
 0x230   : > { %16823 = vst [vmem:[#allocation182_spill] sm:$0xff] %v16822_v44  ;;  %v16827_v46 = vsel %vm10926_vm3, 4294967295, %v16826_v46  ;;  %vm1135_vm5 = vcmp.eq.s32.totalorder %v8779_v54, %v10875_v2  ;;  %vm1139_vm2 = vcmp.eq.s32.totalorder %v8782_v17, %v10875_v2  ;;  %v16829_v31 = vmov 0  ;;  %vm10948_vm8 = vmpackc.low %vm1402_vm4, %vm1398_vm7  ;;  %6709 = vmatpush.bf16.msk.msrb.mxu0 %vm10937_vm12, %v16195_v60 }
 0x231   : > { %16828 = vst [vmem:[#allocation184_spill] sm:$0xff] %v16827_v46  ;;  %v16830_v31 = vsel %vm10937_vm12, 4294967295, %v16829_v31  ;;  %vm1199_vm9 = vcmp.eq.s32.totalorder %v8785_v55, %v10875_v2  ;;  %vm1203_vm10 = vcmp.eq.s32.totalorder %v8794_v56, %v10875_v2  ;;  %6737 = vmatpush.bf16.msk.msrb.mxu2 %vm10915_vm1, %v16195_v60  ;;  %v16832_v33 = vmov 0  ;;  %vm10959_vm13 = vmpackc.low %vm1139_vm2, %vm1135_vm5 }
 0x232   : > { %16831 = vst [vmem:[#allocation185_spill] sm:$0xff] %v16830_v31  ;;  %v16833_v33 = vsel %vm10948_vm8, 4294967295, %v16832_v33  ;;  %vm1470_vm15 = vcmp.eq.s32.totalorder %v9976_v40, %v9871_v19  ;;  %vm1474_vm6 = vcmp.eq.s32.totalorder %v9979_v45, %v9871_v19  ;;  %6753 = vmatpush.bf16.msk.msrb.mxu3 %vm10926_vm3, %v16195_v60  ;;  %v16835_v28 = vmov 0  ;;  %vm10970_vm1 = vmpackc.low %vm1203_vm10, %vm1199_vm9  ;;  %6725 = vmatpush.bf16.msk.msrb.mxu1 %vm10948_vm8, %v16195_v60 }
 0x233   : > { %16834 = vst [vmem:[#allocation241_spill] sm:$0xff] %v16833_v33  ;;  %v16836_v28 = vsel %vm10959_vm13, 4294967295, %v16835_v28  ;;  %vm1534_vm7 = vcmp.eq.s32.totalorder %v9982_v0, %v9871_v19  ;;  %vm1538_vm4 = vcmp.eq.s32.totalorder %v9985_v49, %v9871_v19  ;;  %v16838_v44 = vmov 0  ;;  %vm10984_vm3 = vmpackc.low %vm1474_vm6, %vm1470_vm15 }
 0x234   : > { %16837 = vst [vmem:[#allocation242_spill] sm:$0xff] %v16836_v28  ;;  %v16839_v44 = vsel %vm10970_vm1, 4294967295, %v16838_v44  ;;  %vm1127_vm5 = vcmp.eq.s32.totalorder %v8858_v24, %v10875_v2  ;;  %vm1131_vm2 = vcmp.eq.s32.totalorder %v8861_v14, %v10875_v2  ;;  %6759 = vmatpush.bf16.msk.msra.mxu0 %vm10959_vm13, %v16195_v60  ;;  %v16841_v31 = vmov 0  ;;  %vm10998_vm8 = vmpackc.low %vm1538_vm4, %vm1534_vm7 }
 0x235   : > { %16840 = vst [vmem:[#allocation243_spill] sm:$0xff] %v16839_v44  ;;  %v16842_v31 = vsel %vm10984_vm3, 4294967295, %v16841_v31  ;;  %vm1191_vm9 = vcmp.eq.s32.totalorder %v8864_v16, %v10875_v2  ;;  %vm1195_vm10 = vcmp.eq.s32.totalorder %v8886_v27, %v10875_v2  ;;  %6739 = vmatpush.bf16.msk.msrb.mxu2 %vm10984_vm3, %v16195_v60  ;;  %v16844_v28 = vmov 0  ;;  %3061 = vmatmul.bf16.vlgmr.msrb.gmra.mxu0 %v10585_v47 }
 0x236   : > { %16843 = vst [vmem:[#allocation244_spill] sm:$0xff] %v16842_v31  ;;  %6775 = vmatpush.bf16.msk.msra.mxu1 %vm10970_vm1, %v16195_v60  ;;  %v16845_v28 = vsel %vm10998_vm8, 4294967295, %v16844_v28  ;;  %vm1462_vm15 = vcmp.eq.s32.totalorder %v10064_v8, %v9871_v19  ;;  %vm1466_vm6 = vcmp.eq.s32.totalorder %v10067_v48, %v9871_v19  ;;  %6755 = vmatpush.bf16.msk.msrb.mxu3 %vm10998_vm8, %v16195_v60  ;;  %vm11010_vm1 = vmpackc.low %vm1131_vm2, %vm1127_vm5  ;;  %v16847_v44 = vmov 0 }
 0x237   : > { %16846 = vst [vmem:[#allocation245_spill] sm:$0xff] %v16845_v28  ;;  %v16848_v44 = vsel %vm11010_vm1, 4294967295, %v16847_v44  ;;  %vm1526_vm7 = vcmp.eq.s32.totalorder %v10080_v18, %v9871_v19  ;;  %vm1530_vm4 = vcmp.eq.s32.totalorder %v10083_v22, %v9871_v19  ;;  %3074 = vmatmul.bf16.vlgmr.msrb.gmra.mxu1 %v10587_v37  ;;  %vm11019_vm3 = vmpackc.low %vm1195_vm10, %vm1191_vm9  ;;  %v16850_v31 = vmov 0 }
 0x238   : > { %16849 = vst [vmem:[#allocation246_spill] sm:$0xff] %v16848_v44  ;;  %v16851_v31 = vsel %vm11019_vm3, 4294967295, %v16850_v31  ;;  %vm1263_vm8 = vcmp.eq.s32.totalorder %v8765_v10, %v10875_v2  ;;  %vm1267_vm5 = vcmp.eq.s32.totalorder %v8768_v50, %v10875_v2  ;;  %6761 = vmatpush.bf16.msk.msra.mxu0 %vm11010_vm1, %v16195_v60  ;;  %vm11030_vm2 = vmpackc.low %vm1466_vm6, %vm1462_vm15  ;;  %v16853_v28 = vmov 0 }
 0x239   : > { %16852 = vst [vmem:[#allocation247_spill] sm:$0xff] %v16851_v31  ;;  %v16854_v28 = vsel %vm11030_vm2, 4294967295, %v16853_v28  ;;  %vm1327_vm9 = vcmp.eq.s32.totalorder %v8771_v52, %v10875_v2  ;;  %vm1331_vm10 = vcmp.eq.s32.totalorder %v8774_v53, %v10875_v2  ;;  %6741 = vmatpush.bf16.msk.msrb.mxu2 %vm11030_vm2, %v16195_v60  ;;  %vm11044_vm13 = vmpackc.low %vm1530_vm4, %vm1526_vm7  ;;  %v16856_v19 = vmov 0 }
 0x23a   : > { %16855 = vst [vmem:[#allocation248_spill] sm:$0xff] %v16854_v28  ;;  %6777 = vmatpush.bf16.msk.msra.mxu1 %vm11019_vm3, %v16195_v60  ;;  %v16857_v19 = vsel %vm11044_vm13, 4294967295, %v16856_v19  ;;  %vm1119_vm15 = vcmp.eq.s32.totalorder %v8919_v41, %v10875_v2  ;;  %vm1123_vm6 = vcmp.eq.s32.totalorder %v8922_v42, %v10875_v2  ;;  %6757 = vmatpush.bf16.msk.msrb.mxu3 %vm11044_vm13, %v16195_v60  ;;  %vm11055_vm1 = vmpackc.low %vm1267_vm5, %vm1263_vm8  ;;  %v16859_v31 = vmov 0 }
 0x23b   : > { %16858 = vst [vmem:[#allocation249_spill] sm:$0xff] %v16857_v19  ;;  %v16860_v31 = vsel %vm11055_vm1, 4294967295, %v16859_v31  ;;  %vm1183_vm7 = vcmp.eq.s32.totalorder %v8942_v13, %v10875_v2  ;;  %vm1187_vm4 = vcmp.eq.s32.totalorder %v8973_v29, %v10875_v2  ;;  %vm11066_vm2 = vmpackc.low %vm1331_vm10, %vm1327_vm9  ;;  %v16862_v28 = vmov 0 }
 0x23c   : > { %16861 = vst [vmem:[#allocation250_spill] sm:$0xff] %v16860_v31  ;;  %v16863_v28 = vsel %vm11066_vm2, 4294967295, %v16862_v28  ;;  %vm1255_vm8 = vcmp.eq.s32.totalorder %v8844_v7, %v10875_v2  ;;  %vm1259_vm5 = vcmp.eq.s32.totalorder %v8847_v30, %v10875_v2  ;;  %vm11077_vm13 = vmpackc.low %vm1123_vm6, %vm1119_vm15  ;;  %v16865_v19 = vmov 0  ;;  %3087 = vmatmul.bf16.vlgmr.msrb.gmra.mxu2 %v10681_v62  ;;  %v16868_v31 = vld [vmem:[#allocation29_spill] sm:$0xff] }
 0x23d   : > { %6791 = vmatpush.bf16.msk.msra.mxu2 %vm11055_vm1, %v16195_v60  ;;  %16864 = vst [vmem:[#allocation251_spill] sm:$0xff] %v16863_v28  ;;  %v16866_v19 = vsel %vm11077_vm13, 4294967295, %v16865_v19  ;;  %vm1319_vm9 = vcmp.eq.s32.totalorder %v16524_v32, %v10875_v2  ;;  %vm1323_vm10 = vcmp.eq.s32.totalorder %v16868_v31, %v10875_v2  ;;  %6763 = vmatpush.bf16.msk.msra.mxu0 %vm11077_vm13, %v16195_v60  ;;  %vm11089_vm1 = vmpackc.low %vm1187_vm4, %vm1183_vm7  ;;  %v16869_v44 = vmov 0 }
 0x23e   : > { %6807 = vmatpush.bf16.msk.msra.mxu3 %vm11066_vm2, %v16195_v60  ;;  %16867 = vst [vmem:[#allocation252_spill] sm:$0xff] %v16866_v19  ;;  %v16870_v44 = vsel %vm11089_vm1, 4294967295, %v16869_v44  ;;  %vm1111_vm15 = vcmp.eq.s32.totalorder %v16532_v21, %v10875_v2  ;;  %vm1115_vm6 = vcmp.eq.s32.totalorder %v16533_v51, %v10875_v2  ;;  %6779 = vmatpush.bf16.msk.msra.mxu1 %vm11089_vm1, %v16195_v60  ;;  %vm11101_vm2 = vmpackc.low %vm1259_vm5, %vm1255_vm8  ;;  %v16872_v28 = vmov 0  ;;  %v16875_v19 = vld [vmem:[#allocation48_spill] sm:$0xff] }
 0x23f   : > { %16871 = vst [vmem:[#allocation29_spill] sm:$0xff] %v16870_v44  ;;  %3100 = vmatmul.bf16.vlgmr.msrb.gmra.mxu3 %v10679_v15  ;;  %v16873_v28 = vsel %vm11101_vm2, 4294967295, %v16872_v28  ;;  %vm1175_vm7 = vcmp.eq.s32.totalorder %v9023_v39, %v10875_v2  ;;  %vm1179_vm4 = vcmp.eq.s32.totalorder %v16875_v19, %v10875_v2  ;;  %vm11112_vm13 = vmpackc.low %vm1323_vm10, %vm1319_vm9  ;;  %v16876_v33 = vmov 0  ;;  %v16879_v44 = vld [vmem:[#allocation33_spill] sm:$0xff] }
 0x240   : > { %16874 = vst [vmem:[#allocation253_spill] sm:$0xff] %v16873_v28  ;;  %v16877_v33 = vsel %vm11112_vm13, 4294967295, %v16876_v33  ;;  %vm1247_vm8 = vcmp.eq.s32.totalorder %v16547_v23, %v10875_v2  ;;  %vm1251_vm5 = vcmp.eq.s32.totalorder %v16879_v44, %v10875_v2  ;;  %vm11123_vm1 = vmpackc.low %vm1115_vm6, %vm1111_vm15  ;;  %v16880_v46 = vmov 0  ;;  %v16883_v28 = vld [vmem:[#allocation36_spill] sm:$0xff]  ;;  %v16888_v23 = vld [vmem:[#allocation57_spill] sm:$0xff] }
 0x241   : > { %6793 = vmatpush.bf16.msk.msra.mxu2 %vm11101_vm2, %v16195_v60  ;;  %16878 = vst [vmem:[#allocation48_spill] sm:$0xff] %v16877_v33  ;;  %v16881_v46 = vsel %vm11123_vm1, 4294967295, %v16880_v46  ;;  %vm1311_vm9 = vcmp.eq.s32.totalorder %v16554_v6, %v10875_v2  ;;  %vm1315_vm10 = vcmp.eq.s32.totalorder %v16883_v28, %v10875_v2  ;;  %6765 = vmatpush.bf16.msk.msra.mxu0 %vm11123_vm1, %v16195_v60  ;;  %vm11134_vm2 = vmpackc.low %vm1179_vm4, %vm1175_vm7  ;;  %v16884_v44 = vmov 0  ;;  %v16887_v33 = vld [vmem:[#allocation56_spill] sm:$0xff]  ;;  %v16893_v6 = vld [vmem:[#allocation62_spill] sm:$0xff] }
 0x242   : > { %6809 = vmatpush.bf16.msk.msra.mxu3 %vm11112_vm13, %v16195_v60  ;;  %16882 = vst [vmem:[#allocation254_spill] sm:$0xff] %v16881_v46  ;;  %v16885_v44 = vsel %vm11134_vm2, 4294967295, %v16884_v44  ;;  %vm1103_vm15 = vcmp.eq.s32.totalorder %v16887_v33, %v10875_v2  ;;  %vm1107_vm6 = vcmp.eq.s32.totalorder %v16888_v23, %v10875_v2  ;;  %6781 = vmatpush.bf16.msk.msra.mxu1 %vm11134_vm2, %v16195_v60  ;;  %vm11145_vm13 = vmpackc.low %vm1251_vm5, %vm1247_vm8  ;;  %v16889_v28 = vmov 0  ;;  %v16892_v46 = vld [vmem:[#allocation60_spill] sm:$0xff]  ;;  %v16898_v33 = vld [vmem:[#allocation42_spill] sm:$0xff] }
 0x243   : > { %16886 = vst [vmem:[#allocation255_spill] sm:$0xff] %v16885_v44  ;;  %v16890_v28 = vsel %vm11145_vm13, 4294967295, %v16889_v28  ;;  %vm1167_vm7 = vcmp.eq.s32.totalorder %v16892_v46, %v10875_v2  ;;  %vm1171_vm4 = vcmp.eq.s32.totalorder %v16893_v6, %v10875_v2  ;;  %vm11156_vm1 = vmpackc.low %vm1315_vm10, %vm1311_vm9  ;;  %v16894_v23 = vmov 0  ;;  %v16897_v44 = vld [vmem:[#allocation41_spill] sm:$0xff] }
 0x244   : > { %16891 = vst [vmem:[#allocation256_spill] sm:$0xff] %v16890_v28  ;;  %v16895_v23 = vsel %vm11156_vm1, 4294967295, %v16894_v23  ;;  %vm1239_vm8 = vcmp.eq.s32.totalorder %v16897_v44, %v10875_v2  ;;  %vm1243_vm5 = vcmp.eq.s32.totalorder %v16898_v33, %v10875_v2  ;;  %vm11167_vm2 = vmpackc.low %vm1107_vm6, %vm1103_vm15  ;;  %v16899_v6 = vmov 0  ;;  %v16902_v28 = vld [vmem:[#allocation43_spill] sm:$0xff]  ;;  %v16903_v46 = vld [vmem:[#allocation45_spill] sm:$0xff] }
 0x245   : > { %6795 = vmatpush.bf16.msk.msra.mxu2 %vm11145_vm13, %v16195_v60  ;;  %16896 = vst [vmem:[#allocation257_spill] sm:$0xff] %v16895_v23  ;;  %v16900_v6 = vsel %vm11167_vm2, 4294967295, %v16899_v6  ;;  %vm1303_vm9 = vcmp.eq.s32.totalorder %v16902_v28, %v10875_v2  ;;  %vm1307_vm10 = vcmp.eq.s32.totalorder %v16903_v46, %v10875_v2  ;;  %6767 = vmatpush.bf16.msk.msra.mxu0 %vm11167_vm2, %v16195_v60  ;;  %vm11178_vm13 = vmpackc.low %vm1171_vm4, %vm1167_vm7  ;;  %v16904_v33 = vmov 0 }
 0x246   : > { %6811 = vmatpush.bf16.msk.msra.mxu3 %vm11156_vm1, %v16195_v60  ;;  %16901 = vst [vmem:[#allocation41_spill] sm:$0xff] %v16900_v6  ;;  %v16905_v33 = vsel %vm11178_vm13, 4294967295, %v16904_v33  ;;  %vm1095_vm15 = vcmp.eq.s32.totalorder %v16589_v9, %v10875_v2  ;;  %vm1099_vm6 = vcmp.eq.s32.totalorder %v16590_v63, %v10875_v2  ;;  %6783 = vmatpush.bf16.msk.msra.mxu1 %vm11178_vm13, %v16195_v60  ;;  %vm11189_vm1 = vmpackc.low %vm1243_vm5, %vm1239_vm8  ;;  %v16907_v23 = vmov 0 }
 0x247   : > { %16906 = vst [vmem:[#allocation43_spill] sm:$0xff] %v16905_v33  ;;  %v16908_v23 = vsel %vm11189_vm1, 4294967295, %v16907_v23  ;;  %vm1159_vm7 = vcmp.eq.s32.totalorder %v9208_v57, %v10875_v2  ;;  %vm1163_vm4 = vcmp.eq.s32.totalorder %v16594_v4, %v10875_v2  ;;  %vm11200_vm2 = vmpackc.low %vm1307_vm10, %vm1303_vm9  ;;  %v16910_v6 = vmov 0 }
 0x248   : > { %16909 = vst [vmem:[#allocation45_spill] sm:$0xff] %v16908_v23  ;;  %v16911_v6 = vsel %vm11200_vm2, 4294967295, %v16910_v6  ;;  %vm1231_vm8 = vcmp.eq.s32.totalorder %v16601_v35, %v10875_v2  ;;  %vm1235_vm5 = vcmp.eq.s32.totalorder %v16602_v61, %v10875_v2  ;;  %vm11211_vm13 = vmpackc.low %vm1099_vm6, %vm1095_vm15  ;;  %v16913_v33 = vmov 0 }
 0x249   : > { %6797 = vmatpush.bf16.msk.msra.mxu2 %vm11189_vm1, %v16195_v60  ;;  %16912 = vst [vmem:[#allocation258_spill] sm:$0xff] %v16911_v6  ;;  %v16914_v33 = vsel %vm11211_vm13, 4294967295, %v16913_v33  ;;  %vm1295_vm9 = vcmp.eq.s32.totalorder %v16608_v38, %v10875_v2  ;;  %vm1299_vm10 = vcmp.eq.s32.totalorder %v16609_v5, %v10875_v2  ;;  %6769 = vmatpush.bf16.msk.msra.mxu0 %vm11211_vm13, %v16195_v60  ;;  %vm11222_vm1 = vmpackc.low %vm1163_vm4, %vm1159_vm7  ;;  %v16916_v23 = vmov 0  ;;  %v16923_v5 = vld [vmem:[#allocation85_spill] sm:$0xff] }
 0x24a   : > { %6813 = vmatpush.bf16.msk.msra.mxu3 %vm11200_vm2, %v16195_v60  ;;  %16915 = vst [vmem:[#allocation259_spill] sm:$0xff] %v16914_v33  ;;  %v16917_v23 = vsel %vm11222_vm1, 4294967295, %v16916_v23  ;;  %vm1087_vm15 = vcmp.eq.s32.totalorder %v9254_v26, %v10875_v2  ;;  %vm1091_vm6 = vcmp.eq.s32.totalorder %v9257_v36, %v10875_v2  ;;  %6785 = vmatpush.bf16.msk.msra.mxu1 %vm11222_vm1, %v16195_v60  ;;  %vm11233_vm2 = vmpackc.low %vm1235_vm5, %vm1231_vm8  ;;  %v16919_v6 = vmov 0  ;;  %v16922_v33 = vld [vmem:[#allocation81_spill] sm:$0xff]  ;;  %v16928_v26 = vld [vmem:[#allocation66_spill] sm:$0xff] }
 0x24b   : > { %16918 = vst [vmem:[#allocation260_spill] sm:$0xff] %v16917_v23  ;;  %v16920_v6 = vsel %vm11233_vm2, 4294967295, %v16919_v6  ;;  %vm1151_vm7 = vcmp.eq.s32.totalorder %v16922_v33, %v10875_v2  ;;  %vm1155_vm4 = vcmp.eq.s32.totalorder %v16923_v5, %v10875_v2  ;;  %vm11244_vm13 = vmpackc.low %vm1299_vm10, %vm1295_vm9  ;;  %v16924_v36 = vmov 0  ;;  %v16927_v23 = vld [vmem:[#allocation65_spill] sm:$0xff]  ;;  %v16933_v33 = vld [vmem:[#allocation68_spill] sm:$0xff] }
 0x24c   : > { %16921 = vst [vmem:[#allocation261_spill] sm:$0xff] %v16920_v6  ;;  %v16925_v36 = vsel %vm11244_vm13, 4294967295, %v16924_v36  ;;  %vm1223_vm8 = vcmp.eq.s32.totalorder %v16927_v23, %v10875_v2  ;;  %vm1227_vm5 = vcmp.eq.s32.totalorder %v16928_v26, %v10875_v2  ;;  %vm11255_vm1 = vmpackc.low %vm1091_vm6, %vm1087_vm15  ;;  %v16929_v5 = vmov 0  ;;  %v16932_v6 = vld [vmem:[#allocation67_spill] sm:$0xff] }
 0x24d   : > { %6799 = vmatpush.bf16.msk.msra.mxu2 %vm11233_vm2, %v16195_v60  ;;  %16926 = vst [vmem:[#allocation262_spill] sm:$0xff] %v16925_v36  ;;  %v16930_v5 = vsel %vm11255_vm1, 4294967295, %v16929_v5  ;;  %vm1287_vm9 = vcmp.eq.s32.totalorder %v16932_v6, %v10875_v2  ;;  %vm1291_vm10 = vcmp.eq.s32.totalorder %v16933_v33, %v10875_v2  ;;  %6771 = vmatpush.bf16.msk.msra.mxu0 %vm11255_vm1, %v16195_v60  ;;  %vm11266_vm2 = vmpackc.low %vm1155_vm4, %vm1151_vm7  ;;  %v16934_v26 = vmov 0  ;;  %v16937_v36 = vld [vmem:[#allocation22_spill] sm:$0xff]  ;;  %v16938_v23 = vld [vmem:[#allocation91_spill] sm:$0xff] }
 0x24e   : > { %6815 = vmatpush.bf16.msk.msra.mxu3 %vm11244_vm13, %v16195_v60  ;;  %16931 = vst [vmem:[#allocation263_spill] sm:$0xff] %v16930_v5  ;;  %v16935_v26 = vsel %vm11266_vm2, 4294967295, %v16934_v26  ;;  %vm1079_vm15 = vcmp.eq.s32.totalorder %v16937_v36, %v10875_v2  ;;  %vm1083_vm6 = vcmp.eq.s32.totalorder %v16938_v23, %v10875_v2  ;;  %6787 = vmatpush.bf16.msk.msra.mxu1 %vm11266_vm2, %v16195_v60  ;;  %vm11277_vm13 = vmpackc.low %vm1227_vm5, %vm1223_vm8  ;;  %v16939_v33 = vmov 0  ;;  %v16942_v5 = vld [vmem:[#allocation93_spill] sm:$0xff]  ;;  %v16943_v6 = vld [vmem:[#allocation95_spill] sm:$0xff] }
 0x24f   : > { %16936 = vst [vmem:[#allocation264_spill] sm:$0xff] %v16935_v26  ;;  %v16940_v33 = vsel %vm11277_vm13, 4294967295, %v16939_v33  ;;  %vm1143_vm7 = vcmp.eq.s32.totalorder %v16942_v5, %v10875_v2  ;;  %vm1147_vm4 = vcmp.eq.s32.totalorder %v16943_v6, %v10875_v2  ;;  %vm11288_vm1 = vmpackc.low %vm1291_vm10, %vm1287_vm9  ;;  %v16944_v23 = vmov 0  ;;  %v16947_v26 = vld [vmem:[#allocation98_spill] sm:$0xff]  ;;  %v16948_v36 = vld [vmem:[#allocation99_spill] sm:$0xff] }
 0x250   : > { %16941 = vst [vmem:[#allocation265_spill] sm:$0xff] %v16940_v33  ;;  %v16945_v23 = vsel %vm11288_vm1, 4294967295, %v16944_v23  ;;  %vm1391_vm8 = vcmp.eq.s32.totalorder %v16947_v26, %v10875_v2  ;;  %vm1395_vm5 = vcmp.eq.s32.totalorder %v16948_v36, %v10875_v2  ;;  %vm11299_vm2 = vmpackc.low %vm1083_vm6, %vm1079_vm15  ;;  %v16949_v6 = vmov 0  ;;  %v16952_v33 = vld [vmem:[#allocation100_spill] sm:$0xff]  ;;  %v16953_v5 = vld [vmem:[#allocation102_spill] sm:$0xff] }
 0x251   : > { %6801 = vmatpush.bf16.msk.msra.mxu2 %vm11277_vm13, %v16195_v60  ;;  %16946 = vst [vmem:[#allocation266_spill] sm:$0xff] %v16945_v23  ;;  %v16950_v6 = vsel %vm11299_vm2, 4294967295, %v16949_v6  ;;  %vm1455_vm9 = vcmp.eq.s32.totalorder %v16952_v33, %v10875_v2  ;;  %vm1459_vm10 = vcmp.eq.s32.totalorder %v16953_v5, %v10875_v2  ;;  %6773 = vmatpush.bf16.msk.msra.mxu0 %vm11299_vm2, %v16195_v60  ;;  %vm11310_vm13 = vmpackc.low %vm1147_vm4, %vm1143_vm7  ;;  %v16954_v36 = vmov 0  ;;  %v16957_v23 = vld [vmem:[#allocation74_spill] sm:$0xff]  ;;  %v16958_v26 = vld [vmem:[#allocation75_spill] sm:$0xff] }
 0x252   : > { %6817 = vmatpush.bf16.msk.msra.mxu3 %vm11288_vm1, %v16195_v60  ;;  %16951 = vst [vmem:[#allocation267_spill] sm:$0xff] %v16950_v6  ;;  %v16955_v36 = vsel %vm11310_vm13, 4294967295, %v16954_v36  ;;  %vm1215_vm15 = vcmp.eq.s32.totalorder %v16957_v23, %v10875_v2  ;;  %vm1219_vm6 = vcmp.eq.s32.totalorder %v16958_v26, %v10875_v2  ;;  %6789 = vmatpush.bf16.msk.msra.mxu1 %vm11310_vm13, %v16195_v60  ;;  %vm11321_vm1 = vmpackc.low %vm1395_vm5, %vm1391_vm8  ;;  %v16959_v5 = vmov 0  ;;  %v16962_v6 = vld [vmem:[#allocation77_spill] sm:$0xff]  ;;  %v16963_v33 = vld [vmem:[#allocation78_spill] sm:$0xff] }
 0x253   : > { %16956 = vst [vmem:[#allocation268_spill] sm:$0xff] %v16955_v36  ;;  %v16960_v5 = vsel %vm11321_vm1, 4294967295, %v16959_v5  ;;  %vm1279_vm7 = vcmp.eq.s32.totalorder %v16962_v6, %v10875_v2  ;;  %vm1283_vm4 = vcmp.eq.s32.totalorder %v16963_v33, %v10875_v2  ;;  %vm11332_vm2 = vmpackc.low %vm1459_vm10, %vm1455_vm9  ;;  %v16964_v26 = vmov 0  ;;  %v16967_v36 = vld [vmem:[#allocation105_spill] sm:$0xff]  ;;  %v16968_v23 = vld [vmem:[#allocation106_spill] sm:$0xff] }
 0x254   : > { %16961 = vst [vmem:[#allocation269_spill] sm:$0xff] %v16960_v5  ;;  %v16965_v26 = vsel %vm11332_vm2, 4294967295, %v16964_v26  ;;  %vm1383_vm8 = vcmp.eq.s32.totalorder %v16967_v36, %v10875_v2  ;;  %vm1387_vm5 = vcmp.eq.s32.totalorder %v16968_v23, %v10875_v2  ;;  %vm11343_vm13 = vmpackc.low %vm1219_vm6, %vm1215_vm15  ;;  %v16969_v33 = vmov 0  ;;  %3113 = vmatmul.bf16.vlgmr.msra.gmra.mxu0 %v16776_v59  ;;  %v16972_v5 = vld [vmem:[#allocation109_spill] sm:$0xff]  ;;  %v17050_v59 = vld [vmem:[#allocation155_spill] sm:$0xff] }
 0x255   : > { %6823 = vmatpush.bf16.msk.msrb.mxu0 %vm11321_vm1, %v16195_v60  ;;  %16966 = vst [vmem:[#allocation77_spill] sm:$0xff] %v16965_v26  ;;  %v16970_v33 = vsel %vm11343_vm13, 4294967295, %v16969_v33  ;;  %vm1447_vm9 = vcmp.eq.s32.totalorder %v16680_v3, %v10875_v2  ;;  %vm1451_vm10 = vcmp.eq.s32.totalorder %v16972_v5, %v10875_v2  ;;  %6803 = vmatpush.bf16.msk.msra.mxu2 %vm11343_vm13, %v16195_v60  ;;  %vm11355_vm1 = vmpackc.low %vm1283_vm4, %vm1279_vm7  ;;  %v16973_v23 = vmov 0  ;;  %v2906_v5 = vpop.f32.mrf.mxu0  ;;  %v17045_v3 = vld [vmem:[#allocation151_spill] sm:$0xff] }
 0x256   : > { %6839 = vmatpush.bf16.msk.msrb.mxu1 %vm11332_vm2, %v16195_v60  ;;  %16971 = vst [vmem:[#allocation270_spill] sm:$0xff] %v16970_v33  ;;  %v16974_v23 = vsel %vm11355_vm1, 4294967295, %v16973_v23  ;;  %vm1207_vm15 = vcmp.eq.s32.totalorder %v16692_v11, %v10875_v2  ;;  %vm1211_vm6 = vcmp.eq.s32.totalorder %v16693_v1, %v10875_v2  ;;  %6819 = vmatpush.bf16.msk.msra.mxu3 %vm11355_vm1, %v16195_v60  ;;  %vm11367_vm2 = vmpackc.low %vm1387_vm5, %vm1383_vm8  ;;  %v16976_v26 = vmov 0  ;;  %v16979_v33 = vld [vmem:[#allocation90_spill] sm:$0xff]  ;;  %v16984_v11 = vld [vmem:[#allocation111_spill] sm:$0xff] }
 0x257   : > { %16975 = vst [vmem:[#allocation271_spill] sm:$0xff] %v16974_v23  ;;  %3126 = vmatmul.bf16.vlgmr.msra.gmra.mxu1 %v16783_v43  ;;  %v16977_v26 = vsel %vm11367_vm2, 4294967295, %v16976_v26  ;;  %vm1271_vm7 = vcmp.eq.s32.totalorder %v16698_v25, %v10875_v2  ;;  %vm1275_vm4 = vcmp.eq.s32.totalorder %v16979_v33, %v10875_v2  ;;  %vm11378_vm13 = vmpackc.low %vm1451_vm10, %vm1447_vm9  ;;  %v16980_v1 = vmov 0  ;;  %v16983_v23 = vld [vmem:[#allocation110_spill] sm:$0xff]  ;;  %v17010_v43 = vld [vmem:[#allocation128_spill] sm:$0xff] }
 0x258   : > { %16978 = vst [vmem:[#allocation272_spill] sm:$0xff] %v16977_v26  ;;  %v16981_v1 = vsel %vm11378_vm13, 4294967295, %v16980_v1  ;;  %vm1519_vm8 = vcmp.eq.s32.totalorder %v16983_v23, %v10875_v2  ;;  %vm1523_vm5 = vcmp.eq.s32.totalorder %v16984_v11, %v10875_v2  ;;  %vm11389_vm1 = vmpackc.low %vm1211_vm6, %vm1207_vm15  ;;  %v16985_v33 = vmov 0  ;;  %v16988_v26 = vld [vmem:[#allocation112_spill] sm:$0xff]  ;;  %v16989_v25 = vld [vmem:[#allocation114_spill] sm:$0xff] }
 0x259   : > { %6825 = vmatpush.bf16.msk.msrb.mxu0 %vm11367_vm2, %v16195_v60  ;;  %16982 = vst [vmem:[#allocation273_spill] sm:$0xff] %v16981_v1  ;;  %v16986_v33 = vsel %vm11389_vm1, 4294967295, %v16985_v33  ;;  %vm1583_vm9 = vcmp.eq.s32.totalorder %v16988_v26, %v10875_v2  ;;  %vm1587_vm10 = vcmp.eq.s32.totalorder %v16989_v25, %v10875_v2  ;;  %6805 = vmatpush.bf16.msk.msra.mxu2 %vm11389_vm1, %v16195_v60  ;;  %vm11400_vm2 = vmpackc.low %vm1275_vm4, %vm1271_vm7  ;;  %v16990_v11 = vmov 0  ;;  %v16993_v1 = vld [vmem:[#allocation116_spill] sm:$0xff]  ;;  %v16994_v23 = vld [vmem:[#allocation117_spill] sm:$0xff] }
 0x25a   : > { %6841 = vmatpush.bf16.msk.msrb.mxu1 %vm11378_vm13, %v16195_v60  ;;  %16987 = vst [vmem:[#allocation274_spill] sm:$0xff] %v16986_v33  ;;  %v16991_v11 = vsel %vm11400_vm2, 4294967295, %v16990_v11  ;;  %vm1375_vm15 = vcmp.eq.s32.totalorder %v16993_v1, %v10875_v2  ;;  %vm1379_vm6 = vcmp.eq.s32.totalorder %v16994_v23, %v10875_v2  ;;  %6821 = vmatpush.bf16.msk.msra.mxu3 %vm11400_vm2, %v16195_v60  ;;  %vm11411_vm13 = vmpackc.low %vm1523_vm5, %vm1519_vm8  ;;  %v16995_v25 = vmov 0  ;;  %v16998_v33 = vld [vmem:[#allocation119_spill] sm:$0xff]  ;;  %v16999_v26 = vld [vmem:[#allocation120_spill] sm:$0xff] }
 0x25b   : > { %16992 = vst [vmem:[#allocation275_spill] sm:$0xff] %v16991_v11  ;;  %v16996_v25 = vsel %vm11411_vm13, 4294967295, %v16995_v25  ;;  %vm1439_vm7 = vcmp.eq.s32.totalorder %v16998_v33, %v10875_v2  ;;  %vm1443_vm4 = vcmp.eq.s32.totalorder %v16999_v26, %v10875_v2  ;;  %vm11422_vm1 = vmpackc.low %vm1587_vm10, %vm1583_vm9  ;;  %v17000_v23 = vmov 0  ;;  %v17003_v11 = vld [vmem:[#allocation121_spill] sm:$0xff]  ;;  %v17004_v1 = vld [vmem:[#allocation123_spill] sm:$0xff] }
 0x25c   : > { %16997 = vst [vmem:[#allocation276_spill] sm:$0xff] %v16996_v25  ;;  %v17001_v23 = vsel %vm11422_vm1, 4294967295, %v17000_v23  ;;  %vm1511_vm8 = vcmp.eq.s32.totalorder %v17003_v11, %v10875_v2  ;;  %vm1515_vm5 = vcmp.eq.s32.totalorder %v17004_v1, %v10875_v2  ;;  %v17005_v33 = vld [vmem:[#allocation140_spill] sm:$0xff]  ;;  %vm11434_vm2 = vmpackc.low %vm1379_vm6, %vm1375_vm15  ;;  %v17006_v26 = vmov 0  ;;  %v17009_v25 = vld [vmem:[#allocation125_spill] sm:$0xff]  ;;  %v2945_v11 = vpop.f32.mrf.mxu3 }
 0x25d   : > { %6855 = vmatpush.bf16.msk.msrb.mxu2 %vm11411_vm13, %v16195_v60  ;;  %17002 = vst [vmem:[#allocation277_spill] sm:$0xff] %v17001_v23  ;;  %v17007_v26 = vsel %vm11434_vm2, 4294967295, %v17006_v26  ;;  %vm1575_vm9 = vcmp.eq.s32.totalorder %v17009_v25, %v10875_v2  ;;  %vm1579_vm10 = vcmp.eq.s32.totalorder %v17010_v43, %v10875_v2  ;;  %3152 = vmatmul.bf16.vlgmr.msra.gmra.mxu3 %v16815_v58  ;;  %vm11446_vm13 = vmpackc.low %vm1443_vm4, %vm1439_vm7  ;;  %v17011_v23 = vmov 0  ;;  %v17015_v1 = vld [vmem:[#allocation130_spill] sm:$0xff]  ;;  %v17020_v43 = vld [vmem:[#allocation133_spill] sm:$0xff]  ;;  %v2932_v25 = vpop.f32.mrf.mxu2 }
 0x25e   : > { %6871 = vmatpush.bf16.msk.msrb.mxu3 %vm11422_vm1, %v16195_v60  ;;  %3139 = vmatmul.bf16.vlgmr.msra.gmra.mxu2 %v17005_v33  ;;  %17008 = vst [vmem:[#allocation278_spill] sm:$0xff] %v17007_v26  ;;  %v17012_v23 = vsel %vm11446_vm13, 4294967295, %v17011_v23  ;;  %v17014_v33 = vld [vmem:[#allocation129_spill] sm:$0xff]  ;;  %vm1371_vm6 = vcmp.eq.s32.totalorder %v17015_v1, %v10875_v2  ;;  %vm11457_vm1 = vmpackc.low %vm1515_vm5, %vm1511_vm8  ;;  %v17016_v58 = vmov 0  ;;  %v17019_v26 = vld [vmem:[#allocation132_spill] sm:$0xff]  ;;  %vm1435_vm4 = vcmp.eq.s32.totalorder %v17020_v43, %v10875_v2 }
 0x25f   : > { %6827 = vmatpush.bf16.msk.msrb.mxu0 %vm11434_vm2, %v16195_v60  ;;  %17013 = vst [vmem:[#allocation279_spill] sm:$0xff] %v17012_v23  ;;  %vm1367_vm15 = vcmp.eq.s32.totalorder %v17014_v33, %v10875_v2  ;;  %6843 = vmatpush.bf16.msk.msrb.mxu1 %vm11446_vm13, %v16195_v60  ;;  %v17017_v58 = vsel %vm11457_vm1, 4294967295, %v17016_v58  ;;  %vm1431_vm7 = vcmp.eq.s32.totalorder %v17019_v26, %v10875_v2  ;;  %vm11468_vm2 = vmpackc.low %vm1579_vm10, %vm1575_vm9  ;;  %v17021_v1 = vmov 0  ;;  %v17024_v23 = vld [vmem:[#allocation134_spill] sm:$0xff]  ;;  %v17025_v33 = vld [vmem:[#allocation136_spill] sm:$0xff] }
 0x260   : > { %17018 = vst [vmem:[#allocation280_spill] sm:$0xff] %v17017_v58  ;;  %v17022_v1 = vsel %vm11468_vm2, 4294967295, %v17021_v1  ;;  %vm1503_vm8 = vcmp.eq.s32.totalorder %v17024_v23, %v10875_v2  ;;  %vm1507_vm5 = vcmp.eq.s32.totalorder %v17025_v33, %v10875_v2  ;;  %vm11479_vm13 = vmpackc.low %vm1371_vm6, %vm1367_vm15  ;;  %v17026_v43 = vmov 0  ;;  %v17029_v58 = vld [vmem:[#allocation138_spill] sm:$0xff]  ;;  %v17030_v26 = vld [vmem:[#allocation143_spill] sm:$0xff] }
 0x261   : > { %6857 = vmatpush.bf16.msk.msrb.mxu2 %vm11457_vm1, %v16195_v60  ;;  %17023 = vst [vmem:[#allocation281_spill] sm:$0xff] %v17022_v1  ;;  %v17027_v43 = vsel %vm11479_vm13, 4294967295, %v17026_v43  ;;  %vm1567_vm9 = vcmp.eq.s32.totalorder %v17029_v58, %v10875_v2  ;;  %vm1571_vm10 = vcmp.eq.s32.totalorder %v17030_v26, %v10875_v2  ;;  %vm11490_vm1 = vmpackc.low %vm1435_vm4, %vm1431_vm7  ;;  %v17031_v33 = vmov 0  ;;  %v17034_v1 = vld [vmem:[#allocation144_spill] sm:$0xff]  ;;  %v17035_v23 = vld [vmem:[#allocation145_spill] sm:$0xff] }
 0x262   : > { %6873 = vmatpush.bf16.msk.msrb.mxu3 %vm11468_vm2, %v16195_v60  ;;  %17028 = vst [vmem:[#allocation282_spill] sm:$0xff] %v17027_v43  ;;  %v17032_v33 = vsel %vm11490_vm1, 4294967295, %v17031_v33  ;;  %vm1359_vm15 = vcmp.eq.s32.totalorder %v17034_v1, %v10875_v2  ;;  %vm1363_vm6 = vcmp.eq.s32.totalorder %v17035_v23, %v10875_v2  ;;  %vm11501_vm2 = vmpackc.low %vm1507_vm5, %vm1503_vm8  ;;  %v17036_v26 = vmov 0  ;;  %v17039_v43 = vld [vmem:[#allocation146_spill] sm:$0xff]  ;;  %v17040_v58 = vld [vmem:[#allocation148_spill] sm:$0xff] }
 0x263   : > { %6829 = vmatpush.bf16.msk.msrb.mxu0 %vm11479_vm13, %v16195_v60  ;;  %17033 = vst [vmem:[#allocation283_spill] sm:$0xff] %v17032_v33  ;;  %6845 = vmatpush.bf16.msk.msrb.mxu1 %vm11490_vm1, %v16195_v60  ;;  %v17037_v26 = vsel %vm11501_vm2, 4294967295, %v17036_v26  ;;  %vm1423_vm7 = vcmp.eq.s32.totalorder %v17039_v43, %v10875_v2  ;;  %vm1427_vm4 = vcmp.eq.s32.totalorder %v17040_v58, %v10875_v2  ;;  %vm11512_vm13 = vmpackc.low %vm1571_vm10, %vm1567_vm9  ;;  %v17041_v23 = vmov 0  ;;  %v2919_v33 = vpop.f32.mrf.mxu1  ;;  %v17044_v1 = vld [vmem:[#allocation149_spill] sm:$0xff]  ;;  %v17049_v43 = vld [vmem:[#allocation154_spill] sm:$0xff] }
 0x264   : > { %17038 = vst [vmem:[#allocation284_spill] sm:$0xff] %v17037_v26  ;;  %v17042_v23 = vsel %vm11512_vm13, 4294967295, %v17041_v23  ;;  %vm1495_vm8 = vcmp.eq.s32.totalorder %v17044_v1, %v10875_v2  ;;  %vm1499_vm5 = vcmp.eq.s32.totalorder %v17045_v3, %v10875_v2  ;;  %vm11523_vm1 = vmpackc.low %vm1363_vm6, %vm1359_vm15  ;;  %v17046_v58 = vmov 0  ;;  %v17055_v1 = vld [vmem:[#allocation159_spill] sm:$0xff]  ;;  %v2947_v36 = vpop.f32.mrf.mxu3 }
 0x265   : > { %6859 = vmatpush.bf16.msk.msrb.mxu2 %vm11501_vm2, %v16195_v60  ;;  %17043 = vst [vmem:[#allocation285_spill] sm:$0xff] %v17042_v23  ;;  %v17047_v58 = vsel %vm11523_vm1, 4294967295, %v17046_v58  ;;  %v2920_v26 = vadd.f32 %v2919_v33, %v2906_v5  ;;  %vm1559_vm9 = vcmp.eq.s32.totalorder %v17049_v43, %v10875_v2  ;;  %vm1563_vm10 = vcmp.eq.s32.totalorder %v17050_v59, %v10875_v2  ;;  %vm11534_vm2 = vmpackc.low %vm1427_vm4, %vm1423_vm7  ;;  %v17054_v23 = vld [vmem:[#allocation156_spill] sm:$0xff]  ;;  %v17060_v59 = vld [vmem:[#allocation163_spill] sm:$0xff] }
 0x266   : > { %6875 = vmatpush.bf16.msk.msrb.mxu3 %vm11512_vm13, %v16195_v60  ;;  %17048 = vst [vmem:[#allocation286_spill] sm:$0xff] %v17047_v58  ;;  %v17051_v3 = vmov 0  ;;  %vm1351_vm15 = vcmp.eq.s32.totalorder %v17054_v23, %v10875_v2  ;;  %vm1355_vm6 = vcmp.eq.s32.totalorder %v17055_v1, %v10875_v2  ;;  %vm11545_vm13 = vmpackc.low %vm1499_vm5, %vm1495_vm8  ;;  %v17056_v5 = vmov 0  ;;  %v17059_v58 = vld [vmem:[#allocation162_spill] sm:$0xff]  ;;  %v17061_v43 = vld [vmem:[#allocation21_spill] sm:$0xff]  ;;  %v2934_v1 = vpop.f32.mrf.mxu2 }
 0x267   : > { %6831 = vmatpush.bf16.msk.msrb.mxu0 %vm11523_vm1, %v16195_v60  ;;  %v17052_v3 = vsel %vm11534_vm2, 4294967295, %v17051_v3  ;;  %6847 = vmatpush.bf16.msk.msrb.mxu1 %vm11534_vm2, %v16195_v60  ;;  %v2933_v33 = vadd.f32 %v2932_v25, %v2920_v26  ;;  %v17057_v5 = vsel %vm11545_vm13, 4294967295, %v17056_v5  ;;  %vm1419_vm4 = vcmp.eq.s32.totalorder %v17060_v59, %v10875_v2  ;;  %vm11557_vm1 = vmpackc.low %vm1563_vm10, %vm1559_vm9  ;;  %v17065_v26 = vld [vmem:[#allocation164_spill] sm:$0xff]  ;;  %v17066_v25 = vld [vmem:[#allocation165_spill] sm:$0xff] }
 0x268   : > { %17053 = vst [vmem:[#allocation287_spill] sm:$0xff] %v17052_v3  ;;  %v1072_v23 = vadd.s32 384, %v17061_v43  ;;  %v17062_v3 = vmov 0  ;;  %vm1487_vm8 = vcmp.eq.s32.totalorder %v17065_v26, %v10875_v2  ;;  %vm1491_vm5 = vcmp.eq.s32.totalorder %v17066_v25, %v10875_v2  ;;  %vm11568_vm7 = vmpackc.low %vm1355_vm6, %vm1351_vm15  ;;  %v17071_v59 = vld [vmem:[#allocation168_spill] sm:$0xff]  ;;  %v17077_v25 = vld [vmem:[#allocation171_spill] sm:$0xff] }
 0x269   : > { %17058 = vst [vmem:[#allocation288_spill] sm:$0xff] %v17057_v5  ;;  %6861 = vmatpush.bf16.msk.msrb.mxu2 %vm11545_vm13, %v16195_v60  ;;  %v17063_v3 = vsel %vm11557_vm1, 4294967295, %v17062_v3  ;;  %v17067_v43 = vmov 0  ;;  %v17070_v5 = vld [vmem:[#allocation167_spill] sm:$0xff]  ;;  %vm1555_vm10 = vcmp.eq.s32.totalorder %v17071_v59, %v10875_v2  ;;  %v11576_v26 = vadd.f32 %v2945_v11, %v2933_v33  ;;  %vm11595_vm13 = vmpackc.low %vm1491_vm5, %vm1487_vm8  ;;  %v17081_v11 = vld [vmem:[#allocation173_spill] sm:$0xff] }
 0x26a   : > { %17064 = vst [vmem:[#allocation162_spill] sm:$0xff] %v17063_v3  ;;  %6877 = vmatpush.bf16.msk.msrb.mxu3 %vm11557_vm1, %v16195_v60  ;;  %v17068_v43 = vsel %vm11568_vm7, 4294967295, %v17067_v43  ;;  %vm17072_vm1 = vcmp.eq.s32.totalorder %v17059_v58, %v10875_v2  ;;  %v17073_v1 = vmov 0  ;;  %v17076_v3 = vld [vmem:[#allocation170_spill] sm:$0xff]  ;;  %vm1347_vm9 = vcmp.eq.s32.totalorder %v17077_v25, %v10875_v2 }
 0x26b   : > { %17069 = vst [vmem:[#allocation21_spill] sm:$0xff] %v17068_v43  ;;  %6833 = vmatpush.bf16.msk.msrb.mxu0 %vm11568_vm7, %v16195_v60  ;;  %vm11584_vm15 = vmpackc.low %vm1419_vm4, %vm17072_vm1  ;;  %vm1343_vm6 = vcmp.eq.s32.totalorder %v17076_v3, %v10875_v2  ;;  %v17078_v36 = vmov 0  ;;  %vm1407_vm1 = vcmp.eq.s32.totalorder %v17081_v11, %v10875_v2  ;;  %v17082_v33 = vld [vmem:[#allocation174_spill] sm:$0xff]  ;;  %v2908_v43 = vpop.f32.mrf.mxu0  ;;  %v11603_v59 = vmul.u32 2, %v1072_v23  ;;  %v2921_v25 = vpop.f32.mrf.mxu1  ;;  %v17087_v11 = vld [vmem:[#allocation176_spill] sm:$0xff] }
 0x26c   : > { %v17074_v1 = vsel %vm11584_vm15, 4294967295, %v17073_v1  ;;  %6849 = vmatpush.bf16.msk.msrb.mxu1 %vm11584_vm15, %v16195_v60  ;;  %v17079_v36 = vsel %vm11595_vm13, 4294967295, %v17078_v36  ;;  %vm1411_vm4 = vcmp.eq.s32.totalorder %v17082_v33, %v10875_v2  ;;  %vm17083_vm15 = vcmp.eq.s32.totalorder %v17070_v5, %v10875_v2  ;;  %v17088_v33 = vld [vmem:[#allocation178_spill] sm:$0xff]  ;;  %vm11622_vm2 = vmpackc.low %vm1347_vm9, %vm1343_vm6  ;;  %v17092_v43 = vld [vmem:[#allocation180_spill] sm:$0xff] }
 0x26d   : > { %17075 = vst [vmem:[#allocation167_spill] sm:$0xff] %v17074_v1  ;;  %6863 = vmatpush.bf16.msk.msrb.mxu2 %vm11595_vm13, %v16195_v60  ;;  %vm11611_vm8 = vmpackc.low %vm1555_vm10, %vm17083_vm15  ;;  %v17084_v1 = vmov 0  ;;  %vm1479_vm5 = vcmp.eq.s32.totalorder %v17087_v11, %v10875_v2  ;;  %vm1483_vm7 = vcmp.eq.s32.totalorder %v17088_v33, %v10875_v2  ;;  %v17089_v23 = vmov 0 }
 0x26e   : > { %17080 = vst [vmem:[#allocation170_spill] sm:$0xff] %v17079_v36  ;;  %v17085_v1 = vsel %vm11611_vm8, 4294967295, %v17084_v1  ;;  %6879 = vmatpush.bf16.msk.msrb.mxu3 %vm11611_vm8, %v16195_v60  ;;  %v17090_v23 = vsel %vm11622_vm2, 4294967295, %v17089_v23  ;;  %vm1543_vm10 = vcmp.eq.s32.totalorder %v17092_v43, %v10875_v2  ;;  %v17093_v36 = vld [vmem:[#allocation181_spill] sm:$0xff]  ;;  %vm11633_vm13 = vmpackc.low %vm1411_vm4, %vm1407_vm1  ;;  %v17094_v25 = vmov 0 }
 0x26f   : > { %17086 = vst [vmem:[#allocation289_spill] sm:$0xff] %v17085_v1  ;;  %vm1547_vm15 = vcmp.eq.s32.totalorder %v17093_v36, %v10875_v2  ;;  %6835 = vmatpush.bf16.msk.msrb.mxu0 %vm11622_vm2, %v16195_v60  ;;  %v17095_v25 = vsel %vm11633_vm13, 4294967295, %v17094_v25  ;;  %vm1335_vm9 = vcmp.eq.s32.totalorder %v16819_v20, %v10875_v2  ;;  %v17097_v1 = vld [vmem:[#allocation183_spill] sm:$0xff]  ;;  %vm11644_vm8 = vmpackc.low %vm1483_vm7, %vm1479_vm5  ;;  %v17098_v36 = vmov 0 }
 0x270   : > { %17091 = vst [vmem:[#allocation176_spill] sm:$0xff] %v17090_v23  ;;  %vm1339_vm6 = vcmp.eq.s32.totalorder %v17097_v1, %v10875_v2  ;;  %6851 = vmatpush.bf16.msk.msrb.mxu1 %vm11633_vm13, %v16195_v60  ;;  %v17099_v36 = vsel %vm11644_vm8, 4294967295, %v17098_v36  ;;  %vm1399_vm1 = vcmp.eq.s32.totalorder %v16824_v34, %v10875_v2  ;;  %vm1403_vm4 = vcmp.eq.s32.totalorder %v16825_v12, %v10875_v2  ;;  %vm11655_vm2 = vmpackc.low %vm1547_vm15, %vm1543_vm10 }
 0x271   : > { %17096 = vst [vmem:[#allocation178_spill] sm:$0xff] %v17095_v25  ;;  %6865 = vmatpush.bf16.msk.msrb.mxu2 %vm11644_vm8, %v16195_v60  ;;  %v17100_v23 = vmov 0  ;;  %vm1136_vm7 = vcmp.eq.s32.totalorder %v8779_v54, %v11603_v59  ;;  %vm1140_vm5 = vcmp.eq.s32.totalorder %v8782_v17, %v11603_v59  ;;  %vm11666_vm13 = vmpackc.low %vm1339_vm6, %vm1335_vm9  ;;  %v17102_v25 = vmov 0 }
 0x272   : > { %v17101_v23 = vsel %vm11655_vm2, 4294967295, %v17100_v23  ;;  %6881 = vmatpush.bf16.msk.msrb.mxu3 %vm11655_vm2, %v16195_v60  ;;  %v17103_v25 = vsel %vm11666_vm13, 4294967295, %v17102_v25  ;;  %vm1200_vm10 = vcmp.eq.s32.totalorder %v8785_v55, %v11603_v59  ;;  %vm1204_vm15 = vcmp.eq.s32.totalorder %v8794_v56, %v11603_v59  ;;  %vm11677_vm8 = vmpackc.low %vm1403_vm4, %vm1399_vm1 }
 0x273   : > { %6837 = vmatpush.bf16.msk.msrb.mxu0 %vm11666_vm13, %v16195_v60  ;;  %v17104_v54 = vmov 0  ;;  %vm1471_vm9 = vcmp.eq.s32.totalorder %v9976_v40, %v10875_v2  ;;  %vm1475_vm6 = vcmp.eq.s32.totalorder %v9979_v45, %v10875_v2  ;;  %vm11688_vm2 = vmpackc.low %vm1140_vm5, %vm1136_vm7  ;;  %v17106_v17 = vmov 0 }
 0x274   : > { %v17105_v54 = vsel %vm11677_vm8, 4294967295, %v17104_v54  ;;  %6853 = vmatpush.bf16.msk.msrb.mxu1 %vm11677_vm8, %v16195_v60  ;;  %v17107_v17 = vsel %vm11688_vm2, 4294967295, %v17106_v17  ;;  %vm1535_vm1 = vcmp.eq.s32.totalorder %v9982_v0, %v10875_v2  ;;  %vm1539_vm4 = vcmp.eq.s32.totalorder %v9985_v49, %v10875_v2  ;;  %vm11699_vm13 = vmpackc.low %vm1204_vm15, %vm1200_vm10 }
 0x275   : > { %v17108_v55 = vmov 0  ;;  %vm1128_vm7 = vcmp.eq.s32.totalorder %v8858_v24, %v11603_v59  ;;  %vm1132_vm5 = vcmp.eq.s32.totalorder %v8861_v14, %v11603_v59  ;;  %vm11710_vm8 = vmpackc.low %vm1475_vm6, %vm1471_vm9  ;;  %v17110_v56 = vmov 0 }
 0x276   : > { %v17109_v55 = vsel %vm11699_vm13, 4294967295, %v17108_v55  ;;  %v17111_v56 = vsel %vm11710_vm8, 4294967295, %v17110_v56  ;;  %3165 = vmatmul.bf16.vlgmr.msrb.gmra.mxu0 %v10585_v47  ;;  %vm1192_vm10 = vcmp.eq.s32.totalorder %v8864_v16, %v11603_v59  ;;  %vm1196_vm15 = vcmp.eq.s32.totalorder %v8886_v27, %v11603_v59  ;;  %6867 = vmatpush.bf16.msk.msrb.mxu2 %vm11710_vm8, %v16195_v60 }
 0x277   : > { %6887 = vmatpush.bf16.msk.msra.mxu0 %vm11688_vm2, %v16195_v60  ;;  %vm11722_vm2 = vmpackc.low %vm1539_vm4, %vm1535_vm1  ;;  %v17112_v24 = vmov 0  ;;  %3178 = vmatmul.bf16.vlgmr.msrb.gmra.mxu1 %v10587_v37  ;;  %vm1463_vm9 = vcmp.eq.s32.totalorder %v10064_v8, %v10875_v2  ;;  %vm1467_vm6 = vcmp.eq.s32.totalorder %v10067_v48, %v10875_v2  ;;  %v17114_v14 = vmov 0 }
 0x278   : > { %6903 = vmatpush.bf16.msk.msra.mxu1 %vm11699_vm13, %v16195_v60  ;;  %v17113_v24 = vsel %vm11722_vm2, 4294967295, %v17112_v24  ;;  %6883 = vmatpush.bf16.msk.msrb.mxu3 %vm11722_vm2, %v16195_v60  ;;  %vm11734_vm13 = vmpackc.low %vm1132_vm5, %vm1128_vm7  ;;  %vm1527_vm1 = vcmp.eq.s32.totalorder %v10080_v18, %v10875_v2  ;;  %vm1531_vm4 = vcmp.eq.s32.totalorder %v10083_v22, %v10875_v2  ;;  %v17116_v16 = vmov 0 }
 0x279   : > { %v17115_v14 = vsel %vm11734_vm13, 4294967295, %v17114_v14  ;;  %vm11745_vm8 = vmpackc.low %vm1196_vm15, %vm1192_vm10  ;;  %vm1264_vm7 = vcmp.eq.s32.totalorder %v8765_v10, %v11603_v59  ;;  %vm1268_vm5 = vcmp.eq.s32.totalorder %v8768_v50, %v11603_v59  ;;  %v17118_v27 = vmov 0 }
 0x27a   : > { %v17117_v16 = vsel %vm11745_vm8, 4294967295, %v17116_v16  ;;  %vm11756_vm2 = vmpackc.low %vm1467_vm6, %vm1463_vm9  ;;  %vm1328_vm10 = vcmp.eq.s32.totalorder %v8771_v52, %v11603_v59  ;;  %vm1332_vm15 = vcmp.eq.s32.totalorder %v8774_v53, %v11603_v59  ;;  %v17120_v10 = vmov 0 }
 0x27b   : > { %6889 = vmatpush.bf16.msk.msra.mxu0 %vm11734_vm13, %v16195_v60  ;;  %v17119_v27 = vsel %vm11756_vm2, 4294967295, %v17118_v27  ;;  %6869 = vmatpush.bf16.msk.msrb.mxu2 %vm11756_vm2, %v16195_v60  ;;  %vm11767_vm13 = vmpackc.low %vm1531_vm4, %vm1527_vm1  ;;  %vm1120_vm9 = vcmp.eq.s32.totalorder %v8919_v41, %v11603_v59  ;;  %vm1124_vm6 = vcmp.eq.s32.totalorder %v8922_v42, %v11603_v59  ;;  %v17122_v50 = vmov 0  ;;  %v17134_v41 = vld [vmem:[#allocation32_spill] sm:$0xff]  ;;  %v17135_v42 = vld [vmem:[#allocation33_spill] sm:$0xff] }
 0x27c   : > { %6905 = vmatpush.bf16.msk.msra.mxu1 %vm11745_vm8, %v16195_v60  ;;  %v17121_v10 = vsel %vm11767_vm13, 4294967295, %v17120_v10  ;;  %6885 = vmatpush.bf16.msk.msrb.mxu3 %vm11767_vm13, %v16195_v60  ;;  %vm11778_vm8 = vmpackc.low %vm1268_vm5, %vm1264_vm7  ;;  %vm1184_vm1 = vcmp.eq.s32.totalorder %v8942_v13, %v11603_v59  ;;  %vm1188_vm4 = vcmp.eq.s32.totalorder %v8973_v29, %v11603_v59  ;;  %v17124_v52 = vmov 0  ;;  %v17138_v29 = vld [vmem:[#allocation34_spill] sm:$0xff] }
 0x27d   : > { %v17123_v50 = vsel %vm11778_vm8, 4294967295, %v17122_v50  ;;  %vm11789_vm2 = vmpackc.low %vm1332_vm15, %vm1328_vm10  ;;  %vm1256_vm7 = vcmp.eq.s32.totalorder %v8844_v7, %v11603_v59  ;;  %vm1260_vm5 = vcmp.eq.s32.totalorder %v8847_v30, %v11603_v59  ;;  %v17126_v53 = vmov 0 }
 0x27e   : > { %v17125_v52 = vsel %vm11789_vm2, 4294967295, %v17124_v52  ;;  %3191 = vmatmul.bf16.vlgmr.msrb.gmra.mxu2 %v10681_v62  ;;  %vm11801_vm13 = vmpackc.low %vm1124_vm6, %vm1120_vm9  ;;  %vm1320_vm10 = vcmp.eq.s32.totalorder %v16524_v32, %v11603_v59  ;;  %vm1324_vm15 = vcmp.eq.s32.totalorder %v16868_v31, %v11603_v59  ;;  %v17128_v7 = vmov 0  ;;  %v17139_v31 = vld [vmem:[#allocation36_spill] sm:$0xff] }
 0x27f   : > { %6919 = vmatpush.bf16.msk.msra.mxu2 %vm11778_vm8, %v16195_v60  ;;  %v17127_v53 = vsel %vm11801_vm13, 4294967295, %v17126_v53  ;;  %3204 = vmatmul.bf16.vlgmr.msrb.gmra.mxu3 %v10679_v15  ;;  %vm11813_vm8 = vmpackc.low %vm1188_vm4, %vm1184_vm1  ;;  %vm1112_vm9 = vcmp.eq.s32.totalorder %v16532_v21, %v11603_v59  ;;  %vm1116_vm6 = vcmp.eq.s32.totalorder %v16533_v51, %v11603_v59  ;;  %v17130_v30 = vmov 0  ;;  %v17142_v32 = vld [vmem:[#allocation56_spill] sm:$0xff]  ;;  %v17143_v51 = vld [vmem:[#allocation57_spill] sm:$0xff] }
 0x280   : > { %6935 = vmatpush.bf16.msk.msra.mxu3 %vm11789_vm2, %v16195_v60  ;;  %6891 = vmatpush.bf16.msk.msra.mxu0 %vm11801_vm13, %v16195_v60  ;;  %v17129_v7 = vsel %vm11813_vm8, 4294967295, %v17128_v7  ;;  %vm11824_vm2 = vmpackc.low %vm1260_vm5, %vm1256_vm7  ;;  %vm1176_vm1 = vcmp.eq.s32.totalorder %v9023_v39, %v11603_v59  ;;  %vm1180_vm4 = vcmp.eq.s32.totalorder %v16875_v19, %v11603_v59  ;;  %v17132_v13 = vmov 0  ;;  %v17146_v19 = vld [vmem:[#allocation60_spill] sm:$0xff] }
 0x281   : > { %6907 = vmatpush.bf16.msk.msra.mxu1 %vm11813_vm8, %v16195_v60  ;;  %v17131_v30 = vsel %vm11824_vm2, 4294967295, %v17130_v30  ;;  %vm11835_vm13 = vmpackc.low %vm1324_vm15, %vm1320_vm10  ;;  %vm1248_vm7 = vcmp.eq.s32.totalorder %v17134_v41, %v11603_v59  ;;  %vm1252_vm5 = vcmp.eq.s32.totalorder %v17135_v42, %v11603_v59  ;;  %v17136_v39 = vmov 0  ;;  %v17147_v41 = vld [vmem:[#allocation62_spill] sm:$0xff] }
 0x282   : > { %v17133_v13 = vsel %vm11835_vm13, 4294967295, %v17132_v13  ;;  %vm11846_vm8 = vmpackc.low %vm1116_vm6, %vm1112_vm9  ;;  %vm1312_vm10 = vcmp.eq.s32.totalorder %v17138_v29, %v11603_v59  ;;  %vm1316_vm15 = vcmp.eq.s32.totalorder %v17139_v31, %v11603_v59  ;;  %v17140_v21 = vmov 0  ;;  %v17150_v29 = vld [vmem:[#allocation42_spill] sm:$0xff] }
 0x283   : > { %6921 = vmatpush.bf16.msk.msra.mxu2 %vm11824_vm2, %v16195_v60  ;;  %v17137_v39 = vsel %vm11846_vm8, 4294967295, %v17136_v39  ;;  %vm11857_vm2 = vmpackc.low %vm1180_vm4, %vm1176_vm1  ;;  %vm1104_vm9 = vcmp.eq.s32.totalorder %v17142_v32, %v11603_v59  ;;  %vm1108_vm6 = vcmp.eq.s32.totalorder %v17143_v51, %v11603_v59  ;;  %v17144_v2 = vmov 0  ;;  %v17170_v32 = vld [vmem:[#allocation85_spill] sm:$0xff] }
 0x284   : > { %6937 = vmatpush.bf16.msk.msra.mxu3 %vm11835_vm13, %v16195_v60  ;;  %6893 = vmatpush.bf16.msk.msra.mxu0 %vm11846_vm8, %v16195_v60  ;;  %v17141_v21 = vsel %vm11857_vm2, 4294967295, %v17140_v21  ;;  %vm11868_vm13 = vmpackc.low %vm1252_vm5, %vm1248_vm7  ;;  %vm1168_vm1 = vcmp.eq.s32.totalorder %v17146_v19, %v11603_v59  ;;  %vm1172_vm4 = vcmp.eq.s32.totalorder %v17147_v41, %v11603_v59  ;;  %v17148_v42 = vmov 0  ;;  %v17174_v19 = vld [vmem:[#allocation65_spill] sm:$0xff]  ;;  %v17175_v41 = vld [vmem:[#allocation66_spill] sm:$0xff] }
 0x285   : > { %6909 = vmatpush.bf16.msk.msra.mxu1 %vm11857_vm2, %v16195_v60  ;;  %v17145_v2 = vsel %vm11868_vm13, 4294967295, %v17144_v2  ;;  %vm11879_vm8 = vmpackc.low %vm1316_vm15, %vm1312_vm10  ;;  %vm1240_vm7 = vcmp.eq.s32.totalorder %v16897_v44, %v11603_v59  ;;  %vm1244_vm5 = vcmp.eq.s32.totalorder %v17150_v29, %v11603_v59  ;;  %v17151_v31 = vmov 0 }
 0x286   : > { %v17149_v42 = vsel %vm11879_vm8, 4294967295, %v17148_v42  ;;  %vm11890_vm2 = vmpackc.low %vm1108_vm6, %vm1104_vm9  ;;  %vm1304_vm10 = vcmp.eq.s32.totalorder %v16902_v28, %v11603_v59  ;;  %vm1308_vm15 = vcmp.eq.s32.totalorder %v16903_v46, %v11603_v59  ;;  %v17153_v44 = vmov 0  ;;  %v17169_v46 = vld [vmem:[#allocation81_spill] sm:$0xff] }
 0x287   : > { %6923 = vmatpush.bf16.msk.msra.mxu2 %vm11868_vm13, %v16195_v60  ;;  %v17152_v31 = vsel %vm11890_vm2, 4294967295, %v17151_v31  ;;  %vm11901_vm13 = vmpackc.low %vm1172_vm4, %vm1168_vm1  ;;  %vm1096_vm9 = vcmp.eq.s32.totalorder %v16589_v9, %v11603_v59  ;;  %vm1100_vm6 = vcmp.eq.s32.totalorder %v16590_v63, %v11603_v59  ;;  %v17155_v28 = vmov 0  ;;  %v17165_v63 = vld [vmem:[#allocation80_spill] sm:$0xff] }
 0x288   : > { %6939 = vmatpush.bf16.msk.msra.mxu3 %vm11879_vm8, %v16195_v60  ;;  %6895 = vmatpush.bf16.msk.msra.mxu0 %vm11890_vm2, %v16195_v60  ;;  %v17154_v44 = vsel %vm11901_vm13, 4294967295, %v17153_v44  ;;  %vm11912_vm8 = vmpackc.low %vm1244_vm5, %vm1240_vm7  ;;  %vm1160_vm1 = vcmp.eq.s32.totalorder %v9208_v57, %v11603_v59  ;;  %vm1164_vm4 = vcmp.eq.s32.totalorder %v16594_v4, %v11603_v59  ;;  %v17157_v9 = vmov 0  ;;  %v17161_v4 = vld [vmem:[#allocation55_spill] sm:$0xff] }
 0x289   : > { %6911 = vmatpush.bf16.msk.msra.mxu1 %vm11901_vm13, %v16195_v60  ;;  %v17156_v28 = vsel %vm11912_vm8, 4294967295, %v17155_v28  ;;  %vm11923_vm2 = vmpackc.low %vm1308_vm15, %vm1304_vm10  ;;  %vm1232_vm7 = vcmp.eq.s32.totalorder %v16601_v35, %v11603_v59  ;;  %vm1236_vm5 = vcmp.eq.s32.totalorder %v16602_v61, %v11603_v59  ;;  %v17159_v57 = vmov 0  ;;  %v17164_v61 = vld [vmem:[#allocation79_spill] sm:$0xff] }
 0x28a   : > { %v17158_v9 = vsel %vm11923_vm2, 4294967295, %v17157_v9  ;;  %vm11934_vm13 = vmpackc.low %vm1100_vm6, %vm1096_vm9  ;;  %vm1296_vm10 = vcmp.eq.s32.totalorder %v16608_v38, %v11603_v59  ;;  %vm1300_vm15 = vcmp.eq.s32.totalorder %v17161_v4, %v11603_v59  ;;  %v17162_v35 = vmov 0  ;;  %v17179_v4 = vld [vmem:[#allocation67_spill] sm:$0xff] }
 0x28b   : > { %6925 = vmatpush.bf16.msk.msra.mxu2 %vm11912_vm8, %v16195_v60  ;;  %v17160_v57 = vsel %vm11934_vm13, 4294967295, %v17159_v57  ;;  %vm11945_vm8 = vmpackc.low %vm1164_vm4, %vm1160_vm1  ;;  %vm1088_vm9 = vcmp.eq.s32.totalorder %v17164_v61, %v11603_v59  ;;  %vm1092_vm6 = vcmp.eq.s32.totalorder %v17165_v63, %v11603_v59  ;;  %v17166_v38 = vmov 0  ;;  %v17180_v61 = vld [vmem:[#allocation68_spill] sm:$0xff] }
 0x28c   : > { %6941 = vmatpush.bf16.msk.msra.mxu3 %vm11923_vm2, %v16195_v60  ;;  %6897 = vmatpush.bf16.msk.msra.mxu0 %vm11934_vm13, %v16195_v60  ;;  %v17163_v35 = vsel %vm11945_vm8, 4294967295, %v17162_v35  ;;  %vm11956_vm2 = vmpackc.low %vm1236_vm5, %vm1232_vm7  ;;  %vm1152_vm1 = vcmp.eq.s32.totalorder %v17169_v46, %v11603_v59  ;;  %vm1156_vm4 = vcmp.eq.s32.totalorder %v17170_v32, %v11603_v59  ;;  %v17171_v51 = vmov 0  ;;  %v17184_v46 = vld [vmem:[#allocation22_spill] sm:$0xff]  ;;  %v17185_v32 = vld [vmem:[#allocation91_spill] sm:$0xff] }
 0x28d   : > { %6913 = vmatpush.bf16.msk.msra.mxu1 %vm11945_vm8, %v16195_v60  ;;  %v17167_v38 = vsel %vm11956_vm2, 4294967295, %v17166_v38  ;;  %vm11967_vm13 = vmpackc.low %vm1300_vm15, %vm1296_vm10  ;;  %vm1224_vm7 = vcmp.eq.s32.totalorder %v17174_v19, %v11603_v59  ;;  %vm1228_vm5 = vcmp.eq.s32.totalorder %v17175_v41, %v11603_v59  ;;  %v17176_v29 = vmov 0  ;;  %v17189_v41 = vld [vmem:[#allocation93_spill] sm:$0xff] }
 0x28e   : > { %17168 = vst [vmem:[#allocation180_spill] sm:$0xff] %v17167_v38  ;;  %v17172_v51 = vsel %vm11967_vm13, 4294967295, %v17171_v51  ;;  %vm11978_vm8 = vmpackc.low %vm1092_vm6, %vm1088_vm9  ;;  %vm1288_vm10 = vcmp.eq.s32.totalorder %v17179_v4, %v11603_v59  ;;  %vm1292_vm15 = vcmp.eq.s32.totalorder %v17180_v61, %v11603_v59  ;;  %v17181_v63 = vmov 0  ;;  %v17190_v4 = vld [vmem:[#allocation95_spill] sm:$0xff] }
 0x28f   : > { %6927 = vmatpush.bf16.msk.msra.mxu2 %vm11956_vm2, %v16195_v60  ;;  %17173 = vst [vmem:[#allocation183_spill] sm:$0xff] %v17172_v51  ;;  %v17177_v29 = vsel %vm11978_vm8, 4294967295, %v17176_v29  ;;  %vm11989_vm2 = vmpackc.low %vm1156_vm4, %vm1152_vm1  ;;  %vm1080_vm9 = vcmp.eq.s32.totalorder %v17184_v46, %v11603_v59  ;;  %vm1084_vm6 = vcmp.eq.s32.totalorder %v17185_v32, %v11603_v59  ;;  %v17186_v19 = vmov 0  ;;  %v17194_v46 = vld [vmem:[#allocation98_spill] sm:$0xff]  ;;  %v17195_v32 = vld [vmem:[#allocation99_spill] sm:$0xff] }
 0x290   : > { %6943 = vmatpush.bf16.msk.msra.mxu3 %vm11967_vm13, %v16195_v60  ;;  %17178 = vst [vmem:[#allocation32_spill] sm:$0xff] %v17177_v29  ;;  %6899 = vmatpush.bf16.msk.msra.mxu0 %vm11978_vm8, %v16195_v60  ;;  %v17182_v63 = vsel %vm11989_vm2, 4294967295, %v17181_v63  ;;  %vm12000_vm13 = vmpackc.low %vm1228_vm5, %vm1224_vm7  ;;  %vm1144_vm1 = vcmp.eq.s32.totalorder %v17189_v41, %v11603_v59  ;;  %vm1148_vm4 = vcmp.eq.s32.totalorder %v17190_v4, %v11603_v59  ;;  %v17191_v61 = vmov 0  ;;  %v17199_v4 = vld [vmem:[#allocation100_spill] sm:$0xff]  ;;  %v17220_v51 = vld [vmem:[#allocation109_spill] sm:$0xff] }
 0x291   : > { %17183 = vst [vmem:[#allocation33_spill] sm:$0xff] %v17182_v63  ;;  %6915 = vmatpush.bf16.msk.msra.mxu1 %vm11989_vm2, %v16195_v60  ;;  %v17187_v19 = vsel %vm12000_vm13, 4294967295, %v17186_v19  ;;  %vm12011_vm8 = vmpackc.low %vm1292_vm15, %vm1288_vm10  ;;  %vm1392_vm7 = vcmp.eq.s32.totalorder %v17194_v46, %v11603_v59  ;;  %vm1396_vm5 = vcmp.eq.s32.totalorder %v17195_v32, %v11603_v59  ;;  %v17196_v41 = vmov 0  ;;  %v17204_v32 = vld [vmem:[#allocation74_spill] sm:$0xff]  ;;  %v2971_v63 = vpop.f32.mrf.mxu1  ;;  %v17219_v29 = vld [vmem:[#allocation108_spill] sm:$0xff] }
 0x292   : > { %17188 = vst [vmem:[#allocation34_spill] sm:$0xff] %v17187_v19  ;;  %v17192_v61 = vsel %vm12011_vm8, 4294967295, %v17191_v61  ;;  %vm12022_vm2 = vmpackc.low %vm1084_vm6, %vm1080_vm9  ;;  %vm1456_vm10 = vcmp.eq.s32.totalorder %v17199_v4, %v11603_v59  ;;  %v17200_v19 = vld [vmem:[#allocation102_spill] sm:$0xff]  ;;  %v17201_v46 = vmov 0  ;;  %vm1216_vm9 = vcmp.eq.s32.totalorder %v17204_v32, %v11603_v59  ;;  %v17213_v32 = vld [vmem:[#allocation105_spill] sm:$0xff] }
 0x293   : > { %6929 = vmatpush.bf16.msk.msra.mxu2 %vm12000_vm13, %v16195_v60  ;;  %17193 = vst [vmem:[#allocation36_spill] sm:$0xff] %v17192_v61  ;;  %v17197_v41 = vsel %vm12022_vm2, 4294967295, %v17196_v41  ;;  %vm1460_vm15 = vcmp.eq.s32.totalorder %v17200_v19, %v11603_v59  ;;  %vm12033_vm13 = vmpackc.low %vm1148_vm4, %vm1144_vm1  ;;  %v17205_v61 = vld [vmem:[#allocation75_spill] sm:$0xff]  ;;  %v17206_v19 = vmov 0  ;;  %v17209_v4 = vld [vmem:[#allocation78_spill] sm:$0xff] }
 0x294   : > { %6945 = vmatpush.bf16.msk.msra.mxu3 %vm12011_vm8, %v16195_v60  ;;  %17198 = vst [vmem:[#allocation56_spill] sm:$0xff] %v17197_v41  ;;  %6901 = vmatpush.bf16.msk.msra.mxu0 %vm12022_vm2, %v16195_v60  ;;  %v17202_v46 = vsel %vm12033_vm13, 4294967295, %v17201_v46  ;;  %vm1220_vm6 = vcmp.eq.s32.totalorder %v17205_v61, %v11603_v59  ;;  %vm12044_vm8 = vmpackc.low %vm1396_vm5, %vm1392_vm7  ;;  %vm1284_vm4 = vcmp.eq.s32.totalorder %v17209_v4, %v11603_v59  ;;  %v17210_v61 = vmov 0  ;;  %v2958_v41 = vpop.f32.mrf.mxu0 }
 0x295   : > { %17203 = vst [vmem:[#allocation57_spill] sm:$0xff] %v17202_v46  ;;  %6917 = vmatpush.bf16.msk.msra.mxu1 %vm12033_vm13, %v16195_v60  ;;  %v17207_v19 = vsel %vm12044_vm8, 4294967295, %v17206_v19  ;;  %vm12055_vm2 = vmpackc.low %vm1460_vm15, %vm1456_vm10  ;;  %v17214_v46 = vld [vmem:[#allocation106_spill] sm:$0xff]  ;;  %v17215_v4 = vmov 0  ;;  %vm1448_vm10 = vcmp.eq.s32.totalorder %v17219_v29, %v11603_v59  ;;  %vm1452_vm15 = vcmp.eq.s32.totalorder %v17220_v51, %v11603_v59  ;;  %v17226_v29 = vld [vmem:[#allocation87_spill] sm:$0xff] }
 0x296   : > { %17208 = vst [vmem:[#allocation60_spill] sm:$0xff] %v17207_v19  ;;  %v17211_v61 = vsel %vm12055_vm2, 4294967295, %v17210_v61  ;;  %vm12066_vm1 = vmpackc.low %vm1220_vm6, %vm1216_vm9  ;;  %v17218_v19 = vld [vmem:[#allocation158_spill] sm:$0xff]  ;;  %v2959_v38 = vadd.f32 %v2958_v41, %v11576_v26  ;;  %vm17221_vm9 = vcmp.eq.s32.totalorder %v16962_v6, %v11603_v59  ;;  %vm1208_vm5 = vcmp.eq.s32.totalorder %v17226_v29, %v11603_v59  ;;  %v17227_v51 = vld [vmem:[#allocation88_spill] sm:$0xff] }
 0x297   : > { %17212 = vst [vmem:[#allocation62_spill] sm:$0xff] %v17211_v61  ;;  %v17216_v4 = vsel %vm12066_vm1, 4294967295, %v17215_v4  ;;  %3217 = vmatmul.bf16.vlgmr.msra.gmra.mxu0 %v17218_v19  ;;  %6931 = vmatpush.bf16.msk.msra.mxu2 %vm12066_vm1, %v16195_v60  ;;  %vm12082_vm6 = vmpackc.low %vm1284_vm4, %vm17221_vm9  ;;  %v17222_v61 = vmov 0  ;;  %v17225_v19 = vld [vmem:[#allocation160_spill] sm:$0xff]  ;;  %vm1212_vm7 = vcmp.eq.s32.totalorder %v17227_v51, %v11603_v59  ;;  %vm17228_vm1 = vcmp.eq.s32.totalorder %v17213_v32, %v11603_v59  ;;  %v17233_v26 = vld [vmem:[#allocation89_spill] sm:$0xff] }
 0x298   : > { %6951 = vmatpush.bf16.msk.msrb.mxu0 %vm12044_vm8, %v16195_v60  ;;  %17217 = vst [vmem:[#allocation42_spill] sm:$0xff] %v17216_v4  ;;  %v17223_v61 = vsel %vm12082_vm6, 4294967295, %v17222_v61  ;;  %3230 = vmatmul.bf16.vlgmr.msra.gmra.mxu1 %v17225_v19  ;;  %vm17229_vm4 = vcmp.eq.s32.totalorder %v17214_v46, %v11603_v59  ;;  %v17230_v6 = vmov 0  ;;  %v17234_v41 = vld [vmem:[#allocation90_spill] sm:$0xff]  ;;  %v2972_v19 = vadd.f32 %v2971_v63, %v2959_v38  ;;  %v17239_v29 = vld [vmem:[#allocation111_spill] sm:$0xff]  ;;  %vm12122_vm13 = vmpackc.low %vm1212_vm7, %vm1208_vm5 }
 0x299   : > { %6967 = vmatpush.bf16.msk.msrb.mxu1 %vm12055_vm2, %v16195_v60  ;;  %17224 = vst [vmem:[#allocation55_spill] sm:$0xff] %v17223_v61  ;;  %6947 = vmatpush.bf16.msk.msra.mxu3 %vm12082_vm6, %v16195_v60  ;;  %vm12100_vm9 = vmpackc.low %vm17229_vm4, %vm17228_vm1  ;;  %vm1272_vm2 = vcmp.eq.s32.totalorder %v17233_v26, %v11603_v59  ;;  %vm1276_vm8 = vcmp.eq.s32.totalorder %v17234_v41, %v11603_v59  ;;  %v17235_v32 = vmov 0  ;;  %v17238_v46 = vld [vmem:[#allocation110_spill] sm:$0xff]  ;;  %v17240_v38 = vmov 0  ;;  %v17243_v63 = vld [vmem:[#allocation112_spill] sm:$0xff] }
 0x29a   : > { %v17231_v6 = vsel %vm12100_vm9, 4294967295, %v17230_v6  ;;  %vm12111_vm6 = vmpackc.low %vm1452_vm15, %vm1448_vm10  ;;  %vm1520_vm1 = vcmp.eq.s32.totalorder %v17238_v46, %v11603_v59  ;;  %vm1524_vm4 = vcmp.eq.s32.totalorder %v17239_v29, %v11603_v59  ;;  %v17241_v38 = vsel %vm12122_vm13, 4294967295, %v17240_v38  ;;  %v17244_v51 = vld [vmem:[#allocation114_spill] sm:$0xff]  ;;  %v17248_v41 = vld [vmem:[#allocation116_spill] sm:$0xff] }
 0x29b   : > { %17232 = vst [vmem:[#allocation79_spill] sm:$0xff] %v17231_v6  ;;  %v17236_v32 = vsel %vm12111_vm6, 4294967295, %v17235_v32  ;;  %vm1584_vm10 = vcmp.eq.s32.totalorder %v17243_v63, %v11603_v59  ;;  %vm1588_vm15 = vcmp.eq.s32.totalorder %v17244_v51, %v11603_v59  ;;  %6933 = vmatpush.bf16.msk.msra.mxu2 %vm12122_vm13, %v16195_v60  ;;  %v17245_v26 = vmov 0  ;;  %v17249_v46 = vld [vmem:[#allocation117_spill] sm:$0xff]  ;;  %v17253_v63 = vld [vmem:[#allocation119_spill] sm:$0xff]  ;;  %v17254_v51 = vld [vmem:[#allocation120_spill] sm:$0xff] }
 0x29c   : > { %6953 = vmatpush.bf16.msk.msrb.mxu0 %vm12100_vm9, %v16195_v60  ;;  %17237 = vst [vmem:[#allocation80_spill] sm:$0xff] %v17236_v32  ;;  %vm12133_vm9 = vmpackc.low %vm1276_vm8, %vm1272_vm2  ;;  %vm1376_vm7 = vcmp.eq.s32.totalorder %v17248_v41, %v11603_v59  ;;  %vm1380_vm5 = vcmp.eq.s32.totalorder %v17249_v46, %v11603_v59  ;;  %v17250_v29 = vmov 0  ;;  %vm1444_vm8 = vcmp.eq.s32.totalorder %v17254_v51, %v11603_v59  ;;  %v17257_v46 = vld [vmem:[#allocation121_spill] sm:$0xff]  ;;  %v2973_v32 = vpop.f32.mrf.mxu1  ;;  %v17259_v51 = vld [vmem:[#allocation140_spill] sm:$0xff] }
 0x29d   : > { %6969 = vmatpush.bf16.msk.msrb.mxu1 %vm12111_vm6, %v16195_v60  ;;  %17242 = vst [vmem:[#allocation81_spill] sm:$0xff] %v17241_v38  ;;  %v17246_v26 = vsel %vm12133_vm9, 4294967295, %v17245_v26  ;;  %6949 = vmatpush.bf16.msk.msra.mxu3 %vm12133_vm9, %v16195_v60  ;;  %vm12144_vm6 = vmpackc.low %vm1524_vm4, %vm1520_vm1  ;;  %v17255_v41 = vmov 0  ;;  %v2960_v38 = vpop.f32.mrf.mxu0  ;;  %v17262_v6 = vld [vmem:[#allocation125_spill] sm:$0xff]  ;;  %v17263_v61 = vld [vmem:[#allocation128_spill] sm:$0xff]  ;;  %vm17265_vm1 = vcmp.eq.s32.totalorder %v17253_v63, %v11603_v59  ;;  %v17266_v32 = vmov 0 }
 0x29e   : > { %17247 = vst [vmem:[#allocation85_spill] sm:$0xff] %v17246_v26  ;;  %v17251_v29 = vsel %vm12144_vm6, 4294967295, %v17250_v29  ;;  %vm12155_vm13 = vmpackc.low %vm1588_vm15, %vm1584_vm10  ;;  %v17258_v26 = vld [vmem:[#allocation123_spill] sm:$0xff]  ;;  %3243 = vmatmul.bf16.vlgmr.msra.gmra.mxu2 %v17259_v51  ;;  %vm1576_vm10 = vcmp.eq.s32.totalorder %v17262_v6, %v11603_v59  ;;  %vm1580_vm15 = vcmp.eq.s32.totalorder %v17263_v61, %v11603_v59  ;;  %v17264_v4 = vld [vmem:[#allocation142_spill] sm:$0xff]  ;;  %v17272_v61 = vmov 0 }
 0x29f   : > { %17252 = vst [vmem:[#allocation65_spill] sm:$0xff] %v17251_v29  ;;  %6983 = vmatpush.bf16.msk.msrb.mxu2 %vm12144_vm6, %v16195_v60  ;;  %v17256_v41 = vsel %vm12155_vm13, 4294967295, %v17255_v41  ;;  %vm1516_vm4 = vcmp.eq.s32.totalorder %v17258_v26, %v11603_v59  ;;  %vm12167_vm2 = vmpackc.low %vm1380_vm5, %vm1376_vm7  ;;  %v17260_v29 = vmov 0  ;;  %v17269_v38 = vld [vmem:[#allocation129_spill] sm:$0xff]  ;;  %v17270_v6 = vld [vmem:[#allocation130_spill] sm:$0xff]  ;;  %v17277_v63 = vmov 0 }
 0x2a0   : > { %v17261_v29 = vsel %vm12167_vm2, 4294967295, %v17260_v29  ;;  %3256 = vmatmul.bf16.vlgmr.msra.gmra.mxu3 %v17264_v4  ;;  %6955 = vmatpush.bf16.msk.msrb.mxu0 %vm12167_vm2, %v16195_v60  ;;  %vm1368_vm7 = vcmp.eq.s32.totalorder %v17269_v38, %v11603_v59  ;;  %vm1372_vm5 = vcmp.eq.s32.totalorder %v17270_v6, %v11603_v59  ;;  %vm17271_vm2 = vcmp.eq.s32.totalorder %v17257_v46, %v11603_v59  ;;  %v17275_v4 = vld [vmem:[#allocation132_spill] sm:$0xff]  ;;  %v17276_v26 = vld [vmem:[#allocation133_spill] sm:$0xff]  ;;  %vm12207_vm9 = vmpackc.low %vm1580_vm15, %vm1576_vm10  ;;  %v2984_v38 = vpop.f32.mrf.mxu2 }
 0x2a1   : > { %6999 = vmatpush.bf16.msk.msrb.mxu3 %vm12155_vm13, %v16195_v60  ;;  %vm12182_vm13 = vmpackc.low %vm1444_vm8, %vm17265_vm1  ;;  %vm1432_vm8 = vcmp.eq.s32.totalorder %v17275_v4, %v11603_v59  ;;  %vm1436_vm1 = vcmp.eq.s32.totalorder %v17276_v26, %v11603_v59  ;;  %v17278_v63 = vsel %vm12207_vm9, 4294967295, %v17277_v63  ;;  %v17280_v46 = vld [vmem:[#allocation134_spill] sm:$0xff]  ;;  %v17281_v51 = vld [vmem:[#allocation136_spill] sm:$0xff]  ;;  %v17282_v6 = vmov 0 }
 0x2a2   : > { %v17267_v32 = vsel %vm12182_vm13, 4294967295, %v17266_v32  ;;  %6971 = vmatpush.bf16.msk.msrb.mxu1 %vm12182_vm13, %v16195_v60  ;;  %vm12196_vm6 = vmpackc.low %vm1516_vm4, %vm17271_vm2  ;;  %17279 = vst [vmem:[#allocation68_spill] sm:$0xff] %v17278_v63  ;;  %vm1504_vm2 = vcmp.eq.s32.totalorder %v17280_v46, %v11603_v59  ;;  %vm1508_vm4 = vcmp.eq.s32.totalorder %v17281_v51, %v11603_v59  ;;  %v17285_v4 = vld [vmem:[#allocation138_spill] sm:$0xff]  ;;  %v17286_v26 = vld [vmem:[#allocation143_spill] sm:$0xff]  ;;  %v2997_v46 = vpop.f32.mrf.mxu3  ;;  %v17287_v51 = vmov 0 }
 0x2a3   : > { %17268 = vst [vmem:[#allocation66_spill] sm:$0xff] %v17267_v32  ;;  %v17273_v61 = vsel %vm12196_vm6, 4294967295, %v17272_v61  ;;  %6985 = vmatpush.bf16.msk.msrb.mxu2 %vm12196_vm6, %v16195_v60  ;;  %vm12218_vm13 = vmpackc.low %vm1372_vm5, %vm1368_vm7  ;;  %vm1568_vm10 = vcmp.eq.s32.totalorder %v17285_v4, %v11603_v59  ;;  %vm1572_vm15 = vcmp.eq.s32.totalorder %v17286_v26, %v11603_v59  ;;  %v17290_v63 = vld [vmem:[#allocation144_spill] sm:$0xff]  ;;  %v17291_v32 = vld [vmem:[#allocation145_spill] sm:$0xff] }
 0x2a4   : > { %17274 = vst [vmem:[#allocation67_spill] sm:$0xff] %v17273_v61  ;;  %v17283_v6 = vsel %vm12218_vm13, 4294967295, %v17282_v6  ;;  %v2985_v61 = vadd.f32 %v2984_v38, %v2972_v19  ;;  %6957 = vmatpush.bf16.msk.msrb.mxu0 %vm12218_vm13, %v16195_v60  ;;  %vm12229_vm6 = vmpackc.low %vm1436_vm1, %vm1432_vm8  ;;  %vm1360_vm7 = vcmp.eq.s32.totalorder %v17290_v63, %v11603_v59  ;;  %vm1364_vm5 = vcmp.eq.s32.totalorder %v17291_v32, %v11603_v59  ;;  %v17295_v38 = vld [vmem:[#allocation146_spill] sm:$0xff]  ;;  %v17296_v4 = vld [vmem:[#allocation148_spill] sm:$0xff] }
 0x2a5   : > { %7001 = vmatpush.bf16.msk.msrb.mxu3 %vm12207_vm9, %v16195_v60  ;;  %17284 = vst [vmem:[#allocation22_spill] sm:$0xff] %v17283_v6  ;;  %v17288_v51 = vsel %vm12229_vm6, 4294967295, %v17287_v51  ;;  %vm12240_vm9 = vmpackc.low %vm1508_vm4, %vm1504_vm2  ;;  %v17292_v19 = vmov 0  ;;  %vm1424_vm8 = vcmp.eq.s32.totalorder %v17295_v38, %v11603_v59  ;;  %vm1428_vm1 = vcmp.eq.s32.totalorder %v17296_v4, %v11603_v59  ;;  %v17300_v63 = vld [vmem:[#allocation149_spill] sm:$0xff]  ;;  %v3010_v38 = vpop.f32.mrf.mxu0  ;;  %v17305_v4 = vld [vmem:[#allocation155_spill] sm:$0xff] }
 0x2a6   : > { %17289 = vst [vmem:[#allocation91_spill] sm:$0xff] %v17288_v51  ;;  %6973 = vmatpush.bf16.msk.msrb.mxu1 %vm12229_vm6, %v16195_v60  ;;  %v17293_v19 = vsel %vm12240_vm9, 4294967295, %v17292_v19  ;;  %v12248_v26 = vadd.f32 %v2997_v46, %v2985_v61  ;;  %vm12253_vm13 = vmpackc.low %vm1572_vm15, %vm1568_vm10  ;;  %v17297_v32 = vmov 0  ;;  %vm1496_vm2 = vcmp.eq.s32.totalorder %v17300_v63, %v11603_v59  ;;  %v17301_v51 = vld [vmem:[#allocation151_spill] sm:$0xff]  ;;  %v17304_v46 = vld [vmem:[#allocation154_spill] sm:$0xff] }
 0x2a7   : > { %17294 = vst [vmem:[#allocation93_spill] sm:$0xff] %v17293_v19  ;;  %6987 = vmatpush.bf16.msk.msrb.mxu2 %vm12240_vm9, %v16195_v60  ;;  %v17298_v32 = vsel %vm12253_vm13, 4294967295, %v17297_v32  ;;  %vm1500_vm4 = vcmp.eq.s32.totalorder %v17301_v51, %v11603_v59  ;;  %vm12264_vm6 = vmpackc.low %vm1364_vm5, %vm1360_vm7  ;;  %v17302_v61 = vmov 0  ;;  %vm1560_vm10 = vcmp.eq.s32.totalorder %v17304_v46, %v11603_v59  ;;  %v3023_v19 = vpop.f32.mrf.mxu1  ;;  %v17308_v63 = vld [vmem:[#allocation156_spill] sm:$0xff] }
 0x2a8   : > { %17299 = vst [vmem:[#allocation95_spill] sm:$0xff] %v17298_v32  ;;  %v17303_v61 = vsel %vm12264_vm6, 4294967295, %v17302_v61  ;;  %vm1564_vm15 = vcmp.eq.s32.totalorder %v17305_v4, %v11603_v59  ;;  %6959 = vmatpush.bf16.msk.msrb.mxu0 %vm12264_vm6, %v16195_v60  ;;  %vm12275_vm9 = vmpackc.low %vm1428_vm1, %vm1424_vm8  ;;  %v17306_v51 = vmov 0  ;;  %vm1352_vm7 = vcmp.eq.s32.totalorder %v17308_v63, %v11603_v59  ;;  %v17309_v32 = vld [vmem:[#allocation159_spill] sm:$0xff]  ;;  %v2986_v63 = vpop.f32.mrf.mxu2 }
 0x2a9   : > { %7003 = vmatpush.bf16.msk.msrb.mxu3 %vm12253_vm13, %v16195_v60  ;;  %v17307_v51 = vsel %vm12275_vm9, 4294967295, %v17306_v51  ;;  %vm1356_vm5 = vcmp.eq.s32.totalorder %v17309_v32, %v11603_v59  ;;  %v3024_v6 = vadd.f32 %v3023_v19, %v3010_v38  ;;  %vm12286_vm13 = vmpackc.low %vm1500_vm4, %vm1496_vm2  ;;  %v17310_v46 = vmov 0  ;;  %v17313_v4 = vld [vmem:[#allocation163_spill] sm:$0xff]  ;;  %v17316_v32 = vld [vmem:[#allocation164_spill] sm:$0xff] }
 0x2aa   : > { %6975 = vmatpush.bf16.msk.msrb.mxu1 %vm12275_vm9, %v16195_v60  ;;  %v17311_v46 = vsel %vm12286_vm13, 4294967295, %v17310_v46  ;;  %vm1416_vm8 = vcmp.eq.s32.totalorder %v17059_v58, %v11603_v59  ;;  %vm1420_vm1 = vcmp.eq.s32.totalorder %v17313_v4, %v11603_v59  ;;  %vm12297_vm6 = vmpackc.low %vm1564_vm15, %vm1560_vm10  ;;  %v17314_v19 = vmov 0  ;;  %v17317_v38 = vld [vmem:[#allocation165_spill] sm:$0xff]  ;;  %v17320_v4 = vld [vmem:[#allocation168_spill] sm:$0xff] }
 0x2ab   : > { %17312 = vst [vmem:[#allocation98_spill] sm:$0xff] %v17311_v46  ;;  %6989 = vmatpush.bf16.msk.msrb.mxu2 %vm12286_vm13, %v16195_v60  ;;  %v17315_v19 = vsel %vm12297_vm6, 4294967295, %v17314_v19  ;;  %vm1488_vm2 = vcmp.eq.s32.totalorder %v17316_v32, %v11603_v59  ;;  %vm1492_vm4 = vcmp.eq.s32.totalorder %v17317_v38, %v11603_v59  ;;  %vm12308_vm9 = vmpackc.low %vm1356_vm5, %vm1352_vm7  ;;  %v17318_v58 = vmov 0  ;;  %v2999_v46 = vpop.f32.mrf.mxu3  ;;  %v17323_v38 = vld [vmem:[#allocation171_spill] sm:$0xff]  ;;  %v17327_v63 = vld [vmem:[#allocation174_spill] sm:$0xff] }
 0x2ac   : > { %v17319_v58 = vsel %vm12308_vm9, 4294967295, %v17318_v58  ;;  %vm1552_vm10 = vcmp.eq.s32.totalorder %v17070_v5, %v11603_v59  ;;  %vm1556_vm15 = vcmp.eq.s32.totalorder %v17320_v4, %v11603_v59  ;;  %6961 = vmatpush.bf16.msk.msrb.mxu0 %vm12308_vm9, %v16195_v60  ;;  %vm12319_vm13 = vmpackc.low %vm1420_vm1, %vm1416_vm8  ;;  %v17321_v32 = vmov 0  ;;  %v17326_v46 = vld [vmem:[#allocation173_spill] sm:$0xff] }
 0x2ad   : > { %7005 = vmatpush.bf16.msk.msrb.mxu3 %vm12297_vm6, %v16195_v60  ;;  %v17322_v32 = vsel %vm12319_vm13, 4294967295, %v17321_v32  ;;  %vm1344_vm7 = vcmp.eq.s32.totalorder %v17076_v3, %v11603_v59  ;;  %vm1348_vm5 = vcmp.eq.s32.totalorder %v17323_v38, %v11603_v59  ;;  %vm12330_vm6 = vmpackc.low %vm1492_vm4, %vm1488_vm2  ;;  %v17324_v5 = vmov 0  ;;  %v3012_v4 = vpop.f32.mrf.mxu0 }
 0x2ae   : > { %6977 = vmatpush.bf16.msk.msrb.mxu1 %vm12319_vm13, %v16195_v60  ;;  %v17325_v5 = vsel %vm12330_vm6, 4294967295, %v17324_v5  ;;  %vm1408_vm8 = vcmp.eq.s32.totalorder %v17326_v46, %v11603_v59  ;;  %vm1412_vm1 = vcmp.eq.s32.totalorder %v17327_v63, %v11603_v59  ;;  %vm12341_vm9 = vmpackc.low %vm1556_vm15, %vm1552_vm10  ;;  %v17328_v3 = vmov 0  ;;  %v17332_v46 = vld [vmem:[#allocation181_spill] sm:$0xff] }
 0x2af   : > { %6991 = vmatpush.bf16.msk.msrb.mxu2 %vm12330_vm6, %v16195_v60  ;;  %v17329_v3 = vsel %vm12341_vm9, 4294967295, %v17328_v3  ;;  %vm1480_vm2 = vcmp.eq.s32.totalorder %v17087_v11, %v11603_v59  ;;  %vm1484_vm4 = vcmp.eq.s32.totalorder %v17088_v33, %v11603_v59  ;;  %vm12352_vm13 = vmpackc.low %vm1348_vm5, %vm1344_vm7  ;;  %v17330_v38 = vmov 0  ;;  %v3025_v63 = vpop.f32.mrf.mxu1  ;;  %v17882_v33 = vld [vmem:[#allocation71_spill] sm:$0xff] }
 0x2b0   : > { %v17331_v38 = vsel %vm12352_vm13, 4294967295, %v17330_v38  ;;  %vm1544_vm10 = vcmp.eq.s32.totalorder %v17092_v43, %v11603_v59  ;;  %vm1548_vm15 = vcmp.eq.s32.totalorder %v17332_v46, %v11603_v59  ;;  %6963 = vmatpush.bf16.msk.msrb.mxu0 %vm12352_vm13, %v16195_v60  ;;  %vm12363_vm6 = vmpackc.low %vm1412_vm1, %vm1408_vm8  ;;  %v17333_v11 = vmov 0 }
 0x2b1   : > { %7007 = vmatpush.bf16.msk.msrb.mxu3 %vm12341_vm9, %v16195_v60  ;;  %v17334_v11 = vsel %vm12363_vm6, 4294967295, %v17333_v11  ;;  %vm1336_vm7 = vcmp.eq.s32.totalorder %v16819_v20, %v11603_v59  ;;  %vm1340_vm5 = vcmp.eq.s32.totalorder %v17097_v1, %v11603_v59  ;;  %vm12374_vm9 = vmpackc.low %vm1484_vm4, %vm1480_vm2  ;;  %vm1400_vm8 = vcmp.eq.s32.totalorder %v16824_v34, %v11603_v59  ;;  %v3036_v1 = vpop.f32.mrf.mxu2 }
 0x2b2   : > { %6979 = vmatpush.bf16.msk.msrb.mxu1 %vm12363_vm6, %v16195_v60  ;;  %vm1404_vm1 = vcmp.eq.s32.totalorder %v16825_v12, %v11603_v59  ;;  %vm12385_vm13 = vmpackc.low %vm1548_vm15, %vm1544_vm10  ;;  %v17337_v20 = vmov 0  ;;  %vm1476_vm4 = vcmp.eq.s32.totalorder %v9979_v45, %v11603_v59  ;;  %v17340_v34 = vmov 0 }
 0x2b3   : > { %6993 = vmatpush.bf16.msk.msrb.mxu2 %vm12374_vm9, %v16195_v60  ;;  %v17338_v20 = vsel %vm12385_vm13, 4294967295, %v17337_v20  ;;  %vm12396_vm6 = vmpackc.low %vm1340_vm5, %vm1336_vm7  ;;  %v3037_v12 = vadd.f32 %v3036_v1, %v3024_v6  ;;  %v3049_v43 = vpop.f32.mrf.mxu3  ;;  %v17343_v45 = vmov 0  ;;  %vm1464_vm7 = vcmp.eq.s32.totalorder %v10064_v8, %v11603_v59  ;;  %v17364_v1 = vld [vmem:[#allocation37_spill] sm:$0xff] }
 0x2b4   : > { %17339 = vst [vmem:[#allocation99_spill] sm:$0xff] %v17338_v20  ;;  %v17341_v34 = vsel %vm12396_vm6, 4294967295, %v17340_v34  ;;  %6965 = vmatpush.bf16.msk.msrb.mxu0 %vm12396_vm6, %v16195_v60  ;;  %vm12407_vm2 = vmpackc.low %vm1404_vm1, %vm1400_vm8  ;;  %vm1468_vm5 = vcmp.eq.s32.totalorder %v10067_v48, %v11603_v59  ;;  %vm17347_vm8 = vcmp.eq.s32.totalorder %v9976_v40, %v11603_v59  ;;  %v17348_v4 = vmov 0  ;;  %v17645_v6 = vld [vmem:[#allocation257_spill] sm:$0xff] }
 0x2b5   : > { %7009 = vmatpush.bf16.msk.msrb.mxu3 %vm12385_vm13, %v16195_v60  ;;  %17342 = vst [vmem:[#allocation100_spill] sm:$0xff] %v17341_v34  ;;  %v17344_v45 = vsel %vm12407_vm2, 4294967295, %v17343_v45  ;;  %vm12424_vm1 = vmpackc.low %vm1476_vm4, %vm17347_vm8  ;;  %vm1528_vm15 = vcmp.eq.s32.totalorder %v10080_v18, %v11603_v59  ;;  %vm1532_vm10 = vcmp.eq.s32.totalorder %v10083_v22, %v11603_v59  ;;  %v3050_v8 = vadd.f32 %v3049_v43, %v3037_v12  ;;  %v3062_v22 = vpop.f32.mrf.mxu0  ;;  %v17368_v43 = vld [vmem:[#allocation24_spill] sm:$0xff] }
 0x2b6   : > { %17345 = vst [vmem:[#allocation102_spill] sm:$0xff] %v17344_v45  ;;  %6981 = vmatpush.bf16.msk.msrb.mxu1 %vm12407_vm2, %v16195_v60  ;;  %v17349_v4 = vsel %vm12424_vm1, 4294967295, %v17348_v4  ;;  %vm17352_vm4 = vcmp.eq.s32.totalorder %v9982_v0, %v11603_v59  ;;  %vm17353_vm8 = vcmp.eq.s32.totalorder %v9985_v49, %v11603_v59  ;;  %v17354_v40 = vmov 0  ;;  %v17497_v59 = vld [vmem:[#allocation197_spill] sm:$0xff]  ;;  %v17711_v34 = vld [vmem:[#allocation284_spill] sm:$0xff] }
 0x2b7   : > { %17350 = vst [vmem:[#allocation74_spill] sm:$0xff] %v17349_v4  ;;  %6995 = vmatpush.bf16.msk.msrb.mxu2 %vm12424_vm1, %v16195_v60  ;;  %3269 = vmatmul.bf16.vlgmr.msrb.gmra.mxu0 %v10585_v47  ;;  %v17357_v18 = vmov 0  ;;  %v3063_v46 = vadd.f32 %v3062_v22, %v3050_v8  ;;  %v3075_v0 = vpop.f32.mrf.mxu1  ;;  %vm12457_vm1 = vmpackc.low %vm1532_vm10, %vm1528_vm15  ;;  %v17360_v49 = vmov 0  ;;  %vm17369_vm15 = vnez %v17368_v43  ;;  %v17370_v8 = vld [vmem:[#allocation40_spill] sm:$0xff] }
 0x2b8   : > { %7015 = vmatpush.bf16.msk.msra.mxu0 %vm8823_vm14, %v16195_v60  ;;  %vm12444_vm14 = vmpackc.low %vm17353_vm8, %vm17352_vm4  ;;  %v17361_v49 = vsel %vm12457_vm1, 4294967295, %v17360_v49  ;;  %vm17365_vm4 = vnez %v17364_v1  ;;  %v17372_v22 = vld [vmem:[#allocation44_spill] sm:$0xff]  ;;  %v17425_v1 = vld [vmem:[#allocation113_spill] sm:$0xff] }
 0x2b9   : > { %v17355_v40 = vsel %vm12444_vm14, 4294967295, %v17354_v40  ;;  %7011 = vmatpush.bf16.msk.msrb.mxu3 %vm12444_vm14, %v16195_v60  ;;  %3282 = vmatmul.bf16.vlgmr.msrb.gmra.mxu1 %v10587_v37  ;;  %17362 = vst [vmem:[#allocation105_spill] sm:$0xff] %v17361_v49  ;;  %v3076_v63 = vadd.f32 %v3075_v0, %v3063_v46  ;;  %v3038_v47 = vpop.f32.mrf.mxu2  ;;  %v17366_v37 = vld [vmem:[#allocation23_spill] sm:$0xff]  ;;  %v17374_v0 = vld [vmem:[#allocation30_spill] sm:$0xff]  ;;  %v17431_v49 = vld [vmem:[#allocation97_spill] sm:$0xff] }
 0x2ba   : > { %7031 = vmatpush.bf16.msk.msra.mxu1 %vm8832_vm0, %v16195_v60  ;;  %17356 = vst [vmem:[#allocation75_spill] sm:$0xff] %v17355_v40  ;;  %vm12452_vm0 = vmpackc.low %vm1468_vm5, %vm1464_vm7  ;;  %vm17367_vm10 = vnez %v17366_v37  ;;  %vm17371_vm7 = vnez %v17370_v8  ;;  %vm17373_vm5 = vnez %v17372_v22  ;;  %vm17375_vm8 = vnez %v17374_v0  ;;  %v17391_v8 = vld [vmem:[#allocation49_spill] sm:$0xff]  ;;  %v17499_v40 = vld [vmem:[#allocation198_spill] sm:$0xff] }
 0x2bb   : > { %v17358_v18 = vsel %vm12452_vm0, 4294967295, %v17357_v18  ;;  %6997 = vmatpush.bf16.msk.msrb.mxu2 %vm12452_vm0, %v16195_v60  ;;  %v3051_v12 = vpop.f32.mrf.mxu3 }
 0x2bc   : > { %17359 = vst [vmem:[#allocation78_spill] sm:$0xff] %v17358_v18  ;;  %7017 = vmatpush.bf16.msk.msra.mxu0 %vm8909_vm11, %v16195_v60  ;;  %v17376_v12 = vld [vmem:[#allocation31_spill] sm:$0xff]  ;;  %v17461_v18 = vld [vmem:[#allocation166_spill] sm:$0xff] }
 0x2bd   : > { %7013 = vmatpush.bf16.msk.msrb.mxu3 %vm12457_vm1, %v16195_v60  ;;  %v3064_v46 = vpop.f32.mrf.mxu0 }
 0x2be   : > { %7033 = vmatpush.bf16.msk.msra.mxu1 %vm17365_vm4, %v16195_v60  ;;  %3295 = vmatmul.bf16.vlgmr.msrb.gmra.mxu2 %v10681_v62  ;;  %v17378_v62 = vld [vmem:[#allocation54_spill] sm:$0xff] }
 0x2bf   : > { %7047 = vmatpush.bf16.msk.msra.mxu2 %vm17367_vm10, %v16195_v60  ;;  %v3077_v47 = vpop.f32.mrf.mxu1  ;;  %vm17379_vm10 = vnez %v17378_v62  ;;  %v17382_v46 = vld [vmem:[#allocation38_spill] sm:$0xff] }
 0x2c0   : > { %7019 = vmatpush.bf16.msk.msra.mxu0 %vm17371_vm7, %v16195_v60  ;;  %3308 = vmatmul.bf16.vlgmr.msrb.gmra.mxu3 %v10679_v15  ;;  %v17380_v15 = vld [vmem:[#allocation58_spill] sm:$0xff]  ;;  %v17384_v47 = vld [vmem:[#allocation39_spill] sm:$0xff] }
 0x2c1   : > { %7063 = vmatpush.bf16.msk.msra.mxu3 %vm17369_vm15, %v16195_v60  ;;  %vm17377_vm15 = vnez %v17376_v12  ;;  %vm17381_vm7 = vnez %v17380_v15  ;;  %v3088_v43 = vpop.f32.mrf.mxu2  ;;  %v17386_v12 = vld [vmem:[#allocation63_spill] sm:$0xff]  ;;  %v17389_v15 = vld [vmem:[#allocation64_spill] sm:$0xff] }
 0x2c2   : > { %7035 = vmatpush.bf16.msk.msra.mxu1 %vm17373_vm5, %v16195_v60  ;;  %vm17383_vm5 = vnez %v17382_v46  ;;  %v3089_v0 = vadd.f32 %v3088_v43, %v3076_v63  ;;  %v17393_v63 = vld [vmem:[#allocation50_spill] sm:$0xff]  ;;  %v17395_v43 = vld [vmem:[#allocation76_spill] sm:$0xff] }
 0x2c3   : > { %7049 = vmatpush.bf16.msk.msra.mxu2 %vm17375_vm8, %v16195_v60  ;;  %v3101_v22 = vpop.f32.mrf.mxu3  ;;  %vm17385_vm8 = vnez %v17384_v47  ;;  %v17397_v47 = vld [vmem:[#allocation82_spill] sm:$0xff]  ;;  %v17422_v46 = vld [vmem:[#allocation84_spill] sm:$0xff] }
 0x2c4   : > { %7021 = vmatpush.bf16.msk.msra.mxu0 %vm17379_vm10, %v16195_v60  ;;  %v12508_v62 = vadd.f32 %v3101_v22, %v3089_v0  ;;  %vm17392_vm10 = vnez %v17391_v8  ;;  %v17399_v0 = vld [vmem:[#allocation59_spill] sm:$0xff]  ;;  %v17401_v8 = vld [vmem:[#allocation61_spill] sm:$0xff] }
 0x2c5   : > { %7065 = vmatpush.bf16.msk.msra.mxu3 %vm17377_vm15, %v16195_v60  ;;  %vm17387_vm15 = vnez %v17386_v12 }
 0x2c6   : > { %7037 = vmatpush.bf16.msk.msra.mxu1 %vm17381_vm7, %v16195_v60  ;;  %17388 = vst [vmem:[#allocation106_spill] sm:$0xff] %v12508_v62  ;;  %vm17390_vm7 = vnez %v17389_v15 }
 0x2c7   : > { %7051 = vmatpush.bf16.msk.msra.mxu2 %vm17383_vm5, %v16195_v60  ;;  %vm17394_vm5 = vnez %v17393_v63  ;;  %v17403_v63 = vld [vmem:[#allocation86_spill] sm:$0xff] }
 0x2c8   : > { %7023 = vmatpush.bf16.msk.msra.mxu0 %vm17387_vm15, %v16195_v60  ;;  %vm17398_vm15 = vnez %v17397_v47  ;;  %v17407_v47 = vld [vmem:[#allocation147_spill] sm:$0xff] }
 0x2c9   : > { %7067 = vmatpush.bf16.msk.msra.mxu3 %vm17385_vm8, %v16195_v60  ;;  %vm17396_vm8 = vnez %v17395_v43  ;;  %v3090_v22 = vpop.f32.mrf.mxu2  ;;  %v17405_v43 = vld [vmem:[#allocation92_spill] sm:$0xff]  ;;  %v3317_v12 = vunpack.c.l.b16 %v17407_v47 }
 0x2ca   : > { %7039 = vmatpush.bf16.msk.msra.mxu1 %vm17390_vm7, %v16195_v60  ;;  %vm17400_vm7 = vnez %v17399_v0  ;;  %v17408_v22 = vld [vmem:[#allocation71_spill] sm:$0xff]  ;;  %v17410_v0 = vld [vmem:[#allocation72_spill] sm:$0xff] }
 0x2cb   : > { %7053 = vmatpush.bf16.msk.msra.mxu2 %vm17392_vm10, %v16195_v60  ;;  %v3103_v15 = vpop.f32.mrf.mxu3  ;;  %vm17402_vm10 = vnez %v17401_v8  ;;  %v17412_v8 = vld [vmem:[#allocation101_spill] sm:$0xff] }
 0x2cc   : > { %7025 = vmatpush.bf16.msk.msra.mxu0 %vm17396_vm8, %v16195_v60  ;;  %vm17406_vm8 = vnez %v17405_v43  ;;  %v3318_v15 = vunpack.c.h.b16 %v17407_v47  ;;  %v17416_v43 = vld [vmem:[#allocation104_spill] sm:$0xff]  ;;  %v17418_v47 = vld [vmem:[#allocation107_spill] sm:$0xff] }
 0x2cd   : > { %7069 = vmatpush.bf16.msk.msra.mxu3 %vm17394_vm5, %v16195_v60  ;;  %vm17404_vm5 = vnez %v17403_v63  ;;  %v17414_v63 = vld [vmem:[#allocation103_spill] sm:$0xff] }
 0x2ce   : > { %7041 = vmatpush.bf16.msk.msra.mxu1 %vm17398_vm15, %v16195_v60  ;;  %vm17409_vm15 = vnez %v17408_v22  ;;  %v12554_v22 = vpack.c.b16 %v3317_v12, %v3317_v12 }
 0x2cf   : > { %7055 = vmatpush.bf16.msk.msra.mxu2 %vm17400_vm7, %v16195_v60  ;;  %vm17411_vm7 = vnez %v17410_v0  ;;  %v17420_v0 = vld [vmem:[#allocation83_spill] sm:$0xff] }
 0x2d0   : > { %7027 = vmatpush.bf16.msk.msra.mxu0 %vm17404_vm5, %v16195_v60  ;;  %vm17415_vm5 = vnez %v17414_v63 }
 0x2d1   : > { %7071 = vmatpush.bf16.msk.msra.mxu3 %vm17402_vm10, %v16195_v60  ;;  %vm17413_vm10 = vnez %v17412_v8  ;;  %v12562_v8 = vpack.c.b16 %v3318_v15, %v3318_v15  ;;  %v3114_v12 = vpop.f32.mrf.mxu0 }
 0x2d2   : > { %7043 = vmatpush.bf16.msk.msra.mxu1 %vm17406_vm8, %v16195_v60  ;;  %vm17417_vm8 = vnez %v17416_v43  ;;  %v17424_v43 = vld [vmem:[#allocation126_spill] sm:$0xff] }
 0x2d3   : > { %7057 = vmatpush.bf16.msk.msra.mxu2 %vm17409_vm15, %v16195_v60  ;;  %vm17419_vm15 = vnez %v17418_v47  ;;  %v3319_v63 = vunpack.c.l.b16 %v17424_v43  ;;  %v3320_v47 = vunpack.c.h.b16 %v17424_v43  ;;  %v17433_v43 = vld [vmem:[#allocation118_spill] sm:$0xff] }
 0x2d4   : > { %7029 = vmatpush.bf16.msk.msra.mxu0 %vm17413_vm10, %v16195_v60  ;;  %vm17423_vm10 = vnez %v17422_v46  ;;  %v3127_v37 = vpop.f32.mrf.mxu1  ;;  %v17429_v46 = vld [vmem:[#allocation94_spill] sm:$0xff] }
 0x2d5   : > { %7073 = vmatpush.bf16.msk.msra.mxu3 %vm17411_vm7, %v16195_v60  ;;  %vm17421_vm7 = vnez %v17420_v0  ;;  %v3128_v15 = vadd.f32 %v3127_v37, %v3114_v12  ;;  %v17427_v0 = vld [vmem:[#allocation115_spill] sm:$0xff]  ;;  %v12586_v62 = vpack.c.b16 %v3319_v63, %v3319_v63  ;;  %v12591_v37 = vpack.c.b16 %v3320_v47, %v3320_v47 }
 0x2d6   : > { %7045 = vmatpush.bf16.msk.msra.mxu1 %vm17415_vm5, %v16195_v60  ;;  %vm17434_vm5 = vnez %v17433_v43  ;;  %v17439_v12 = vld [vmem:[#allocation127_spill] sm:$0xff] }
 0x2d7   : > { %7059 = vmatpush.bf16.msk.msra.mxu2 %vm17421_vm7, %v16195_v60  ;;  %3349 = vmatmul.bf16.vlgmr.msra.gmra.mxu0 %v12554_v22  ;;  %vm17432_vm7 = vnez %v17431_v49  ;;  %v17441_v63 = vld [vmem:[#allocation131_spill] sm:$0xff]  ;;  %v17445_v49 = vld [vmem:[#allocation137_spill] sm:$0xff] }
 0x2d8   : > { %7079 = vmatpush.bf16.msk.msrb.mxu0 %vm17417_vm8, %v16195_v60  ;;  %vm17428_vm8 = vnez %v17427_v0  ;;  %v17437_v0 = vld [vmem:[#allocation124_spill] sm:$0xff]  ;;  %v17443_v47 = vld [vmem:[#allocation135_spill] sm:$0xff] }
 0x2d9   : > { %7075 = vmatpush.bf16.msk.msra.mxu3 %vm17423_vm10, %v16195_v60  ;;  %3362 = vmatmul.bf16.vlgmr.msra.gmra.mxu1 %v12562_v8  ;;  %vm17430_vm10 = vnez %v17429_v46  ;;  %v3116_v43 = vpop.f32.mrf.mxu0  ;;  %v17457_v46 = vld [vmem:[#allocation157_spill] sm:$0xff] }
 0x2da   : > { %7095 = vmatpush.bf16.msk.msrb.mxu1 %vm17419_vm15, %v16195_v60  ;;  %vm17426_vm15 = vnez %v17425_v1  ;;  %v17435_v1 = vld [vmem:[#allocation122_spill] sm:$0xff]  ;;  %v17453_v43 = vld [vmem:[#allocation152_spill] sm:$0xff] }
 0x2db   : > { %7061 = vmatpush.bf16.msk.msra.mxu2 %vm17430_vm10, %v16195_v60  ;;  %vm17446_vm10 = vnez %v17445_v49  ;;  %v17455_v49 = vld [vmem:[#allocation153_spill] sm:$0xff] }
 0x2dc   : > { %7081 = vmatpush.bf16.msk.msrb.mxu0 %vm17426_vm15, %v16195_v60  ;;  %vm17436_vm15 = vnez %v17435_v1  ;;  %v3129_v1 = vpop.f32.mrf.mxu1 }
 0x2dd   : > { %7077 = vmatpush.bf16.msk.msra.mxu3 %vm17432_vm7, %v16195_v60  ;;  %vm17440_vm7 = vnez %v17439_v12  ;;  %v17449_v12 = vld [vmem:[#allocation141_spill] sm:$0xff] }
 0x2de   : > { %7097 = vmatpush.bf16.msk.msrb.mxu1 %vm17428_vm8, %v16195_v60  ;;  %3375 = vmatmul.bf16.vlgmr.msra.gmra.mxu2 %v12586_v62  ;;  %vm17438_vm8 = vnez %v17437_v0  ;;  %v17447_v0 = vld [vmem:[#allocation139_spill] sm:$0xff] }
 0x2df   : > { %7111 = vmatpush.bf16.msk.msrb.mxu2 %vm17434_vm5, %v16195_v60  ;;  %vm17442_vm5 = vnez %v17441_v63  ;;  %v17451_v63 = vld [vmem:[#allocation150_spill] sm:$0xff] }
 0x2e0   : > { %7083 = vmatpush.bf16.msk.msrb.mxu0 %vm17438_vm8, %v16195_v60  ;;  %3388 = vmatmul.bf16.vlgmr.msra.gmra.mxu3 %v12591_v37  ;;  %vm17448_vm8 = vnez %v17447_v0  ;;  %v3153_v0 = vpop.f32.mrf.mxu3 }
 0x2e1   : > { %7127 = vmatpush.bf16.msk.msrb.mxu3 %vm17436_vm15, %v16195_v60  ;;  %vm17444_vm15 = vnez %v17443_v47  ;;  %v3140_v47 = vpop.f32.mrf.mxu2 }
 0x2e2   : > { %7099 = vmatpush.bf16.msk.msrb.mxu1 %vm17440_vm7, %v16195_v60  ;;  %vm17450_vm7 = vnez %v17449_v12  ;;  %v3141_v1 = vadd.f32 %v3140_v47, %v3128_v15  ;;  %v17459_v12 = vld [vmem:[#allocation161_spill] sm:$0xff]  ;;  %v17465_v15 = vld [vmem:[#allocation172_spill] sm:$0xff] }
 0x2e3   : > { %7113 = vmatpush.bf16.msk.msrb.mxu2 %vm17442_vm5, %v16195_v60  ;;  %vm17452_vm5 = vnez %v17451_v63  ;;  %v17469_v47 = vld [vmem:[#allocation177_spill] sm:$0xff] }
 0x2e4   : > { %7085 = vmatpush.bf16.msk.msrb.mxu0 %vm17446_vm10, %v16195_v60  ;;  %vm17456_vm10 = vnez %v17455_v49  ;;  %v3154_v63 = vadd.f32 %v3153_v0, %v3141_v1  ;;  %v17473_v0 = vld [vmem:[#allocation207_spill] sm:$0xff] }
 0x2e5   : > { %7129 = vmatpush.bf16.msk.msrb.mxu3 %vm17444_vm15, %v16195_v60  ;;  %vm17454_vm15 = vnez %v17453_v43  ;;  %v17463_v43 = vld [vmem:[#allocation169_spill] sm:$0xff] }
 0x2e6   : > { %7101 = vmatpush.bf16.msk.msrb.mxu1 %vm17448_vm8, %v16195_v60  ;;  %vm17458_vm8 = vnez %v17457_v46  ;;  %v17467_v46 = vld [vmem:[#allocation175_spill] sm:$0xff] }
 0x2e7   : > { %7115 = vmatpush.bf16.msk.msrb.mxu2 %vm17450_vm7, %v16195_v60  ;;  %vm17460_vm7 = vnez %v17459_v12  ;;  %v3321_v12 = vunpack.c.l.b16 %v17473_v0 }
 0x2e8   : > { %7087 = vmatpush.bf16.msk.msrb.mxu0 %vm17454_vm15, %v16195_v60  ;;  %vm17464_vm15 = vnez %v17463_v43  ;;  %v3155_v1 = vpop.f32.mrf.mxu3  ;;  %v17474_v43 = vld [vmem:[#allocation186_spill] sm:$0xff] }
 0x2e9   : > { %7131 = vmatpush.bf16.msk.msrb.mxu3 %vm17452_vm5, %v16195_v60  ;;  %vm17462_vm5 = vnez %v17461_v18  ;;  %v3142_v49 = vpop.f32.mrf.mxu2  ;;  %v17471_v18 = vld [vmem:[#allocation179_spill] sm:$0xff]  ;;  %v12666_v1 = vpack.c.b16 %v3321_v12, %v3321_v12 }
 0x2ea   : > { %7103 = vmatpush.bf16.msk.msrb.mxu1 %vm17456_vm10, %v16195_v60  ;;  %vm17466_vm10 = vnez %v17465_v15  ;;  %v3322_v15 = vunpack.c.h.b16 %v17473_v0  ;;  %v17480_v49 = vld [vmem:[#allocation189_spill] sm:$0xff]  ;;  %v17484_v0 = vld [vmem:[#allocation191_spill] sm:$0xff] }
 0x2eb   : > { %7117 = vmatpush.bf16.msk.msrb.mxu2 %vm17458_vm8, %v16195_v60  ;;  %vm17468_vm8 = vnez %v17467_v46  ;;  %v17476_v46 = vld [vmem:[#allocation187_spill] sm:$0xff] }
 0x2ec   : > { %7089 = vmatpush.bf16.msk.msrb.mxu0 %vm17462_vm5, %v16195_v60  ;;  %vm17472_vm5 = vnez %v17471_v18  ;;  %v17482_v18 = vld [vmem:[#allocation190_spill] sm:$0xff] }
 0x2ed   : > { %7133 = vmatpush.bf16.msk.msrb.mxu3 %vm17460_vm7, %v16195_v60  ;;  %vm17470_vm7 = vnez %v17469_v47  ;;  %v17478_v47 = vld [vmem:[#allocation188_spill] sm:$0xff] }
 0x2ee   : > { %7105 = vmatpush.bf16.msk.msrb.mxu1 %vm17464_vm15, %v16195_v60  ;;  %vm17475_vm15 = vnez %v17474_v43  ;;  %v17486_v43 = vld [vmem:[#allocation192_spill] sm:$0xff] }
 0x2ef   : > { %7119 = vmatpush.bf16.msk.msrb.mxu2 %vm17466_vm10, %v16195_v60  ;;  %vm17477_vm10 = vnez %v17476_v46  ;;  %v12674_v46 = vpack.c.b16 %v3322_v15, %v3322_v15  ;;  %v17495_v15 = vld [vmem:[#allocation196_spill] sm:$0xff] }
 0x2f0   : > { %7091 = vmatpush.bf16.msk.msrb.mxu0 %vm17470_vm7, %v16195_v60  ;;  %vm17481_vm7 = vnez %v17480_v49  ;;  %v17490_v49 = vld [vmem:[#allocation214_spill] sm:$0xff] }
 0x2f1   : > { %7135 = vmatpush.bf16.msk.msrb.mxu3 %vm17468_vm8, %v16195_v60  ;;  %vm17479_vm8 = vnez %v17478_v47  ;;  %v17488_v47 = vld [vmem:[#allocation193_spill] sm:$0xff]  ;;  %v3324_v12 = vunpack.c.h.b16 %v17490_v49 }
 0x2f2   : > { %7107 = vmatpush.bf16.msk.msrb.mxu1 %vm17472_vm5, %v16195_v60  ;;  %vm17483_vm5 = vnez %v17482_v18  ;;  %v3323_v18 = vunpack.c.l.b16 %v17490_v49 }
 0x2f3   : > { %7121 = vmatpush.bf16.msk.msrb.mxu2 %vm17475_vm15, %v16195_v60  ;;  %vm17485_vm15 = vnez %v17484_v0  ;;  %v17491_v0 = vld [vmem:[#allocation194_spill] sm:$0xff]  ;;  %v12703_v4 = vpack.c.b16 %v3324_v12, %v3324_v12  ;;  %v17509_v12 = vld [vmem:[#allocation47_spill] sm:$0xff] }
 0x2f4   : > { %7093 = vmatpush.bf16.msk.msrb.mxu0 %vm17479_vm8, %v16195_v60  ;;  %vm17489_vm8 = vnez %v17488_v47  ;;  %v3166_v47 = vpop.f32.mrf.mxu0  ;;  %v12698_v49 = vpack.c.b16 %v3323_v18, %v3323_v18  ;;  %v3179_v48 = vpop.f32.mrf.mxu1  ;;  %v17505_v18 = vld [vmem:[#allocation27_spill] sm:$0xff] }
 0x2f5   : > { %7137 = vmatpush.bf16.msk.msrb.mxu3 %vm17477_vm10, %v16195_v60  ;;  %vm17487_vm10 = vnez %v17486_v43  ;;  %v17493_v43 = vld [vmem:[#allocation195_spill] sm:$0xff] }
 0x2f6   : > { %7109 = vmatpush.bf16.msk.msrb.mxu1 %vm17481_vm7, %v16195_v60  ;;  %vm17492_vm7 = vnez %v17491_v0  ;;  %v3167_v0 = vadd.f32 %v3166_v47, %v3154_v63  ;;  %v17507_v63 = vld [vmem:[#allocation46_spill] sm:$0xff]  ;;  %v17511_v47 = vld [vmem:[#allocation201_spill] sm:$0xff] }
 0x2f7   : > { %7123 = vmatpush.bf16.msk.msrb.mxu2 %vm17487_vm10, %v16195_v60  ;;  %3401 = vmatmul.bf16.vlgmr.msrb.gmra.mxu0 %v12666_v1  ;;  %vm17494_vm10 = vnez %v17493_v43  ;;  %v17501_v43 = vld [vmem:[#allocation199_spill] sm:$0xff] }
 0x2f8   : > { %7143 = vmatpush.bf16.msk.msra.mxu0 %vm17483_vm5, %v16195_v60  ;;  %vm17500_vm5 = vnez %v17499_v40 }
 0x2f9   : > { %7139 = vmatpush.bf16.msk.msrb.mxu3 %vm17489_vm8, %v16195_v60  ;;  %3414 = vmatmul.bf16.vlgmr.msrb.gmra.mxu1 %v12674_v46  ;;  %vm17498_vm8 = vnez %v17497_v59  ;;  %v3180_v59 = vadd.f32 %v3179_v48, %v3167_v0  ;;  %v17513_v48 = vld [vmem:[#allocation202_spill] sm:$0xff] }
 0x2fa   : > { %7159 = vmatpush.bf16.msk.msra.mxu1 %vm17485_vm15, %v16195_v60  ;;  %vm17496_vm15 = vnez %v17495_v15  ;;  %v17503_v15 = vld [vmem:[#allocation200_spill] sm:$0xff] }
 0x2fb   : > { %7125 = vmatpush.bf16.msk.msrb.mxu2 %vm17496_vm15, %v16195_v60  ;;  %vm17504_vm15 = vnez %v17503_v15  ;;  %v17536_v15 = vld [vmem:[#allocation53_spill] sm:$0xff] }
 0x2fc   : > { %7145 = vmatpush.bf16.msk.msra.mxu0 %vm17492_vm7, %v16195_v60  ;;  %vm17512_vm7 = vnez %v17511_v47  ;;  %v3168_v0 = vpop.f32.mrf.mxu0  ;;  %v3181_v40 = vpop.f32.mrf.mxu1  ;;  %v17521_v47 = vld [vmem:[#allocation206_spill] sm:$0xff] }
 0x2fd   : > { %7141 = vmatpush.bf16.msk.msrb.mxu3 %vm17498_vm8, %v16195_v60  ;;  %vm17506_vm8 = vnez %v17505_v18  ;;  %v17525_v0 = vld [vmem:[#allocation70_spill] sm:$0xff]  ;;  %v17529_v18 = vld [vmem:[#allocation28_spill] sm:$0xff] }
 0x2fe   : > { %7161 = vmatpush.bf16.msk.msra.mxu1 %vm17494_vm10, %v16195_v60  ;;  %vm17502_vm10 = vnez %v17501_v43  ;;  %3427 = vmatmul.bf16.vlgmr.msrb.gmra.mxu2 %v12698_v49  ;;  %v17515_v43 = vld [vmem:[#allocation203_spill] sm:$0xff] }
 0x2ff   : > { %7175 = vmatpush.bf16.msk.msra.mxu2 %vm17500_vm5, %v16195_v60  ;;  %vm17508_vm5 = vnez %v17507_v63  ;;  %v17517_v63 = vld [vmem:[#allocation204_spill] sm:$0xff] }
 0x300   : > { %7147 = vmatpush.bf16.msk.msra.mxu0 %vm17504_vm15, %v16195_v60  ;;  %3440 = vmatmul.bf16.vlgmr.msrb.gmra.mxu3 %v12703_v4  ;;  %vm17514_vm15 = vnez %v17513_v48  ;;  %v17523_v48 = vld [vmem:[#allocation69_spill] sm:$0xff] }
 0x301   : > { %7191 = vmatpush.bf16.msk.msra.mxu3 %vm17502_vm10, %v16195_v60  ;;  %vm17510_vm10 = vnez %v17509_v12  ;;  %v17519_v12 = vld [vmem:[#allocation205_spill] sm:$0xff]  ;;  %v3192_v40 = vpop.f32.mrf.mxu2 }
 0x302   : > { %7163 = vmatpush.bf16.msk.msra.mxu1 %vm17506_vm8, %v16195_v60  ;;  %vm17516_vm8 = vnez %v17515_v43  ;;  %v3193_v43 = vadd.f32 %v3192_v40, %v3180_v59  ;;  %v17538_v59 = vld [vmem:[#allocation96_spill] sm:$0xff] }
 0x303   : > { %7177 = vmatpush.bf16.msk.msra.mxu2 %vm17508_vm5, %v16195_v60  ;;  %vm17518_vm5 = vnez %v17517_v63  ;;  %v17527_v63 = vld [vmem:[#allocation73_spill] sm:$0xff]  ;;  %v17540_v40 = vld [vmem:[#allocation208_spill] sm:$0xff] }
 0x304   : > { %7149 = vmatpush.bf16.msk.msra.mxu0 %vm17512_vm7, %v16195_v60  ;;  %vm17522_vm7 = vnez %v17521_v47  ;;  %v17531_v47 = vld [vmem:[#allocation51_spill] sm:$0xff] }
 0x305   : > { %7193 = vmatpush.bf16.msk.msra.mxu3 %vm17510_vm10, %v16195_v60  ;;  %vm17520_vm10 = vnez %v17519_v12  ;;  %v3205_v12 = vpop.f32.mrf.mxu3 }
 0x306   : > { %7165 = vmatpush.bf16.msk.msra.mxu1 %vm17514_vm15, %v16195_v60  ;;  %vm17524_vm15 = vnez %v17523_v48  ;;  %v12752_v48 = vadd.f32 %v3205_v12, %v3193_v43  ;;  %v17544_v12 = vld [vmem:[#allocation210_spill] sm:$0xff] }
 0x307   : > { %7179 = vmatpush.bf16.msk.msra.mxu2 %vm17516_vm8, %v16195_v60  ;;  %vm17526_vm8 = vnez %v17525_v0  ;;  %v17534_v0 = vld [vmem:[#allocation52_spill] sm:$0xff] }
 0x308   : > { %7151 = vmatpush.bf16.msk.msra.mxu0 %vm17520_vm10, %v16195_v60  ;;  %vm17530_vm10 = vnez %v17529_v18  ;;  %17533 = vst [vmem:[#allocation158_spill] sm:$0xff] %v12752_v48  ;;  %v17578_v18 = vld [vmem:[#allocation228_spill] sm:$0xff] }
 0x309   : > { %7195 = vmatpush.bf16.msk.msra.mxu3 %vm17518_vm5, %v16195_v60  ;;  %vm17528_vm5 = vnez %v17527_v63  ;;  %v3194_v43 = vpop.f32.mrf.mxu2  ;;  %v17600_v63 = vld [vmem:[#allocation239_spill] sm:$0xff]  ;;  %v17602_v48 = vld [vmem:[#allocation240_spill] sm:$0xff] }
 0x30a   : > { %7167 = vmatpush.bf16.msk.msra.mxu1 %vm17522_vm7, %v16195_v60  ;;  %vm17532_vm7 = vnez %v17531_v47  ;;  %v17542_v47 = vld [vmem:[#allocation209_spill] sm:$0xff]  ;;  %v17554_v43 = vld [vmem:[#allocation216_spill] sm:$0xff] }
 0x30b   : > { %7181 = vmatpush.bf16.msk.msra.mxu2 %vm17524_vm15, %v16195_v60  ;;  %vm17537_vm15 = vnez %v17536_v15  ;;  %v17546_v15 = vld [vmem:[#allocation211_spill] sm:$0xff] }
 0x30c   : > { %7153 = vmatpush.bf16.msk.msra.mxu0 %vm17528_vm5, %v16195_v60  ;;  %vm17539_vm5 = vnez %v17538_v59  ;;  %v17548_v59 = vld [vmem:[#allocation212_spill] sm:$0xff] }
 0x30d   : > { %7197 = vmatpush.bf16.msk.msra.mxu3 %vm17526_vm8, %v16195_v60  ;;  %vm17535_vm8 = vnez %v17534_v0  ;;  %v3207_v0 = vpop.f32.mrf.mxu3 }
 0x30e   : > { %7169 = vmatpush.bf16.msk.msra.mxu1 %vm17530_vm10, %v16195_v60  ;;  %vm17541_vm10 = vnez %v17540_v40  ;;  %v17550_v40 = vld [vmem:[#allocation213_spill] sm:$0xff] }
 0x30f   : > { %7183 = vmatpush.bf16.msk.msra.mxu2 %vm17532_vm7, %v16195_v60  ;;  %vm17543_vm7 = vnez %v17542_v47  ;;  %v17552_v47 = vld [vmem:[#allocation215_spill] sm:$0xff]  ;;  %v17556_v0 = vld [vmem:[#allocation217_spill] sm:$0xff] }
 0x310   : > { %7155 = vmatpush.bf16.msk.msra.mxu0 %vm17537_vm15, %v16195_v60  ;;  %vm17547_vm15 = vnez %v17546_v15  ;;  %v17566_v15 = vld [vmem:[#allocation222_spill] sm:$0xff] }
 0x311   : > { %7199 = vmatpush.bf16.msk.msra.mxu3 %vm17535_vm8, %v16195_v60  ;;  %vm17545_vm8 = vnez %v17544_v12  ;;  %vm17567_vm4 = vnez %v17566_v15  ;;  %v17574_v12 = vld [vmem:[#allocation226_spill] sm:$0xff] }
 0x312   : > { %7171 = vmatpush.bf16.msk.msra.mxu1 %vm17539_vm5, %v16195_v60  ;;  %vm17549_vm5 = vnez %v17548_v59  ;;  %v17558_v59 = vld [vmem:[#allocation218_spill] sm:$0xff] }
 0x313   : > { %7185 = vmatpush.bf16.msk.msra.mxu2 %vm17541_vm10, %v16195_v60  ;;  %vm17551_vm10 = vnez %v17550_v40  ;;  %v17560_v40 = vld [vmem:[#allocation219_spill] sm:$0xff] }
 0x314   : > { %7157 = vmatpush.bf16.msk.msra.mxu0 %vm17545_vm8, %v16195_v60  ;;  %vm17555_vm8 = vnez %v17554_v43  ;;  %v17564_v43 = vld [vmem:[#allocation221_spill] sm:$0xff] }
 0x315   : > { %7201 = vmatpush.bf16.msk.msra.mxu3 %vm17543_vm7, %v16195_v60  ;;  %vm17553_vm7 = vnez %v17552_v47  ;;  %v17562_v47 = vld [vmem:[#allocation220_spill] sm:$0xff] }
 0x316   : > { %7173 = vmatpush.bf16.msk.msra.mxu1 %vm17547_vm15, %v16195_v60  ;;  %vm17557_vm15 = vnez %v17556_v0  ;;  %v17568_v0 = vld [vmem:[#allocation223_spill] sm:$0xff] }
 0x317   : > { %7187 = vmatpush.bf16.msk.msra.mxu2 %vm17553_vm7, %v16195_v60  ;;  %3453 = vmatmul.bf16.vlgmr.msra.gmra.mxu0 %v12554_v22  ;;  %vm17563_vm7 = vnez %v17562_v47  ;;  %v17570_v47 = vld [vmem:[#allocation224_spill] sm:$0xff] }
 0x318   : > { %7207 = vmatpush.bf16.msk.msrb.mxu0 %vm17549_vm5, %v16195_v60  ;;  %vm17559_vm5 = vnez %v17558_v59  ;;  %v3218_v59 = vpop.f32.mrf.mxu0 }
 0x319   : > { %7203 = vmatpush.bf16.msk.msra.mxu3 %vm17555_vm8, %v16195_v60  ;;  %3466 = vmatmul.bf16.vlgmr.msra.gmra.mxu1 %v12562_v8  ;;  %vm17565_vm8 = vnez %v17564_v43  ;;  %v17572_v43 = vld [vmem:[#allocation225_spill] sm:$0xff] }
 0x31a   : > { %7223 = vmatpush.bf16.msk.msrb.mxu1 %vm17551_vm10, %v16195_v60  ;;  %vm17561_vm10 = vnez %v17560_v40  ;;  %v3231_v40 = vpop.f32.mrf.mxu1 }
 0x31b   : > { %7189 = vmatpush.bf16.msk.msra.mxu2 %vm17561_vm10, %v16195_v60  ;;  %v3232_v15 = vadd.f32 %v3231_v40, %v3218_v59  ;;  %v17584_v40 = vld [vmem:[#allocation231_spill] sm:$0xff]  ;;  %v17586_v59 = vld [vmem:[#allocation232_spill] sm:$0xff] }
 0x31c   : > { %7209 = vmatpush.bf16.msk.msrb.mxu0 %vm17557_vm15, %v16195_v60  ;;  %vm17569_vm15 = vnez %v17568_v0  ;;  %v17576_v0 = vld [vmem:[#allocation227_spill] sm:$0xff]  ;;  %vm17585_vm10 = vnez %v17584_v40  ;;  %v17594_v40 = vld [vmem:[#allocation236_spill] sm:$0xff] }
 0x31d   : > { %7205 = vmatpush.bf16.msk.msra.mxu3 %vm17563_vm7, %v16195_v60  ;;  %vm17579_vm7 = vnez %v17578_v18  ;;  %v17588_v18 = vld [vmem:[#allocation233_spill] sm:$0xff] }
 0x31e   : > { %7225 = vmatpush.bf16.msk.msrb.mxu1 %vm17559_vm5, %v16195_v60  ;;  %3479 = vmatmul.bf16.vlgmr.msra.gmra.mxu2 %v12586_v62  ;;  %vm17571_vm5 = vnez %v17570_v47  ;;  %v17580_v47 = vld [vmem:[#allocation229_spill] sm:$0xff] }
 0x31f   : > { %7239 = vmatpush.bf16.msk.msrb.mxu2 %vm17565_vm8, %v16195_v60  ;;  %vm17573_vm8 = vnez %v17572_v43  ;;  %v17582_v43 = vld [vmem:[#allocation230_spill] sm:$0xff] }
 0x320   : > { %7211 = vmatpush.bf16.msk.msrb.mxu0 %vm17569_vm15, %v16195_v60  ;;  %3492 = vmatmul.bf16.vlgmr.msra.gmra.mxu3 %v12591_v37  ;;  %vm17577_vm15 = vnez %v17576_v0 }
 0x321   : > { %7255 = vmatpush.bf16.msk.msrb.mxu3 %vm17567_vm4, %v16195_v60  ;;  %vm17575_vm4 = vnez %v17574_v12  ;;  %v3220_v12 = vpop.f32.mrf.mxu0 }
 0x322   : > { %7227 = vmatpush.bf16.msk.msrb.mxu1 %vm17571_vm5, %v16195_v60  ;;  %vm17581_vm5 = vnez %v17580_v47  ;;  %v3233_v0 = vpop.f32.mrf.mxu1  ;;  %v17590_v47 = vld [vmem:[#allocation234_spill] sm:$0xff]  ;;  %v17596_v12 = vld [vmem:[#allocation237_spill] sm:$0xff] }
 0x323   : > { %7241 = vmatpush.bf16.msk.msrb.mxu2 %vm17573_vm8, %v16195_v60  ;;  %vm17583_vm8 = vnez %v17582_v43  ;;  %v17592_v43 = vld [vmem:[#allocation235_spill] sm:$0xff]  ;;  %v17598_v0 = vld [vmem:[#allocation238_spill] sm:$0xff] }
 0x324   : > { %7213 = vmatpush.bf16.msk.msrb.mxu0 %vm17577_vm15, %v16195_v60  ;;  %vm17591_vm15 = vnez %v17590_v47  ;;  %v3257_v47 = vpop.f32.mrf.mxu3 }
 0x325   : > { %7257 = vmatpush.bf16.msk.msrb.mxu3 %vm17575_vm4, %v16195_v60  ;;  %vm17587_vm4 = vnez %v17586_v59  ;;  %v3244_v59 = vpop.f32.mrf.mxu2 }
 0x326   : > { %7229 = vmatpush.bf16.msk.msrb.mxu1 %vm17579_vm7, %v16195_v60  ;;  %vm17589_vm7 = vnez %v17588_v18  ;;  %v3245_v18 = vadd.f32 %v3244_v59, %v3232_v15  ;;  %v17611_v59 = vld [vmem:[#allocation242_spill] sm:$0xff]  ;;  %v12919_v15 = vld [vmem:[#allocation10] sm:$0xff] }
 0x327   : > { %7243 = vmatpush.bf16.msk.msrb.mxu2 %vm17581_vm5, %v16195_v60  ;;  %vm17593_vm5 = vnez %v17592_v43  ;;  %17636 = vst [vmem:[#allocation108_spill] sm:$0xff] %v12919_v15 }
 0x328   : > { %7215 = vmatpush.bf16.msk.msrb.mxu0 %vm17585_vm10, %v16195_v60  ;;  %vm17595_vm10 = vnez %v17594_v40  ;;  %v3258_v43 = vadd.f32 %v3257_v47, %v3245_v18  ;;  %v17604_v40 = vld [vmem:[#allocation182_spill] sm:$0xff]  ;;  %v17617_v47 = vld [vmem:[#allocation245_spill] sm:$0xff] }
 0x329   : > { %7259 = vmatpush.bf16.msk.msrb.mxu3 %vm17583_vm8, %v16195_v60  ;;  %vm17597_vm8 = vnez %v17596_v12  ;;  %v17606_v12 = vld [vmem:[#allocation184_spill] sm:$0xff] }
 0x32a   : > { %7231 = vmatpush.bf16.msk.msrb.mxu1 %vm17587_vm4, %v16195_v60  ;;  %vm17599_vm4 = vnez %v17598_v0  ;;  %v17615_v0 = vld [vmem:[#allocation244_spill] sm:$0xff] }
 0x32b   : > { %7245 = vmatpush.bf16.msk.msrb.mxu2 %vm17589_vm7, %v16195_v60  ;;  %vm17601_vm7 = vnez %v17600_v63  ;;  %v17609_v63 = vld [vmem:[#allocation241_spill] sm:$0xff] }
 0x32c   : > { %7217 = vmatpush.bf16.msk.msrb.mxu0 %vm17593_vm5, %v16195_v60  ;;  %vm17605_vm5 = vnez %v17604_v40  ;;  %v3259_v40 = vpop.f32.mrf.mxu3 }
 0x32d   : > { %7261 = vmatpush.bf16.msk.msrb.mxu3 %vm17591_vm15, %v16195_v60  ;;  %vm17603_vm15 = vnez %v17602_v48  ;;  %v17613_v48 = vld [vmem:[#allocation243_spill] sm:$0xff]  ;;  %v3246_v18 = vpop.f32.mrf.mxu2  ;;  %v17632_v40 = vld [vmem:[#allocation29_spill] sm:$0xff] }
 0x32e   : > { %7233 = vmatpush.bf16.msk.msrb.mxu1 %vm17595_vm10, %v16195_v60  ;;  %vm17607_vm10 = vnez %v17606_v12  ;;  %v17619_v12 = vld [vmem:[#allocation246_spill] sm:$0xff]  ;;  %v16097_v18 = vmov 1  }
 0x32f   : > { %7247 = vmatpush.bf16.msk.msrb.mxu2 %vm17597_vm8, %v16195_v60  ;;  %vm17610_vm8 = vnez %v17609_v63  ;;  %v17622_v63 = vld [vmem:[#allocation248_spill] sm:$0xff]  ;;  %7974 = vset.pattern.permute.xlu1 %v16097_v18 }
 0x330   : > { %7219 = vmatpush.bf16.msk.msrb.mxu0 %vm17601_vm7, %v16195_v60  ;;  %vm17614_vm7 = vnez %v17613_v48  ;;  %v17626_v48 = vld [vmem:[#allocation250_spill] sm:$0xff]  ;;  %3839 = vperm.xlu1 %7974, %v12919_v15   ;;  %v17643_v18 = vld [vmem:[#allocation256_spill] sm:$0xff] }
 0x331   : > { %7263 = vmatpush.bf16.msk.msrb.mxu3 %vm17599_vm4, %v16195_v60  ;;  %vm17612_vm4 = vnez %v17611_v59  ;;  %v17624_v59 = vld [vmem:[#allocation249_spill] sm:$0xff] }
 0x332   : > { %7235 = vmatpush.bf16.msk.msrb.mxu1 %vm17603_vm15, %v16195_v60  ;;  %vm17616_vm15 = vnez %v17615_v0  ;;  %v17628_v0 = vld [vmem:[#allocation251_spill] sm:$0xff] }
 0x333   : > { %7249 = vmatpush.bf16.msk.msrb.mxu2 %vm17605_vm5, %v16195_v60  ;;  %vm17620_vm5 = vnez %v17619_v12  ;;  %v17634_v12 = vld [vmem:[#allocation253_spill] sm:$0xff] }
 0x334   : > { %7221 = vmatpush.bf16.msk.msrb.mxu0 %vm10937_vm12, %v16195_v60  ;;  %vm17618_vm12 = vnez %v17617_v47  ;;  %v17630_v47 = vld [vmem:[#allocation252_spill] sm:$0xff] }
 0x335   : > { %7265 = vmatpush.bf16.msk.msrb.mxu3 %vm17607_vm10, %v16195_v60  ;;  %vm17623_vm10 = vnez %v17622_v63  ;;  %v17637_v63 = vld [vmem:[#allocation48_spill] sm:$0xff] }
 0x336   : > { %7237 = vmatpush.bf16.msk.msrb.mxu1 %vm17610_vm8, %v16195_v60  ;;  %vm17625_vm8 = vnez %v17624_v59  ;;  %v3270_v59 = vpop.f32.mrf.mxu0 }
 0x337   : > { %7251 = vmatpush.bf16.msk.msrb.mxu2 %vm17616_vm15, %v16195_v60  ;;  %3505 = vmatmul.bf16.vlgmr.msrb.gmra.mxu0 %v12666_v1  ;;  %vm17633_vm15 = vnez %v17632_v40  ;;  %v17641_v40 = vld [vmem:[#allocation255_spill] sm:$0xff] }
 0x338   : > { %7271 = vmatpush.bf16.msk.msra.mxu0 %vm17612_vm4, %v16195_v60  ;;  %vm17627_vm4 = vnez %v17626_v48  ;;  %v3271_v48 = vadd.f32 %v3270_v59, %v3258_v43  ;;  %v17647_v43 = vld [vmem:[#allocation41_spill] sm:$0xff]  ;;  %v17649_v59 = vld [vmem:[#allocation43_spill] sm:$0xff] }
 0x339   : > { %7267 = vmatpush.bf16.msk.msrb.mxu3 %vm17618_vm12, %v16195_v60  ;;  %3518 = vmatmul.bf16.vlgmr.msrb.gmra.mxu1 %v12674_v46  ;;  %vm17635_vm12 = vnez %v17634_v12 }
 0x33a   : > { %7287 = vmatpush.bf16.msk.msra.mxu1 %vm17614_vm7, %v16195_v60  ;;  %vm17629_vm7 = vnez %v17628_v0  ;;  %v3283_v0 = vpop.f32.mrf.mxu1 }
 0x33b   : > { %7253 = vmatpush.bf16.msk.msrb.mxu2 %vm17623_vm10, %v16195_v60  ;;  %v3284_v12 = vadd.f32 %v3283_v0, %v3271_v48  ;;  %v17651_v48 = vld [vmem:[#allocation45_spill] sm:$0xff]  ;;  %v17654_v0 = vld [vmem:[#allocation258_spill] sm:$0xff] }
 0x33c   : > { %7273 = vmatpush.bf16.msk.msra.mxu0 %vm17620_vm5, %v16195_v60  ;;  %vm17638_vm5 = vnez %v17637_v63  ;;  %v12940_v63 = vld [vmem:[#allocation10 + $0x8] sm:$0xff] }
 0x33d   : > { %7269 = vmatpush.bf16.msk.msrb.mxu3 %vm17625_vm8, %v16195_v60  ;;  %vm17642_vm8 = vnez %v17641_v40  ;;  %v17656_v40 = vld [vmem:[#allocation259_spill] sm:$0xff] }
 0x33e   : > { %7289 = vmatpush.bf16.msk.msra.mxu1 %vm11019_vm3, %v16195_v60  ;;  %3531 = vmatmul.bf16.vlgmr.msrb.gmra.mxu2 %v12698_v49  ;;  %vm17631_vm3 = vnez %v17630_v47  ;;  %v17639_v47 = vld [vmem:[#allocation254_spill] sm:$0xff] }
 0x33f   : > { %7303 = vmatpush.bf16.msk.msra.mxu2 %vm17627_vm4, %v16195_v60  ;;  %vm17640_vm10 = vnez %v17639_v47  ;;  %vm17644_vm4 = vnez %v17643_v18  ;;  %v17653_v18 = vmov 0  }
 0x340   : > { %7275 = vmatpush.bf16.msk.msra.mxu0 %vm17631_vm3, %v16195_v60  ;;  %3544 = vmatmul.bf16.vlgmr.msrb.gmra.mxu3 %v12703_v4  ;;  %vm17648_vm3 = vnez %v17647_v43  ;;  %v17658_v43 = vld [vmem:[#allocation260_spill] sm:$0xff] }
 0x341   : > { %7319 = vmatpush.bf16.msk.msra.mxu3 %vm17629_vm7, %v16195_v60  ;;  %vm17646_vm7 = vnez %v17645_v6  ;;  %7976 = vset.pattern.permute.xlu1 %v17653_v18  ;;  %v3272_v6 = vpop.f32.mrf.mxu0 }
 0x342   : > { %7291 = vmatpush.bf16.msk.msra.mxu1 %vm17633_vm15, %v16195_v60  ;;  %vm17650_vm15 = vnez %v17649_v59  ;;  %3917 = vperm.xlu1 %7976, %v12940_v63   ;;  %v3285_v47 = vpop.f32.mrf.mxu1  ;;  %v17660_v59 = vld [vmem:[#allocation261_spill] sm:$0xff] }
 0x343   : > { %7305 = vmatpush.bf16.msk.msra.mxu2 %vm17635_vm12, %v16195_v60  ;;  %vm17652_vm12 = vnez %v17651_v48  ;;  %v17662_v48 = vld [vmem:[#allocation262_spill] sm:$0xff]  ;;  %v3309_v45 = vpop.f32.mrf.mxu3  ;;  %v17664_v47 = vld [vmem:[#allocation263_spill] sm:$0xff] }
 0x344   : > { %7277 = vmatpush.bf16.msk.msra.mxu0 %vm17640_vm10, %v16195_v60  ;;  %vm17657_vm10 = vnez %v17656_v40  ;;  %v16100_v40 = vmov 2  }
 0x345   : > { %7321 = vmatpush.bf16.msk.msra.mxu3 %vm17638_vm5, %v16195_v60  ;;  %vm17655_vm5 = vnez %v17654_v0  ;;  %v3296_v0 = vpop.f32.mrf.mxu2  ;;  %7975 = vset.pattern.permute.xlu2 %v16100_v40 }
 0x346   : > { %7293 = vmatpush.bf16.msk.msra.mxu1 %vm17642_vm8, %v16195_v60  ;;  %vm17659_vm8 = vnez %v17658_v43  ;;  %v3297_v6 = vadd.f32 %v3296_v0, %v3284_v12  ;;  %v17666_v43 = vld [vmem:[#allocation264_spill] sm:$0xff]  ;;  %3863 = vperm.xlu2 %7975, %v12919_v15   ;;  %v17669_v12 = vld [vmem:[#allocation265_spill] sm:$0xff]  ;;  %v17671_v0 = vld [vmem:[#allocation266_spill] sm:$0xff] }
 0x347   : > { %7307 = vmatpush.bf16.msk.msra.mxu2 %vm17644_vm4, %v16195_v60  ;;  %vm17661_vm4 = vnez %v17660_v59  ;;  %v12973_v59 = vld [vmem:[#allocation13] sm:$0xff]  ;;  %8007 = vset.pattern.permute.xlu0 %v16100_v40  ;;  %v17707_v15 = vld [vmem:[#allocation282_spill] sm:$0xff] }
 0x348   : > { %7279 = vmatpush.bf16.msk.msra.mxu0 %vm17648_vm3, %v16195_v60  ;;  %vm17665_vm3 = vnez %v17664_v47  ;;  %v17673_v47 = vmov 1  }
 0x349   : > { %7323 = vmatpush.bf16.msk.msra.mxu3 %vm17646_vm7, %v16195_v60  ;;  %vm17663_vm7 = vnez %v17662_v48  ;;  %v12975_v48 = vadd.f32 %v3309_v45, %v3297_v6  ;;  %v17676_v45 = vld [vmem:[#allocation268_spill] sm:$0xff]  ;;  %v17678_v6 = vld [vmem:[#allocation269_spill] sm:$0xff] }
 0x34a   : > { %7295 = vmatpush.bf16.msk.msra.mxu1 %vm17650_vm15, %v16195_v60  ;;  %vm17667_vm15 = vnez %v17666_v43  ;;  %7993 = vset.pattern.permute.xlu1 %v17673_v47  ;;  %v17674_v43 = vld [vmem:[#allocation267_spill] sm:$0xff] }
 0x34b   : > { %7309 = vmatpush.bf16.msk.msra.mxu2 %vm17652_vm12, %v16195_v60  ;;  %17668 = vst [vmem:[#allocation109_spill] sm:$0xff] %v12975_v48  ;;  %vm17670_vm12 = vnez %v17669_v12  ;;  %4855 = vperm.xlu1 %7993, %v12973_v59   ;;  %v17680_v12 = vld [vmem:[#allocation77_spill] sm:$0xff] }
 0x34c   : > { %7281 = vmatpush.bf16.msk.msra.mxu0 %vm17657_vm10, %v16195_v60  ;;  %vm17675_vm10 = vnez %v17674_v43  ;;  %v17684_v43 = vld [vmem:[#allocation271_spill] sm:$0xff] }
 0x34d   : > { %7325 = vmatpush.bf16.msk.msra.mxu3 %vm17655_vm5, %v16195_v60  ;;  %vm17672_vm5 = vnez %v17671_v0  ;;  %v17682_v0 = vld [vmem:[#allocation270_spill] sm:$0xff]  ;;  %v3298_v40 = vpop.f32.mrf.mxu2 }
 0x34e   : > { %7297 = vmatpush.bf16.msk.msra.mxu1 %vm17659_vm8, %v16195_v60  ;;  %vm17677_vm8 = vnez %v17676_v45  ;;  %v3311_v45 = vpop.f32.mrf.mxu3  ;;  %7977 = vset.pattern.permute.xlu2 %v17673_v47  ;;  %v17692_v40 = vld [vmem:[#allocation275_spill] sm:$0xff] }
 0x34f   : > { %7311 = vmatpush.bf16.msk.msra.mxu2 %vm17661_vm4, %v16195_v60  ;;  %vm17679_vm4 = vnez %v17678_v6  ;;  %v17686_v6 = vld [vmem:[#allocation272_spill] sm:$0xff]  ;;  %v17696_v45 = vld [vmem:[#allocation277_spill] sm:$0xff]  ;;  %3971 = vperm.xlu2 %7977, %v12940_v63  }
 0x350   : > { %7283 = vmatpush.bf16.msk.msra.mxu0 %vm17665_vm3, %v16195_v60  ;;  %vm17683_vm3 = vnez %v17682_v0  ;;  %v17690_v0 = vld [vmem:[#allocation274_spill] sm:$0xff] }
 0x351   : > { %7327 = vmatpush.bf16.msk.msra.mxu3 %vm17663_vm7, %v16195_v60  ;;  %vm17681_vm7 = vnez %v17680_v12  ;;  %v17688_v12 = vld [vmem:[#allocation273_spill] sm:$0xff] }
 0x352   : > { %7299 = vmatpush.bf16.msk.msra.mxu1 %vm17667_vm15, %v16195_v60  ;;  %vm17685_vm15 = vnez %v17684_v43  ;;  %v17694_v43 = vld [vmem:[#allocation276_spill] sm:$0xff] }
 0x353   : > { %7313 = vmatpush.bf16.msk.msra.mxu2 %vm17670_vm12, %v16195_v60  ;;  %vm17687_vm12 = vnez %v17686_v6  ;;  %v17698_v6 = vmov 2  }
 0x354   : > { %7285 = vmatpush.bf16.msk.msra.mxu0 %vm17675_vm10, %v16195_v60  ;;  %vm17691_vm10 = vnez %v17690_v0  ;;  %7995 = vset.pattern.permute.xlu1 %v17698_v6  ;;  %v17701_v0 = vld [vmem:[#allocation279_spill] sm:$0xff] }
 0x355   : > { %7329 = vmatpush.bf16.msk.msra.mxu3 %vm17672_vm5, %v16195_v60  ;;  %vm17689_vm5 = vnez %v17688_v12  ;;  %v17699_v12 = vld [vmem:[#allocation278_spill] sm:$0xff]  ;;  %4873 = vperm.xlu1 %7995, %v12973_v59  }
 0x356   : > { %7301 = vmatpush.bf16.msk.msra.mxu1 %vm17677_vm8, %v16195_v60  ;;  %vm17693_vm8 = vnez %v17692_v40  ;;  %v17703_v40 = vld [vmem:[#allocation280_spill] sm:$0xff]  ;;  %v3363_v48 = vpop.f32.mrf.mxu1 }
 0x357   : > { %7315 = vmatpush.bf16.msk.msra.mxu2 %vm17683_vm3, %v16195_v60  ;;  %3557 = vmatmul.bf16.vlgmr.msra.gmra.mxu0 %v12554_v22  ;;  %vm17700_vm3 = vnez %v17699_v12 }
 0x358   : > { %7335 = vmatpush.bf16.msk.msrb.mxu0 %vm17679_vm4, %v16195_v60  ;;  %vm17695_vm4 = vnez %v17694_v43  ;;  %v17705_v43 = vld [vmem:[#allocation281_spill] sm:$0xff]  ;;  %7978 = vset.pattern.permute.xlu2 %v17698_v6 }
 0x359   : > { %7331 = vmatpush.bf16.msk.msra.mxu3 %vm17685_vm15, %v16195_v60  ;;  %3570 = vmatmul.bf16.vlgmr.msra.gmra.mxu1 %v12562_v8  ;;  %vm17702_vm15 = vnez %v17701_v0  ;;  %v17709_v0 = vld [vmem:[#allocation283_spill] sm:$0xff] }
 0x35a   : > { %7351 = vmatpush.bf16.msk.msrb.mxu1 %vm17681_vm7, %v16195_v60  ;;  %vm17697_vm7 = vnez %v17696_v45  ;;  %v3350_v45 = vpop.f32.mrf.mxu0  ;;  %4022 = vperm.xlu2 %7978, %v12940_v63  }
 0x35b   : > { %7317 = vmatpush.bf16.msk.msra.mxu2 %vm17691_vm10, %v16195_v60  ;;  %v3351_v12 = vadd.f32 %v3350_v45, %v12248_v26  ;;  %vm17708_vm10 = vnez %v17707_v15  ;;  %v17715_v26 = vld [vmem:[#allocation286_spill] sm:$0xff]  ;;  %v17717_v15 = vld [vmem:[#allocation287_spill] sm:$0xff]  ;;  %v17719_v45 = vld [vmem:[#allocation288_spill] sm:$0xff] }
 0x35c   : > { %7337 = vmatpush.bf16.msk.msrb.mxu0 %vm17687_vm12, %v16195_v60  ;;  %vm17704_vm12 = vnez %v17703_v40 }
 0x35d   : > { %7333 = vmatpush.bf16.msk.msra.mxu3 %vm17693_vm8, %v16195_v60  ;;  %vm17710_vm8 = vnez %v17709_v0  ;;  %v3364_v40 = vadd.f32 %v3363_v48, %v3351_v12  ;;  %v17721_v48 = vld [vmem:[#allocation162_spill] sm:$0xff]  ;;  %v16104_v0 = vmov 3  }
 0x35e   : > { %7353 = vmatpush.bf16.msk.msrb.mxu1 %vm17689_vm5, %v16195_v60  ;;  %3583 = vmatmul.bf16.vlgmr.msra.gmra.mxu2 %v12586_v62  ;;  %vm17706_vm5 = vnez %v17705_v43  ;;  %v17713_v43 = vld [vmem:[#allocation285_spill] sm:$0xff] }
 0x35f   : > { %7367 = vmatpush.bf16.msk.msrb.mxu2 %vm17695_vm4, %v16195_v60  ;;  %vm17712_vm4 = vnez %v17711_v34  ;;  %v13065_v34 = vld [vmem:[#allocation13 + $0x8] sm:$0xff]  ;;  %7997 = vset.pattern.permute.xlu1 %v16104_v0 }
 0x360   : > { %7339 = vmatpush.bf16.msk.msrb.mxu0 %vm17700_vm3, %v16195_v60  ;;  %3596 = vmatmul.bf16.vlgmr.msra.gmra.mxu3 %v12591_v37  ;;  %vm17716_vm3 = vnez %v17715_v26  ;;  %v17723_v26 = vld [vmem:[#allocation21_spill] sm:$0xff]  ;;  %v17731_v0 = vld [vmem:[#allocation176_spill] sm:$0xff] }
 0x361   : > { %7383 = vmatpush.bf16.msk.msrb.mxu3 %vm17697_vm7, %v16195_v60  ;;  %vm17714_vm7 = vnez %v17713_v43  ;;  %v3365_v43 = vpop.f32.mrf.mxu1  ;;  %4895 = vperm.xlu1 %7997, %v13065_v34  }
 0x362   : > { %7355 = vmatpush.bf16.msk.msrb.mxu1 %vm17702_vm15, %v16195_v60  ;;  %vm17718_vm15 = vnez %v17717_v15  ;;  %v3352_v12 = vpop.f32.mrf.mxu0  ;;  %v17725_v15 = vld [vmem:[#allocation167_spill] sm:$0xff] }
 0x363   : > { %7369 = vmatpush.bf16.msk.msrb.mxu2 %vm17704_vm12, %v16195_v60  ;;  %vm17720_vm12 = vnez %v17719_v45  ;;  %v17727_v45 = vld [vmem:[#allocation170_spill] sm:$0xff]  ;;  %v3376_v12 = vpop.f32.mrf.mxu2 }
 0x364   : > { %7341 = vmatpush.bf16.msk.msrb.mxu0 %vm17708_vm10, %v16195_v60  ;;  %vm17724_vm10 = vnez %v17723_v26  ;;  %v3377_v43 = vadd.f32 %v3376_v12, %v3364_v40  ;;  %v3389_v26 = vpop.f32.mrf.mxu3  ;;  %v17738_v40 = vmov 3   ;;  %v17802_v12 = vld [vmem:[#allocation67_spill] sm:$0xff] }
 0x365   : > { %7385 = vmatpush.bf16.msk.msrb.mxu3 %vm17706_vm5, %v16195_v60  ;;  %vm17722_vm5 = vnez %v17721_v48  ;;  %v17729_v48 = vld [vmem:[#allocation289_spill] sm:$0xff]  ;;  %7979 = vset.pattern.permute.xlu2 %v17738_v40 }
 0x366   : > { %7357 = vmatpush.bf16.msk.msrb.mxu1 %vm17710_vm8, %v16195_v60  ;;  %vm17726_vm8 = vnez %v17725_v15  ;;  %v17733_v15 = vld [vmem:[#allocation178_spill] sm:$0xff]  ;;  %v3390_v20 = vadd.f32 %v3389_v26, %v3377_v43  ;;  %4073 = vperm.xlu2 %7979, %v12940_v63   ;;  %v17790_v63 = vld [vmem:[#allocation80_spill] sm:$0xff]  ;;  %v17810_v26 = vld [vmem:[#allocation93_spill] sm:$0xff] }
 0x367   : > { %7371 = vmatpush.bf16.msk.msrb.mxu2 %vm17712_vm4, %v16195_v60  ;;  %vm17728_vm4 = vnez %v17727_v45  ;;  %v13258_v45 = vld [vmem:[#allocation13 + $0x18] sm:$0xff] }
 0x368   : > { %7343 = vmatpush.bf16.msk.msrb.mxu0 %vm17716_vm3, %v16195_v60  ;;  %vm17732_vm3 = vnez %v17731_v0  ;;  %v17792_v0 = vld [vmem:[#allocation81_spill] sm:$0xff] }
 0x369   : > { %7387 = vmatpush.bf16.msk.msrb.mxu3 %vm17714_vm7, %v16195_v60  ;;  %vm17730_vm7 = vnez %v17729_v48  ;;  %v17800_v48 = vld [vmem:[#allocation66_spill] sm:$0xff] }
 0x36a   : > { %7359 = vmatpush.bf16.msk.msrb.mxu1 %vm17718_vm15, %v16195_v60  ;;  %vm17734_vm15 = vnez %v17733_v15  ;;  %v17812_v15 = vld [vmem:[#allocation95_spill] sm:$0xff] }
 0x36b   : > { %7373 = vmatpush.bf16.msk.msrb.mxu2 %vm17720_vm12, %v16195_v60  ;;  %vm17735_vm12 = vnez %v17099_v36  ;;  %v3378_v36 = vpop.f32.mrf.mxu2 }
 0x36c   : > { %7345 = vmatpush.bf16.msk.msrb.mxu0 %vm17724_vm10, %v16195_v60  ;;  %vm17737_vm10 = vnez %v17103_v25  ;;  %v16112_v25 = vmov 4   ;;  %v17816_v36 = vld [vmem:[#allocation98_spill] sm:$0xff] }
 0x36d   : > { %7389 = vmatpush.bf16.msk.msrb.mxu3 %vm17722_vm5, %v16195_v60  ;;  %vm17736_vm5 = vnez %v17101_v23  ;;  %v3391_v23 = vpop.f32.mrf.mxu3  ;;  %7999 = vset.pattern.permute.xlu1 %v16112_v25 }
 0x36e   : > { %7361 = vmatpush.bf16.msk.msrb.mxu1 %vm17726_vm8, %v16195_v60  ;;  %vm17739_vm8 = vnez %v17105_v54  ;;  %4913 = vperm.xlu1 %7999, %v13065_v34   ;;  %v13150_v54 = vld [vmem:[#allocation10 + $0x10] sm:$0xff] }
 0x36f   : > { %7375 = vmatpush.bf16.msk.msrb.mxu2 %vm17728_vm4, %v16195_v60  ;;  %vm17740_vm4 = vnez %v17107_v17  ;;  %7980 = vset.pattern.permute.xlu2 %v17653_v18 }
 0x370   : > { %7347 = vmatpush.bf16.msk.msrb.mxu0 %vm17732_vm3, %v16195_v60  ;;  %vm17742_vm3 = vnez %v17111_v56  ;;  %4127 = vperm.xlu2 %7980, %v13150_v54  }
 0x371   : > { %7391 = vmatpush.bf16.msk.msrb.mxu3 %vm17730_vm7, %v16195_v60  ;;  %vm17741_vm7 = vnez %v17109_v55 }
 0x372   : > { %7363 = vmatpush.bf16.msk.msrb.mxu1 %vm17734_vm15, %v16195_v60  ;;  %vm17743_vm15 = vnez %v17113_v24 }
 0x373   : > { %7377 = vmatpush.bf16.msk.msrb.mxu2 %vm17735_vm12, %v16195_v60  ;;  %vm17744_vm12 = vnez %v17115_v14  ;;  %v16110_v14 = vmov 6  }
 0x374   : > { %7349 = vmatpush.bf16.msk.msrb.mxu0 %vm17737_vm10, %v16195_v60  ;;  %vm17746_vm10 = vnez %v17119_v27  ;;  %v3402_v17 = vpop.f32.mrf.mxu0 }
 0x375   : > { %7393 = vmatpush.bf16.msk.msrb.mxu3 %vm17736_vm5, %v16195_v60  ;;  %vm17745_vm5 = vnez %v17117_v16  ;;  %v3403_v55 = vadd.f32 %v3402_v17, %v3390_v20  ;;  %v17788_v20 = vld [vmem:[#allocation79_spill] sm:$0xff] }
 0x376   : > { %7365 = vmatpush.bf16.msk.msrb.mxu1 %vm17739_vm8, %v16195_v60  ;;  %vm17747_vm8 = vnez %v17121_v10  ;;  %v3415_v56 = vpop.f32.mrf.mxu1  ;;  %8001 = vset.pattern.permute.xlu1 %v16110_v14  ;;  %v17764_v10 = vld [vmem:[#allocation180_spill] sm:$0xff]  ;;  %v17918_v14 = vld [vmem:[#allocation202_spill] sm:$0xff] }
 0x377   : > { %7379 = vmatpush.bf16.msk.msrb.mxu2 %vm17742_vm3, %v16195_v60  ;;  %3609 = vmatmul.bf16.vlgmr.msrb.gmra.mxu0 %v12666_v1  ;;  %vm17750_vm3 = vnez %v17127_v53  ;;  %v13163_v24 = vadd.f32 %v3415_v56, %v3403_v55 }
 0x378   : > { %7399 = vmatpush.bf16.msk.msra.mxu0 %vm17740_vm4, %v16195_v60  ;;  %vm17748_vm4 = vnez %v17123_v50  ;;  %4945 = vperm.xlu1 %8001, %v12973_v59   ;;  %v17766_v50 = vld [vmem:[#allocation183_spill] sm:$0xff] }
 0x379   : > { %7395 = vmatpush.bf16.msk.msrb.mxu3 %vm17743_vm15, %v16195_v60  ;;  %3622 = vmatmul.bf16.vlgmr.msrb.gmra.mxu1 %v12674_v46  ;;  %vm17751_vm15 = vnez %v17129_v7  ;;  %v17768_v7 = vld [vmem:[#allocation32_spill] sm:$0xff] }
 0x37a   : > { %7415 = vmatpush.bf16.msk.msra.mxu1 %vm17741_vm7, %v16195_v60  ;;  %vm17749_vm7 = vnez %v17125_v52  ;;  %7981 = vset.pattern.permute.xlu2 %v17673_v47 }
 0x37b   : > { %7381 = vmatpush.bf16.msk.msrb.mxu2 %vm17746_vm10, %v16195_v60  ;;  %vm17754_vm10 = vnez %v17137_v39  ;;  %4163 = vperm.xlu2 %7981, %v13150_v54   ;;  %v17772_v39 = vld [vmem:[#allocation34_spill] sm:$0xff] }
 0x37c   : > { %7401 = vmatpush.bf16.msk.msra.mxu0 %vm17744_vm12, %v16195_v60  ;;  %vm17752_vm12 = vnez %v17131_v30  ;;  %v3404_v16 = vpop.f32.mrf.mxu0  ;;  %v16108_v30 = vmov 7  }
 0x37d   : > { %7397 = vmatpush.bf16.msk.msrb.mxu3 %vm17747_vm8, %v16195_v60  ;;  %vm17755_vm8 = vnez %v17141_v21  ;;  %v17774_v21 = vld [vmem:[#allocation36_spill] sm:$0xff] }
 0x37e   : > { %7417 = vmatpush.bf16.msk.msra.mxu1 %vm17745_vm5, %v16195_v60  ;;  %3635 = vmatmul.bf16.vlgmr.msrb.gmra.mxu2 %v12698_v49  ;;  %vm17753_vm5 = vnez %v17133_v13  ;;  %v3417_v27 = vpop.f32.mrf.mxu1  ;;  %v17770_v13 = vld [vmem:[#allocation33_spill] sm:$0xff] }
 0x37f   : > { %7431 = vmatpush.bf16.msk.msra.mxu2 %vm17748_vm4, %v16195_v60  ;;  %vm17756_vm4 = vnez %v17145_v2  ;;  %v17776_v2 = vld [vmem:[#allocation56_spill] sm:$0xff]  ;;  %v17837_v27 = vld [vmem:[#allocation106_spill] sm:$0xff] }
 0x380   : > { %7403 = vmatpush.bf16.msk.msra.mxu0 %vm17750_vm3, %v16195_v60  ;;  %3648 = vmatmul.bf16.vlgmr.msrb.gmra.mxu3 %v12703_v4  ;;  %vm17758_vm3 = vnez %v17152_v31  ;;  %v17780_v31 = vld [vmem:[#allocation60_spill] sm:$0xff] }
 0x381   : > { %7447 = vmatpush.bf16.msk.msra.mxu3 %vm17749_vm7, %v16195_v60  ;;  %vm17757_vm7 = vnez %v17149_v42  ;;  %v13199_v52 = vpop.f32.mrf.mxu2  ;;  %8003 = vset.pattern.permute.xlu1 %v16108_v30  ;;  %v17778_v42 = vld [vmem:[#allocation57_spill] sm:$0xff] }
 0x382   : > { %7419 = vmatpush.bf16.msk.msra.mxu1 %vm17751_vm15, %v16195_v60  ;;  %vm17759_vm15 = vnez %v17154_v44  ;;  %4963 = vperm.xlu1 %8003, %v12973_v59   ;;  %v17782_v44 = vld [vmem:[#allocation62_spill] sm:$0xff] }
 0x383   : > { %7433 = vmatpush.bf16.msk.msra.mxu2 %vm17752_vm12, %v16195_v60  ;;  %vm17760_vm12 = vnez %v17156_v28  ;;  %v13201_v53 = vpop.f32.mrf.mxu3  ;;  %v17784_v28 = vld [vmem:[#allocation42_spill] sm:$0xff]  ;;  %7982 = vset.pattern.permute.xlu2 %v17698_v6 }
 0x384   : > { %7405 = vmatpush.bf16.msk.msra.mxu0 %vm17754_vm10, %v16195_v60  ;;  %vm17762_vm10 = vnez %v17160_v57  ;;  %4199 = vperm.xlu2 %7982, %v13150_v54  }
 0x385   : > { %7449 = vmatpush.bf16.msk.msra.mxu3 %vm17753_vm5, %v16195_v60  ;;  %vm17761_vm5 = vnez %v17158_v9  ;;  %v17786_v9 = vld [vmem:[#allocation55_spill] sm:$0xff] }
 0x386   : > { %7421 = vmatpush.bf16.msk.msra.mxu1 %vm17755_vm8, %v16195_v60  ;;  %vm17763_vm8 = vnez %v17163_v35 }
 0x387   : > { %7435 = vmatpush.bf16.msk.msra.mxu2 %vm17756_vm4, %v16195_v60  ;;  %vm17765_vm4 = vnez %v17764_v10 }
 0x388   : > { %7407 = vmatpush.bf16.msk.msra.mxu0 %vm17758_vm3, %v16195_v60  ;;  %vm17769_vm3 = vnez %v17768_v7  ;;  %v17843_v7 = vld [vmem:[#allocation40_spill] sm:$0xff] }
 0x389   : > { %7451 = vmatpush.bf16.msk.msra.mxu3 %vm17757_vm7, %v16195_v60  ;;  %vm17767_vm7 = vnez %v17766_v50  ;;  %v3430_v57 = vpop.f32.mrf.mxu2  ;;  %v17886_v50 = vld [vmem:[#allocation103_spill] sm:$0xff] }
 0x38a   : > { %7423 = vmatpush.bf16.msk.msra.mxu1 %vm17759_vm15, %v16195_v60  ;;  %vm17771_vm15 = vnez %v17770_v13  ;;  %8005 = vset.pattern.permute.xlu1 %v17653_v18  ;;  %v17855_v57 = vld [vmem:[#allocation31_spill] sm:$0xff] }
 0x38b   : > { %7437 = vmatpush.bf16.msk.msra.mxu2 %vm17760_vm12, %v16195_v60  ;;  %vm17773_vm12 = vnez %v17772_v39  ;;  %v3443_v35 = vpop.f32.mrf.mxu3  ;;  %4993 = vperm.xlu1 %8005, %v13258_v45   ;;  %v17845_v39 = vld [vmem:[#allocation44_spill] sm:$0xff] }
 0x38c   : > { %7409 = vmatpush.bf16.msk.msra.mxu0 %vm17762_vm10, %v16195_v60  ;;  %vm17777_vm10 = vnez %v17776_v2  ;;  %7983 = vset.pattern.permute.xlu2 %v17738_v40  ;;  %v17857_v35 = vld [vmem:[#allocation38_spill] sm:$0xff] }
 0x38d   : > { %7453 = vmatpush.bf16.msk.msra.mxu3 %vm17761_vm5, %v16195_v60  ;;  %vm17775_vm5 = vnez %v17774_v21  ;;  %4235 = vperm.xlu2 %7983, %v13150_v54   ;;  %v17847_v21 = vld [vmem:[#allocation24_spill] sm:$0xff] }
 0x38e   : > { %7425 = vmatpush.bf16.msk.msra.mxu1 %vm17763_vm8, %v16195_v60  ;;  %vm17779_vm8 = vnez %v17778_v42  ;;  %v13384_v42 = vld [vmem:[#allocation13 + $0x10] sm:$0xff] }
 0x38f   : > { %7439 = vmatpush.bf16.msk.msra.mxu2 %vm17765_vm4, %v16195_v60  ;;  %vm17781_vm4 = vnez %v17780_v31  ;;  %5083 = vperm.xlu0 %8007, %v13384_v42  }
 0x390   : > { %7411 = vmatpush.bf16.msk.msra.mxu0 %vm17769_vm3, %v16195_v60  ;;  %vm17785_vm3 = vnez %v17784_v28  ;;  %v17851_v28 = vld [vmem:[#allocation54_spill] sm:$0xff] }
 0x391   : > { %7455 = vmatpush.bf16.msk.msra.mxu3 %vm17767_vm7, %v16195_v60  ;;  %vm17783_vm7 = vnez %v17782_v44 }
 0x392   : > { %7427 = vmatpush.bf16.msk.msra.mxu1 %vm17771_vm15, %v16195_v60  ;;  %vm17787_vm15 = vnez %v17786_v9  ;;  %v17853_v9 = vld [vmem:[#allocation58_spill] sm:$0xff] }
 0x393   : > { %7441 = vmatpush.bf16.msk.msra.mxu2 %vm17773_vm12, %v16195_v60  ;;  %vm17789_vm12 = vnez %v17788_v20  ;;  %8006 = vset.pattern.permute.xlu1 %v17673_v47 }
 0x394   : > { %7413 = vmatpush.bf16.msk.msra.mxu0 %vm17777_vm10, %v16195_v60  ;;  %vm17793_vm10 = vnez %v17792_v0  ;;  %5040 = vperm.xlu1 %8006, %v13258_v45   ;;  %v3429_v0 = vadd.f32 %v13199_v52, %v13163_v24  ;;  %v17867_v24 = vld [vmem:[#allocation108_spill] sm:$0xff] }
 0x395   : > { %7457 = vmatpush.bf16.msk.msra.mxu3 %vm17775_vm5, %v16195_v60  ;;  %vm17791_vm5 = vnez %v17790_v63  ;;  %7984 = vset.pattern.permute.xlu2 %v17653_v18  ;;  %v17859_v63 = vld [vmem:[#allocation63_spill] sm:$0xff]  ;;  %v17868_v52 = vld [vmem:[#allocation76_spill] sm:$0xff] }
 0x396   : > { %7429 = vmatpush.bf16.msk.msra.mxu1 %vm17779_vm8, %v16195_v60  ;;  %v3467_v43 = vpop.f32.mrf.mxu1 }
 0x397   : > { %7443 = vmatpush.bf16.msk.msra.mxu2 %vm17785_vm3, %v16195_v60  ;;  %3661 = vmatmul.bf16.vlgmr.msra.gmra.mxu0 %v12554_v22  ;;  %v17794_v22 = vld [vmem:[#allocation85_spill] sm:$0xff]  ;;  %vm17799_vm3 = vnez %v17261_v29  ;;  %v17806_v29 = vld [vmem:[#allocation22_spill] sm:$0xff] }
 0x398   : > { %7463 = vmatpush.bf16.msk.msrb.mxu0 %vm17781_vm4, %v16195_v60  ;;  %vm17795_vm8 = vnez %v17794_v22  ;;  %8008 = vset.pattern.permute.xlu0 %v17738_v40 }
 0x399   : > { %7459 = vmatpush.bf16.msk.msra.mxu3 %vm17787_vm15, %v16195_v60  ;;  %3674 = vmatmul.bf16.vlgmr.msra.gmra.mxu1 %v12562_v8  ;;  %v17796_v8 = vld [vmem:[#allocation65_spill] sm:$0xff]  ;;  %vm17801_vm15 = vnez %v17800_v48 }
 0x39a   : > { %7479 = vmatpush.bf16.msk.msrb.mxu1 %vm17783_vm7, %v16195_v60  ;;  %vm17797_vm4 = vnez %v17796_v8  ;;  %vm17798_vm7 = vnez %v17256_v41  ;;  %v17804_v41 = vld [vmem:[#allocation68_spill] sm:$0xff]  ;;  %3887 = vperm.xlu0 %8008, %v17867_v24  }
 0x39b   : > { %7445 = vmatpush.bf16.msk.msra.mxu2 %vm17793_vm10, %v16195_v60  ;;  %vm17807_vm10 = vnez %v17806_v29  ;;  %v17861_v8 = vld [vmem:[#allocation64_spill] sm:$0xff] }
 0x39c   : > { %7465 = vmatpush.bf16.msk.msrb.mxu0 %vm17789_vm12, %v16195_v60  ;;  %vm17803_vm12 = vnez %v17802_v12  ;;  %8009 = vset.pattern.permute.xlu1 %v17698_v6  ;;  %v17863_v12 = vld [vmem:[#allocation39_spill] sm:$0xff] }
 0x39d   : > { %7461 = vmatpush.bf16.msk.msra.mxu3 %vm17795_vm8, %v16195_v60  ;;  %5087 = vperm.xlu1 %8009, %v13258_v45  }
 0x39e   : > { %7481 = vmatpush.bf16.msk.msrb.mxu1 %vm17791_vm5, %v16195_v60  ;;  %3687 = vmatmul.bf16.vlgmr.msra.gmra.mxu2 %v12586_v62  ;;  %vm17805_vm5 = vnez %v17804_v41  ;;  %v3454_v62 = vpop.f32.mrf.mxu0  ;;  %v17865_v41 = vld [vmem:[#allocation49_spill] sm:$0xff] }
 0x39f   : > { %7495 = vmatpush.bf16.msk.msrb.mxu2 %vm17797_vm4, %v16195_v60  ;;  %vm17811_vm4 = vnez %v17810_v26  ;;  %v3455_v10 = vadd.f32 %v3454_v62, %v17837_v27 }
 0x3a0   : > { %7467 = vmatpush.bf16.msk.msrb.mxu0 %vm17799_vm3, %v16195_v60  ;;  %3700 = vmatmul.bf16.vlgmr.msra.gmra.mxu3 %v12591_v37  ;;  %v17808_v37 = vld [vmem:[#allocation91_spill] sm:$0xff]  ;;  %vm17814_vm3 = vnez %v17303_v61  ;;  %v3469_v61 = vpop.f32.mrf.mxu1  ;;  %v13391_v44 = vpop.permute.xlu2 %3863 }
 0x3a1   : > { %7511 = vmatpush.bf16.msk.msrb.mxu3 %vm17798_vm7, %v16195_v60  ;;  %vm17809_vm8 = vnez %v17808_v37  ;;  %vm17813_vm7 = vnez %v17812_v15  ;;  %v3468_v13 = vadd.f32 %v3467_v43, %v3455_v10  ;;  %v3442_v43 = vadd.f32 %v13201_v53, %v3429_v0  ;;  %v17870_v37 = vld [vmem:[#allocation82_spill] sm:$0xff]  ;;  %v17874_v53 = vld [vmem:[#allocation59_spill] sm:$0xff] }
 0x3a2   : > { %7483 = vmatpush.bf16.msk.msrb.mxu1 %vm17801_vm15, %v16195_v60  ;;  %vm17815_vm15 = vnez %v17307_v51  ;;  %v13312_v51 = vld [vmem:[#allocation10 + $0x18] sm:$0xff]  ;;  %v13422_v62 = vpop.permute.xlu1 %3839  ;;  %4891 = vperm.xlu0 %8008, %v12973_v59  }
 0x3a3   : > { %7497 = vmatpush.bf16.msk.msrb.mxu2 %vm17803_vm12, %v16195_v60  ;;  %vm17817_vm12 = vnez %v17816_v36  ;;  %v3493_v54 = vpop.f32.mrf.mxu3  ;;  %4274 = vperm.xlu2 %7984, %v13312_v51   ;;  %v17872_v36 = vld [vmem:[#allocation50_spill] sm:$0xff] }
 0x3a4   : > { %7469 = vmatpush.bf16.msk.msrb.mxu0 %vm17807_vm10, %v16195_v60  ;;  %vm17819_vm10 = vnez %v17319_v58 }
 0x3a5   : > { %7513 = vmatpush.bf16.msk.msrb.mxu3 %vm17805_vm5, %v16195_v60  ;;  %vm17818_vm5 = vnez %v17315_v19  ;;  %v3480_v19 = vpop.f32.mrf.mxu2  ;;  %8011 = vset.pattern.permute.xlu1 %v17738_v40 }
 0x3a6   : > { %7485 = vmatpush.bf16.msk.msrb.mxu1 %vm17809_vm8, %v16195_v60  ;;  %v3456_v23 = vpop.f32.mrf.mxu0  ;;  %vm17820_vm8 = vnez %v17322_v32  ;;  %5134 = vperm.xlu1 %8011, %v13258_v45   ;;  %v17878_v32 = vld [vmem:[#allocation92_spill] sm:$0xff] }
 0x3a7   : > { %7499 = vmatpush.bf16.msk.msrb.mxu2 %vm17811_vm4, %v16195_v60  ;;  %vm17821_vm4 = vnez %v17325_v5  ;;  %v17880_v5 = vld [vmem:[#allocation61_spill] sm:$0xff] }
 0x3a8   : > { %7471 = vmatpush.bf16.msk.msrb.mxu0 %vm17814_vm3, %v16195_v60  ;;  %vm17823_vm3 = vnez %v17331_v38  ;;  %v17830_v38 = vld [vmem:[#allocation74_spill] sm:$0xff] }
 0x3a9   : > { %7515 = vmatpush.bf16.msk.msrb.mxu3 %vm17813_vm7, %v16195_v60  ;;  %vm17822_vm7 = vnez %v17329_v3  ;;  %v17828_v3 = vld [vmem:[#allocation25_spill] sm:$0xff]  ;;  %v13435_v15 = vpop.permute.xlu2 %3971 }
 0x3aa   : > { %7487 = vmatpush.bf16.msk.msrb.mxu1 %vm17815_vm15, %v16195_v60  ;;  %vm17824_vm15 = vnez %v17334_v11  ;;  %v17832_v11 = vld [vmem:[#allocation26_spill] sm:$0xff]  ;;  %5130 = vperm.xlu0 %8008, %v13384_v42  }
 0x3ab   : > { %7501 = vmatpush.bf16.msk.msrb.mxu2 %vm17817_vm12, %v16195_v60  ;;  %vm17829_vm12 = vnez %v17828_v3  ;;  %v3495_v55 = vpop.f32.mrf.mxu3  ;;  %7985 = vset.pattern.permute.xlu2 %v17673_v47 }
 0x3ac   : > { %7473 = vmatpush.bf16.msk.msrb.mxu0 %vm17819_vm10, %v16195_v60  ;;  %4310 = vperm.xlu2 %7985, %v13312_v51   ;;  %vm17852_vm10 = vnez %v17851_v28  ;;  %v17884_v55 = vld [vmem:[#allocation101_spill] sm:$0xff] }
 0x3ad   : > { %7517 = vmatpush.bf16.msk.msrb.mxu3 %vm17818_vm5, %v16195_v60  ;;  %v3482_v17 = vpop.f32.mrf.mxu2 }
 0x3ae   : > { %7489 = vmatpush.bf16.msk.msrb.mxu1 %vm17820_vm8, %v16195_v60  ;;  %vm17854_vm8 = vnez %v17853_v9  ;;  %8012 = vset.pattern.permute.xlu1 %v16112_v25  ;;  %v13459_v17 = vld [vmem:[#allocation10 + $0x20] sm:$0xff] }
 0x3af   : > { %7503 = vmatpush.bf16.msk.msrb.mxu2 %vm17821_vm4, %v16195_v60  ;;  %vm17856_vm4 = vnez %v17855_v57  ;;  %5181 = vperm.xlu1 %8012, %v13258_v45   ;;  %v17924_v25 = vld [vmem:[#allocation205_spill] sm:$0xff] }
 0x3b0   : > { %7475 = vmatpush.bf16.msk.msrb.mxu0 %vm17823_vm3, %v16195_v60  ;;  %vm17860_vm3 = vnez %v17859_v63 }
 0x3b1   : > { %7519 = vmatpush.bf16.msk.msrb.mxu3 %vm17822_vm7, %v16195_v60  ;;  %vm17858_vm7 = vnez %v17857_v35 }
 0x3b2   : > { %7491 = vmatpush.bf16.msk.msrb.mxu1 %vm17824_vm15, %v16195_v60  ;;  %vm17862_vm15 = vnez %v17861_v8 }
 0x3b3   : > { %7505 = vmatpush.bf16.msk.msrb.mxu2 %vm12374_vm9, %v16195_v60  ;;  %vm17831_vm9 = vnez %v17830_v38 }
 0x3b4   : > { %7477 = vmatpush.bf16.msk.msrb.mxu0 %vm12396_vm6, %v16195_v60  ;;  %v3506_v2 = vpop.f32.mrf.mxu0  ;;  %7986 = vset.pattern.permute.xlu2 %v17698_v6  ;;  %v13465_v10 = vpop.permute.xlu1 %3917 }
 0x3b5   : > { %7521 = vmatpush.bf16.msk.msrb.mxu3 %vm12385_vm13, %v16195_v60  ;;  %vm17833_vm13 = vnez %v17832_v11  ;;  %4346 = vperm.xlu2 %7986, %v13312_v51  }
 0x3b6   : > { %7493 = vmatpush.bf16.msk.msrb.mxu1 %vm12407_vm2, %v16195_v60  ;;  %vm17846_vm2 = vnez %v17845_v39  ;;  %v3519_v31 = vpop.f32.mrf.mxu1 }
 0x3b7   : > { %7507 = vmatpush.bf16.msk.msrb.mxu2 %vm17831_vm9, %v16195_v60  ;;  %3713 = vmatmul.bf16.vlgmr.msrb.gmra.mxu0 %v12666_v1  ;;  %v17839_v1 = vld [vmem:[#allocation37_spill] sm:$0xff]  ;;  %vm17864_vm9 = vnez %v17863_v12 }
 0x3b8   : > { %7527 = vmatpush.bf16.msk.msra.mxu0 %vm17829_vm12, %v16195_v60 }
 0x3b9   : > { %7523 = vmatpush.bf16.msk.msrb.mxu3 %vm12444_vm14, %v16195_v60  ;;  %3726 = vmatmul.bf16.vlgmr.msrb.gmra.mxu1 %v12674_v46  ;;  %vm17840_vm14 = vnez %v17839_v1  ;;  %v17841_v46 = vld [vmem:[#allocation23_spill] sm:$0xff] }
 0x3ba   : > { %7543 = vmatpush.bf16.msk.msra.mxu1 %vm17833_vm13, %v16195_v60  ;;  %vm17842_vm6 = vnez %v17841_v46 }
 0x3bb   : > { %7509 = vmatpush.bf16.msk.msrb.mxu2 %vm12452_vm0, %v16195_v60  ;;  %vm17844_vm0 = vnez %v17843_v7 }
 0x3bc   : > { %7529 = vmatpush.bf16.msk.msra.mxu0 %vm8909_vm11, %v16195_v60  ;;  %v3508_v48 = vpop.f32.mrf.mxu0 }
 0x3bd   : > { %7525 = vmatpush.bf16.msk.msrb.mxu3 %vm12457_vm1, %v16195_v60  ;;  %vm17848_vm1 = vnez %v17847_v21  ;;  %7987 = vset.pattern.permute.xlu2 %v17738_v40  ;;  %v17894_v48 = vld [vmem:[#allocation83_spill] sm:$0xff] }
 0x3be   : > { %7545 = vmatpush.bf16.msk.msra.mxu1 %vm17840_vm14, %v16195_v60  ;;  %3739 = vmatmul.bf16.vlgmr.msrb.gmra.mxu2 %v12698_v49  ;;  %v17849_v49 = vld [vmem:[#allocation30_spill] sm:$0xff]  ;;  %v3521_v45 = vpop.f32.mrf.mxu1 }
 0x3bf   : > { %7559 = vmatpush.bf16.msk.msra.mxu2 %vm17842_vm6, %v16195_v60  ;;  %vm17850_vm5 = vnez %v17849_v49  ;;  %4382 = vperm.xlu2 %7987, %v13312_v51  }
 0x3c0   : > { %3752 = vmatmul.bf16.vlgmr.msrb.gmra.mxu3 %v12703_v4  ;;  %7531 = vmatpush.bf16.msk.msra.mxu0 %vm17844_vm0, %v16195_v60  ;;  %v3481_v4 = vadd.f32 %v3480_v19, %v3468_v13  ;;  %v13443_v19 = vpop.permute.xlu0 %3760  ;;  %v17888_v13 = vld [vmem:[#allocation190_spill] sm:$0xff] }
 0x3c1   : > { %7575 = vmatpush.bf16.msk.msra.mxu3 %vm17848_vm1, %v16195_v60  ;;  %v3532_v26 = vpop.f32.mrf.mxu2  ;;  %v3763_v51 = vadd.f32 %v13443_v19, %v3442_v43  ;;  %v17896_v43 = vld [vmem:[#allocation194_spill] sm:$0xff] }
 0x3c2   : > { %7547 = vmatpush.bf16.msk.msra.mxu1 %vm17846_vm2, %v16195_v60  ;;  %v3494_v20 = vadd.f32 %v3493_v54, %v3481_v4  ;;  %v17876_v54 = vld [vmem:[#allocation86_spill] sm:$0xff]  ;;  %v13474_v4 = vpop.permute.xlu2 %4022  ;;  %vm17897_vm1 = vnez %v17896_v43 }
 0x3c3   : > { %7561 = vmatpush.bf16.msk.msra.mxu2 %vm17850_vm5, %v16195_v60  ;;  %v3545_v61 = vpop.f32.mrf.mxu3  ;;  %vm17875_vm5 = vnez %v17874_v53  ;;  %v3767_v16 = vmul.f32 0.2, %v3763_v51 }
 0x3c4   : > { %7533 = vmatpush.bf16.msk.msra.mxu0 %vm17852_vm10, %v16195_v60  ;;  %v3507_v22 = vadd.f32 %v3506_v2, %v3494_v20 }
 0x3c5   : > { %7577 = vmatpush.bf16.msk.msra.mxu3 %vm17856_vm4, %v16195_v60  ;;  %vm17869_vm4 = vnez %v17868_v52  ;;  %v3771_v45 = vmax.f32 %v3763_v51, %v3767_v16  ;;  %v17904_v51 = vld [vmem:[#allocation94_spill] sm:$0xff] }
 0x3c6   : > { %7549 = vmatpush.bf16.msk.msra.mxu1 %vm17854_vm8, %v16195_v60  ;;  %v3520_v29 = vadd.f32 %v3519_v31, %v3507_v22  ;;  %v17890_v31 = vld [vmem:[#allocation191_spill] sm:$0xff]  ;;  %v17892_v22 = vld [vmem:[#allocation72_spill] sm:$0xff] }
 0x3c7   : > { %7563 = vmatpush.bf16.msk.msra.mxu2 %vm17858_vm7, %v16195_v60  ;;  %vm17866_vm7 = vnez %v17865_v41  ;;  %7988 = vset.pattern.permute.xlu2 %v17653_v18 }
 0x3c8   : > { %7535 = vmatpush.bf16.msk.msra.mxu0 %vm17860_vm3, %v16195_v60  ;;  %v3533_v23 = vadd.f32 %v3532_v26, %v3520_v29  ;;  %4421 = vperm.xlu2 %7988, %v13459_v17   ;;  %v17898_v29 = vld [vmem:[#allocation195_spill] sm:$0xff] }
 0x3c9   : > { %7579 = vmatpush.bf16.msk.msra.mxu3 %vm17864_vm9, %v16195_v60  ;;  %vm17871_vm9 = vnez %v17870_v37  ;;  %v3534_v2 = vpop.f32.mrf.mxu2 }
 0x3ca   : > { %7551 = vmatpush.bf16.msk.msra.mxu1 %vm17862_vm15, %v16195_v60  ;;  %v3546_v58 = vadd.f32 %v3545_v61, %v3533_v23  ;;  %v17900_v23 = vld [vmem:[#allocation84_spill] sm:$0xff]  ;;  %v13511_v42 = vpop.permute.xlu2 %4073  ;;  %v17912_v2 = vld [vmem:[#allocation158_spill] sm:$0xff] }
 0x3cb   : > { %7565 = vmatpush.bf16.msk.msra.mxu2 %vm17866_vm7, %v16195_v60  ;;  %vm17873_vm7 = vnez %v17872_v36  ;;  %v3547_v0 = vpop.f32.mrf.mxu3  ;;  %v17902_v61 = vld [vmem:[#allocation200_spill] sm:$0xff] }
 0x3cc   : > { %7537 = vmatpush.bf16.msk.msra.mxu0 %vm17869_vm4, %v16195_v60  ;;  %vm17879_vm4 = vnez %v17878_v32  ;;  %v3764_v38 = vadd.f32 %v13443_v19, %v3546_v58  ;;  %v17906_v58 = vld [vmem:[#allocation27_spill] sm:$0xff] }
 0x3cd   : > { %7581 = vmatpush.bf16.msk.msra.mxu3 %vm17873_vm7, %v16195_v60  ;;  %vm17881_vm7 = vnez %v17880_v5 }
 0x3ce   : > { %7553 = vmatpush.bf16.msk.msra.mxu1 %vm17871_vm9, %v16195_v60  ;;  %vm17877_vm9 = vnez %v17876_v54  ;;  %v3768_v27 = vmul.f32 0.2, %v3764_v38 }
 0x3cf   : > { %7567 = vmatpush.bf16.msk.msra.mxu2 %vm17875_vm5, %v16195_v60  ;;  %vm17883_vm5 = vnez %v17882_v33 }
 0x3d0   : > { %7539 = vmatpush.bf16.msk.msra.mxu0 %vm17877_vm9, %v16195_v60  ;;  %vm17885_vm9 = vnez %v17884_v55  ;;  %v3772_v20 = vmax.f32 %v3764_v38, %v3768_v27  ;;  %v17908_v38 = vld [vmem:[#allocation198_spill] sm:$0xff]  ;;  %7989 = vset.pattern.permute.xlu2 %v17673_v47  ;;  %v17910_v27 = vld [vmem:[#allocation97_spill] sm:$0xff] }
 0x3d1   : > { %7583 = vmatpush.bf16.msk.msra.mxu3 %vm17881_vm7, %v16195_v60  ;;  %vm17887_vm7 = vnez %v17886_v50  ;;  %4457 = vperm.xlu2 %7989, %v13459_v17  }
 0x3d2   : > { %7555 = vmatpush.bf16.msk.msra.mxu1 %vm17879_vm4, %v16195_v60  ;;  %vm17889_vm4 = vnez %v17888_v13  ;;  %v3783_v24 = vrot.slane %v3772_v20, 4 }
 0x3d3   : > { %7569 = vmatpush.bf16.msk.msra.mxu2 %vm17883_vm5, %v16195_v60  ;;  %vm17891_vm5 = vnez %v17890_v31 }
 0x3d4   : > { %7541 = vmatpush.bf16.msk.msra.mxu0 %vm17885_vm9, %v16195_v60  ;;  %vm16107_vm9 = vcmask 1043456   ;;  %v3558_v16 = vpop.f32.mrf.mxu0 }
 0x3d5   : > { %v3786_v26 = vsel %vm16107_vm9, %v3771_v45, %v3783_v24  ;;  %vm17907_vm9 = vnez %v17906_v58  ;;  %v3559_v20 = vadd.f32 %v3558_v16, %v17912_v2  ;;  %v13517_v45 = vpop.permute.xlu1 %4855  ;;  %v17914_v24 = vld [vmem:[#allocation199_spill] sm:$0xff]  ;;  %v17920_v16 = vld [vmem:[#allocation46_spill] sm:$0xff] }
 0x3d6   : > { %7557 = vmatpush.bf16.msk.msra.mxu1 %vm17887_vm7, %v16195_v60  ;;  %vm17893_vm7 = vnez %v17892_v22  ;;  %3788 = vrot.lane.b32.xlu1 %v3786_v26, %s8330_s19  ;;  %v3571_v0 = vpop.f32.mrf.mxu1  ;;  %17913 = vst [vmem:[#allocation160_spill] sm:$0xff] %v13517_v45  ;;  %v17916_v26 = vld [vmem:[#allocation201_spill] sm:$0xff]  ;;  %v17922_v2 = vld [vmem:[#allocation47_spill] sm:$0xff]  ;;  %v17926_v45 = vld [vmem:[#allocation206_spill] sm:$0xff] }
 0x3d7   : > { %7585 = vmatpush.bf16.msk.msra.mxu3 %vm17893_vm7, %v16195_v60  ;;  %vm17901_vm7 = vnez %v17900_v23  ;;  %v3572_v30 = vadd.f32 %v3571_v0, %v3559_v20  ;;  %v17928_v20 = vld [vmem:[#allocation203_spill] sm:$0xff] }
 0x3d8   : > { %7591 = vmatpush.bf16.msk.msrb.mxu0 %vm17889_vm4, %v16195_v60  ;;  %vm17895_vm4 = vnez %v17894_v48  ;;  %vm17929_vm6 = vnez %v17928_v20  ;;  %v17935_v20 = vld [vmem:[#allocation28_spill] sm:$0xff]  ;;  %v17970_v48 = vmov 4  }
 0x3d9   : > { %7571 = vmatpush.bf16.msk.msra.mxu2 %vm17895_vm4, %v16195_v60  ;;  %vm17903_vm4 = vnez %v17902_v61  ;;  %7990 = vset.pattern.permute.xlu2 %v17698_v6 }
 0x3da   : > { %7607 = vmatpush.bf16.msk.msrb.mxu1 %vm17891_vm5, %v16195_v60  ;;  %vm17899_vm5 = vnez %v17898_v29  ;;  %4493 = vperm.xlu2 %7990, %v13459_v17  }
 0x3db   : > { %7587 = vmatpush.bf16.msk.msra.mxu3 %vm17901_vm7, %v16195_v60  ;;  %vm17909_vm7 = vnez %v17908_v38  ;;  %v17932_v38 = vld [vmem:[#allocation73_spill] sm:$0xff] }
 0x3dc   : > { %7593 = vmatpush.bf16.msk.msrb.mxu0 %vm17897_vm1, %v16195_v60  ;;  %vm17905_vm1 = vnez %v17904_v51  ;;  %v3560_v0 = vpop.f32.mrf.mxu0  ;;  %v17943_v51 = vld [vmem:[#allocation96_spill] sm:$0xff] }
 0x3dd   : > { %7573 = vmatpush.bf16.msk.msra.mxu2 %vm17905_vm1, %v16195_v60  ;;  %vm17915_vm1 = vnez %v17914_v24 }
 0x3de   : > { %7609 = vmatpush.bf16.msk.msrb.mxu1 %vm17899_vm5, %v16195_v60  ;;  %vm17923_vm5 = vnez %v17922_v2  ;;  %v3573_v24 = vpop.f32.mrf.mxu1  ;;  %v17930_v2 = vld [vmem:[#allocation204_spill] sm:$0xff] }
 0x3df   : > { %v17937_v24 = vld [vmem:[#allocation69_spill] sm:$0xff] }
 0x3e0   : > { %7595 = vmatpush.bf16.msk.msrb.mxu0 %vm17903_vm4, %v16195_v60  ;;  %vm17911_vm4 = vnez %v17910_v27  ;;  %v17939_v27 = vld [vmem:[#allocation70_spill] sm:$0xff] }
 0x3e1   : > { %7623 = vmatpush.bf16.msk.msrb.mxu2 %vm17909_vm7, %v16195_v60  ;;  %7589 = vmatpush.bf16.msk.msra.mxu3 %vm17911_vm4, %v16195_v60  ;;  %vm17917_vm7 = vnez %v17916_v26  ;;  %vm17921_vm4 = vnez %v17920_v16  ;;  %v13545_v16 = vpop.permute.xlu2 %4127  ;;  %v3584_v0 = vpop.f32.mrf.mxu2 }
 0x3e2   : > { %7611 = vmatpush.bf16.msk.msrb.mxu1 %vm17907_vm9, %v16195_v60  ;;  %vm17919_vm9 = vnez %v17918_v14  ;;  %7991 = vset.pattern.permute.xlu2 %v17738_v40  ;;  %v17956_v40 = vld [vmem:[#allocation209_spill] sm:$0xff] }
 0x3e3   : > { %4529 = vperm.xlu2 %7991, %v13459_v17   ;;  %v4800_v17 = vld [vmem:[#allocation11] sm:$0xff] }
 0x3e4   : > { %7597 = vmatpush.bf16.msk.msrb.mxu0 %vm17917_vm7, %v16195_v60  ;;  %vm17927_vm7 = vnez %v17926_v45  ;;  %v13554_v45 = vpop.permute.xlu1 %4873 }
 0x3e5   : > { %7639 = vmatpush.bf16.msk.msrb.mxu3 %vm17915_vm1, %v16195_v60  ;;  %7625 = vmatpush.bf16.msk.msrb.mxu2 %vm17921_vm4, %v16195_v60  ;;  %vm17925_vm1 = vnez %v17924_v25  ;;  %vm17933_vm4 = vnez %v17932_v38  ;;  %17934 = vst [vmem:[#allocation87_spill] sm:$0xff] %v13554_v45  ;;  %v3585_v25 = vadd.f32 %v3584_v0, %v3572_v30  ;;  %v17941_v38 = vld [vmem:[#allocation53_spill] sm:$0xff]  ;;  %v17947_v30 = vld [vmem:[#allocation52_spill] sm:$0xff] }
 0x3e6   : > { %7613 = vmatpush.bf16.msk.msrb.mxu1 %vm17919_vm9, %v16195_v60 }
 0x3e8   : > { %7599 = vmatpush.bf16.msk.msrb.mxu0 %vm17925_vm1, %v16195_v60  ;;  %vm17944_vm1 = vnez %v17943_v51 }
 0x3e9   : > { %7641 = vmatpush.bf16.msk.msrb.mxu3 %vm17923_vm5, %v16195_v60  ;;  %7627 = vmatpush.bf16.msk.msrb.mxu2 %vm17929_vm6, %v16195_v60  ;;  %vm17931_vm5 = vnez %v17930_v2  ;;  %vm17936_vm6 = vnez %v17935_v20  ;;  %v3597_v2 = vpop.f32.mrf.mxu3  ;;  %v17945_v20 = vld [vmem:[#allocation51_spill] sm:$0xff]  ;;  %v13578_v0 = vpop.permute.xlu2 %4163 }
 0x3ea   : > { %7615 = vmatpush.bf16.msk.msrb.mxu1 %vm17927_vm7, %v16195_v60  ;;  %vm17938_vm7 = vnez %v17937_v24  ;;  %v3598_v45 = vadd.f32 %v3597_v2, %v3585_v25  ;;  %v17951_v25 = vld [vmem:[#allocation211_spill] sm:$0xff]  ;;  %v3586_v2 = vpop.f32.mrf.mxu2 }
 0x3eb   : > { %7992 = vset.pattern.permute.xlu2 %v17653_v18 }
 0x3ec   : > { %7601 = vmatpush.bf16.msk.msrb.mxu0 %vm17933_vm4, %v16195_v60  ;;  %vm17942_vm4 = vnez %v17941_v38  ;;  %v13590_v24 = vpop.permute.xlu1 %4895  ;;  %4803 = vperm.xlu2 %7992, %v4800_v17  }
 0x3ed   : > { %7643 = vmatpush.bf16.msk.msrb.mxu3 %vm17931_vm5, %v16195_v60  ;;  %7629 = vmatpush.bf16.msk.msrb.mxu2 %vm17938_vm7, %v16195_v60  ;;  %vm17940_vm5 = vnez %v17939_v27  ;;  %vm17948_vm7 = vnez %v17947_v30  ;;  %v17949_v27 = vld [vmem:[#allocation210_spill] sm:$0xff]  ;;  %17955 = vst [vmem:[#allocation88_spill] sm:$0xff] %v13590_v24 }
 0x3ee   : > { %7617 = vmatpush.bf16.msk.msrb.mxu1 %vm17936_vm6, %v16195_v60  ;;  %vm17946_vm6 = vnez %v17945_v20  ;;  %v17953_v20 = vld [vmem:[#allocation208_spill] sm:$0xff] }
 0x3f0   : > { %7603 = vmatpush.bf16.msk.msrb.mxu0 %vm17942_vm4, %v16195_v60  ;;  %vm17980_vm4 = vcmask 15360  }
 0x3f1   : > { %7645 = vmatpush.bf16.msk.msrb.mxu3 %vm17940_vm5, %v16195_v60  ;;  %7631 = vmatpush.bf16.msk.msrb.mxu2 %vm17946_vm6, %v16195_v60  ;;  %vm17950_vm5 = vnez %v17949_v27  ;;  %vm17954_vm6 = vnez %v17953_v20  ;;  %v3599_v30 = vpop.f32.mrf.mxu3  ;;  %v17958_v27 = vld [vmem:[#allocation215_spill] sm:$0xff]  ;;  %v13602_v2 = vpop.permute.xlu2 %4199 }
 0x3f2   : > { %7619 = vmatpush.bf16.msk.msrb.mxu1 %vm17944_vm1, %v16195_v60  ;;  %vm17952_vm1 = vnez %v17951_v25  ;;  %v17960_v25 = vld [vmem:[#allocation216_spill] sm:$0xff]  ;;  %v17962_v30 = vld [vmem:[#allocation219_spill] sm:$0xff] }
 0x3f4   : > { %7605 = vmatpush.bf16.msk.msrb.mxu0 %vm17950_vm5, %v16195_v60  ;;  %vm17959_vm5 = vnez %v17958_v27  ;;  %v3610_v24 = vpop.f32.mrf.mxu0  ;;  %v13610_v51 = vpop.permute.xlu1 %4913  ;;  %4836 = vperm.xlu2 %7992, %v12973_v59  }
 0x3f5   : > { %7647 = vmatpush.bf16.msk.msrb.mxu3 %vm17948_vm7, %v16195_v60  ;;  %7633 = vmatpush.bf16.msk.msrb.mxu2 %vm17954_vm6, %v16195_v60  ;;  %vm17957_vm7 = vnez %v17956_v40  ;;  %vm17963_vm6 = vnez %v17962_v30  ;;  %v17964_v40 = vld [vmem:[#allocation220_spill] sm:$0xff]  ;;  %v3611_v27 = vadd.f32 %v3610_v24, %v3598_v45  ;;  %17966 = vst [vmem:[#allocation89_spill] sm:$0xff] %v13610_v51  ;;  %v16120_v45 = vmov 5  }
 0x3f6   : > { %7621 = vmatpush.bf16.msk.msrb.mxu1 %vm17952_vm1, %v16195_v60  ;;  %vm17961_vm1 = vnez %v17960_v25  ;;  %v3623_v20 = vpop.f32.mrf.mxu1  ;;  %8010 = vset.pattern.permute.xlu0 %v16120_v45 }
 0x3f7   : > { %v3624_v25 = vadd.f32 %v3623_v20, %v3611_v27  ;;  %8013 = vset.pattern.permute.xlu1 %v16120_v45  ;;  %4931 = vperm.xlu0 %8010, %v13065_v34  }
 0x3f9   : > { %7649 = vmatpush.bf16.msk.msrb.mxu3 %vm17957_vm7, %v16195_v60  ;;  %7635 = vmatpush.bf16.msk.msrb.mxu2 %vm17959_vm5, %v16195_v60  ;;  %vm17965_vm7 = vnez %v17964_v40  ;;  %v13613_v17 = vpop.permute.xlu2 %4235  ;;  %vm17979_vm5 = vcmask 1043456  }
 0x3fc   : > { %v3612_v38 = vpop.f32.mrf.mxu0  ;;  %v13615_v23 = vpop.permute.xlu1 %4945  ;;  %7994 = vset.pattern.permute.xlu2 %v17673_v47 }
 0x3fd   : > { %7651 = vmatpush.bf16.msk.msrb.mxu3 %vm17961_vm1, %v16195_v60  ;;  %7637 = vmatpush.bf16.msk.msrb.mxu2 %vm17963_vm6, %v16195_v60  ;;  %17967 = vst [vmem:[#allocation90_spill] sm:$0xff] %v13615_v23  ;;  %vm3802_vm6 = vcmask 1047556  }
 0x3fe   : > { %v3625_v14 = vpop.f32.mrf.mxu1  ;;  %4859 = vperm.xlu2 %7994, %v13065_v34  }
 0x401   : > { %7653 = vmatpush.bf16.msk.msrb.mxu3 %vm17965_vm7, %v16195_v60  ;;  %v3636_v26 = vpop.f32.mrf.mxu2  ;;  %v13619_v40 = vpop.permute.xlu2 %4274  ;;  %vm16127_vm7 = vcmask 15360  }
 0x402   : > { %v3637_v13 = vadd.f32 %v3636_v26, %v3624_v25 }
 0x403   : > { %v3649_v30 = vpop.f32.mrf.mxu3 }
 0x404   : > { %v13624_v14 = vpop.permute.xlu1 %4963 }
 0x405   : > { %17968 = vst [vmem:[#allocation110_spill] sm:$0xff] %v13624_v14 }
 0x406   : > { %7996 = vset.pattern.permute.xlu2 %v17698_v6  ;;  %v17972_v6 = vmov 5  }
 0x407   : > { %4877 = vperm.xlu2 %7996, %v13065_v34  }
 0x409   : > { %v3638_v27 = vpop.f32.mrf.mxu2  ;;  %v13628_v20 = vpop.permute.xlu2 %4310 }
 0x40b   : > { %v3651_v38 = vpop.f32.mrf.mxu3 }
 0x40c   : > { %v13630_v51 = vpop.permute.xlu1 %4993 }
 0x40d   : > { %17969 = vst [vmem:[#allocation111_spill] sm:$0xff] %v13630_v51 }
 0x40f   : > { %7998 = vset.pattern.permute.xlu2 %v17970_v48  ;;  %v13642_v48 = vld [vmem:[#allocation3] sm:$0xff] }
 0x410   : > { %4909 = vperm.xlu2 %7998, %v12973_v59   ;;  %4814 = vst.msk [vmem:[#allocation4 + $0x10] sm:$0xff] %vm16127_vm7, %v13642_v48  ;;  %vm3801_vm7 = vcmask 1043472  }
 0x411   : > { %v13634_v27 = vpop.permute.xlu2 %4346  ;;  %vm3803_vm1 = vmor %vm3802_vm6, %vm3801_vm7  ;;  %vm3777_vm6 = vcmask 27648   ;;  %vm17997_vm7 = vcmask 1039360  }
 0x412   : > { %3778 = vst.msk [vmem:[#allocation3 + $0x10] sm:$0xf] %vm3777_vm6, %v13642_v48  ;;  %vm17998_vm6 = vmmov %vm17997_vm7 }
 0x414   : > { %v3662_v24 = vpop.f32.mrf.mxu0  ;;  %v13636_v61 = vpop.permute.xlu1 %5040 }
 0x415   : > { %17971 = vst [vmem:[#allocation112_spill] sm:$0xff] %v13636_v61  ;;  %v17975_v61 = vld [vmem:[#allocation109_spill] sm:$0xff] }
 0x416   : > { %v3675_v23 = vpop.f32.mrf.mxu1 }
 0x418   : > { %8000 = vset.pattern.permute.xlu2 %v17972_v6  ;;  %v3663_v6 = vadd.f32 %v3662_v24, %v17975_v61  ;;  %v3650_v61 = vadd.f32 %v3649_v30, %v3637_v13 }
 0x419   : > { %4927 = vperm.xlu2 %8000, %v12973_v59   ;;  %v13640_v22 = vpop.permute.xlu2 %4382 }
 0x41a   : > { %v3676_v59 = vadd.f32 %v3675_v23, %v3663_v6 }
 0x41c   : > { %v3664_v45 = vpop.f32.mrf.mxu0 }
 0x41d   : > { %v17973_v45 = vmov 6  }
 0x41e   : > { %v3677_v38 = vpop.f32.mrf.mxu1 }
 0x41f   : > { %v13647_v38 = vpop.permute.xlu1 %5087 }
 0x420   : > { %17974 = vst [vmem:[#allocation114_spill] sm:$0xff] %v13647_v38 }
 0x421   : > { %v3688_v58 = vpop.f32.mrf.mxu2  ;;  %8002 = vset.pattern.permute.xlu2 %v17973_v45 }
 0x422   : > { %4949 = vperm.xlu2 %8002, %v13065_v34   ;;  %v13651_v29 = vpop.permute.xlu2 %4421 }
 0x423   : > { %v3701_v14 = vpop.f32.mrf.mxu3 }
 0x427   : > { %v13655_v53 = vpop.permute.xlu1 %5134 }
 0x428   : > { %17977 = vst [vmem:[#allocation116_spill] sm:$0xff] %v13655_v53 }
 0x429   : > { %v3690_v33 = vpop.f32.mrf.mxu2 }
 0x42a   : > { %v3689_v33 = vadd.f32 %v3688_v58, %v3676_v59 }
 0x42b   : > { %v3703_v51 = vpop.f32.mrf.mxu3  ;;  %v13657_v41 = vpop.permute.xlu2 %4457 }
 0x42c   : > { %v17976_v51 = vmov 7   ;;  %v3702_v31 = vadd.f32 %v3701_v14, %v3689_v33 }
 0x42d   : > { %8004 = vset.pattern.permute.xlu2 %v17976_v51 }
 0x42e   : > { %4967 = vperm.xlu2 %8004, %v13065_v34   ;;  %v3765_v34 = vadd.f32 %v13443_v19, %v3650_v61 }
 0x42f   : > { %v13660_v59 = vpop.permute.xlu1 %5181 }
 0x430   : > { %17978 = vst [vmem:[#allocation117_spill] sm:$0xff] %v13660_v59 }
 0x434   : > { %v3714_v43 = vpop.f32.mrf.mxu0  ;;  %v13664_v26 = vpop.permute.xlu2 %4493 }
 0x435   : > { %v3715_v36 = vadd.f32 %v3714_v43, %v3702_v31  ;;  %v3769_v31 = vmul.f32 0.2, %v3765_v34 }
 0x436   : > { %v3727_v5 = vpop.f32.mrf.mxu1  ;;  %8015 = vset.pattern.permute.xlu2 %v17973_v45 }
 0x437   : > { %v3728_v24 = vadd.f32 %v3727_v5, %v3715_v36  ;;  %v3773_v36 = vmax.f32 %v3765_v34, %v3769_v31 }
 0x43c   : > { %v3716_v38 = vpop.f32.mrf.mxu0 }
 0x43e   : > { %v3729_v50 = vpop.f32.mrf.mxu1 }
 0x441   : > { %v3740_v6 = vpop.f32.mrf.mxu2 }
 0x442   : > { %v3741_v23 = vadd.f32 %v3740_v6, %v3728_v24 }
 0x443   : > { %v3753_v58 = vpop.f32.mrf.mxu3 }
 0x444   : > { %v3754_v55 = vadd.f32 %v3753_v58, %v3741_v23 }
 0x446   : > { %v3766_v14 = vadd.f32 %v13443_v19, %v3754_v55  ;;  %v13675_v55 = vpop.permute.xlu2 %4529 }
 0x448   : > { %v3770_v43 = vmul.f32 0.2, %v3766_v14  ;;  %v13666_v30 = vpop.permute.xlu1 %3788 }
 0x449   : > { %v3742_v25 = vpop.f32.mrf.mxu2  ;;  %v16128_v38 = vrot.slane %v13666_v30, 4 }
 0x44a   : > { %v3774_v50 = vmax.f32 %v3766_v14, %v3770_v43 }
 0x44b   : > { %v3755_v13 = vpop.f32.mrf.mxu3  ;;  %v3795_v19 = vsel %vm17980_vm4, %v16128_v38, %v13666_v30 }
 0x44c   : > { %v3784_v5 = vrot.slane %v3774_v50, 4  ;;  %3804 = vst.msk [vmem:[#allocation3] sm:$0xff] %vm3803_vm1, %v3795_v19  ;;  %vm3806_vm1 = vcmask 11264  }
 0x44e   : > { %v3787_v33 = vsel %vm17979_vm5, %v3773_v36, %v3784_v5  ;;  %v13677_v58 = vpop.permute.xlu2 %4803 }
 0x44f   : > { %3790 = vrot.lane.b32.xlu2 %v3787_v33, %s8330_s19  ;;  %17981 = vst [vmem:[#allocation119_spill] sm:$0xff] %v13677_v58 }
 0x453   : > { %v3910_v61 = vld [vmem:[#allocation3] sm:$0xff] }
 0x454   : > { %v3974_v24 = vperm.slane %v3910_v61, 1  ;;  %v3924_v6 = vperm.slane %v3910_v61, 4  ;;  %v3923_v23 = vperm.slane %v3910_v61, 0  ;;  %v4025_v43 = vperm.slane %v3910_v61, 2 }
 0x455   : > { %v3975_v36 = vperm.slane %v3910_v61, 5  ;;  %v4026_v38 = vperm.slane %v3910_v61, 6 }
 0x456   : > { %v13679_v34 = vperm.slane %v3974_v24, 1  ;;  %v13681_v14 = vperm.slane %v3924_v6, 0  ;;  %v13683_v31 = vperm.slane %v3923_v23, 0  ;;  %v13694_v5 = vperm.slane %v4025_v43, 2  ;;  %v13698_v19 = vpop.permute.xlu2 %4836 }
 0x457   : > { %v13696_v33 = vperm.slane %v3975_v36, 1  ;;  %17982 = vst [vmem:[#allocation120_spill] sm:$0xff] %v13698_v19  ;;  %v4076_v23 = vperm.slane %v3910_v61, 3  ;;  %v13708_v43 = vperm.slane %v4026_v38, 2  ;;  %v4077_v36 = vperm.slane %v3910_v61, 7 }
 0x458   : > { %v3989_v25 = vmul.f32 %v13679_v34, %v13435_v15  ;;  %v3939_v50 = vmul.f32 %v13681_v14, %v13465_v10  ;;  %v3938_v13 = vmul.f32 %v13683_v31, %v13465_v10  ;;  %v4040_v24 = vmul.f32 %v13694_v5, %v13474_v4 }
 0x459   : > { %v3990_v6 = vmul.f32 %v13696_v33, %v13435_v15  ;;  %v4130_v38 = vmul.f32 %v13545_v16, %v13683_v31  ;;  %v3855_v59 = vmul.f32 %v13696_v33, %v13422_v62  ;;  %v4203_v35 = vmul.f32 %v13602_v2, %v13708_v43 }
 0x45a   : > { %3999 = vrot.lane.b32.xlu0 %v3989_v25, %s8319_s30  ;;  %3950 = vrot.lane.b32.xlu1 %v3939_v50, %s8319_s30  ;;  %v13706_v25 = vperm.slane %v4076_v23, 3  ;;  %v13724_v23 = vpop.permute.xlu0 %3813 }
 0x45b   : > { %3948 = vrot.lane.b32.xlu2 %v3938_v13, %s8319_s30  ;;  %v4041_v13 = vmul.f32 %v13708_v43, %v13474_v4 }
 0x45c   : > { %v4091_v50 = vmul.f32 %v13706_v25, %v13511_v42  ;;  %v4238_v32 = vmul.f32 %v13613_v17, %v13706_v25 }
 0x45e   : > { %v13714_v19 = vpop.permute.xlu2 %4859 }
 0x45f   : > { %17983 = vst [vmem:[#allocation121_spill] sm:$0xff] %v13714_v19 }
 0x462   : > { %4050 = vrot.lane.b32.xlu0 %v4040_v24, %s8319_s30  ;;  %4001 = vrot.lane.b32.xlu1 %v3990_v6, %s8319_s30  ;;  %v13718_v24 = vperm.slane %v4077_v36, 3  ;;  %v13734_v36 = vpop.permute.xlu0 %5083 }
 0x463   : > { %17985 = vst [vmem:[#allocation140_spill] sm:$0xff] %v13734_v36  ;;  %v3879_v36 = vmul.f32 %v13708_v43, %v13391_v44 }
 0x464   : > { %v4092_v6 = vmul.f32 %v13718_v24, %v13511_v42 }
 0x466   : > { %v13728_v61 = vpop.permute.xlu2 %4877 }
 0x467   : > { %17984 = vst [vmem:[#allocation123_spill] sm:$0xff] %v13728_v61  ;;  %v3831_v61 = vmul.f32 %v13681_v14, %v13724_v23 }
 0x469   : > { %v3859_v48 = vadd.f32 %v3855_v59, %v3831_v61  ;;  %v4239_v61 = vmul.f32 %v13613_v17, %v13718_v24 }
 0x46a   : > { %4101 = vrot.lane.b32.xlu0 %v4091_v50, %s8319_s30  ;;  %4052 = vrot.lane.b32.xlu1 %v4041_v13, %s8319_s30  ;;  %v4131_v50 = vmul.f32 %v13545_v16, %v13681_v14  ;;  %v4166_v13 = vmul.f32 %v13578_v0, %v13679_v34 }
 0x46e   : > { %v13738_v19 = vpop.permute.xlu2 %4909 }
 0x46f   : > { %17986 = vst [vmem:[#allocation125_spill] sm:$0xff] %v13738_v19  ;;  %v13751_v19 = vpop.permute.xlu0 %3887 }
 0x470   : > { %v3902_v12 = vmul.f32 %v13706_v25, %v13751_v19 }
 0x472   : > { %4103 = vrot.lane.b32.xlu1 %v4092_v6, %s8319_s30  ;;  %4140 = vrot.lane.b32.xlu0 %v4130_v38, %s8318_s29  ;;  %v4167_v6 = vmul.f32 %v13578_v0, %v13696_v33  ;;  %v4202_v38 = vmul.f32 %v13602_v2, %v13694_v5 }
 0x476   : > { %v13759_v53 = vpop.permute.xlu2 %4927 }
 0x477   : > { %17987 = vst [vmem:[#allocation128_spill] sm:$0xff] %v13759_v53 }
 0x47a   : > { %4142 = vrot.lane.b32.xlu1 %v4131_v50, %s8318_s29  ;;  %4176 = vrot.lane.b32.xlu0 %v4166_v13, %s8318_s29  ;;  %v3830_v50 = vmul.f32 %v13683_v31, %v13724_v23  ;;  %v3854_v13 = vmul.f32 %v13679_v34, %v13422_v62 }
 0x482   : > { %4178 = vrot.lane.b32.xlu1 %v4167_v6, %s8318_s29  ;;  %4212 = vrot.lane.b32.xlu0 %v4202_v38, %s8318_s29  ;;  %v3858_v6 = vadd.f32 %v3854_v13, %v3830_v50  ;;  %v3878_v38 = vmul.f32 %v13694_v5, %v13391_v44  ;;  %v3883_v50 = vadd.f32 %v3879_v36, %v3859_v48 }
 0x483   : > { %v3903_v13 = vmul.f32 %v13718_v24, %v13751_v19  ;;  %v4349_v36 = vmul.f32 %v13634_v27, %v13694_v5 }
 0x484   : > { %v3882_v58 = vadd.f32 %v3878_v38, %v3858_v6  ;;  %v4277_v6 = vmul.f32 %v13619_v40, %v13683_v31  ;;  %v13781_v38 = vpop.permute.xlu2 %4949 }
 0x485   : > { %v13775_v59 = vadd.f32 %v3903_v13, %v3883_v50  ;;  %17988 = vst [vmem:[#allocation142_spill] sm:$0xff] %v13781_v38  ;;  %v17990_v13 = vrot.slane %v13666_v30, 4 }
 0x486   : > { %v13771_v54 = vadd.f32 %v3902_v12, %v3882_v58  ;;  %v4278_v12 = vmul.f32 %v13619_v40, %v13681_v14  ;;  %v4314_v58 = vmul.f32 %v13628_v20, %v13696_v33 }
 0x48a   : > { %4214 = vrot.lane.b32.xlu1 %v4203_v35, %s8318_s29  ;;  %4248 = vrot.lane.b32.xlu0 %v4238_v32, %s8318_s29  ;;  %v4313_v35 = vmul.f32 %v13628_v20, %v13679_v34 }
 0x48c   : > { %v13791_v32 = vpop.permute.xlu2 %4967 }
 0x48d   : > { %17989 = vst [vmem:[#allocation129_spill] sm:$0xff] %v13791_v32  ;;  %v4425_v32 = vmul.f32 %v13651_v29, %v13681_v14  ;;  %v4461_v14 = vmul.f32 %v13657_v41, %v13696_v33  ;;  %v4497_v33 = vmul.f32 %v13664_v26, %v13708_v43 }
 0x492   : > { %4250 = vrot.lane.b32.xlu1 %v4239_v61, %s8318_s29  ;;  %4287 = vrot.lane.b32.xlu0 %v4277_v6, %s8317_s23 }
 0x49a   : > { %4289 = vrot.lane.b32.xlu1 %v4278_v12, %s8317_s23  ;;  %4323 = vrot.lane.b32.xlu0 %v4313_v35, %s8317_s23  ;;  %v4350_v12 = vmul.f32 %v13634_v27, %v13708_v43  ;;  %v4385_v35 = vmul.f32 %v13640_v22, %v13706_v25  ;;  %v4533_v43 = vmul.f32 %v13675_v55, %v13718_v24 }
 0x4a2   : > { %4325 = vrot.lane.b32.xlu1 %v4314_v58, %s8317_s23  ;;  %4359 = vrot.lane.b32.xlu0 %v4349_v36, %s8317_s23  ;;  %v13814_v36 = vpop.permute.xlu0 %4891 }
 0x4a3   : > { %17991 = vst [vmem:[#allocation130_spill] sm:$0xff] %v13814_v36 }
 0x4a9   : > { %v3791_v48 = vpop.permute.xlu2 %3790 }
 0x4aa   : > { %v3793_v50 = vrot.slane %v3791_v48, 4  ;;  %4361 = vrot.lane.b32.xlu1 %v4350_v12, %s8317_s23  ;;  %4395 = vrot.lane.b32.xlu0 %v4385_v35, %s8317_s23 }
 0x4ac   : > { %v3796_v61 = vsel %vm17979_vm5, %v17990_v13, %v3793_v50  ;;  %3807 = vst.msk [vmem:[#allocation3 + $0x10] sm:$0xf] %vm3806_vm1, %v3793_v50  ;;  %v4424_v50 = vmul.f32 %v13651_v29, %v13683_v31  ;;  %v4460_v31 = vmul.f32 %v13657_v41, %v13679_v34  ;;  %v4496_v34 = vmul.f32 %v13664_v26, %v13694_v5  ;;  %vm17999_vm1 = vmmov %vm17998_vm6 }
 0x4ad   : > { %v13803_v6 = vsel %vm17980_vm4, %v3796_v61, %v3791_v48  ;;  %v4386_v48 = vmul.f32 %v13640_v22, %v13718_v24  ;;  %v4532_v5 = vmul.f32 %v13675_v55, %v13706_v25  ;;  %vm18000_vm5 = vmmov %vm17999_vm1 }
 0x4ae   : > { %v3925_v12 = vperm.slane %v13803_v6, 0  ;;  %vm18001_vm4 = vmmov %vm17999_vm1 }
 0x4b0   : > { %v13828_v35 = vperm.slane %v3925_v12, 0 }
 0x4b2   : > { %4397 = vrot.lane.b32.xlu1 %v4386_v48, %s8317_s23  ;;  %4434 = vrot.lane.b32.xlu0 %v4424_v50, %s8320_s10  ;;  %v3940_v48 = vmul.f32 %v13828_v35, %v13465_v10  ;;  %v3976_v50 = vperm.slane %v13803_v6, 1 }
 0x4b3   : > { %v13811_v58 = vld [vmem:[#allocation3 + $0x10] sm:$0xf] }
 0x4b4   : > { %v4029_v30 = vperm.slane %v13811_v58, 2 }
 0x4b6   : > { %v13820_v13 = vperm.slane %v4029_v30, 2  ;;  %v13834_v30 = vpop.permute.xlu0 %5130 }
 0x4b7   : > { %17992 = vst [vmem:[#allocation132_spill] sm:$0xff] %v13834_v30  ;;  %v4028_v30 = vperm.slane %v13803_v6, 6 }
 0x4b8   : > { %v4500_v61 = vmul.f32 %v13664_v26, %v13820_v13 }
 0x4ba   : > { %4514 = vrot.lane.b32.xlu2 %v4500_v61, %s8320_s10  ;;  %4436 = vrot.lane.b32.xlu1 %v4425_v32, %s8320_s10  ;;  %v13842_v61 = vperm.slane %v3976_v50, 1  ;;  %v3926_v50 = vperm.slane %v13803_v6, 4 }
 0x4bb   : > { %4470 = vrot.lane.b32.xlu0 %v4460_v31, %s8320_s10  ;;  %v4027_v31 = vperm.slane %v13803_v6, 2 }
 0x4bc   : > { %v3991_v12 = vmul.f32 %v13842_v61, %v13435_v15  ;;  %v13872_v38 = vperm.slane %v3926_v50, 0 }
 0x4be   : > { %v13850_v32 = vpop.permute.xlu0 %4931  ;;  %v3833_v8 = vmul.f32 %v13872_v38, %v13724_v23 }
 0x4bf   : > { %17993 = vst [vmem:[#allocation133_spill] sm:$0xff] %v13850_v32  ;;  %v3977_v32 = vperm.slane %v13803_v6, 5 }
 0x4c1   : > { %v13893_v24 = vperm.slane %v3977_v32, 1  ;;  %v3832_v32 = vmul.f32 %v13828_v35, %v13724_v23  ;;  %v4168_v23 = vmul.f32 %v13578_v0, %v13842_v61 }
 0x4c2   : > { %3952 = vrot.lane.b32.xlu2 %v3940_v48, %s8319_s30  ;;  %4472 = vrot.lane.b32.xlu1 %v4461_v14, %s8320_s10  ;;  %v13856_v48 = vperm.slane %v4027_v31, 2 }
 0x4c3   : > { %4506 = vrot.lane.b32.xlu0 %v4496_v34, %s8320_s10  ;;  %v4078_v34 = vperm.slane %v13803_v6, 3 }
 0x4c4   : > { %v4042_v14 = vmul.f32 %v13856_v48, %v13474_v4 }
 0x4c5   : > { %v13875_v25 = vperm.slane %v4078_v34, 3 }
 0x4c7   : > { %v4093_v50 = vmul.f32 %v13875_v25, %v13511_v42  ;;  %v3904_v46 = vmul.f32 %v13875_v25, %v13751_v19 }
 0x4ca   : > { %4003 = vrot.lane.b32.xlu2 %v3991_v12, %s8319_s30  ;;  %4508 = vrot.lane.b32.xlu1 %v4497_v33, %s8320_s10  ;;  %v3941_v33 = vmul.f32 %v13872_v38, %v13465_v10 }
 0x4cb   : > { %4542 = vrot.lane.b32.xlu0 %v4532_v5, %s8320_s10  ;;  %v3927_v5 = vperm.slane %v13811_v58, 0 }
 0x4cc   : > { %v13868_v12 = vpop.permute.xlu0 %3999  ;;  %v13870_v31 = vpop.permute.xlu1 %3950 }
 0x4cd   : > { %v13891_v53 = vperm.slane %v3927_v5, 0  ;;  %v4079_v5 = vperm.slane %v13803_v6, 7 }
 0x4cf   : > { %v3942_v36 = vmul.f32 %v13891_v53, %v13465_v10  ;;  %v4132_v10 = vmul.f32 %v13545_v16, %v13828_v35  ;;  %v13922_v52 = vperm.slane %v4079_v5, 3 }
 0x4d1   : > { %v4388_v28 = vmul.f32 %v13640_v22, %v13922_v52  ;;  %v4535_v7 = vmul.f32 %v13675_v55, %v13922_v52 }
 0x4d2   : > { %4054 = vrot.lane.b32.xlu2 %v4042_v14, %s8319_s30  ;;  %4544 = vrot.lane.b32.xlu1 %v4533_v43, %s8320_s10  ;;  %v3992_v43 = vmul.f32 %v13893_v24, %v13435_v15 }
 0x4d3   : > { %3954 = vrot.lane.b32.xlu0 %v3941_v33, %s8319_s30  ;;  %v3978_v33 = vperm.slane %v13811_v58, 1 }
 0x4d4   : > { %v13887_v14 = vpop.permute.xlu0 %4050  ;;  %v13889_v34 = vpop.permute.xlu1 %4001 }
 0x4d5   : > { %v13915_v37 = vperm.slane %v3978_v33, 1  ;;  %v3857_v33 = vmul.f32 %v13893_v24, %v13422_v62 }
 0x4d7   : > { %v3861_v5 = vadd.f32 %v3857_v33, %v3833_v8  ;;  %v4080_v8 = vperm.slane %v13811_v58, 3  ;;  %v4133_v58 = vmul.f32 %v13545_v16, %v13872_v38  ;;  %v4464_v39 = vmul.f32 %v13657_v41, %v13915_v37 }
 0x4da   : > { %4105 = vrot.lane.b32.xlu2 %v4093_v50, %s8319_s30  ;;  %3956 = vrot.lane.b32.xlu1 %v3942_v36, %s8319_s30  ;;  %v3856_v50 = vmul.f32 %v13842_v61, %v13422_v62  ;;  %v13917_v36 = vperm.slane %v4028_v30, 2  ;;  %v3993_v30 = vmul.f32 %v13915_v37, %v13435_v15  ;;  %v3905_v15 = vmul.f32 %v13922_v52, %v13751_v19 }
 0x4db   : > { %4005 = vrot.lane.b32.xlu0 %v3992_v43, %s8319_s30  ;;  %v3880_v43 = vmul.f32 %v13856_v48, %v13391_v44  ;;  %v4204_v19 = vmul.f32 %v13602_v2, %v13856_v48 }
 0x4dc   : > { %v13911_v57 = vpop.permute.xlu0 %4101  ;;  %v13913_v49 = vpop.permute.xlu1 %4052  ;;  %v3860_v6 = vadd.f32 %v3856_v50, %v3832_v32  ;;  %v4043_v32 = vmul.f32 %v13917_v36, %v13474_v4 }
 0x4de   : > { %v3884_v21 = vadd.f32 %v3880_v43, %v3860_v6 }
 0x4e0   : > { %v13934_v50 = vadd.f32 %v3904_v46, %v3884_v21  ;;  %v4044_v21 = vmul.f32 %v13820_v13, %v13474_v4 }
 0x4e2   : > { %4144 = vrot.lane.b32.xlu2 %v4132_v10, %s8318_s29  ;;  %v3881_v10 = vmul.f32 %v13917_v36, %v13391_v44  ;;  %4007 = vrot.lane.b32.xlu1 %v3993_v30, %s8319_s30  ;;  %v4094_v44 = vmul.f32 %v13922_v52, %v13511_v42 }
 0x4e3   : > { %4056 = vrot.lane.b32.xlu0 %v4043_v32, %s8319_s30  ;;  %v13964_v32 = vperm.slane %v4080_v8, 3  ;;  %v4170_v8 = vmul.f32 %v13578_v0, %v13915_v37 }
 0x4e4   : > { %v3885_v62 = vadd.f32 %v3881_v10, %v3861_v5  ;;  %v13944_v6 = vpop.permute.xlu1 %4103  ;;  %v13946_v43 = vpop.permute.xlu0 %4140  ;;  %v4240_v5 = vmul.f32 %v13613_v17, %v13875_v25 }
 0x4e5   : > { %v4095_v4 = vmul.f32 %v13964_v32, %v13511_v42  ;;  %v4169_v42 = vmul.f32 %v13578_v0, %v13893_v24  ;;  %v4241_v0 = vmul.f32 %v13613_v17, %v13922_v52 }
 0x4e6   : > { %v13949_v46 = vadd.f32 %v3905_v15, %v3885_v62  ;;  %v4134_v62 = vmul.f32 %v13545_v16, %v13891_v53  ;;  %v4279_v15 = vmul.f32 %v13619_v40, %v13828_v35  ;;  %v4205_v16 = vmul.f32 %v13602_v2, %v13917_v36 }
 0x4ea   : > { %4180 = vrot.lane.b32.xlu2 %v4168_v23, %s8318_s29  ;;  %4058 = vrot.lane.b32.xlu1 %v4044_v21, %s8319_s30 }
 0x4eb   : > { %4107 = vrot.lane.b32.xlu0 %v4094_v44, %s8319_s30 }
 0x4ec   : > { %v13960_v33 = vpop.permute.xlu1 %4142  ;;  %v13962_v30 = vpop.permute.xlu0 %4176 }
 0x4f2   : > { %4216 = vrot.lane.b32.xlu2 %v4204_v19, %s8318_s29  ;;  %4109 = vrot.lane.b32.xlu1 %v4095_v4, %s8319_s30  ;;  %v4315_v19 = vmul.f32 %v13628_v20, %v13842_v61 }
 0x4f3   : > { %4146 = vrot.lane.b32.xlu0 %v4133_v58, %s8318_s29 }
 0x4f4   : > { %v13975_v10 = vpop.permute.xlu1 %4178  ;;  %v13977_v23 = vpop.permute.xlu0 %4212 }
 0x4fa   : > { %4252 = vrot.lane.b32.xlu2 %v4240_v5, %s8318_s29  ;;  %4148 = vrot.lane.b32.xlu1 %v4134_v62, %s8318_s29  ;;  %v4206_v5 = vmul.f32 %v13602_v2, %v13820_v13  ;;  %v4351_v62 = vmul.f32 %v13634_v27, %v13856_v48  ;;  %v4280_v2 = vmul.f32 %v13619_v40, %v13872_v38 }
 0x4fb   : > { %4182 = vrot.lane.b32.xlu0 %v4169_v42, %s8318_s29 }
 0x4fc   : > { %v13988_v21 = vpop.permute.xlu1 %4214  ;;  %v13990_v44 = vpop.permute.xlu0 %4248 }
 0x502   : > { %4291 = vrot.lane.b32.xlu2 %v4279_v15, %s8317_s23  ;;  %4184 = vrot.lane.b32.xlu1 %v4170_v8, %s8318_s29  ;;  %v4242_v8 = vmul.f32 %v13613_v17, %v13964_v32  ;;  %v4281_v17 = vmul.f32 %v13619_v40, %v13891_v53  ;;  %v4317_v40 = vmul.f32 %v13628_v20, %v13915_v37 }
 0x503   : > { %4218 = vrot.lane.b32.xlu0 %v4205_v16, %s8318_s29  ;;  %v4387_v16 = vmul.f32 %v13640_v22, %v13875_v25 }
 0x504   : > { %v14001_v4 = vpop.permute.xlu1 %4250  ;;  %v14003_v58 = vpop.permute.xlu0 %4287 }
 0x50a   : > { %4327 = vrot.lane.b32.xlu2 %v4315_v19, %s8317_s23  ;;  %4220 = vrot.lane.b32.xlu1 %v4206_v5, %s8318_s29 }
 0x50b   : > { %4254 = vrot.lane.b32.xlu0 %v4241_v0, %s8318_s29  ;;  %v14031_v0 = vpop.permute.xlu2 %3948 }
 0x50c   : > { %v14014_v42 = vpop.permute.xlu1 %4289  ;;  %v14016_v15 = vpop.permute.xlu0 %4323 }
 0x512   : > { %4363 = vrot.lane.b32.xlu2 %v4351_v62, %s8317_s23  ;;  %4256 = vrot.lane.b32.xlu1 %v4242_v8, %s8318_s29  ;;  %v4316_v62 = vmul.f32 %v13628_v20, %v13893_v24  ;;  %v4426_v8 = vmul.f32 %v13651_v29, %v13828_v35  ;;  %v4462_v35 = vmul.f32 %v13657_v41, %v13842_v61 }
 0x513   : > { %4293 = vrot.lane.b32.xlu0 %v4280_v2, %s8317_s23  ;;  %v4353_v20 = vmul.f32 %v13634_v27, %v13820_v13  ;;  %v4534_v61 = vmul.f32 %v13675_v55, %v13875_v25 }
 0x514   : > { %v14027_v19 = vpop.permute.xlu1 %4325  ;;  %v14029_v5 = vpop.permute.xlu0 %4359 }
 0x515   : > { %v14046_v9 = vpop.permute.xlu2 %4514 }
 0x516   : > { %17994 = vst [vmem:[#allocation134_spill] sm:$0xff] %v14046_v9 }
 0x51a   : > { %4399 = vrot.lane.b32.xlu2 %v4387_v16, %s8317_s23  ;;  %4295 = vrot.lane.b32.xlu1 %v4281_v17, %s8317_s23  ;;  %v4352_v16 = vmul.f32 %v13634_v27, %v13917_v36  ;;  %v4427_v27 = vmul.f32 %v13651_v29, %v13872_v38  ;;  %v4463_v38 = vmul.f32 %v13657_v41, %v13893_v24 }
 0x51b   : > { %4329 = vrot.lane.b32.xlu0 %v4316_v62, %s8317_s23 }
 0x51c   : > { %v14042_v2 = vpop.permute.xlu1 %4361  ;;  %v14044_v63 = vpop.permute.xlu0 %4395 }
 0x522   : > { %4438 = vrot.lane.b32.xlu2 %v4426_v8, %s8320_s10  ;;  %4331 = vrot.lane.b32.xlu1 %v4317_v40, %s8317_s23  ;;  %v14062_v8 = vpop.permute.xlu2 %3952 }
 0x523   : > { %4365 = vrot.lane.b32.xlu0 %v4352_v16, %s8317_s23 }
 0x524   : > { %v14057_v17 = vpop.permute.xlu1 %4397  ;;  %v14059_v62 = vpop.permute.xlu0 %4434 }
 0x52a   : > { %4474 = vrot.lane.b32.xlu2 %v4462_v35, %s8320_s10  ;;  %4367 = vrot.lane.b32.xlu1 %v4353_v20, %s8317_s23  ;;  %v4389_v35 = vmul.f32 %v13640_v22, %v13964_v32  ;;  %v14081_v13 = vpop.permute.xlu2 %4003  ;;  %v14089_v20 = vld [vmem:[#allocation13 + $0x18] sm:$0xff]  ;;  %v4428_v22 = vmul.f32 %v13651_v29, %v13891_v53  ;;  %v4498_v53 = vmul.f32 %v13664_v26, %v13856_v48 }
 0x52b   : > { %4401 = vrot.lane.b32.xlu0 %v4388_v28, %s8317_s23  ;;  %v4499_v48 = vmul.f32 %v13664_v26, %v13917_v36 }
 0x52c   : > { %v14072_v40 = vpop.permute.xlu1 %4436 }
 0x52d   : > { %v14074_v16 = vpop.permute.xlu0 %4470 }
 0x532   : > { %4546 = vrot.lane.b32.xlu2 %v4534_v61, %s8320_s10  ;;  %4403 = vrot.lane.b32.xlu1 %v4389_v35, %s8317_s23  ;;  %v14098_v61 = vpop.permute.xlu2 %4054 }
 0x533   : > { %4440 = vrot.lane.b32.xlu0 %v4427_v27, %s8320_s10 }
 0x534   : > { %v14085_v28 = vpop.permute.xlu1 %4472 }
 0x535   : > { %v14087_v25 = vpop.permute.xlu0 %4506 }
 0x53a   : > { %5275 = vperm.xlu2 %8015, %v14089_v20   ;;  %4442 = vrot.lane.b32.xlu1 %v4428_v22, %s8320_s10  ;;  %v14113_v22 = vpop.permute.xlu2 %4105 }
 0x53b   : > { %4476 = vrot.lane.b32.xlu0 %v4463_v38, %s8320_s10  ;;  %v4536_v38 = vmul.f32 %v13675_v55, %v13964_v32 }
 0x53c   : > { %v14100_v35 = vpop.permute.xlu1 %4508 }
 0x53d   : > { %v14102_v27 = vpop.permute.xlu0 %4542 }
 0x53e   : > { %17995 = vst [vmem:[#allocation136_spill] sm:$0xff] %v14102_v27 }
 0x542   : > { %8019 = vset.pattern.permute.xlu2 %v17653_v18  ;;  %4478 = vrot.lane.b32.xlu1 %v4464_v39, %s8320_s10  ;;  %v14121_v39 = vpop.permute.xlu2 %4144 }
 0x543   : > { %4510 = vrot.lane.b32.xlu0 %v4498_v53, %s8320_s10  ;;  %v14126_v53 = vld [vmem:[#allocation13 + $0x10] sm:$0xff] }
 0x544   : > { %v14111_v29 = vpop.permute.xlu1 %4544 }
 0x545   : > { %17996 = vst [vmem:[#allocation138_spill] sm:$0xff] %v14111_v29  ;;  %v3955_v24 = vpop.permute.xlu0 %3954 }
 0x54a   : > { %4550 = vrot.lane.b32.xlu1 %v4536_v38, %s8320_s10  ;;  %v14129_v52 = vpop.permute.xlu2 %4180 }
 0x54b   : > { %4548 = vrot.lane.b32.xlu0 %v4535_v7, %s8320_s10  ;;  %v3960_v7 = vsel %vm17997_vm7, %v14062_v8, %v3955_v24  ;;  %vm18002_vm7 = vmmov %vm17999_vm1 }
 0x54c   : > { %v3957_v41 = vpop.permute.xlu1 %3956  ;;  %v3968_v38 = vadd.f32 %v3960_v7, %v13934_v50 }
 0x54d   : > { %v4006_v37 = vpop.permute.xlu0 %4005  ;;  %v3961_v60 = vsel %vm18001_vm4, %v3955_v24, %v3957_v41 }
 0x54e   : > { %v4011_v36 = vsel %vm17998_vm6, %v14081_v13, %v4006_v37  ;;  %vm18003_vm6 = vcmask 1031168  }
 0x54f   : > { %v4019_v56 = vadd.f32 %v4011_v36, %v3968_v38  ;;  %v3969_v38 = vadd.f32 %v3961_v60, %v13949_v46  ;;  %vm18005_vm4 = vmmov %vm18003_vm6 }
 0x552   : > { %4512 = vrot.lane.b32.xlu1 %v4499_v48, %s8320_s10  ;;  %v14144_v3 = vpop.permute.xlu2 %4216 }
 0x553   : > { %5224 = vperm.xlu0 %8010, %v14126_v53  }
 0x554   : > { %v4008_v32 = vpop.permute.xlu1 %4007 }
 0x555   : > { %v4057_v1 = vpop.permute.xlu0 %4056  ;;  %v4012_v36 = vsel %vm18002_vm7, %v4006_v37, %v4008_v32  ;;  %vm18006_vm7 = vmmov %vm18005_vm4 }
 0x556   : > { %v4062_v48 = vsel %vm17999_vm1, %v14098_v61, %v4057_v1  ;;  %v4020_v24 = vadd.f32 %v4012_v36, %v3969_v38 }
 0x557   : > { %v4070_v11 = vadd.f32 %v4062_v48, %v4019_v56 }
 0x55a   : > { %5228 = vperm.xlu1 %8013, %v14089_v20   ;;  %v14158_v37 = vpop.permute.xlu2 %4252 }
 0x55b   : > { %8016 = vset.pattern.permute.xlu0 %v17976_v51 }
 0x55c   : > { %5318 = vperm.xlu0 %8016, %v14126_v53   ;;  %v4059_v26 = vpop.permute.xlu1 %4058 }
 0x55d   : > { %v4108_v55 = vpop.permute.xlu0 %4107 }
 0x55e   : > { %v4113_v9 = vsel %vm18000_vm5, %v14113_v22, %v4108_v55  ;;  %vm18004_vm5 = vmmov %vm17999_vm1 }
 0x55f   : > { %v4121_v27 = vadd.f32 %v4113_v9, %v4070_v11 }
 0x562   : > { %8014 = vset.pattern.permute.xlu1 %v17973_v45  ;;  %v4063_v45 = vsel %vm17999_vm1, %v4057_v1, %v4059_v26  ;;  %vm18008_vm1 = vmmov %vm18005_vm4 }
 0x563   : > { %5271 = vperm.xlu1 %8014, %v14126_v53  }
 0x564   : > { %8017 = vset.pattern.permute.xlu0 %v17673_v47  ;;  %v4110_v50 = vpop.permute.xlu1 %4109  ;;  %v4071_v47 = vadd.f32 %v4063_v45, %v4020_v24 }
 0x565   : > { %v4147_v7 = vpop.permute.xlu0 %4146  ;;  %5036 = vperm.xlu0 %8017, %v14126_v53   ;;  %v4114_v41 = vsel %vm18004_vm5, %v4108_v55, %v4110_v50  ;;  %v14169_v50 = vpop.permute.xlu2 %4291  ;;  %vm18009_vm5 = vmmov %vm18008_vm1 }
 0x566   : > { %v4152_v56 = vsel %vm18003_vm6, %v14121_v39, %v4147_v7  ;;  %v4122_v11 = vadd.f32 %v4114_v41, %v4071_v47  ;;  %vm18007_vm6 = vmmov %vm18005_vm4 }
 0x567   : > { %v4160_v48 = vadd.f32 %v4152_v56, %v4121_v27 }
 0x56b   : > { %8018 = vset.pattern.permute.xlu1 %v17976_v51 }
 0x56c   : > { %v4149_v9 = vpop.permute.xlu1 %4148  ;;  %5322 = vperm.xlu1 %8018, %v14089_v20  }
 0x56d   : > { %v4183_v29 = vpop.permute.xlu0 %4182  ;;  %v4153_v32 = vsel %vm18005_vm4, %v4147_v7, %v4149_v9  ;;  %vm18010_vm4 = vcmask 1039360  }
 0x56e   : > { %v4188_v60 = vsel %vm18006_vm7, %v14129_v52, %v4183_v29  ;;  %v4161_v46 = vadd.f32 %v4153_v32, %v4122_v11  ;;  %vm18011_vm7 = vmmov %vm18010_vm4 }
 0x56f   : > { %v4196_v1 = vadd.f32 %v4188_v60, %v4160_v48  ;;  %v14176_v48 = vpop.permute.xlu2 %4327 }
 0x574   : > { %v4185_v27 = vpop.permute.xlu1 %4184  ;;  %8020 = vset.pattern.permute.xlu1 %v17653_v18 }
 0x575   : > { %v4219_v26 = vpop.permute.xlu0 %4218  ;;  %v4189_v45 = vsel %vm18007_vm6, %v4183_v29, %v4185_v27  ;;  %v3959_v27 = vsel %vm18011_vm7, %v13870_v31, %v14062_v8  ;;  %vm18012_vm6 = vmmov %vm18010_vm4 }
 0x576   : > { %v4224_v47 = vsel %vm18008_vm1, %v14144_v3, %v4219_v26  ;;  %v4197_v55 = vadd.f32 %v4189_v45, %v4161_v46  ;;  %vm18013_vm1 = vmmov %vm18010_vm4 }
 0x577   : > { %v14167_v20 = vadd.f32 %v4224_v47, %v4196_v1  ;;  %v14182_v41 = vpop.permute.xlu2 %4363  ;;  %v3958_v1 = vsel %vm18010_vm4, %v14031_v0, %v13870_v31  ;;  %v4010_v45 = vsel %vm18013_vm1, %v13889_v34, %v14081_v13  ;;  %vm18015_vm4 = vmmov %vm18013_vm1 }
 0x578   : > { %v3966_v47 = vadd.f32 %v3958_v1, %v13771_v54  ;;  %v4061_v31 = vsel %vm18015_vm4, %v13913_v49, %v14098_v61  ;;  %vm18016_vm7 = vmmov %vm18013_vm1 }
 0x579   : > { %v4111_v54 = vsel %vm18016_vm7, %v13911_v57, %v13944_v6 }
 0x57c   : > { %v4221_v7 = vpop.permute.xlu1 %4220 }
 0x57d   : > { %v14171_v36 = vpop.permute.xlu0 %4254  ;;  %v4225_v56 = vsel %vm18009_vm5, %v4219_v26, %v4221_v7  ;;  %v4009_v26 = vsel %vm18012_vm6, %v13868_v12, %v13889_v34  ;;  %vm18014_vm5 = vmmov %vm18013_vm1 }
 0x57e   : > { %v14174_v38 = vadd.f32 %v4225_v56, %v4197_v55  ;;  %v3967_v55 = vadd.f32 %v3959_v27, %v13775_v59  ;;  %v4060_v0 = vsel %vm18014_vm5, %v13887_v14, %v13913_v49  ;;  %v4017_v8 = vadd.f32 %v4009_v26, %v3966_v47  ;;  %vm18017_vm6 = vmmov %vm18013_vm1 }
 0x57f   : > { %v14192_v46 = vpop.permute.xlu2 %4399  ;;  %v4112_v59 = vsel %vm18017_vm6, %v13944_v6, %v14113_v22  ;;  %vm18018_vm1 = vcmask 1031168  }
 0x580   : > { %v4018_v7 = vadd.f32 %v4010_v45, %v3967_v55  ;;  %v4068_v34 = vadd.f32 %v4060_v0, %v4017_v8  ;;  %v4150_v49 = vsel %vm18018_vm1, %v13946_v43, %v13960_v33  ;;  %vm18019_vm5 = vmmov %vm18018_vm1 }
 0x581   : > { %v4151_v13 = vsel %vm18019_vm5, %v13960_v33, %v14121_v39  ;;  %vm18020_vm4 = vmmov %vm18018_vm1  ;;  %v4223_v33 = vsel %vm18018_vm1, %v13988_v21, %v14144_v3 }
 0x582   : > { %v4069_v14 = vadd.f32 %v4061_v31, %v4018_v7  ;;  %v4119_v1 = vadd.f32 %v4111_v54, %v4068_v34  ;;  %v4186_v57 = vsel %vm18020_vm4, %v13962_v30, %v13975_v10  ;;  %vm18021_vm7 = vmmov %vm18018_vm1 }
 0x583   : > { %v4187_v6 = vsel %vm18021_vm7, %v13975_v10, %v14129_v52  ;;  %vm18022_vm6 = vmmov %vm18018_vm1  ;;  %vm18025_vm7 = vcmask 1022976  }
 0x584   : > { %v14178_v24 = vpop.permute.xlu1 %4256  ;;  %v4120_v27 = vadd.f32 %v4112_v59, %v4069_v14  ;;  %v4158_v22 = vadd.f32 %v4150_v49, %v4119_v1  ;;  %v4222_v43 = vsel %vm18022_vm6, %v13977_v23, %v13988_v21  ;;  %vm18023_vm5 = vmmov %vm18018_vm1  ;;  %v4297_v3 = vsel %vm18025_vm7, %v14003_v58, %v14014_v42 }
 0x585   : > { %v14180_v29 = vpop.permute.xlu0 %4293  ;;  %v4258_v30 = vsel %vm18023_vm5, %v13990_v44, %v14001_v4  ;;  %vm18024_vm4 = vmmov %vm18018_vm1 }
 0x586   : > { %v4159_v26 = vadd.f32 %v4151_v13, %v4120_v27  ;;  %v4194_v39 = vadd.f32 %v4186_v57, %v4158_v22  ;;  %v4259_v10 = vsel %vm18024_vm4, %v14001_v4, %v14158_v37  ;;  %vm18026_vm6 = vmmov %vm18025_vm7 }
 0x587   : > { %v14230_v61 = vpop.permute.xlu2 %4438  ;;  %v4298_v21 = vsel %vm18026_vm6, %v14014_v42, %v14169_v50  ;;  %vm18027_vm1 = vmmov %vm18026_vm6 }
 0x588   : > { %v4195_v45 = vadd.f32 %v4187_v6, %v4159_v26  ;;  %v4230_v52 = vadd.f32 %v4222_v43, %v4194_v39  ;;  %v4333_v44 = vsel %vm18027_vm1, %v14016_v15, %v14027_v19  ;;  %vm18028_vm5 = vmmov %vm18027_vm1  ;;  %v4406_v49 = vsel %vm18027_vm1, %v14057_v17, %v14192_v46 }
 0x589   : > { %v4334_v4 = vsel %vm18028_vm5, %v14027_v19, %v14176_v48  ;;  %vm18029_vm4 = vmmov %vm18027_vm1  ;;  %vm18032_vm5 = vcmask 1014784  }
 0x58a   : > { %v4231_v23 = vadd.f32 %v4223_v33, %v4195_v45  ;;  %v4266_v0 = vadd.f32 %v4258_v30, %v4230_v52  ;;  %v4369_v58 = vsel %vm18029_vm4, %v14029_v5, %v14042_v2  ;;  %vm18030_vm7 = vmmov %vm18027_vm1  ;;  %v4444_v5 = vsel %vm18032_vm5, %v14059_v62, %v14072_v40  ;;  %v18037_v45 = vld [vmem:[#allocation138_spill] sm:$0xff]  ;;  %v18038_v30 = vld [vmem:[#allocation136_spill] sm:$0xff] }
 0x58b   : > { %v4370_v42 = vsel %vm18030_vm7, %v14042_v2, %v14182_v41  ;;  %vm18031_vm6 = vmmov %vm18027_vm1 }
 0x58c   : > { %v14184_v11 = vpop.permute.xlu1 %4295  ;;  %v4267_v31 = vadd.f32 %v4259_v10, %v4231_v23  ;;  %v4305_v7 = vadd.f32 %v4297_v3, %v4266_v0  ;;  %v4405_v19 = vsel %vm18031_vm6, %v14044_v63, %v14057_v17  ;;  %vm18033_vm4 = vmmov %vm18032_vm5 }
 0x58d   : > { %v14186_v9 = vpop.permute.xlu0 %4329  ;;  %v4445_v2 = vsel %vm18033_vm4, %v14072_v40, %v14230_v61  ;;  %vm18034_vm7 = vmmov %vm18033_vm4 }
 0x58e   : > { %v4306_v54 = vadd.f32 %v4298_v21, %v4267_v31  ;;  %v4341_v59 = vadd.f32 %v4333_v44, %v4305_v7  ;;  %v4480_v63 = vsel %vm18034_vm7, %v14074_v16, %v14085_v28  ;;  %vm18035_vm6 = vmmov %vm18033_vm4 }
 0x58f   : > { %v14266_v8 = vpop.permute.xlu2 %4474  ;;  %vm18036_vm1 = vmmov %vm18033_vm4  ;;  %vm18040_vm4 = vcmask 1031168  }
 0x590   : > { %v4342_v34 = vadd.f32 %v4334_v4, %v4306_v54  ;;  %v4377_v13 = vadd.f32 %v4369_v58, %v4341_v59  ;;  %v4481_v17 = vsel %vm18035_vm6, %v14085_v28, %v14266_v8  ;;  %v4516_v62 = vsel %vm18036_vm1, %v14087_v25, %v14100_v35  ;;  %vm18039_vm5 = vmmov %vm18036_vm1 }
 0x591   : > { %v4552_v10 = vsel %vm18039_vm5, %v18038_v30, %v18037_v45  ;;  %v4260_v16 = vsel %vm18040_vm4, %v14158_v37, %v14171_v36  ;;  %vm18041_vm7 = vmmov %vm18040_vm4 }
 0x592   : > { %v4378_v1 = vadd.f32 %v4370_v42, %v4342_v34  ;;  %v4413_v27 = vadd.f32 %v4405_v19, %v4377_v13  ;;  %v4261_v28 = vsel %vm18041_vm7, %v14171_v36, %v14178_v24  ;;  %vm18042_vm6 = vmmov %vm18036_vm1  ;;  %vm18043_vm1 = vcmask 1022976  }
 0x593   : > { %v4299_v3 = vsel %vm18043_vm1, %v14169_v50, %v14180_v29  ;;  %vm18044_vm9 = vmmov %vm18039_vm5  ;;  %v4268_v31 = vadd.f32 %v4260_v16, %v14167_v20  ;;  %v4269_v36 = vadd.f32 %v4261_v28, %v14174_v38 }
 0x594   : > { %v14188_v32 = vpop.permute.xlu1 %4331  ;;  %v4414_v57 = vadd.f32 %v4406_v49, %v4378_v1  ;;  %v4452_v6 = vadd.f32 %v4444_v5, %v4413_v27  ;;  %vm18045_vm5 = vmmov %vm18043_vm1  ;;  %v5366_v27 = vld [vmem:[#allocation13 + $0x28] sm:$0xff] }
 0x595   : > { %v14190_v60 = vpop.permute.xlu0 %4365  ;;  %v4300_v37 = vsel %vm18045_vm5, %v14180_v29, %v14184_v11  ;;  %vm18046_vm4 = vmmov %vm18043_vm1  ;;  %v4307_v44 = vadd.f32 %v4299_v3, %v4268_v31  ;;  %5418 = vperm.xlu0 %8017, %v5366_v27   ;;  %5374 = vperm.xlu1 %8020, %v5366_v27   ;;  %v18188_v3 = vmov 3  }
 0x596   : > { %v4453_v22 = vadd.f32 %v4445_v2, %v4414_v57  ;;  %v4488_v43 = vadd.f32 %v4480_v63, %v4452_v6  ;;  %vm18047_vm7 = vmmov %vm18043_vm1  ;;  %v4308_v4 = vadd.f32 %v4300_v37, %v4269_v36  ;;  %v18055_v2 = vmov 1.0|1.0   ;;  %v18071_v36 = vld [vmem:[#allocation23_spill] sm:$0xff] }
 0x597   : > { %v4547_v26 = vpop.permute.xlu2 %4546  ;;  %v4336_v50 = vsel %vm18047_vm7, %v14186_v9, %v14188_v32  ;;  %vm18050_vm5 = vmmov %vm18043_vm1 }
 0x598   : > { %v4489_v33 = vadd.f32 %v4481_v17, %v4453_v22  ;;  %v4524_v52 = vadd.f32 %v4516_v62, %v4488_v43  ;;  %v4553_v21 = vsel %vm18044_vm9, %v18037_v45, %v4547_v26  ;;  %vm18048_vm9 = vmmov %vm18043_vm1  ;;  %v4344_v11 = vadd.f32 %v4336_v50, %v4308_v4  ;;  %v18059_v17 = vld [vmem:[#allocation134_spill] sm:$0xff]  ;;  %v18081_v4 = vld [vmem:[#allocation31_spill] sm:$0xff] }
 0x599   : > { %v4371_v29 = vsel %vm18048_vm9, %v14182_v41, %v14190_v60  ;;  %v18077_v50 = vld [vmem:[#allocation82_spill] sm:$0xff] }
 0x59a   : > { %v4560_v0 = vadd.f32 %v4552_v10, %v4524_v52 }
 0x59c   : > { %v14214_v56 = vpop.permute.xlu1 %4367 }
 0x59d   : > { %v14216_v12 = vpop.permute.xlu0 %4401 }
 0x5a4   : > { %v14244_v47 = vpop.permute.xlu1 %4403 }
 0x5a5   : > { %v14246_v55 = vpop.permute.xlu0 %4440  ;;  %v4408_v32 = vsel %vm18050_vm5, %v14216_v12, %v14244_v47 }
 0x5ac   : > { %v4443_v14 = vpop.permute.xlu1 %4442 }
 0x5ad   : > { %v4477_v15 = vpop.permute.xlu0 %4476 }
 0x5b4   : > { %v4479_v40 = vpop.permute.xlu1 %4478 }
 0x5b5   : > { %v4511_v39 = vpop.permute.xlu0 %4510 }
 0x5b6   : > { %v4517_v25 = vsel %vm18042_vm6, %v14100_v35, %v4511_v39  ;;  %v4335_v35 = vsel %vm18046_vm4, %v14176_v48, %v14186_v9  ;;  %vm18049_vm6 = vmmov %vm18043_vm1  ;;  %v4407_v9 = vsel %vm18043_vm1, %v14192_v46, %v14216_v12  ;;  %vm18051_vm4 = vcmask 1014784  }
 0x5b7   : > { %v4525_v23 = vadd.f32 %v4517_v25, %v4489_v33  ;;  %v4372_v20 = vsel %vm18049_vm6, %v14190_v60, %v14214_v56  ;;  %v4343_v38 = vadd.f32 %v4335_v35, %v4307_v44  ;;  %v4446_v60 = vsel %vm18051_vm4, %v14230_v61, %v14246_v55  ;;  %vm18052_vm7 = vmmov %vm18051_vm4  ;;  %v18075_v35 = vld [vmem:[#allocation76_spill] sm:$0xff]  ;;  %v18079_v44 = vld [vmem:[#allocation30_spill] sm:$0xff] }
 0x5b8   : > { %v4380_v42 = vadd.f32 %v4372_v20, %v4344_v11  ;;  %v4447_v56 = vsel %vm18052_vm7, %v14246_v55, %v4443_v14  ;;  %vm18053_vm9 = vmmov %vm18051_vm4  ;;  %v18085_v20 = vld [vmem:[#allocation92_spill] sm:$0xff]  ;;  %v18089_v11 = vld [vmem:[#allocation39_spill] sm:$0xff]  ;;  %v18185_v61 = vmov 4   ;;  %v18186_v33 = vmov 2  }
 0x5b9   : > { %v4561_v24 = vadd.f32 %v4553_v21, %v4525_v23  ;;  %v4379_v41 = vadd.f32 %v4371_v29, %v4343_v38  ;;  %v4482_v46 = vsel %vm18053_vm9, %v14266_v8, %v4477_v15  ;;  %vm18054_vm6 = vmmov %vm18051_vm4  ;;  %vm18072_vm9 = vnez %v18071_v36  ;;  %v18083_v29 = vld [vmem:[#allocation86_spill] sm:$0xff]  ;;  %8022 = vset.pattern.permute.xlu0 %v18185_v61 }
 0x5ba   : > { %v4416_v49 = vadd.f32 %v4408_v32, %v4380_v42  ;;  %v4483_v12 = vsel %vm18054_vm6, %v4477_v15, %v4479_v40  ;;  %vm18058_vm1 = vmmov %vm18051_vm4  ;;  %v18087_v38 = vld [vmem:[#allocation38_spill] sm:$0xff]  ;;  %v18095_v32 = vld [vmem:[#allocation49_spill] sm:$0xff]  ;;  %8023 = vset.pattern.permute.xlu1 %v18186_v33  ;;  %5177 = vperm.xlu0 %8022, %v14126_v53   ;;  %v18187_v23 = vmov 6  }
 0x5bb   : > { %v14322_v7 = vpack.c.bf16 %v4561_v24, %v4560_v0  ;;  %v4415_v19 = vadd.f32 %v4407_v9, %v4379_v41  ;;  %vm18060_vm5 = vmmov %vm18058_vm1  ;;  %v18093_v9 = vld [vmem:[#allocation103_spill] sm:$0xff]  ;;  %v18097_v41 = vld [vmem:[#allocation50_spill] sm:$0xff] }
 0x5bc   : > { %v4551_v54 = vpop.permute.xlu1 %4550  ;;  %v4455_v5 = vadd.f32 %v4447_v56, %v4416_v49  ;;  %vm18061_vm4 = vmmov %vm18058_vm1  ;;  %v18099_v42 = vld [vmem:[#allocation190_spill] sm:$0xff]  ;;  %v18105_v56 = vld [vmem:[#allocation61_spill] sm:$0xff] }
 0x5bd   : > { %v4567_v48 = vunpack.c.h.bf16 %v14322_v7  ;;  %v4566_v58 = vunpack.c.l.bf16 %v14322_v7  ;;  %v4454_v47 = vadd.f32 %v4446_v60, %v4415_v19  ;;  %v4549_v57 = vpop.permute.xlu0 %4548  ;;  %vm18062_vm7 = vmmov %vm18058_vm1  ;;  %v18103_v60 = vld [vmem:[#allocation59_spill] sm:$0xff]  ;;  %v18107_v19 = vld [vmem:[#allocation194_spill] sm:$0xff] }
 0x5be   : > { %v4491_v14 = vadd.f32 %v4483_v12, %v4455_v5  ;;  %v4554_v62 = vsel %vm18061_vm4, %v4547_v26, %v4549_v57  ;;  %v4555_v43 = vsel %vm18062_vm7, %v4549_v57, %v4551_v54  ;;  %vm18080_vm4 = vnez %v18079_v44  ;;  %v18109_v49 = vld [vmem:[#allocation195_spill] sm:$0xff]  ;;  %v18121_v5 = vld [vmem:[#allocation84_spill] sm:$0xff]  ;;  %v18155_v36 = vld [vmem:[#allocation210_spill] sm:$0xff] }
 0x5bf   : > { %v4571_v59 = vsub.f32 %v4561_v24, %v4567_v48  ;;  %v4570_v34 = vsub.f32 %v4560_v0, %v4566_v58  ;;  %v4490_v55 = vadd.f32 %v4482_v46, %v4454_v47  ;;  %v18073_v24 = vld [vmem:[#allocation24_spill] sm:$0xff]  ;;  %vm18082_vm7 = vnez %v18081_v4  ;;  %v18091_v58 = vld [vmem:[#allocation101_spill] sm:$0xff]  ;;  %v18117_v12 = vld [vmem:[#allocation27_spill] sm:$0xff] }
 0x5c0   : > { %vm18074_vm6 = vnez %v18073_v24  ;;  %v4684_v48 = vunpack.c.l.b16 %v14322_v7  ;;  %v4685_v54 = vunpack.c.h.b16 %v14322_v7  ;;  %v18101_v7 = vld [vmem:[#allocation191_spill] sm:$0xff]  ;;  %v18115_v46 = vld [vmem:[#allocation200_spill] sm:$0xff]  ;;  %v18159_v44 = vld [vmem:[#allocation69_spill] sm:$0xff]  ;;  %v18189_v0 = vmov 1  }
 0x5c1   : > { %v4575_v13 = vpack.c.bf16 %v4571_v59, %v4571_v59  ;;  %v4574_v1 = vpack.c.bf16 %v4570_v34, %v4570_v34  ;;  %v18119_v47 = vld [vmem:[#allocation83_spill] sm:$0xff]  ;;  %v18161_v4 = vld [vmem:[#allocation70_spill] sm:$0xff] }
 0x5c2   : > { %v4688_v59 = vpack.c.b16 %v4684_v48, %v4684_v48  ;;  %v4689_v34 = vpack.c.b16 %v4685_v54, %v4685_v54  ;;  %v18157_v24 = vld [vmem:[#allocation211_spill] sm:$0xff]  ;;  %v18167_v48 = vld [vmem:[#allocation208_spill] sm:$0xff]  ;;  %v18169_v54 = vld [vmem:[#allocation209_spill] sm:$0xff] }
 0x5c3   : > { %4586 = vmatmul.bf16.vlgmr.msra.gmra.mxu0 %v4574_v1  ;;  %4599 = vmatmul.bf16.vlgmr.msra.gmra.mxu1 %v4575_v13  ;;  %v5365_v40 = vld [vmem:[#allocation13 + $0x20] sm:$0xff] }
 0x5c4   : > { %7655 = vmatpush.bf16.msk.msra.mxu0 %vm17829_vm12, %v18055_v2  ;;  %7671 = vmatpush.bf16.msk.msra.mxu1 %vm17833_vm13, %v18055_v2  ;;  %v4513_v63 = vpop.permute.xlu1 %4512 }
 0x5c5   : > { %v4518_v8 = vsel %vm18058_vm1, %v4511_v39, %v4513_v63  ;;  %v4519_v15 = vsel %vm18060_vm5, %v4513_v63, %v18059_v17  ;;  %vm18076_vm1 = vnez %v18075_v35  ;;  %vm18078_vm5 = vnez %v18077_v50  ;;  %v18129_v17 = vld [vmem:[#allocation97_spill] sm:$0xff]  ;;  %5546 = vperm.xlu0 %8022, %v5365_v40   ;;  %5458 = vperm.xlu1 %8023, %v5365_v40  }
 0x5c6   : > { %v4526_v6 = vadd.f32 %v4518_v8, %v4490_v55  ;;  %v4527_v22 = vadd.f32 %v4519_v15, %v4491_v14  ;;  %v18123_v55 = vld [vmem:[#allocation201_spill] sm:$0xff]  ;;  %v18125_v14 = vld [vmem:[#allocation202_spill] sm:$0xff]  ;;  %5369 = vperm.xlu2 %8019, %v5365_v40  }
 0x5c7   : > { %v18127_v8 = vld [vmem:[#allocation94_spill] sm:$0xff]  ;;  %v18131_v15 = vld [vmem:[#allocation205_spill] sm:$0xff] }
 0x5c8   : > { %7657 = vmatpush.bf16.msk.msra.mxu0 %vm8909_vm11, %v18055_v2  ;;  %7673 = vmatpush.bf16.msk.msra.mxu1 %vm17840_vm14, %v18055_v2  ;;  %v4562_v45 = vadd.f32 %v4554_v62, %v4526_v6  ;;  %v4563_v30 = vadd.f32 %v4555_v43, %v4527_v22  ;;  %v18133_v6 = vld [vmem:[#allocation206_spill] sm:$0xff] }
 0x5c9   : > { %v18135_v43 = vld [vmem:[#allocation198_spill] sm:$0xff] }
 0x5ca   : > { %v4565_v39 = vpack.c.bf16 %v4563_v30, %v4562_v45 }
 0x5cc   : > { %7659 = vmatpush.bf16.msk.msra.mxu0 %vm17844_vm0, %v18055_v2  ;;  %7675 = vmatpush.bf16.msk.msra.mxu1 %vm17846_vm2, %v18055_v2  ;;  %v4568_v26 = vunpack.c.l.bf16 %v4565_v39  ;;  %v4569_v28 = vunpack.c.h.bf16 %v4565_v39  ;;  %v4686_v57 = vunpack.c.l.b16 %v4565_v39  ;;  %v4687_v63 = vunpack.c.h.b16 %v4565_v39  ;;  %v18141_v39 = vld [vmem:[#allocation28_spill] sm:$0xff] }
 0x5cd   : > { %8031 = vset.pattern.permute.xlu0 %v18187_v23  ;;  %8025 = vset.pattern.permute.xlu1 %v18188_v3 }
 0x5ce   : > { %v4572_v25 = vsub.f32 %v4562_v45, %v4568_v26  ;;  %v4573_v52 = vsub.f32 %v4563_v30, %v4569_v28  ;;  %v4690_v22 = vpack.c.b16 %v4686_v57, %v4686_v57  ;;  %v4691_v62 = vpack.c.b16 %v4687_v63, %v4687_v63  ;;  %v18137_v45 = vld [vmem:[#allocation199_spill] sm:$0xff]  ;;  %v18139_v30 = vld [vmem:[#allocation73_spill] sm:$0xff]  ;;  %v18143_v26 = vld [vmem:[#allocation46_spill] sm:$0xff]  ;;  %5638 = vperm.xlu0 %8031, %v5366_v27  }
 0x5cf   : > { %v18145_v28 = vld [vmem:[#allocation47_spill] sm:$0xff]  ;;  %5502 = vperm.xlu1 %8025, %v5365_v40   ;;  %8021 = vset.pattern.permute.xlu2 %v18189_v0 }
 0x5d0   : > { %7661 = vmatpush.bf16.msk.msra.mxu0 %vm17852_vm10, %v18055_v2  ;;  %7677 = vmatpush.bf16.msk.msra.mxu1 %vm17854_vm8, %v18055_v2  ;;  %v4576_v21 = vpack.c.bf16 %v4572_v25, %v4572_v25  ;;  %v4577_v37 = vpack.c.bf16 %v4573_v52, %v4573_v52  ;;  %v18147_v25 = vld [vmem:[#allocation53_spill] sm:$0xff]  ;;  %v18149_v52 = vld [vmem:[#allocation96_spill] sm:$0xff] }
 0x5d1   : > { %5414 = vperm.xlu2 %8021, %v5365_v40  }
 0x5d2   : > { %4612 = vmatmul.bf16.vlgmr.msra.gmra.mxu2 %v4576_v21  ;;  %4625 = vmatmul.bf16.vlgmr.msra.gmra.mxu3 %v4577_v37 }
 0x5d3   : > { %4638 = vmatmul.bf16.vlgmr.msrb.gmra.mxu0 %v4574_v1  ;;  %4651 = vmatmul.bf16.vlgmr.msrb.gmra.mxu1 %v4575_v13  ;;  %v18111_v13 = vld [vmem:[#allocation71_spill] sm:$0xff]  ;;  %v18113_v1 = vld [vmem:[#allocation72_spill] sm:$0xff] }
 0x5d4   : > { %7663 = vmatpush.bf16.msk.msra.mxu0 %vm17860_vm3, %v18055_v2  ;;  %7679 = vmatpush.bf16.msk.msra.mxu1 %vm17862_vm15, %v18055_v2 }
 0x5d5   : > { %7687 = vmatpush.bf16.msk.msra.mxu2 %vm18072_vm9, %v18055_v2  ;;  %7703 = vmatpush.bf16.msk.msra.mxu3 %vm18074_vm6, %v18055_v2  ;;  %vm18084_vm9 = vnez %v18083_v29  ;;  %vm18086_vm6 = vnez %v18085_v20 }
 0x5d6   : > { %8032 = vset.pattern.permute.xlu0 %v17653_v18 }
 0x5d7   : > { %8027 = vset.pattern.permute.xlu1 %v18185_v61  ;;  %v14666_v61 = vpop.permute.xlu1 %5228 }
 0x5d8   : > { %7665 = vmatpush.bf16.msk.msra.mxu0 %vm18076_vm1, %v18055_v2  ;;  %7681 = vmatpush.bf16.msk.msra.mxu1 %vm18078_vm5, %v18055_v2  ;;  %vm18088_vm1 = vnez %v18087_v38  ;;  %vm18090_vm5 = vnez %v18089_v11  ;;  %v18163_v38 = vld [vmem:[#allocation51_spill] sm:$0xff]  ;;  %v18165_v11 = vld [vmem:[#allocation52_spill] sm:$0xff] }
 0x5d9   : > { %7689 = vmatpush.bf16.msk.msra.mxu2 %vm18080_vm4, %v18055_v2  ;;  %7705 = vmatpush.bf16.msk.msra.mxu3 %vm18082_vm7, %v18055_v2  ;;  %vm18092_vm4 = vnez %v18091_v58  ;;  %vm18094_vm7 = vnez %v18093_v9 }
 0x5da   : > { %5550 = vperm.xlu1 %8027, %v5366_v27   ;;  %8024 = vset.pattern.permute.xlu2 %v18186_v33 }
 0x5db   : > { %5462 = vperm.xlu2 %8024, %v5366_v27  }
 0x5dc   : > { %7667 = vmatpush.bf16.msk.msra.mxu0 %vm18084_vm9, %v18055_v2  ;;  %7683 = vmatpush.bf16.msk.msra.mxu1 %vm18086_vm6, %v18055_v2  ;;  %vm18096_vm6 = vnez %v18095_v32  ;;  %vm18102_vm9 = vnez %v18101_v7  ;;  %v18171_v32 = vld [vmem:[#allocation215_spill] sm:$0xff]  ;;  %v18177_v7 = vld [vmem:[#allocation220_spill] sm:$0xff] }
 0x5dd   : > { %7691 = vmatpush.bf16.msk.msra.mxu2 %vm18088_vm1, %v18055_v2  ;;  %7707 = vmatpush.bf16.msk.msra.mxu3 %vm18090_vm5, %v18055_v2  ;;  %vm18098_vm1 = vnez %v18097_v41  ;;  %vm18100_vm5 = vnez %v18099_v42  ;;  %v18173_v41 = vld [vmem:[#allocation216_spill] sm:$0xff]  ;;  %v18175_v42 = vld [vmem:[#allocation219_spill] sm:$0xff] }
 0x5e0   : > { %7669 = vmatpush.bf16.msk.msra.mxu0 %vm18092_vm4, %v18055_v2  ;;  %7685 = vmatpush.bf16.msk.msra.mxu1 %vm18094_vm7, %v18055_v2  ;;  %vm18112_vm7 = vnez %v18111_v13  ;;  %vm18114_vm4 = vnez %v18113_v1 }
 0x5e1   : > { %7693 = vmatpush.bf16.msk.msra.mxu2 %vm18096_vm6, %v18055_v2  ;;  %7709 = vmatpush.bf16.msk.msra.mxu3 %vm18098_vm1, %v18055_v2  ;;  %vm18104_vm6 = vnez %v18103_v60  ;;  %vm18106_vm1 = vnez %v18105_v56 }
 0x5e2   : > { %4664 = vmatmul.bf16.vlgmr.msrb.gmra.mxu2 %v4576_v21  ;;  %4677 = vmatmul.bf16.vlgmr.msrb.gmra.mxu3 %v4577_v37  ;;  %v18151_v21 = vld [vmem:[#allocation203_spill] sm:$0xff]  ;;  %v18153_v37 = vld [vmem:[#allocation204_spill] sm:$0xff] }
 0x5e3   : > { %4704 = vmatmul.bf16.vlgmr.msra.gmra.mxu0 %v4688_v59  ;;  %4717 = vmatmul.bf16.vlgmr.msra.gmra.mxu1 %v4689_v34 }
 0x5e4   : > { %7719 = vmatpush.bf16.msk.msrb.mxu0 %vm18100_vm5, %v18055_v2  ;;  %7735 = vmatpush.bf16.msk.msrb.mxu1 %vm18102_vm9, %v18055_v2  ;;  %vm18108_vm5 = vnez %v18107_v19  ;;  %vm18110_vm9 = vnez %v18109_v49 }
 0x5e5   : > { %7695 = vmatpush.bf16.msk.msra.mxu2 %vm18104_vm6, %v18055_v2  ;;  %7711 = vmatpush.bf16.msk.msra.mxu3 %vm18106_vm1, %v18055_v2  ;;  %vm18116_vm6 = vnez %v18115_v46  ;;  %vm18118_vm1 = vnez %v18117_v12 }
 0x5e6   : > { %8026 = vset.pattern.permute.xlu2 %v18188_v3 }
 0x5e7   : > { %5506 = vperm.xlu2 %8026, %v5366_v27  }
 0x5e8   : > { %7721 = vmatpush.bf16.msk.msrb.mxu0 %vm18108_vm5, %v18055_v2  ;;  %7737 = vmatpush.bf16.msk.msrb.mxu1 %vm18110_vm9, %v18055_v2  ;;  %vm18120_vm5 = vnez %v18119_v47  ;;  %vm18122_vm9 = vnez %v18121_v5 }
 0x5e9   : > { %7697 = vmatpush.bf16.msk.msra.mxu2 %vm18112_vm7, %v18055_v2  ;;  %7713 = vmatpush.bf16.msk.msra.mxu3 %vm18114_vm4, %v18055_v2  ;;  %vm18124_vm7 = vnez %v18123_v55  ;;  %vm18126_vm4 = vnez %v18125_v14 }
 0x5ec   : > { %7723 = vmatpush.bf16.msk.msrb.mxu0 %vm18116_vm6, %v18055_v2  ;;  %7739 = vmatpush.bf16.msk.msrb.mxu1 %vm18118_vm1, %v18055_v2  ;;  %vm18128_vm6 = vnez %v18127_v8  ;;  %vm18130_vm1 = vnez %v18129_v17 }
 0x5ed   : > { %7699 = vmatpush.bf16.msk.msra.mxu2 %vm18120_vm5, %v18055_v2  ;;  %7715 = vmatpush.bf16.msk.msra.mxu3 %vm18122_vm9, %v18055_v2  ;;  %vm18132_vm5 = vnez %v18131_v15  ;;  %vm18134_vm9 = vnez %v18133_v6  ;;  %v18191_v6 = vld [vmem:[#allocation119_spill] sm:$0xff] }
 0x5f0   : > { %7725 = vmatpush.bf16.msk.msrb.mxu0 %vm18124_vm7, %v18055_v2  ;;  %7741 = vmatpush.bf16.msk.msrb.mxu1 %vm18126_vm4, %v18055_v2  ;;  %vm18136_vm7 = vnez %v18135_v43  ;;  %vm18138_vm4 = vnez %v18137_v45 }
 0x5f1   : > { %7701 = vmatpush.bf16.msk.msra.mxu2 %vm18128_vm6, %v18055_v2  ;;  %7717 = vmatpush.bf16.msk.msra.mxu3 %vm18130_vm1, %v18055_v2  ;;  %vm18140_vm6 = vnez %v18139_v30  ;;  %vm18142_vm1 = vnez %v18141_v39 }
 0x5f4   : > { %7727 = vmatpush.bf16.msk.msrb.mxu0 %vm18132_vm5, %v18055_v2  ;;  %7743 = vmatpush.bf16.msk.msrb.mxu1 %vm18134_vm9, %v18055_v2  ;;  %vm18144_vm5 = vnez %v18143_v26  ;;  %vm18146_vm9 = vnez %v18145_v28 }
 0x5f5   : > { %7751 = vmatpush.bf16.msk.msrb.mxu2 %vm18136_vm7, %v18055_v2  ;;  %7767 = vmatpush.bf16.msk.msrb.mxu3 %vm18138_vm4, %v18055_v2  ;;  %vm18148_vm7 = vnez %v18147_v25  ;;  %vm18150_vm4 = vnez %v18149_v52 }
 0x5f6   : > { %4730 = vmatmul.bf16.vlgmr.msra.gmra.mxu2 %v4690_v22  ;;  %4743 = vmatmul.bf16.vlgmr.msra.gmra.mxu3 %v4691_v62 }
 0x5f8   : > { %7729 = vmatpush.bf16.msk.msrb.mxu0 %vm18140_vm6, %v18055_v2  ;;  %7745 = vmatpush.bf16.msk.msrb.mxu1 %vm18142_vm1, %v18055_v2  ;;  %vm18152_vm6 = vnez %v18151_v21  ;;  %vm18154_vm1 = vnez %v18153_v37 }
 0x5f9   : > { %7753 = vmatpush.bf16.msk.msrb.mxu2 %vm18144_vm5, %v18055_v2  ;;  %7769 = vmatpush.bf16.msk.msrb.mxu3 %vm18146_vm9, %v18055_v2  ;;  %vm18156_vm5 = vnez %v18155_v36  ;;  %vm18158_vm9 = vnez %v18157_v24 }
 0x5fc   : > { %7731 = vmatpush.bf16.msk.msrb.mxu0 %vm18148_vm7, %v18055_v2  ;;  %7747 = vmatpush.bf16.msk.msrb.mxu1 %vm18150_vm4, %v18055_v2  ;;  %vm18160_vm7 = vnez %v18159_v44  ;;  %vm18162_vm4 = vnez %v18161_v4 }
 0x5fd   : > { %7755 = vmatpush.bf16.msk.msrb.mxu2 %vm18152_vm6, %v18055_v2  ;;  %7771 = vmatpush.bf16.msk.msrb.mxu3 %vm18154_vm1, %v18055_v2  ;;  %vm18164_vm6 = vnez %v18163_v38  ;;  %vm18166_vm1 = vnez %v18165_v11 }
 0x600   : > { %7733 = vmatpush.bf16.msk.msrb.mxu0 %vm18156_vm5, %v18055_v2  ;;  %7749 = vmatpush.bf16.msk.msrb.mxu1 %vm18158_vm9, %v18055_v2  ;;  %vm18168_vm5 = vnez %v18167_v48  ;;  %vm18170_vm9 = vnez %v18169_v54 }
 0x601   : > { %7757 = vmatpush.bf16.msk.msrb.mxu2 %vm18160_vm7, %v18055_v2  ;;  %7773 = vmatpush.bf16.msk.msrb.mxu3 %vm18162_vm4, %v18055_v2  ;;  %vm18172_vm7 = vnez %v18171_v32  ;;  %vm18174_vm4 = vnez %v18173_v41 }
 0x603   : > { %4756 = vmatmul.bf16.vlgmr.msrb.gmra.mxu0 %v4688_v59  ;;  %4769 = vmatmul.bf16.vlgmr.msrb.gmra.mxu1 %v4689_v34 }
 0x604   : > { %7783 = vmatpush.bf16.msk.msra.mxu0 %vm17829_vm12, %v18055_v2  ;;  %7799 = vmatpush.bf16.msk.msra.mxu1 %vm17833_vm13, %v18055_v2 }
 0x605   : > { %7759 = vmatpush.bf16.msk.msrb.mxu2 %vm18164_vm6, %v18055_v2  ;;  %7775 = vmatpush.bf16.msk.msrb.mxu3 %vm18166_vm1, %v18055_v2  ;;  %vm18176_vm6 = vnez %v18175_v42  ;;  %vm18178_vm1 = vnez %v18177_v7  ;;  %v14660_v42 = vpop.permute.xlu0 %5224 }
 0x608   : > { %7785 = vmatpush.bf16.msk.msra.mxu0 %vm8909_vm11, %v18055_v2  ;;  %7801 = vmatpush.bf16.msk.msra.mxu1 %vm17840_vm14, %v18055_v2 }
 0x609   : > { %7761 = vmatpush.bf16.msk.msrb.mxu2 %vm18168_vm5, %v18055_v2  ;;  %7777 = vmatpush.bf16.msk.msrb.mxu3 %vm18170_vm9, %v18055_v2 }
 0x60c   : > { %7787 = vmatpush.bf16.msk.msra.mxu0 %vm17844_vm0, %v18055_v2  ;;  %7803 = vmatpush.bf16.msk.msra.mxu1 %vm17846_vm2, %v18055_v2 }
 0x60d   : > { %7763 = vmatpush.bf16.msk.msrb.mxu2 %vm18172_vm7, %v18055_v2  ;;  %7779 = vmatpush.bf16.msk.msrb.mxu3 %vm18174_vm4, %v18055_v2  ;;  %v14662_v7 = vpop.permute.xlu0 %5318 }
 0x610   : > { %7789 = vmatpush.bf16.msk.msra.mxu0 %vm17852_vm10, %v18055_v2  ;;  %7805 = vmatpush.bf16.msk.msra.mxu1 %vm17854_vm8, %v18055_v2 }
 0x611   : > { %7765 = vmatpush.bf16.msk.msrb.mxu2 %vm18176_vm6, %v18055_v2  ;;  %7781 = vmatpush.bf16.msk.msrb.mxu3 %vm18178_vm1, %v18055_v2 }
 0x614   : > { %7791 = vmatpush.bf16.msk.msra.mxu0 %vm17860_vm3, %v18055_v2  ;;  %7807 = vmatpush.bf16.msk.msra.mxu1 %vm17862_vm15, %v18055_v2 }
 0x615   : > { %7815 = vmatpush.bf16.msk.msra.mxu2 %vm17829_vm12, %v18055_v2  ;;  %7831 = vmatpush.bf16.msk.msra.mxu3 %vm17833_vm13, %v18055_v2  ;;  %vm18179_vm12 = vnez %v18075_v35  ;;  %vm18180_vm13 = vnez %v18077_v50  ;;  %v8045_v35 = vld [vmem:[#allocation13 + $0x8] sm:$0xff] }
 0x616   : > { %4782 = vmatmul.bf16.vlgmr.msrb.gmra.mxu2 %v4690_v22  ;;  %4795 = vmatmul.bf16.vlgmr.msrb.gmra.mxu3 %v4691_v62 }
 0x617   : > { %4841 = vperm.xlu0 %8032, %v8045_v35  }
 0x618   : > { %7793 = vmatpush.bf16.msk.msra.mxu0 %vm18179_vm12, %v18055_v2  ;;  %7809 = vmatpush.bf16.msk.msra.mxu1 %vm18180_vm13, %v18055_v2 }
 0x619   : > { %7817 = vmatpush.bf16.msk.msra.mxu2 %vm8909_vm11, %v18055_v2  ;;  %7833 = vmatpush.bf16.msk.msra.mxu3 %vm17840_vm14, %v18055_v2  ;;  %vm18181_vm11 = vnez %v18083_v29  ;;  %vm18182_vm14 = vnez %v18085_v20  ;;  %v18190_v20 = vmov 5  }
 0x61a   : > { %8029 = vset.pattern.permute.xlu1 %v18190_v20  ;;  %8028 = vset.pattern.permute.xlu2 %v18190_v20 }
 0x61b   : > { %5594 = vperm.xlu1 %8029, %v5366_v27   ;;  %5590 = vperm.xlu2 %8028, %v5365_v40  }
 0x61c   : > { %7795 = vmatpush.bf16.msk.msra.mxu0 %vm18181_vm11, %v18055_v2  ;;  %7811 = vmatpush.bf16.msk.msra.mxu1 %vm18182_vm14, %v18055_v2 }
 0x61d   : > { %7819 = vmatpush.bf16.msk.msra.mxu2 %vm17844_vm0, %v18055_v2  ;;  %7835 = vmatpush.bf16.msk.msra.mxu3 %vm17846_vm2, %v18055_v2  ;;  %vm18183_vm0 = vnez %v18091_v58  ;;  %vm18184_vm2 = vnez %v18093_v9 }
 0x61f   : > { %4988 = vperm.xlu0 %8032, %v14126_v53  }
 0x620   : > { %7797 = vmatpush.bf16.msk.msra.mxu0 %vm18183_vm0, %v18055_v2  ;;  %7813 = vmatpush.bf16.msk.msra.mxu1 %vm18184_vm2, %v18055_v2 }
 0x621   : > { %7821 = vmatpush.bf16.msk.msra.mxu2 %vm17852_vm10, %v18055_v2  ;;  %7837 = vmatpush.bf16.msk.msra.mxu3 %vm17854_vm8, %v18055_v2  ;;  %vm4826_vm10 = vcmask 1047560   ;;  %vm4821_vm8 = vcmask 7168  }
 0x623   : > { %8033 = vset.pattern.permute.xlu1 %v17976_v51  ;;  %8030 = vset.pattern.permute.xlu2 %v18187_v23 }
 0x624   : > { %5678 = vperm.xlu1 %8033, %v5365_v40   ;;  %5634 = vperm.xlu2 %8030, %v5365_v40   ;;  %v14670_v40 = vpop.permute.xlu1 %5271 }
 0x625   : > { %7823 = vmatpush.bf16.msk.msra.mxu2 %vm17860_vm3, %v18055_v2  ;;  %7839 = vmatpush.bf16.msk.msra.mxu3 %vm17862_vm15, %v18055_v2  ;;  %vm18221_vm3 = vcmask 1039360  }
 0x626   : > { %vm18222_vm15 = vmmov %vm18221_vm3 }
 0x627   : > { %vm18225_vm5 = vmmov %vm18221_vm3 }
 0x628   : > { %vm18226_vm9 = vmmov %vm18221_vm3 }
 0x629   : > { %7825 = vmatpush.bf16.msk.msra.mxu2 %vm18179_vm12, %v18055_v2  ;;  %7841 = vmatpush.bf16.msk.msra.mxu3 %vm18180_vm13, %v18055_v2  ;;  %vm18228_vm7 = vmmov %vm18221_vm3 }
 0x62a   : > { %vm18229_vm4 = vmmov %vm18221_vm3 }
 0x62b   : > { %vm18231_vm6 = vmmov %vm18221_vm3 }
 0x62c   : > { %8035 = vset.pattern.permute.xlu1 %v17653_v18  ;;  %8034 = vset.pattern.permute.xlu2 %v17976_v51  ;;  %vm18232_vm1 = vmmov %vm18221_vm3 }
 0x62d   : > { %7827 = vmatpush.bf16.msk.msra.mxu2 %vm18181_vm11, %v18055_v2  ;;  %7843 = vmatpush.bf16.msk.msra.mxu3 %vm18182_vm14, %v18055_v2  ;;  %vm18234_vm12 = vmmov %vm18232_vm1 }
 0x62e   : > { %5682 = vperm.xlu2 %8034, %v5366_v27   ;;  %v14664_v27 = vpop.permute.xlu0 %5036  ;;  %vm18235_vm13 = vmmov %vm18232_vm1 }
 0x62f   : > { %vm18236_vm11 = vmmov %vm18232_vm1 }
 0x630   : > { %vm18237_vm14 = vmmov %vm18232_vm1 }
 0x631   : > { %7829 = vmatpush.bf16.msk.msra.mxu2 %vm18183_vm0, %v18055_v2  ;;  %7845 = vmatpush.bf16.msk.msra.mxu3 %vm18184_vm2, %v18055_v2  ;;  %vm18239_vm0 = vmmov %vm18232_vm1 }
 0x632   : > { %vm18240_vm2 = vmmov %vm18239_vm0 }
 0x636   : > { %v14668_v33 = vpop.permute.xlu0 %5418 }
 0x640   : > { %v4587_v10 = vpop.f32.mrf.mxu0  ;;  %v4600_v16 = vpop.f32.mrf.mxu1 }
 0x641   : > { %v4601_v12 = vadd.f32 %v4600_v16, %v4587_v10  ;;  %v14672_v10 = vpop.permute.xlu0 %5177  ;;  %v14674_v16 = vpop.permute.xlu1 %5322 }
 0x648   : > { %v4589_v2 = vpop.f32.mrf.mxu0  ;;  %v4602_v31 = vpop.f32.mrf.mxu1 }
 0x649   : > { %v14676_v23 = vpop.permute.xlu0 %5546  ;;  %v14678_v3 = vpop.permute.xlu1 %5374 }
 0x64a   : > { %18192 = vst [vmem:[#allocation143_spill] sm:$0xff] %v14676_v23 }
 0x650   : > { %v4639_v50 = vpop.f32.mrf.mxu0  ;;  %v4652_v29 = vpop.f32.mrf.mxu1 }
 0x651   : > { %v4653_v51 = vadd.f32 %v4652_v29, %v4639_v50  ;;  %v14680_v0 = vpop.permute.xlu0 %5638  ;;  %v14682_v2 = vpop.permute.xlu1 %5458 }
 0x652   : > { %18193 = vst [vmem:[#allocation144_spill] sm:$0xff] %v14680_v0 }
 0x655   : > { %v4613_v58 = vpop.f32.mrf.mxu2  ;;  %v4626_v9 = vpop.f32.mrf.mxu3 }
 0x656   : > { %v4614_v47 = vadd.f32 %v4613_v58, %v4601_v12  ;;  %v14719_v12 = vpop.permute.xlu2 %5275 }
 0x658   : > { %v4641_v59 = vpop.f32.mrf.mxu0  ;;  %v4654_v34 = vpop.f32.mrf.mxu1  ;;  %v4627_v14 = vadd.f32 %v4626_v9, %v4614_v47  ;;  %v18199_v47 = vld [vmem:[#allocation114_spill] sm:$0xff] }
 0x659   : > { %v14686_v35 = vpop.permute.xlu1 %5502  ;;  %v18196_v34 = vld [vmem:[#allocation111_spill] sm:$0xff] }
 0x65d   : > { %v4615_v60 = vpop.f32.mrf.mxu2  ;;  %v4628_v56 = vpop.f32.mrf.mxu3 }
 0x660   : > { %v4705_v19 = vpop.f32.mrf.mxu0  ;;  %v4718_v53 = vpop.f32.mrf.mxu1 }
 0x661   : > { %v4706_v57 = vadd.f32 %v4705_v19, %v4627_v14  ;;  %v14690_v20 = vpop.permute.xlu1 %5550 }
 0x662   : > { %18194 = vst [vmem:[#allocation145_spill] sm:$0xff] %v14690_v20  ;;  %v18218_v20 = vld [vmem:[#allocation110_spill] sm:$0xff] }
 0x663   : > { %v4719_v63 = vadd.f32 %v4718_v53, %v4706_v57  ;;  %v18197_v53 = vld [vmem:[#allocation112_spill] sm:$0xff] }
 0x665   : > { %v4665_v49 = vpop.f32.mrf.mxu2  ;;  %v4678_v13 = vpop.f32.mrf.mxu3 }
 0x666   : > { %v4666_v52 = vadd.f32 %v4665_v49, %v4653_v51 }
 0x668   : > { %v4707_v1 = vpop.f32.mrf.mxu0  ;;  %v4720_v46 = vpop.f32.mrf.mxu1  ;;  %v4679_v21 = vadd.f32 %v4678_v13, %v4666_v52 }
 0x66d   : > { %v4667_v5 = vpop.f32.mrf.mxu2  ;;  %v4680_v55 = vpop.f32.mrf.mxu3 }
 0x66e   : > { %v18200_v55 = vld [vmem:[#allocation140_spill] sm:$0xff] }
 0x679   : > { %v4731_v8 = vpop.f32.mrf.mxu2  ;;  %v4744_v17 = vpop.f32.mrf.mxu3 }
 0x67a   : > { %v4732_v18 = vadd.f32 %v4731_v8, %v4719_v63 }
 0x67c   : > { %v4745_v15 = vadd.f32 %v4744_v17, %v4732_v18 }
 0x67e   : > { %v4806_v22 = vadd.f32 %v18191_v6, %v4745_v15  ;;  %v14737_v15 = vpop.permute.xlu2 %5369 }
 0x680   : > { %v4808_v62 = vmul.f32 0.2, %v4806_v22  ;;  %v4757_v43 = vpop.f32.mrf.mxu0  ;;  %v4770_v45 = vpop.f32.mrf.mxu1 }
 0x681   : > { %v4733_v30 = vpop.f32.mrf.mxu2  ;;  %v4746_v39 = vpop.f32.mrf.mxu3  ;;  %v4758_v37 = vadd.f32 %v4757_v43, %v4679_v21 }
 0x682   : > { %v4810_v26 = vmax.f32 %v4806_v22, %v4808_v62  ;;  %v18202_v62 = vld [vmem:[#allocation132_spill] sm:$0xff]  ;;  %v18204_v39 = vld [vmem:[#allocation117_spill] sm:$0xff] }
 0x683   : > { %v4771_v36 = vadd.f32 %v4770_v45, %v4758_v37  ;;  %v18206_v37 = vld [vmem:[#allocation120_spill] sm:$0xff] }
 0x684   : > { %4817 = vrot.lane.b32.xlu0 %v4810_v26, %s8332_s22 }
 0x688   : > { %v4759_v28 = vpop.f32.mrf.mxu0  ;;  %v4772_v25 = vpop.f32.mrf.mxu1 }
 0x689   : > { %v14684_v31 = vpop.permute.xlu0 %4841  ;;  %v14756_v25 = vpop.permute.xlu2 %5414 }
 0x68d   : > { %v14697_v59 = vpop.permute.xlu1 %5594 }
 0x68e   : > { %18195 = vst [vmem:[#allocation146_spill] sm:$0xff] %v14697_v59 }
 0x691   : > { %v14688_v50 = vpop.permute.xlu0 %4988 }
 0x696   : > { %v14712_v1 = vpop.permute.xlu1 %5678 }
 0x697   : > { %18198 = vst [vmem:[#allocation148_spill] sm:$0xff] %v14712_v1  ;;  %v18215_v1 = vld [vmem:[#allocation89_spill] sm:$0xff] }
 0x699   : > { %v4783_v24 = vpop.f32.mrf.mxu2  ;;  %v4796_v44 = vpop.f32.mrf.mxu3 }
 0x69a   : > { %v4784_v4 = vadd.f32 %v4783_v24, %v4771_v36  ;;  %v18207_v24 = vld [vmem:[#allocation160_spill] sm:$0xff] }
 0x69c   : > { %v4797_v38 = vadd.f32 %v4796_v44, %v4784_v4 }
 0x69e   : > { %v4807_v11 = vadd.f32 %v18191_v6, %v4797_v38  ;;  %v18201_v6 = vld [vmem:[#allocation116_spill] sm:$0xff] }
 0x6a0   : > { %v4809_v48 = vmul.f32 0.2, %v4807_v11 }
 0x6a1   : > { %v4785_v54 = vpop.f32.mrf.mxu2  ;;  %v4798_v32 = vpop.f32.mrf.mxu3 }
 0x6a2   : > { %v4811_v41 = vmax.f32 %v4807_v11, %v4809_v48  ;;  %v18208_v54 = vld [vmem:[#allocation87_spill] sm:$0xff] }
 0x6a4   : > { %4819 = vrot.lane.b32.xlu1 %v4811_v41, %s8332_s22 }
 0x6f6   : > { %v4818_v29 = vpop.permute.xlu0 %4817 }
 0x6f7   : > { %4827 = vst.msk [vmem:[#allocation4] sm:$0xff] %vm4826_vm10, %v4818_v29  ;;  %vm18242_vm10 = vmmov %vm18239_vm0 }
 0x6fe   : > { %v14692_v58 = vld [vmem:[#allocation4] sm:$0xff] }
 0x6ff   : > { %v14695_v9 = vperm.slane %v14692_v58, 0  ;;  %v14706_v19 = vperm.slane %v14692_v58, 1  ;;  %v14717_v46 = vperm.slane %v14692_v58, 2  ;;  %v14730_v8 = vperm.slane %v14692_v58, 3 }
 0x700   : > { %v14747_v45 = vperm.slane %v14692_v58, 4  ;;  %v14764_v52 = vperm.slane %v14692_v58, 5 }
 0x701   : > { %v5002_v60 = vmul.f32 %v14695_v9, %v18196_v34  ;;  %v4999_v56 = vmul.f32 %v14695_v9, %v14688_v50  ;;  %v5049_v49 = vmul.f32 %v14706_v19, %v18197_v53  ;;  %v5046_v13 = vmul.f32 %v14706_v19, %v14664_v27 }
 0x702   : > { %v5096_v5 = vmul.f32 %v14717_v46, %v18199_v47  ;;  %v5093_v14 = vmul.f32 %v14717_v46, %v18200_v55  ;;  %v5143_v22 = vmul.f32 %v14730_v8, %v18201_v6  ;;  %v5140_v43 = vmul.f32 %v14730_v8, %v18202_v62  ;;  %18203 = vst [vmem:[#allocation149_spill] sm:$0xff] %v14747_v45 }
 0x703   : > { %5017 = vrot.lane.b32.xlu0 %v5002_v60, %s8319_s30  ;;  %5011 = vrot.lane.b32.xlu2 %v4999_v56, %s8319_s30  ;;  %v5190_v26 = vmul.f32 %v14747_v45, %v18204_v39  ;;  %v5187_v28 = vmul.f32 %v14747_v45, %v14672_v10  ;;  %18205 = vst [vmem:[#allocation151_spill] sm:$0xff] %v14764_v52 }
 0x704   : > { %v4846_v36 = vmul.f32 %v14695_v9, %v18206_v37  ;;  %v4864_v44 = vmul.f32 %v14706_v19, %v18207_v24  ;;  %v5237_v4 = vmul.f32 %v14764_v52, %v14666_v61  ;;  %v5234_v38 = vmul.f32 %v14764_v52, %v14660_v42 }
 0x705   : > { %v4882_v32 = vmul.f32 %v14717_v46, %v18208_v54  ;;  %v4848_v41 = vmul.f32 %v14695_v9, %v14684_v31 }
 0x706   : > { %v4868_v48 = vadd.f32 %v4864_v44, %v4846_v36  ;;  %v18213_v36 = vld [vmem:[#allocation88_spill] sm:$0xff] }
 0x707   : > { %v4902_v44 = vmul.f32 %v14730_v8, %v18213_v36 }
 0x708   : > { %v4886_v56 = vadd.f32 %v4882_v32, %v4868_v48  ;;  %v18214_v32 = vld [vmem:[#allocation128_spill] sm:$0xff] }
 0x70b   : > { %5064 = vrot.lane.b32.xlu0 %v5049_v49, %s8319_s30  ;;  %5058 = vrot.lane.b32.xlu2 %v5046_v13, %s8319_s30  ;;  %v18210_v49 = vld [vmem:[#allocation130_spill] sm:$0xff] }
 0x70c   : > { %v4900_v13 = vmul.f32 %v14730_v8, %v18210_v49 }
 0x713   : > { %5111 = vrot.lane.b32.xlu0 %v5096_v5, %s8319_s30  ;;  %5105 = vrot.lane.b32.xlu2 %v5093_v14, %s8319_s30  ;;  %v18211_v14 = vld [vmem:[#allocation123_spill] sm:$0xff] }
 0x716   : > { %v4820_v57 = vpop.permute.xlu1 %4819 }
 0x717   : > { %v14727_v63 = vsel %vm4821_vm8, %v4818_v29, %v4820_v57  ;;  %4829 = vst.msk [vmem:[#allocation4 + $0x10] sm:$0xff] %vm4821_vm8, %v4820_v57  ;;  %v18209_v29 = vld [vmem:[#allocation121_spill] sm:$0xff]  ;;  %v4884_v57 = vmul.f32 %v14717_v46, %v18211_v14  ;;  %vm18243_vm8 = vmmov %vm18239_vm0 }
 0x718   : > { %v14733_v17 = vperm.slane %v14727_v63, 0  ;;  %v14761_v51 = vperm.slane %v14727_v63, 1  ;;  %v4866_v60 = vmul.f32 %v14706_v19, %v18209_v29 }
 0x71a   : > { %v5000_v18 = vmul.f32 %v14733_v17, %v14688_v50  ;;  %v5003_v30 = vmul.f32 %v14733_v17, %v18196_v34  ;;  %v5047_v21 = vmul.f32 %v14761_v51, %v14664_v27  ;;  %v4870_v5 = vadd.f32 %v4866_v60, %v4848_v41 }
 0x71b   : > { %5158 = vrot.lane.b32.xlu0 %v5143_v22, %s8319_s30  ;;  %5152 = vrot.lane.b32.xlu2 %v5140_v43, %s8319_s30  ;;  %v14794_v22 = vperm.slane %v14692_v58, 6  ;;  %v4936_v41 = vmul.f32 %v14764_v52, %v18214_v32 }
 0x71c   : > { %5013 = vrot.lane.b32.xlu1 %v5000_v18, %s8319_s30  ;;  %v14791_v18 = vpop.permute.xlu2 %5462 }
 0x71e   : > { %v14777_v11 = vld [vmem:[#allocation4 + $0x10] sm:$0xff] }
 0x71f   : > { %v14797_v43 = vperm.slane %v14777_v11, 0 }
 0x723   : > { %5205 = vrot.lane.b32.xlu0 %v5190_v26, %s8319_s30  ;;  %5199 = vrot.lane.b32.xlu2 %v5187_v28, %s8319_s30  ;;  %v18212_v26 = vld [vmem:[#allocation125_spill] sm:$0xff] }
 0x724   : > { %5019 = vrot.lane.b32.xlu1 %v5003_v30, %s8319_s30  ;;  %v4904_v30 = vadd.f32 %v4900_v13, %v4886_v56  ;;  %v4918_v28 = vmul.f32 %v14747_v45, %v18212_v26  ;;  %v4920_v56 = vmul.f32 %v14747_v45, %v18215_v1  ;;  %v5281_v13 = vmul.f32 %v14794_v22, %v14670_v40 }
 0x726   : > { %v4922_v48 = vadd.f32 %v4918_v28, %v4904_v30  ;;  %v18217_v28 = vld [vmem:[#allocation133_spill] sm:$0xff] }
 0x727   : > { %v4938_v59 = vmul.f32 %v14764_v52, %v18217_v28 }
 0x72b   : > { %5252 = vrot.lane.b32.xlu0 %v5237_v4, %s8319_s30  ;;  %5246 = vrot.lane.b32.xlu2 %v5234_v38, %s8319_s30  ;;  %v14804_v4 = vperm.slane %v14692_v58, 7  ;;  %v5050_v38 = vmul.f32 %v14761_v51, %v18197_v53  ;;  %v4940_v58 = vadd.f32 %v4936_v41, %v4922_v48  ;;  %v18219_v48 = vld [vmem:[#allocation142_spill] sm:$0xff] }
 0x72c   : > { %5060 = vrot.lane.b32.xlu1 %v5047_v21, %s8319_s30  ;;  %v4888_v21 = vadd.f32 %v4884_v57, %v4870_v5  ;;  %v5001_v5 = vmul.f32 %v14797_v43, %v14688_v50  ;;  %v18216_v57 = vld [vmem:[#allocation90_spill] sm:$0xff]  ;;  %v4956_v41 = vmul.f32 %v14794_v22, %v18219_v48 }
 0x72d   : > { %v4954_v0 = vmul.f32 %v14794_v22, %v18216_v57  ;;  %v4972_v50 = vmul.f32 %v14804_v4, %v18218_v20 }
 0x72e   : > { %v4906_v60 = vadd.f32 %v4902_v44, %v4888_v21  ;;  %v14824_v21 = vperm.slane %v14727_v63, 2 }
 0x72f   : > { %v4958_v44 = vadd.f32 %v4954_v0, %v4940_v58  ;;  %v5284_v0 = vmul.f32 %v14794_v22, %v14719_v12  ;;  %v14848_v58 = vperm.slane %v14777_v11, 1 }
 0x730   : > { %v4924_v30 = vadd.f32 %v4920_v56, %v4906_v60  ;;  %v18220_v56 = vld [vmem:[#allocation129_spill] sm:$0xff] }
 0x731   : > { %v14830_v23 = vadd.f32 %v4972_v50, %v4958_v44  ;;  %v4974_v52 = vmul.f32 %v14804_v4, %v18220_v56  ;;  %v4865_v44 = vmul.f32 %v14761_v51, %v18207_v24  ;;  %v14860_v50 = vperm.slane %v14727_v63, 4 }
 0x733   : > { %5293 = vrot.lane.b32.xlu0 %v5281_v13, %s8319_s30  ;;  %5015 = vrot.lane.b32.xlu2 %v5001_v5, %s8319_s30  ;;  %v14834_v13 = vpop.permute.xlu2 %5506  ;;  %v5094_v5 = vmul.f32 %v14824_v21, %v18200_v55 }
 0x734   : > { %5066 = vrot.lane.b32.xlu1 %v5050_v38, %s8319_s30  ;;  %v4942_v38 = vadd.f32 %v4938_v59, %v4924_v30  ;;  %v5004_v59 = vmul.f32 %v14797_v43, %v18196_v34  ;;  %v14851_v30 = vperm.slane %v14727_v63, 3  ;;  %v5097_v34 = vmul.f32 %v14824_v21, %v18199_v47 }
 0x736   : > { %v4960_v60 = vadd.f32 %v4956_v41, %v4942_v38  ;;  %v4883_v41 = vmul.f32 %v14824_v21, %v18208_v54  ;;  %v4901_v54 = vmul.f32 %v14851_v30, %v18210_v49  ;;  %v14890_v49 = vperm.slane %v14727_v63, 7 }
 0x738   : > { %v14838_v45 = vadd.f32 %v4974_v52, %v4960_v60  ;;  %v4847_v52 = vmul.f32 %v14733_v17, %v18206_v37  ;;  %v5328_v60 = vmul.f32 %v14804_v4, %v14662_v7  ;;  %v4849_v37 = vmul.f32 %v14733_v17, %v14684_v31 }
 0x73a   : > { %v4869_v38 = vadd.f32 %v4865_v44, %v4847_v52  ;;  %v4867_v52 = vmul.f32 %v14761_v51, %v18209_v29  ;;  %v4919_v44 = vmul.f32 %v14860_v50, %v18212_v26 }
 0x73b   : > { %5299 = vrot.lane.b32.xlu0 %v5284_v0, %s8319_s30  ;;  %5021 = vrot.lane.b32.xlu2 %v5004_v59, %s8319_s30  ;;  %v14870_v24 = vpop.permute.xlu2 %5590  ;;  %v14874_v0 = vperm.slane %v14727_v63, 5 }
 0x73c   : > { %5107 = vrot.lane.b32.xlu1 %v5094_v5, %s8319_s30  ;;  %v5048_v5 = vmul.f32 %v14848_v58, %v14664_v27  ;;  %v4887_v59 = vadd.f32 %v4883_v41, %v4869_v38  ;;  %v14883_v27 = vperm.slane %v14727_v63, 6  ;;  %v4885_v38 = vmul.f32 %v14824_v21, %v18211_v14 }
 0x73d   : > { %v4937_v29 = vmul.f32 %v14874_v0, %v18214_v32  ;;  %v4921_v63 = vmul.f32 %v14860_v50, %v18215_v1  ;;  %v5331_v14 = vmul.f32 %v14804_v4, %v14674_v16  ;;  %v5051_v32 = vmul.f32 %v14848_v58, %v18197_v53 }
 0x73e   : > { %v4905_v31 = vadd.f32 %v4901_v54, %v4887_v59  ;;  %v5141_v59 = vmul.f32 %v14851_v30, %v18202_v62  ;;  %v4955_v26 = vmul.f32 %v14883_v27, %v18216_v57  ;;  %v4939_v57 = vmul.f32 %v14874_v0, %v18217_v28 }
 0x73f   : > { %v4957_v53 = vmul.f32 %v14883_v27, %v18219_v48  ;;  %v5144_v28 = vmul.f32 %v14851_v30, %v18201_v6 }
 0x740   : > { %v4923_v41 = vadd.f32 %v4919_v44, %v4905_v31 }
 0x742   : > { %v4941_v54 = vadd.f32 %v4937_v29, %v4923_v41  ;;  %v4975_v41 = vmul.f32 %v14890_v49, %v18220_v56  ;;  %v5188_v56 = vmul.f32 %v14860_v50, %v14672_v10 }
 0x743   : > { %5340 = vrot.lane.b32.xlu0 %v5328_v60, %s8319_s30  ;;  %5062 = vrot.lane.b32.xlu2 %v5048_v5, %s8319_s30  ;;  %v4903_v5 = vmul.f32 %v14851_v30, %v18213_v36  ;;  %v14911_v44 = vpop.permute.xlu2 %5634 }
 0x744   : > { %5113 = vrot.lane.b32.xlu1 %v5097_v34, %s8319_s30  ;;  %v4871_v34 = vadd.f32 %v4867_v52, %v4849_v37  ;;  %v4959_v36 = vadd.f32 %v4955_v26, %v4941_v54  ;;  %v4973_v52 = vmul.f32 %v14890_v49, %v18218_v20  ;;  %v14947_v26 = vperm.slane %v14777_v11, 3 }
 0x746   : > { %v4889_v60 = vadd.f32 %v4885_v38, %v4871_v34  ;;  %v14915_v1 = vadd.f32 %v4973_v52, %v4959_v36  ;;  %v14920_v38 = vperm.slane %v14777_v11, 2  ;;  %v5145_v36 = vmul.f32 %v14947_v26, %v18201_v6 }
 0x747   : > { %v14972_v52 = vperm.slane %v14777_v11, 4 }
 0x748   : > { %v4907_v37 = vadd.f32 %v4903_v5, %v4889_v60  ;;  %v5377_v60 = vmul.f32 %v14737_v15, %v14695_v9  ;;  %v5095_v5 = vmul.f32 %v14920_v38, %v18200_v55  ;;  %v5098_v54 = vmul.f32 %v14920_v38, %v18199_v47 }
 0x749   : > { %v5189_v6 = vmul.f32 %v14972_v52, %v14672_v10 }
 0x74a   : > { %v4925_v31 = vadd.f32 %v4921_v63, %v4907_v37  ;;  %v5191_v37 = vmul.f32 %v14860_v50, %v18204_v39  ;;  %v5421_v63 = vmul.f32 %v14756_v25, %v14706_v19 }
 0x74b   : > { %5346 = vrot.lane.b32.xlu0 %v5331_v14, %s8319_s30  ;;  %5068 = vrot.lane.b32.xlu2 %v5051_v32, %s8319_s30  ;;  %v14935_v48 = vpop.permute.xlu2 %5682  ;;  %v5235_v14 = vmul.f32 %v14874_v0, %v14660_v42  ;;  %v5424_v32 = vmul.f32 %v14668_v33, %v14706_v19  ;;  %v5465_v19 = vmul.f32 %v14682_v2, %v14717_v46 }
 0x74c   : > { %5154 = vrot.lane.b32.xlu1 %v5141_v59, %s8319_s30  ;;  %v4943_v34 = vadd.f32 %v4939_v57, %v4925_v31  ;;  %v5380_v59 = vmul.f32 %v14678_v3, %v14695_v9  ;;  %v5142_v9 = vmul.f32 %v14947_v26, %v18202_v62  ;;  %v5238_v31 = vmul.f32 %v14874_v0, %v14666_v61 }
 0x74e   : > { %v4961_v20 = vadd.f32 %v4957_v53, %v4943_v34  ;;  %v5282_v34 = vmul.f32 %v14883_v27, %v14670_v40  ;;  %v5468_v53 = vmul.f32 %v14791_v18, %v14717_v46  ;;  %v5509_v46 = vmul.f32 %v14686_v35, %v14730_v8 }
 0x750   : > { %v14926_v29 = vadd.f32 %v4975_v41, %v4961_v20  ;;  %v5192_v20 = vmul.f32 %v14972_v52, %v18204_v39  ;;  %v14997_v41 = vperm.slane %v14777_v11, 5 }
 0x752   : > { %v5236_v39 = vmul.f32 %v14997_v41, %v14660_v42 }
 0x753   : > { %5389 = vrot.lane.b32.xlu0 %v5377_v60, %s8318_s29  ;;  %5109 = vrot.lane.b32.xlu2 %v5095_v5, %s8319_s30  ;;  %v5329_v5 = vmul.f32 %v14890_v49, %v14662_v7 }
 0x754   : > { %5160 = vrot.lane.b32.xlu1 %v5144_v28, %s8319_s30  ;;  %v5285_v28 = vmul.f32 %v14883_v27, %v14719_v12 }
 0x75b   : > { %5395 = vrot.lane.b32.xlu0 %v5380_v59, %s8318_s29  ;;  %5115 = vrot.lane.b32.xlu2 %v5098_v54, %s8319_s30  ;;  %v5512_v59 = vmul.f32 %v14834_v13, %v14730_v8  ;;  %v5239_v54 = vmul.f32 %v14997_v41, %v14666_v61  ;;  %v5332_v61 = vmul.f32 %v14890_v49, %v14674_v16 }
 0x75c   : > { %5201 = vrot.lane.b32.xlu1 %v5188_v56, %s8319_s30 }
 0x75d   : > { %v5012_v55 = vpop.permute.xlu2 %5011 }
 0x763   : > { %5433 = vrot.lane.b32.xlu0 %v5421_v63, %s8318_s29  ;;  %5156 = vrot.lane.b32.xlu2 %v5142_v9, %s8319_s30 }
 0x764   : > { %5207 = vrot.lane.b32.xlu1 %v5191_v37, %s8319_s30 }
 0x765   : > { %v14958_v47 = vpop.permute.xlu2 %5058 }
 0x76b   : > { %5439 = vrot.lane.b32.xlu0 %v5424_v32, %s8318_s29  ;;  %5162 = vrot.lane.b32.xlu2 %v5145_v36, %s8319_s30  ;;  %v18223_v36 = vld [vmem:[#allocation149_spill] sm:$0xff] }
 0x76c   : > { %5248 = vrot.lane.b32.xlu1 %v5235_v14, %s8319_s30  ;;  %v15022_v14 = vperm.slane %v14777_v11, 6 }
 0x76d   : > { %v14969_v62 = vpop.permute.xlu2 %5105 }
 0x773   : > { %5477 = vrot.lane.b32.xlu0 %v5465_v19, %s8318_s29  ;;  %5203 = vrot.lane.b32.xlu2 %v5189_v6, %s8319_s30  ;;  %v5283_v6 = vmul.f32 %v15022_v14, %v14670_v40  ;;  %v5378_v40 = vmul.f32 %v14737_v15, %v14733_v17 }
 0x774   : > { %5254 = vrot.lane.b32.xlu1 %v5238_v31, %s8319_s30  ;;  %v18224_v31 = vld [vmem:[#allocation143_spill] sm:$0xff] }
 0x775   : > { %v14983_v57 = vpop.permute.xlu2 %5152  ;;  %v5018_v56 = vpop.permute.xlu0 %5017  ;;  %v5553_v19 = vmul.f32 %v18224_v31, %v18223_v36 }
 0x77b   : > { %5483 = vrot.lane.b32.xlu0 %v5468_v53, %s8318_s29  ;;  %5209 = vrot.lane.b32.xlu2 %v5192_v20, %s8319_s30 }
 0x77c   : > { %5295 = vrot.lane.b32.xlu1 %v5282_v34, %s8319_s30 }
 0x77d   : > { %v14994_v10 = vpop.permute.xlu2 %5199 }
 0x783   : > { %5521 = vrot.lane.b32.xlu0 %v5509_v46, %s8318_s29  ;;  %5250 = vrot.lane.b32.xlu2 %v5236_v39, %s8319_s30  ;;  %v18227_v46 = vld [vmem:[#allocation145_spill] sm:$0xff] }
 0x784   : > { %5301 = vrot.lane.b32.xlu1 %v5285_v28, %s8319_s30  ;;  %v5556_v39 = vmul.f32 %v18227_v46, %v18223_v36 }
 0x785   : > { %v15008_v60 = vpop.permute.xlu2 %5246 }
 0x78b   : > { %5527 = vrot.lane.b32.xlu0 %v5512_v59, %s8318_s29  ;;  %5256 = vrot.lane.b32.xlu2 %v5239_v54, %s8319_s30 }
 0x78c   : > { %5342 = vrot.lane.b32.xlu1 %v5329_v5, %s8319_s30  ;;  %v5286_v5 = vmul.f32 %v15022_v14, %v14719_v12  ;;  %v5381_v12 = vmul.f32 %v14678_v3, %v14733_v17 }
 0x78d   : > { %v5016_v63 = vpop.permute.xlu2 %5015 }
 0x78e   : > { %v5014_v42 = vpop.permute.xlu1 %5013 }
 0x78f   : > { %v5023_v37 = vsel %vm18221_vm3, %v5012_v55, %v5014_v42  ;;  %v5024_v8 = vsel %vm18222_vm15, %v5014_v42, %v5016_v63  ;;  %v5065_v55 = vpop.permute.xlu0 %5064  ;;  %v15051_v42 = vperm.slane %v14777_v11, 7  ;;  %vm18244_vm3 = vmmov %vm18239_vm0 }
 0x790   : > { %v5031_v9 = vadd.f32 %v5023_v37, %v14830_v23  ;;  %v5032_v32 = vadd.f32 %v5024_v8, %v14915_v1  ;;  %v18230_v8 = vld [vmem:[#allocation151_spill] sm:$0xff]  ;;  %vm18245_vm15 = vmmov %vm18239_vm0 }
 0x791   : > { %v5330_v36 = vmul.f32 %v15051_v42, %v14662_v7  ;;  %v18233_v7 = vld [vmem:[#allocation146_spill] sm:$0xff] }
 0x793   : > { %5565 = vrot.lane.b32.xlu0 %v5553_v19, %s8318_s29  ;;  %5297 = vrot.lane.b32.xlu2 %v5283_v6, %s8319_s30 }
 0x794   : > { %5348 = vrot.lane.b32.xlu1 %v5332_v61, %s8319_s30  ;;  %v5597_v61 = vmul.f32 %v14870_v24, %v18230_v8 }
 0x795   : > { %v5022_v1 = vpop.permute.xlu2 %5021 }
 0x796   : > { %v5020_v23 = vpop.permute.xlu1 %5019 }
 0x797   : > { %v5025_v34 = vsel %vm18225_vm5, %v5018_v56, %v5020_v23  ;;  %v5026_v20 = vsel %vm18226_vm9, %v5020_v23, %v5022_v1  ;;  %v5422_v23 = vmul.f32 %v14756_v25, %v14761_v51  ;;  %v5333_v1 = vmul.f32 %v15051_v42, %v14674_v16  ;;  %vm18246_vm5 = vmmov %vm18239_vm0 }
 0x798   : > { %v5033_v53 = vadd.f32 %v5025_v34, %v14838_v45  ;;  %v5034_v28 = vadd.f32 %v5026_v20, %v14926_v29  ;;  %v5112_v29 = vpop.permute.xlu0 %5111  ;;  %v5600_v34 = vmul.f32 %v18233_v7, %v18230_v8  ;;  %v5641_v16 = vmul.f32 %v14911_v44, %v14794_v22  ;;  %v18238_v8 = vld [vmem:[#allocation144_spill] sm:$0xff]  ;;  %vm18247_vm9 = vmmov %vm18239_vm0 }
 0x79b   : > { %5571 = vrot.lane.b32.xlu0 %v5556_v39, %s8318_s29  ;;  %5303 = vrot.lane.b32.xlu2 %v5286_v5, %s8319_s30  ;;  %v5425_v5 = vmul.f32 %v14668_v33, %v14761_v51 }
 0x79c   : > { %5391 = vrot.lane.b32.xlu1 %v5378_v40, %s8318_s29 }
 0x79d   : > { %v5063_v59 = vpop.permute.xlu2 %5062 }
 0x79e   : > { %v5061_v45 = vpop.permute.xlu1 %5060 }
 0x79f   : > { %v5070_v56 = vsel %vm18228_vm7, %v14958_v47, %v5061_v45  ;;  %v5071_v37 = vsel %vm18229_vm4, %v5061_v45, %v5063_v59  ;;  %vm18248_vm7 = vmmov %vm18239_vm0 }
 0x7a0   : > { %v5078_v54 = vadd.f32 %v5070_v56, %v5031_v9  ;;  %v5079_v63 = vadd.f32 %v5071_v37, %v5032_v32  ;;  %v5159_v17 = vpop.permute.xlu0 %5158  ;;  %v5379_v56 = vmul.f32 %v14737_v15, %v14797_v43  ;;  %v5644_v15 = vmul.f32 %v18238_v8, %v14794_v22  ;;  %vm18249_vm4 = vmmov %vm18239_vm0 }
 0x7a3   : > { %5609 = vrot.lane.b32.xlu0 %v5597_v61, %s8318_s29  ;;  %5344 = vrot.lane.b32.xlu2 %v5330_v36, %s8319_s30  ;;  %v5382_v61 = vmul.f32 %v14678_v3, %v14797_v43  ;;  %v5469_v3 = vmul.f32 %v14791_v18, %v14824_v21  ;;  %v18241_v43 = vld [vmem:[#allocation148_spill] sm:$0xff] }
 0x7a4   : > { %5397 = vrot.lane.b32.xlu1 %v5381_v12, %s8318_s29  ;;  %v5466_v12 = vmul.f32 %v14682_v2, %v14824_v21 }
 0x7a5   : > { %v5069_v9 = vpop.permute.xlu2 %5068 }
 0x7a6   : > { %v5067_v11 = vpop.permute.xlu1 %5066 }
 0x7a7   : > { %v5072_v47 = vsel %vm18231_vm6, %v5065_v55, %v5067_v11  ;;  %v5073_v19 = vsel %vm18232_vm1, %v5067_v11, %v5069_v9  ;;  %vm18250_vm6 = vmmov %vm18239_vm0 }
 0x7a8   : > { %v5080_v32 = vadd.f32 %v5072_v47, %v5033_v53  ;;  %v5081_v6 = vadd.f32 %v5073_v19, %v5034_v28  ;;  %v5206_v45 = vpop.permute.xlu0 %5205  ;;  %v5685_v19 = vmul.f32 %v18241_v43, %v14804_v4  ;;  %vm18251_vm1 = vmmov %vm18239_vm0 }
 0x7ab   : > { %5615 = vrot.lane.b32.xlu0 %v5600_v34, %s8318_s29  ;;  %5350 = vrot.lane.b32.xlu2 %v5333_v1, %s8319_s30 }
 0x7ac   : > { %5435 = vrot.lane.b32.xlu1 %v5422_v23, %s8318_s29 }
 0x7ad   : > { %v5110_v20 = vpop.permute.xlu2 %5109 }
 0x7ae   : > { %v5108_v55 = vpop.permute.xlu1 %5107 }
 0x7af   : > { %v5117_v53 = vsel %vm18234_vm12, %v14969_v62, %v5108_v55  ;;  %v5118_v40 = vsel %vm18235_vm13, %v5108_v55, %v5110_v20  ;;  %v5510_v20 = vmul.f32 %v14686_v35, %v14851_v30  ;;  %vm18252_vm12 = vmmov %vm18239_vm0 }
 0x7b0   : > { %v5125_v28 = vadd.f32 %v5117_v53, %v5078_v54  ;;  %v5126_v39 = vadd.f32 %v5118_v40, %v5079_v63  ;;  %v15095_v36 = vpop.permute.xlu0 %5252  ;;  %vm18253_vm13 = vmmov %vm18239_vm0 }
 0x7b3   : > { %5653 = vrot.lane.b32.xlu0 %v5641_v16, %s8318_s29  ;;  %5393 = vrot.lane.b32.xlu2 %v5379_v56, %s8318_s29 }
 0x7b4   : > { %5441 = vrot.lane.b32.xlu1 %v5425_v5, %s8318_s29 }
 0x7b5   : > { %v5116_v54 = vpop.permute.xlu2 %5115 }
 0x7b6   : > { %v5114_v62 = vpop.permute.xlu1 %5113 }
 0x7b7   : > { %v5119_v59 = vsel %vm18236_vm11, %v5112_v29, %v5114_v62  ;;  %v5120_v51 = vsel %vm18237_vm14, %v5114_v62, %v5116_v54  ;;  %vm18254_vm11 = vmmov %vm18239_vm0 }
 0x7b8   : > { %v5127_v37 = vadd.f32 %v5119_v59, %v5080_v32  ;;  %v5128_v63 = vadd.f32 %v5120_v51, %v5081_v6  ;;  %v5423_v6 = vmul.f32 %v14756_v25, %v14848_v58  ;;  %v5294_v34 = vpop.permute.xlu0 %5293  ;;  %v5688_v25 = vmul.f32 %v14935_v48, %v14804_v4  ;;  %vm18255_vm14 = vmmov %vm18239_vm0 }
 0x7b9   : > { %v5513_v4 = vmul.f32 %v14834_v13, %v14851_v30  ;;  %v5554_v30 = vmul.f32 %v18224_v31, %v14860_v50 }
 0x7bb   : > { %5659 = vrot.lane.b32.xlu0 %v5644_v15, %s8318_s29  ;;  %5399 = vrot.lane.b32.xlu2 %v5382_v61, %s8318_s29 }
 0x7bc   : > { %5479 = vrot.lane.b32.xlu1 %v5466_v12, %s8318_s29 }
 0x7bd   : > { %v5157_v47 = vpop.permute.xlu2 %5156 }
 0x7be   : > { %v5155_v29 = vpop.permute.xlu1 %5154 }
 0x7bf   : > { %v5164_v11 = vsel %vm18239_vm0, %v14983_v57, %v5155_v29  ;;  %v5165_v32 = vsel %vm18240_vm2, %v5155_v29, %v5157_v47  ;;  %vm18256_vm2 = vmmov %vm18239_vm0 }
 0x7c0   : > { %v5172_v9 = vadd.f32 %v5164_v11, %v5125_v28  ;;  %v5173_v22 = vadd.f32 %v5165_v32, %v5126_v39  ;;  %v5426_v28 = vmul.f32 %v14668_v33, %v14848_v58  ;;  %v5300_v56 = vpop.permute.xlu0 %5299  ;;  %v5799_v33 = vld [vmem:[#allocation14] sm:$0xff]  ;;  %v5467_v58 = vmul.f32 %v14682_v2, %v14920_v38 }
 0x7c1   : > { %v5470_v2 = vmul.f32 %v14791_v18, %v14920_v38  ;;  %v5511_v32 = vmul.f32 %v14686_v35, %v14947_v26  ;;  %v5514_v35 = vmul.f32 %v14834_v13, %v14947_v26 }
 0x7c3   : > { %5697 = vrot.lane.b32.xlu0 %v5685_v19, %s8318_s29  ;;  %5437 = vrot.lane.b32.xlu2 %v5423_v6, %s8318_s29 }
 0x7c4   : > { %5485 = vrot.lane.b32.xlu1 %v5469_v3, %s8318_s29 }
 0x7c5   : > { %v5163_v1 = vpop.permute.xlu2 %5162 }
 0x7c6   : > { %v5161_v57 = vpop.permute.xlu1 %5160 }
 0x7c7   : > { %v5166_v23 = vsel %vm18242_vm10, %v5159_v17, %v5161_v57  ;;  %v5167_v21 = vsel %vm18243_vm8, %v5161_v57, %v5163_v1  ;;  %vm18257_vm10 = vmmov %vm18239_vm0 }
 0x7c8   : > { %v5174_v55 = vadd.f32 %v5166_v23, %v5127_v37  ;;  %v5175_v53 = vadd.f32 %v5167_v21, %v5128_v63  ;;  %v5341_v12 = vpop.permute.xlu0 %5340  ;;  %vm18258_vm8 = vmmov %vm18239_vm0 }
 0x7cb   : > { %5703 = vrot.lane.b32.xlu0 %v5688_v25, %s8318_s29  ;;  %5443 = vrot.lane.b32.xlu2 %v5426_v28, %s8318_s29  ;;  %v5555_v25 = vmul.f32 %v18224_v31, %v14972_v52 }
 0x7cc   : > { %5523 = vrot.lane.b32.xlu1 %v5510_v20, %s8318_s29  ;;  %v5601_v20 = vmul.f32 %v18233_v7, %v14874_v0 }
 0x7cd   : > { %v5204_v39 = vpop.permute.xlu2 %5203 }
 0x7ce   : > { %v5202_v17 = vpop.permute.xlu1 %5201 }
 0x7cf   : > { %v5211_v40 = vsel %vm18244_vm3, %v14994_v10, %v5202_v17  ;;  %v5212_v16 = vsel %vm18245_vm15, %v5202_v17, %v5204_v39  ;;  %vm18259_vm3 = vcmask 1031168  }
 0x7d0   : > { %v5219_v5 = vadd.f32 %v5211_v40, %v5172_v9  ;;  %v5220_v62 = vadd.f32 %v5212_v16, %v5173_v22  ;;  %v5557_v9 = vmul.f32 %v18227_v46, %v14860_v50  ;;  %v5347_v18 = vpop.permute.xlu0 %5346  ;;  %v5598_v50 = vmul.f32 %v14870_v24, %v14874_v0  ;;  %vm18260_vm15 = vmmov %vm18259_vm3 }
 0x7d1   : > { %v5558_v0 = vmul.f32 %v18227_v46, %v14972_v52 }
 0x7d3   : > { %5803 = vperm.xlu0 %8032, %v5799_v33   ;;  %5481 = vrot.lane.b32.xlu2 %v5467_v58, %s8318_s29  ;;  %v5645_v58 = vmul.f32 %v18238_v8, %v14883_v27 }
 0x7d4   : > { %5529 = vrot.lane.b32.xlu1 %v5513_v4, %s8318_s29 }
 0x7d5   : > { %v5210_v54 = vpop.permute.xlu2 %5209 }
 0x7d6   : > { %v5208_v59 = vpop.permute.xlu1 %5207 }
 0x7d7   : > { %v5213_v10 = vsel %vm18246_vm5, %v5206_v45, %v5208_v59  ;;  %v5214_v51 = vsel %vm18247_vm9, %v5208_v59, %v5210_v54  ;;  %vm18261_vm5 = vmmov %vm18259_vm3 }
 0x7d8   : > { %v5221_v37 = vadd.f32 %v5213_v10, %v5174_v55  ;;  %v5222_v63 = vadd.f32 %v5214_v51, %v5175_v53  ;;  %v5390_v1 = vpop.permute.xlu0 %5389  ;;  %v5599_v10 = vmul.f32 %v14870_v24, %v14997_v41  ;;  %vm18262_vm9 = vmmov %vm18259_vm3 }
 0x7db   : > { %5487 = vrot.lane.b32.xlu2 %v5470_v2, %s8318_s29 }
 0x7dc   : > { %5567 = vrot.lane.b32.xlu1 %v5554_v30, %s8318_s29  ;;  %v5686_v30 = vmul.f32 %v18241_v43, %v14890_v49 }
 0x7dd   : > { %v5251_v61 = vpop.permute.xlu2 %5250 }
 0x7de   : > { %v5249_v15 = vpop.permute.xlu1 %5248 }
 0x7df   : > { %v5258_v45 = vsel %vm18248_vm7, %v15008_v60, %v5249_v15  ;;  %v5259_v11 = vsel %vm18249_vm4, %v5249_v15, %v5251_v61  ;;  %vm18263_vm7 = vmmov %vm18259_vm3 }
 0x7e0   : > { %v5266_v29 = vadd.f32 %v5258_v45, %v5219_v5  ;;  %v5267_v47 = vadd.f32 %v5259_v11, %v5220_v62  ;;  %v5396_v40 = vpop.permute.xlu0 %5395  ;;  %v5642_v5 = vmul.f32 %v14911_v44, %v14883_v27  ;;  %v5602_v27 = vmul.f32 %v18233_v7, %v14997_v41  ;;  %vm18264_vm4 = vmmov %vm18259_vm3 }
 0x7e1   : > { %v5689_v11 = vmul.f32 %v14935_v48, %v14890_v49 }
 0x7e3   : > { %5525 = vrot.lane.b32.xlu2 %v5511_v32, %s8318_s29 }
 0x7e4   : > { %5573 = vrot.lane.b32.xlu1 %v5557_v9, %s8318_s29 }
 0x7e5   : > { %v5257_v22 = vpop.permute.xlu2 %5256 }
 0x7e6   : > { %v5255_v38 = vpop.permute.xlu1 %5254 }
 0x7e7   : > { %v5260_v60 = vsel %vm18250_vm6, %v15095_v36, %v5255_v38  ;;  %v5261_v19 = vsel %vm18251_vm1, %v5255_v38, %v5257_v22  ;;  %v5646_v22 = vmul.f32 %v18238_v8, %v15022_v14  ;;  %vm18265_vm6 = vmmov %vm18259_vm3 }
 0x7e8   : > { %v5268_v3 = vadd.f32 %v5260_v60, %v5221_v37  ;;  %v5269_v6 = vadd.f32 %v5261_v19, %v5222_v63  ;;  %v5434_v59 = vpop.permute.xlu0 %5433  ;;  %vm18266_vm1 = vmmov %vm18259_vm3 }
 0x7eb   : > { %5531 = vrot.lane.b32.xlu2 %v5514_v35, %s8318_s29 }
 0x7ec   : > { %5611 = vrot.lane.b32.xlu1 %v5598_v50, %s8318_s29 }
 0x7ed   : > { %v5298_v36 = vpop.permute.xlu2 %5297 }
 0x7ee   : > { %v5296_v57 = vpop.permute.xlu1 %5295 }
 0x7ef   : > { %v5305_v23 = vsel %vm18252_vm12, %v5294_v34, %v5296_v57  ;;  %v5306_v21 = vsel %vm18253_vm13, %v5296_v57, %v5298_v36  ;;  %v5687_v57 = vmul.f32 %v18241_v43, %v15051_v42  ;;  %vm18267_vm12 = vmmov %vm18266_vm1 }
 0x7f0   : > { %v5313_v55 = vadd.f32 %v5305_v23, %v5266_v29  ;;  %v5314_v53 = vadd.f32 %v5306_v21, %v5267_v47  ;;  %v5440_v24 = vpop.permute.xlu0 %5439  ;;  %v5643_v47 = vmul.f32 %v14911_v44, %v15022_v14  ;;  %vm18268_vm13 = vmmov %vm18266_vm1 }
 0x7f3   : > { %5569 = vrot.lane.b32.xlu2 %v5555_v25, %s8318_s29 }
 0x7f4   : > { %5617 = vrot.lane.b32.xlu1 %v5601_v20, %s8318_s29 }
 0x7f5   : > { %v5304_v34 = vpop.permute.xlu2 %5303 }
 0x7f6   : > { %v5302_v13 = vpop.permute.xlu1 %5301 }
 0x7f7   : > { %v5307_v26 = vsel %vm18254_vm11, %v5300_v56, %v5302_v13  ;;  %v5308_v17 = vsel %vm18255_vm14, %v5302_v13, %v5304_v34  ;;  %vm18269_vm11 = vmmov %vm18266_vm1 }
 0x7f8   : > { %v5315_v28 = vadd.f32 %v5307_v26, %v5268_v3  ;;  %v5316_v39 = vadd.f32 %v5308_v17, %v5269_v6  ;;  %v5478_v9 = vpop.permute.xlu0 %5477  ;;  %vm18270_vm14 = vmmov %vm18266_vm1 }
 0x7fb   : > { %5575 = vrot.lane.b32.xlu2 %v5558_v0, %s8318_s29 }
 0x7fc   : > { %5655 = vrot.lane.b32.xlu1 %v5642_v5, %s8318_s29 }
 0x7fd   : > { %v5345_v56 = vpop.permute.xlu2 %5344 }
 0x7fe   : > { %v5343_v31 = vpop.permute.xlu1 %5342 }
 0x7ff   : > { %v5352_v16 = vsel %vm18239_vm0, %v5341_v12, %v5343_v31  ;;  %v5353_v4 = vsel %vm18256_vm2, %v5343_v31, %v5345_v56  ;;  %vm18271_vm0 = vmmov %vm18266_vm1 }
 0x800   : > { %v5360_v62 = vadd.f32 %v5352_v16, %v5313_v55  ;;  %v5361_v33 = vadd.f32 %v5353_v4, %v5314_v53  ;;  %v5484_v50 = vpop.permute.xlu0 %5483  ;;  %v5690_v53 = vmul.f32 %v14935_v48, %v15051_v42  ;;  %vm18272_vm2 = vmmov %vm18271_vm0 }
 0x803   : > { %5613 = vrot.lane.b32.xlu2 %v5599_v10, %s8318_s29 }
 0x804   : > { %5661 = vrot.lane.b32.xlu1 %v5645_v58, %s8318_s29 }
 0x805   : > { %v5351_v54 = vpop.permute.xlu2 %5350 }
 0x806   : > { %v5349_v52 = vpop.permute.xlu1 %5348 }
 0x807   : > { %v5354_v46 = vsel %vm18257_vm10, %v5347_v18, %v5349_v52  ;;  %v5355_v51 = vsel %vm18258_vm8, %v5349_v52, %v5351_v54  ;;  %vm18273_vm10 = vmmov %vm18271_vm0 }
 0x808   : > { %v5362_v37 = vadd.f32 %v5354_v46, %v5315_v28  ;;  %v5363_v63 = vadd.f32 %v5355_v51, %v5316_v39  ;;  %v5522_v21 = vpop.permute.xlu0 %5521  ;;  %vm18274_vm8 = vmmov %vm18271_vm0 }
 0x80b   : > { %5619 = vrot.lane.b32.xlu2 %v5602_v27, %s8318_s29 }
 0x80c   : > { %5699 = vrot.lane.b32.xlu1 %v5686_v30, %s8318_s29 }
 0x80d   : > { %v5394_v15 = vpop.permute.xlu2 %5393 }
 0x80e   : > { %v5392_v12 = vpop.permute.xlu1 %5391 }
 0x80f   : > { %v5401_v2 = vsel %vm18259_vm3, %v5390_v1, %v5392_v12  ;;  %v5402_v61 = vsel %vm18260_vm15, %v5392_v12, %v5394_v15  ;;  %vm18275_vm3 = vmmov %vm18271_vm0 }
 0x810   : > { %v5409_v45 = vadd.f32 %v5401_v2, %v5360_v62  ;;  %v5410_v29 = vadd.f32 %v5402_v61, %v5361_v33  ;;  %v5528_v28 = vpop.permute.xlu0 %5527  ;;  %vm18276_vm15 = vmmov %vm18271_vm0 }
 0x813   : > { %5657 = vrot.lane.b32.xlu2 %v5643_v47, %s8318_s29 }
 0x814   : > { %5705 = vrot.lane.b32.xlu1 %v5689_v11, %s8318_s29 }
 0x815   : > { %v5400_v32 = vpop.permute.xlu2 %5399 }
 0x816   : > { %v5398_v41 = vpop.permute.xlu1 %5397 }
 0x817   : > { %v5403_v7 = vsel %vm18261_vm5, %v5396_v40, %v5398_v41  ;;  %v5404_v38 = vsel %vm18262_vm9, %v5398_v41, %v5400_v32  ;;  %vm18277_vm5 = vmmov %vm18271_vm0 }
 0x818   : > { %v5411_v18 = vadd.f32 %v5403_v7, %v5362_v37  ;;  %v5412_v60 = vadd.f32 %v5404_v38, %v5363_v63  ;;  %v5566_v16 = vpop.permute.xlu0 %5565  ;;  %vm18278_vm9 = vmmov %vm18271_vm0 }
 0x81b   : > { %5663 = vrot.lane.b32.xlu2 %v5646_v22, %s8318_s29 }
 0x81d   : > { %v5438_v3 = vpop.permute.xlu2 %5437 }
 0x81e   : > { %v5436_v49 = vpop.permute.xlu1 %5435 }
 0x81f   : > { %v5445_v44 = vsel %vm18263_vm7, %v5434_v59, %v5436_v49  ;;  %v5446_v6 = vsel %vm18264_vm4, %v5436_v49, %v5438_v3  ;;  %vm18279_vm7 = vmmov %vm18271_vm0 }
 0x820   : > { %v5453_v19 = vadd.f32 %v5445_v44, %v5409_v45  ;;  %v5454_v35 = vadd.f32 %v5446_v6, %v5410_v29  ;;  %v5572_v10 = vpop.permute.xlu0 %5571  ;;  %v5800_v29 = vld [vmem:[#allocation14 + $0x8] sm:$0xff]  ;;  %vm18280_vm4 = vmmov %vm18271_vm0 }
 0x821   : > { %5808 = vperm.xlu1 %8035, %v5800_v29  }
 0x823   : > { %5701 = vrot.lane.b32.xlu2 %v5687_v57, %s8318_s29 }
 0x825   : > { %v5444_v14 = vpop.permute.xlu2 %5443 }
 0x826   : > { %v5442_v23 = vpop.permute.xlu1 %5441 }
 0x827   : > { %v5447_v1 = vsel %vm18265_vm6, %v5440_v24, %v5442_v23  ;;  %v5448_v36 = vsel %vm18266_vm1, %v5442_v23, %v5444_v14  ;;  %vm18281_vm6 = vmmov %vm18271_vm0 }
 0x828   : > { %v5455_v8 = vadd.f32 %v5447_v1, %v5411_v18  ;;  %v5456_v55 = vadd.f32 %v5448_v36, %v5412_v60  ;;  %v5610_v54 = vpop.permute.xlu0 %5609  ;;  %vm18282_vm1 = vmmov %vm18271_vm0 }
 0x82b   : > { %5707 = vrot.lane.b32.xlu2 %v5690_v53, %s8318_s29 }
 0x82d   : > { %v5482_v43 = vpop.permute.xlu2 %5481 }
 0x82e   : > { %v5480_v20 = vpop.permute.xlu1 %5479 }
 0x82f   : > { %v5489_v25 = vsel %vm18267_vm12, %v5478_v9, %v5480_v20  ;;  %v5490_v26 = vsel %vm18268_vm13, %v5480_v20, %v5482_v43  ;;  %vm18283_vm12 = vmmov %vm18271_vm0 }
 0x830   : > { %v5497_v13 = vadd.f32 %v5489_v25, %v5453_v19  ;;  %v5498_v34 = vadd.f32 %v5490_v26, %v5454_v35  ;;  %v5616_v63 = vpop.permute.xlu0 %5615  ;;  %vm18284_vm13 = vmmov %vm18271_vm0 }
 0x835   : > { %v5488_v39 = vpop.permute.xlu2 %5487 }
 0x836   : > { %v5486_v17 = vpop.permute.xlu1 %5485 }
 0x837   : > { %v5491_v40 = vsel %vm18269_vm11, %v5484_v50, %v5486_v17  ;;  %v5492_v0 = vsel %vm18270_vm14, %v5486_v17, %v5488_v39  ;;  %vm18285_vm11 = vmmov %vm18271_vm0 }
 0x838   : > { %v5499_v5 = vadd.f32 %v5491_v40, %v5455_v8  ;;  %v5500_v31 = vadd.f32 %v5492_v0, %v5456_v55  ;;  %v5654_v12 = vpop.permute.xlu0 %5653  ;;  %vm18286_vm14 = vmmov %vm18271_vm0 }
 0x83d   : > { %v5526_v56 = vpop.permute.xlu2 %5525 }
 0x83e   : > { %v5524_v48 = vpop.permute.xlu1 %5523 }
 0x83f   : > { %v5533_v42 = vsel %vm18271_vm0, %v5522_v21, %v5524_v48  ;;  %v5534_v4 = vsel %vm18272_vm2, %v5524_v48, %v5526_v56  ;;  %vm18287_vm2 = vmmov %vm18271_vm0 }
 0x840   : > { %v5541_v62 = vadd.f32 %v5533_v42, %v5497_v13  ;;  %v5542_v33 = vadd.f32 %v5534_v4, %v5498_v34  ;;  %v5660_v61 = vpop.permute.xlu0 %5659 }
 0x845   : > { %v5532_v59 = vpop.permute.xlu2 %5531 }
 0x846   : > { %v5530_v58 = vpop.permute.xlu1 %5529 }
 0x847   : > { %v5535_v6 = vsel %vm18279_vm7, %v5528_v28, %v5530_v58  ;;  %v5536_v50 = vsel %vm18280_vm4, %v5530_v58, %v5532_v59 }
 0x848   : > { %v5698_v18 = vpop.permute.xlu0 %5697  ;;  %v5543_v55 = vadd.f32 %v5535_v6, %v5499_v5  ;;  %v5544_v21 = vadd.f32 %v5536_v50, %v5500_v31 }
 0x84d   : > { %v5570_v46 = vpop.permute.xlu2 %5569 }
 0x84e   : > { %v5568_v52 = vpop.permute.xlu1 %5567 }
 0x84f   : > { %v5577_v41 = vsel %vm18273_vm10, %v5566_v16, %v5568_v52  ;;  %v5578_v7 = vsel %vm18274_vm8, %v5568_v52, %v5570_v46  ;;  %vm18288_vm10 = vmmov %vm18271_vm0 }
 0x850   : > { %v5585_v38 = vadd.f32 %v5577_v41, %v5541_v62  ;;  %v5586_v60 = vadd.f32 %v5578_v7, %v5542_v33  ;;  %v5704_v40 = vpop.permute.xlu0 %5703  ;;  %vm18289_vm8 = vmmov %vm18271_vm0 }
 0x855   : > { %v5576_v51 = vpop.permute.xlu2 %5575 }
 0x856   : > { %v5574_v37 = vpop.permute.xlu1 %5573 }
 0x857   : > { %v5579_v14 = vsel %vm18282_vm1, %v5572_v10, %v5574_v37  ;;  %v5580_v8 = vsel %vm18283_vm12, %v5574_v37, %v5576_v51 }
 0x858   : > { %v5587_v13 = vadd.f32 %v5579_v14, %v5543_v55  ;;  %v5588_v26 = vadd.f32 %v5580_v8, %v5544_v21  ;;  %v5818_v8 = vld [vmem:[#allocation16 + $0x8] sm:$0xff] }
 0x85d   : > { %v5614_v27 = vpop.permute.xlu2 %5613 }
 0x85e   : > { %v5612_v30 = vpop.permute.xlu1 %5611 }
 0x85f   : > { %v5621_v9 = vsel %vm18275_vm3, %v5610_v54, %v5612_v30  ;;  %v5622_v32 = vsel %vm18276_vm15, %v5612_v30, %v5614_v27 }
 0x860   : > { %v5629_v44 = vadd.f32 %v5621_v9, %v5585_v38  ;;  %v5630_v3 = vadd.f32 %v5622_v32, %v5586_v60  ;;  %v5804_v9 = vpop.permute.xlu0 %5803 }
 0x865   : > { %v5620_v2 = vpop.permute.xlu2 %5619 }
 0x866   : > { %v5618_v24 = vpop.permute.xlu1 %5617 }
 0x867   : > { %v5623_v25 = vsel %vm18285_vm11, %v5616_v63, %v5618_v24  ;;  %v5624_v43 = vsel %vm18286_vm14, %v5618_v24, %v5620_v2 }
 0x868   : > { %v5631_v39 = vadd.f32 %v5623_v25, %v5587_v13  ;;  %v5632_v0 = vadd.f32 %v5624_v43, %v5588_v26 }
 0x86d   : > { %v5658_v45 = vpop.permute.xlu2 %5657 }
 0x86e   : > { %v5656_v15 = vpop.permute.xlu1 %5655 }
 0x86f   : > { %v5665_v22 = vsel %vm18277_vm5, %v5654_v12, %v5656_v15  ;;  %v5666_v49 = vsel %vm18278_vm9, %v5656_v15, %v5658_v45  ;;  %vm5853_vm5 = vcmask 0  }
 0x870   : > { %v5673_v57 = vadd.f32 %v5665_v22, %v5629_v44  ;;  %v5674_v23 = vadd.f32 %v5666_v49, %v5630_v3  ;;  %v5817_v3 = vld [vmem:[#allocation16] sm:$0xff] }
 0x875   : > { %v5664_v47 = vpop.permute.xlu2 %5663 }
 0x876   : > { %v5662_v11 = vpop.permute.xlu1 %5661 }
 0x877   : > { %v5667_v28 = vsel %vm18271_vm0, %v5660_v61, %v5662_v11  ;;  %v5668_v17 = vsel %vm18287_vm2, %v5662_v11, %v5664_v47 }
 0x878   : > { %v5675_v16 = vadd.f32 %v5667_v28, %v5631_v39  ;;  %v5676_v56 = vadd.f32 %v5668_v17, %v5632_v0  ;;  %v5832_v28 = vld [vmem:[#allocation5] sm:$0x1] }
 0x87d   : > { %v5702_v1 = vpop.permute.xlu2 %5701 }
 0x87e   : > { %v5700_v19 = vpop.permute.xlu1 %5699 }
 0x87f   : > { %v5709_v35 = vsel %vm18281_vm6, %v5698_v18, %v5700_v19  ;;  %v5710_v36 = vsel %vm18284_vm13, %v5700_v19, %v5702_v1 }
 0x880   : > { %v5717_v53 = vadd.f32 %v5709_v35, %v5673_v57  ;;  %v5718_v20 = vadd.f32 %v5710_v36, %v5674_v23 }
 0x882   : > { %v5721_v34 = vpack.c.bf16 %v5718_v20, %v5717_v53 }
 0x884   : > { %v5723_v48 = vunpack.c.l.bf16 %v5721_v34  ;;  %v5724_v42 = vunpack.c.h.bf16 %v5721_v34  ;;  %v5763_v46 = vunpack.c.l.b16 %v5721_v34  ;;  %v5764_v54 = vunpack.c.h.b16 %v5721_v34 }
 0x885   : > { %v5708_v33 = vpop.permute.xlu2 %5707 }
 0x886   : > { %v5706_v5 = vpop.permute.xlu1 %5705  ;;  %v5727_v62 = vsub.f32 %v5717_v53, %v5723_v48  ;;  %v5728_v4 = vsub.f32 %v5718_v20, %v5724_v42 }
 0x887   : > { %v5711_v31 = vsel %vm18288_vm10, %v5704_v40, %v5706_v5  ;;  %v5712_v58 = vsel %vm18289_vm8, %v5706_v5, %v5708_v33 }
 0x888   : > { %v5719_v59 = vadd.f32 %v5711_v31, %v5675_v16  ;;  %v5720_v10 = vadd.f32 %v5712_v58, %v5676_v56 }
 0x88a   : > { %v5722_v52 = vpack.c.bf16 %v5720_v10, %v5719_v59 }
 0x88c   : > { %v5725_v37 = vunpack.c.l.bf16 %v5722_v52  ;;  %v5726_v51 = vunpack.c.h.bf16 %v5722_v52  ;;  %v5765_v63 = vunpack.c.l.b16 %v5722_v52  ;;  %v5766_v30 = vunpack.c.h.b16 %v5722_v52 }
 0x88e   : > { %v5729_v27 = vsub.f32 %v5719_v59, %v5725_v37  ;;  %v5730_v24 = vsub.f32 %v5720_v10, %v5726_v51  ;;  %v5767_v12 = vpack.c.b16 %v5765_v63, %v5763_v46  ;;  %v5768_v2 = vpack.c.b16 %v5766_v30, %v5764_v54 }
 0x890   : > { %v5731_v15 = vpack.c.bf16 %v5729_v27, %v5727_v62  ;;  %v5732_v45 = vpack.c.bf16 %v5730_v24, %v5728_v4  ;;  %5779 = vmatmul.bf16.vlgmr.msra.gmra.mxu2 %v5767_v12  ;;  %5793 = vmatmul.bf16.vlgmr.msra.gmra.mxu3 %v5768_v2 }
 0x892   : > { %5741 = vmatmul.bf16.vlgmr.msra.gmra.mxu0 %v5731_v15  ;;  %5755 = vmatmul.bf16.vlgmr.msra.gmra.mxu1 %v5732_v45 }
 0x893   : > { %v5809_v35 = vpop.permute.xlu1 %5808 }
 0x90f   : > { %v5742_v61 = vpop.f32.mrf.mxu0  ;;  %v5756_v29 = vpop.f32.mrf.mxu1 }
 0x910   : > { %v5757_v11 = vadd.f32 %v5756_v29, %v5742_v61 }
 0x913   : > { %v5780_v47 = vpop.f32.mrf.mxu2  ;;  %v5794_v41 = vpop.f32.mrf.mxu3 }
 0x914   : > { %v5781_v7 = vadd.f32 %v5780_v47, %v5757_v11 }
 0x916   : > { %v5795_v32 = vadd.f32 %v5794_v41, %v5781_v7 }
 0x917   : > { %v5744_v18 = vpop.f32.mrf.mxu0  ;;  %v5758_v38 = vpop.f32.mrf.mxu1 }
 0x918   : > { %v5811_v60 = vadd.f32 %v5804_v9, %v5795_v32  ;;  %v5759_v49 = vadd.f32 %v5758_v38, %v5744_v18 }
 0x91a   : > { %v5813_v22 = vmul.f32 0.2, %v5811_v60 }
 0x91b   : > { %v5782_v44 = vpop.f32.mrf.mxu2  ;;  %v5796_v50 = vpop.f32.mrf.mxu3 }
 0x91c   : > { %v5815_v19 = vmax.f32 %v5811_v60, %v5813_v22  ;;  %v5783_v6 = vadd.f32 %v5782_v44, %v5759_v49 }
 0x91e   : > { %v5797_v57 = vadd.f32 %v5796_v50, %v5783_v6  ;;  %v5819_v23 = vmul.f32 %v5817_v3, %v5815_v19 }
 0x920   : > { %v5812_v1 = vadd.f32 %v5809_v35, %v5797_v57  ;;  %5821 = vadd.xlane.f32.xlu2 %v5819_v23 }
 0x922   : > { %v5814_v14 = vmul.f32 0.2, %v5812_v1 }
 0x924   : > { %v5816_v36 = vmax.f32 %v5812_v1, %v5814_v14 }
 0x926   : > { %v5820_v55 = vmul.f32 %v5818_v8, %v5816_v36 }
 0x928   : > { %5823 = vadd.xlane.f32.xlu1 %v5820_v55 }
 0x993   : > { %v5822_v21 = vpop.xlane.xlu2 %5821 }
 0x99b   : > { %v5824_v53 = vpop.xlane.xlu1 %5823 }
 0x99c   : > { %v5825_v20 = vadd.f32 %v5824_v53, %v5822_v21 }
 0x99e   : > { %v5826_v25 = vrot.slane %v5825_v20, 4 }
 0x9a0   : > { %v5827_v43 = vadd.f32 %v5826_v25, %v5825_v20 }
 0x9a2   : > { %v5828_v13 = vrot.slane %v5827_v43, 2 }
 0x9a4   : > { %v5829_v26 = vadd.f32 %v5828_v13, %v5827_v43 }
 0x9a6   : > { %v5830_v34 = vrot.slane %v5829_v26, 1 }
 0x9a8   : > { %v5831_v17 = vadd.f32 %v5830_v34, %v5829_v26 }
 0x9aa   : > { %v5833_v40 = vadd.f32 %v5832_v28, %v5831_v17 }
 0x9ac   : > { %v5834_v39 = vsub.f32 0.0, %v5833_v40 }
 0x9ae   : > { %v5835_v0 = vmul.f32 1.442695, %v5834_v39 }
 0x9b0   : > { %8037 = vpow2.f32 %v5835_v0 }
 0x9b6   : > { %v8038_v48 = vpop.eup %8037 }
 0x9b7   : > { %v5837_v42 = vadd.f32 1.0, %v8038_v48 }
 0x9b9   : > { %8039 = vrcp.f32 %v5837_v42  ;;  %v5849_v56 = vand.u32 2147483648, %v5837_v42  ;;  %v5847_v4 = vand.u32 2147483647, %v5837_v42  ;;  %vm5843_vm15 = vweird.f32 %v5837_v42 }
 0x9bb   : > { %v5850_v58 = vor.u32 1.1754944e-38, %v5849_v56  ;;  %vm5848_vm7 = vcmp.eq.f32.partialorder %v5847_v4, 8.507059e+37 }
 0x9bf   : > { %v8040_v5 = vpop.eup %8039 }
 0x9c0   : > { %v5839_v31 = vmul.f32 %v8040_v5, %v5837_v42  ;;  %vm5844_vm3 = vweird.f32 %v8040_v5 }
 0x9c1   : > { %vm5845_vm9 = vmor %vm5843_vm15, %vm5844_vm3 }
 0x9c2   : > { %v5840_v16 = vsub.f32 1.0, %v5839_v31 }
 0x9c4   : > { %v5841_v62 = vmul.f32 %v8040_v5, %v5840_v16 }
 0x9c6   : > { %v5842_v33 = vadd.f32 %v8040_v5, %v5841_v62 }
 0x9c8   : > { %v5846_v59 = vsel %vm5845_vm9, %v8040_v5, %v5842_v33 }
 0x9c9   : > { %v5851_v10 = vsel %vm5848_vm7, %v5850_v58, %v5846_v59 }
 0x9ca   : > { %5854 = vst.msk [vmem:[%s446_s1] sm:$0x1] %vm5853_vm5, %v5851_v10 }
 0x9cb PF: > { %p24_p3 = scmp.ge.s32.totalorder %s8455_s21, 4   ;;  %s18290_s11 = smov %s8294_s12 }
 0x9cc   : > { %s18291_s12 = smov %s8298_s13  ;;  %s18292_s13 = smov %s8466_s20 }
 0x9cd   : > { %s18293_s14 = smov %s8455_s21  ;;  %26 = sbr.rel (!%p24_p3) target bundleno = 9 (0x9), region = 132 }
 0x9d2   :  { %5872 = vsyncpa [#allocation7], 1 }
 0x9d3   :  { %5874 = vsyncpa [#allocation7 + $0x1], 1 }
 0x9d4   :  { %5875 = vsyncpa [#allocation9], 1 }
 0x9d5   :  { %5876 = vsyncpa [#allocation12], 1 }
 0x9d6   :  { %5877 = vsyncpa [#allocation15], 1 }

</bundles_post_ra>
